<compile_context>
chip_gen: v6e
topology: v6e:2x2x1
jax: 0.10.0
libtpu: 0.0.40
codegen_flags: <defaults>
</compile_context>

<pallas_src>
import numpy as np
import jax
import jax.numpy as jnp
from jax.experimental import pallas as pl
from jax.experimental.pallas import tpu as pltpu


# ---------------------------------------------------------------------------
# Fused ConvGRU cell kernel (one grid step == one batch element)
# ---------------------------------------------------------------------------
def _convgru_kernel(stk_ref,   # (1, H, W, Cx+Ch)   stacked [x, h], NHWC
                    h_ref,     # (1, H, W, Ch)      previous hidden state
                    wa_ref,    # (9, Cx+Ch, 3*Ch)   per-tap weights [u | r | o_x]
                    wb_ref,    # (9, Ch, Ch)        per-tap out-gate weights (h side)
                    b_ref,     # (1, 3*Ch)          biases [bu | br | bo]
                    out_ref,   # (1, H*W, Ch)       new hidden state (pixel-major)
                    sp_s,      # VMEM (H+2, W+2, Cx+Ch) padded stacked input
                    rp_s):     # VMEM (H+2, W+2, Ch)    padded r*h
    H = stk_ref.shape[1]
    W = stk_ref.shape[2]
    Ct = stk_ref.shape[3]
    Ch = h_ref.shape[3]
    HW = H * W
    f32 = jnp.float32

    # ---- in-kernel zero padding (conv padding=1) of the stacked input ------
    sp_s[...] = jnp.zeros_like(sp_s)
    sp_s[1:H + 1, 1:W + 1, :] = stk_ref[0].astype(f32)

    # ---- update / reset gates + x-contribution of the out gate -------------
    # 9 taps of a 3x3 "same" conv over the concatenated [x, h] channels.
    acc_a = jnp.zeros((HW, 3 * Ch), f32)
    for t in range(9):
        dh, dw = t // 3, t % 3
        patch = sp_s[dh:dh + H, dw:dw + W, :].reshape(HW, Ct)
        acc_a = acc_a + jnp.dot(patch, wa_ref[t].astype(f32),
                                preferred_element_type=f32)
    acc_a = acc_a + b_ref[...].astype(f32)

    u = jax.nn.sigmoid(acc_a[:, :Ch])            # update gate
    r = jax.nn.sigmoid(acc_a[:, Ch:2 * Ch])      # reset gate

    h2 = h_ref[0].astype(f32).reshape(HW, Ch)
    rh = r * h2                                   # reset-gated hidden state

    # ---- h-side of the out gate: conv over r*h (re-padded in VMEM) ---------
    rp_s[...] = jnp.zeros_like(rp_s)
    rp_s[1:H + 1, 1:W + 1, :] = rh.reshape(H, W, Ch)

    acc_b = jnp.zeros((HW, Ch), f32)
    for t in range(9):
        dh, dw = t // 3, t % 3
        patch = rp_s[dh:dh + H, dw:dw + W, :].reshape(HW, Ch)
        acc_b = acc_b + jnp.dot(patch, wb_ref[t].astype(f32),
                                preferred_element_type=f32)

    o_pre = acc_a[:, 2 * Ch:] + acc_b            # bo already folded into b_ref
    o = jnp.where(o_pre >= 0, o_pre, 0.2 * o_pre)  # leaky_relu, slope 0.2

    new_h = h2 * (1.0 - u) + o * u               # GRU state blend
    out_ref[0] = new_h.astype(out_ref.dtype)


# ---------------------------------------------------------------------------
# Wrapper: layout glue + weight prep + pallas_call (jitted so it all fuses)
# ---------------------------------------------------------------------------
@jax.jit
def _forward_jit(x_nchw, h_nchw, params):
    B, Cx, H, W = x_nchw.shape
    Ch = h_nchw.shape[1]
    Ct = Cx + Ch

    # NCHW -> NHWC and stack x, h along channels (conv of a concat).
    x = jnp.transpose(x_nchw, (0, 2, 3, 1))
    h = jnp.transpose(h_nchw, (0, 2, 3, 1))
    stk = jnp.concatenate([x, h], axis=-1)                     # (B, H, W, Ct)

    # PyTorch conv weight (Cout, Cin_total, 3, 3) -> per-tap (9, Cin, Cout).
    def tapw(w_oihw):
        return jnp.transpose(w_oihw, (2, 3, 1, 0))              # (3,3,Cin,Cout)

    wu, wr, wo = tapw(params["wu"]), tapw(params["wr"]), tapw(params["wo"])
    # Out-gate split: x rows go with the [x,h] pass (h rows zeroed there),
    # h rows are applied to r*h in the second pass.
    wo_x = jnp.concatenate(
        [wo[:, :, :Cx, :], jnp.zeros((3, 3, Ch, Ch), wo.dtype)], axis=2)
    wa = jnp.concatenate([wu, wr, wo_x], axis=-1).reshape(9, Ct, 3 * Ch)
    wb = wo[:, :, Cx:, :].reshape(9, Ch, Ch)
    bias = jnp.concatenate(
        [params["bu"], params["br"], params["bo"]]).reshape(1, 3 * Ch)

    per_b4 = lambda b: (b, 0, 0, 0)
    per_b3 = lambda b: (b, 0, 0)
    full3 = lambda b: (0, 0, 0)
    full2 = lambda b: (0, 0)

    out = pl.pallas_call(
        _convgru_kernel,
        out_shape=jax.ShapeDtypeStruct((B, H * W, Ch), x_nchw.dtype),
        grid=(B,),
        in_specs=[
            pl.BlockSpec((1, H, W, Ct), per_b4),
            pl.BlockSpec((1, H, W, Ch), per_b4),
            pl.BlockSpec((9, Ct, 3 * Ch), full3),
            pl.BlockSpec((9, Ch, Ch), full3),
            pl.BlockSpec((1, 3 * Ch), full2),
        ],
        out_specs=pl.BlockSpec((1, H * W, Ch), per_b3),
        scratch_shapes=[
            pltpu.VMEM((H + 2, W + 2, Ct), jnp.float32),
            pltpu.VMEM((H + 2, W + 2, Ch), jnp.float32),
        ],
        compiler_params=pltpu.CompilerParams(
            dimension_semantics=("parallel",)),   # 2 TCs on v7x; loop on v5e/v6e
    )(stk, h, wa, wb, bias)

    # (B, H*W, Ch) pixel-major -> NCHW (fused XLA transpose under jit).
    return jnp.transpose(out, (0, 2, 1)).reshape(B, Ch, H, W)


def convgru_cell_forward(x_nchw, prev_state_nchw, params):
    """ConvGRUCell.forward.  x_nchw: (B, Cx, H, W).  Returns (B, Ch, H, W)."""
    B, _, H, W = x_nchw.shape
    Ch = params["wu"].shape[0]
    if prev_state_nchw is None:
        prev_state_nchw = jnp.zeros((B, Ch, H, W), x_nchw.dtype)
    return _forward_jit(x_nchw, prev_state_nchw, params)


# ---------------------------------------------------------------------------
# Pure-JAX reference (for correctness check only)
# ---------------------------------------------------------------------------
def convgru_cell_reference(x, h, params):
    def conv(inp, w, b):
        out = jax.lax.conv_general_dilated(
            inp, w, window_strides=(1, 1), padding=((1, 1), (1, 1)),
            dimension_numbers=("NCHW", "OIHW", "NCHW"))
        return out + b[None, :, None, None]

    stacked = jnp.concatenate([x, h], axis=1)
    u = jax.nn.sigmoid(conv(stacked, params["wu"], params["bu"]))
    r = jax.nn.sigmoid(conv(stacked, params["wr"], params["br"]))
    o = jax.nn.leaky_relu(conv(jnp.concatenate([x, h * r], axis=1),
                               params["wo"], params["bo"]),
                          negative_slope=0.2)
    return h * (1.0 - u) + o * u


# ---------------------------------------------------------------------------
# Deterministic parameter init (mimics torch.nn.init.orthogonal_ / zeros bias)
# ---------------------------------------------------------------------------
def orthogonal_init(key, shape):
    rows = shape[0]
    cols = int(np.prod(shape[1:]))
    n, m = max(rows, cols), min(rows, cols)
    a = jax.random.normal(key, (n, m), dtype=jnp.float32)
    q, r = jnp.linalg.qr(a)
    q = q * jnp.sign(jnp.diagonal(r))
    mat = q if rows >= cols else q.T
    return mat.reshape(shape).astype(jnp.float32)


if __name__ == "__main__":
    B, Cx, Ch, H, W = 2, 4, 32, 16, 16

    key = jax.random.PRNGKey(0)
    k1, k2, k3, k4, k5 = jax.random.split(key, 5)
    params = {
        "wu": orthogonal_init(k1, (Ch, Cx + Ch, 3, 3)),
        "wr": orthogonal_init(k2, (Ch, Cx + Ch, 3, 3)),
        "wo": orthogonal_init(k3, (Ch, Cx + Ch, 3, 3)),
        "bu": jnp.zeros((Ch,), jnp.float32),
        "br": jnp.zeros((Ch,), jnp.float32),
        "bo": jnp.zeros((Ch,), jnp.float32),
    }
    x = jax.random.normal(k4, (B, Cx, H, W), dtype=jnp.float32)
    prev = jax.random.normal(k5, (B, Ch, H, W), dtype=jnp.float32)

    out = jax.block_until_ready(convgru_cell_forward(x, prev, params))
    assert out.shape == (B, Ch, H, W)

    ref = jax.block_until_ready(convgru_cell_reference(x, prev, params))
    if not jnp.allclose(out, ref, atol=1e-4, rtol=1e-4):
        raise AssertionError("Pallas ConvGRU output does not match JAX reference")

    # prev_state=None path (zero initial state), as in the PyTorch forward.
    out0 = jax.block_until_ready(convgru_cell_forward(x, None, params))
    ref0 = convgru_cell_reference(x, jnp.zeros((B, Ch, H, W), jnp.float32), params)
    if not jnp.allclose(out0, ref0, atol=1e-4, rtol=1e-4):
        raise AssertionError("Pallas ConvGRU (None prev_state) mismatch")

    print("KERNEL_OK")
</pallas_src>

<mosaic_0001>
module attributes {stable_mosaic.version = 11 : i64} {
  func.func @_convgru_kernel(%arg0: i32, %arg1: memref<1x16x16x36xf32, #tpu.memory_space<vmem>>, %arg2: memref<1x16x16x32xf32, #tpu.memory_space<vmem>>, %arg3: memref<9x36x96xf32, #tpu.memory_space<vmem>>, %arg4: memref<9x32x32xf32, #tpu.memory_space<vmem>>, %arg5: memref<1x96xf32, #tpu.memory_space<vmem>>, %arg6: memref<1x256x32xf32, #tpu.memory_space<vmem>>, %arg7: memref<18x18x36xf32, #tpu.memory_space<vmem>>, %arg8: memref<18x18x32xf32, #tpu.memory_space<vmem>>) attributes {dimension_semantics = [#tpu.dimension_semantics<parallel>], iteration_bounds = array<i64: 2>, scalar_prefetch = 0 : i64, scratch_operands = 2 : i64, tpu.core_type = #tpu.core_type<tc>, window_params = [{transform_indices = @transform_0, window_bounds = array<i64: 1, 16, 16, 36>}, {transform_indices = @transform_1, window_bounds = array<i64: 1, 16, 16, 32>}, {pipeline_mode = #tpu.pipeline_mode<synchronous>, transform_indices = @transform_2, window_bounds = array<i64: 9, 36, 96>}, {pipeline_mode = #tpu.pipeline_mode<synchronous>, transform_indices = @transform_3, window_bounds = array<i64: 9, 32, 32>}, {pipeline_mode = #tpu.pipeline_mode<synchronous>, transform_indices = @transform_4, window_bounds = array<i64: 1, 96>}, {transform_indices = @transform_5, window_bounds = array<i64: 1, 256, 32>}]} {
    %cst = arith.constant 0.000000e+00 : f32
    %0 = vector.broadcast %cst : f32 to vector<18x18x36xf32>
    %c0 = arith.constant 0 : index
    %c0_0 = arith.constant 0 : index
    %c0_1 = arith.constant 0 : index
    %1 = vector.load %arg7[%c0, %c0_0, %c0_1] : memref<18x18x36xf32, #tpu.memory_space<vmem>>, vector<18x18x36xf32>
    tpu.vector_store %arg7[%c0, %c0_0, %c0_1], %0 {strides = array<i32>} : memref<18x18x36xf32, #tpu.memory_space<vmem>>, vector<18x18x36xf32>,
    %c0_2 = arith.constant 0 : index
    %c0_3 = arith.constant 0 : index
    %c0_4 = arith.constant 0 : index
    %c0_5 = arith.constant 0 : index
    %2 = vector.load %arg1[%c0_2, %c0_3, %c0_4, %c0_5] : memref<1x16x16x36xf32, #tpu.memory_space<vmem>>, vector<1x16x16x36xf32>
    %3 = vector.shape_cast %2 : vector<1x16x16x36xf32> to vector<16x16x36xf32>
    %c1 = arith.constant 1 : index
    %c1_6 = arith.constant 1 : index
    %c0_7 = arith.constant 0 : index
    %4 = vector.load %arg7[%c1, %c1_6, %c0_7] : memref<18x18x36xf32, #tpu.memory_space<vmem>>, vector<16x16x36xf32>
    tpu.vector_store %arg7[%c1, %c1_6, %c0_7], %3 {strides = array<i32>} : memref<18x18x36xf32, #tpu.memory_space<vmem>>, vector<16x16x36xf32>,
    %cst_8 = arith.constant 0.000000e+00 : f32
    %5 = vector.broadcast %cst_8 : f32 to vector<256x96xf32>
    %c0_9 = arith.constant 0 : index
    %c0_10 = arith.constant 0 : index
    %c0_11 = arith.constant 0 : index
    %6 = vector.load %arg7[%c0_9, %c0_10, %c0_11] : memref<18x18x36xf32, #tpu.memory_space<vmem>>, vector<16x16x36xf32>
    %7 = vector.shape_cast %6 : vector<16x16x36xf32> to vector<256x36xf32>
    %c0_12 = arith.constant 0 : index
    %c0_13 = arith.constant 0 : index
    %c0_14 = arith.constant 0 : index
    %8 = vector.load %arg3[%c0_12, %c0_13, %c0_14] : memref<9x36x96xf32, #tpu.memory_space<vmem>>, vector<1x36x96xf32>
    %9 = vector.shape_cast %8 : vector<1x36x96xf32> to vector<36x96xf32>
    %cst_15 = arith.constant dense<0.000000e+00> : vector<256x96xf32>
    %10 = tpu.matmul %7, %9, %cst_15 {dimension_numbers = #tpu.dot_dimension_numbers<[1], [0], [0], [1], [0, 0, 1, 1], [], []>} : vector<256x36xf32>, vector<36x96xf32>, vector<256x96xf32> -> vector<256x96xf32>
    %11 = arith.addf %5, %10 : vector<256x96xf32>
    %c0_16 = arith.constant 0 : index
    %c1_17 = arith.constant 1 : index
    %c0_18 = arith.constant 0 : index
    %12 = vector.load %arg7[%c0_16, %c1_17, %c0_18] : memref<18x18x36xf32, #tpu.memory_space<vmem>>, vector<16x16x36xf32>
    %13 = vector.shape_cast %12 : vector<16x16x36xf32> to vector<256x36xf32>
    %c1_19 = arith.constant 1 : index
    %c0_20 = arith.constant 0 : index
    %c0_21 = arith.constant 0 : index
    %14 = vector.load %arg3[%c1_19, %c0_20, %c0_21] : memref<9x36x96xf32, #tpu.memory_space<vmem>>, vector<1x36x96xf32>
    %15 = vector.shape_cast %14 : vector<1x36x96xf32> to vector<36x96xf32>
    %cst_22 = arith.constant dense<0.000000e+00> : vector<256x96xf32>
    %16 = tpu.matmul %13, %15, %cst_22 {dimension_numbers = #tpu.dot_dimension_numbers<[1], [0], [0], [1], [0, 0, 1, 1], [], []>} : vector<256x36xf32>, vector<36x96xf32>, vector<256x96xf32> -> vector<256x96xf32>
    %17 = arith.addf %11, %16 : vector<256x96xf32>
    %c0_23 = arith.constant 0 : index
    %c2 = arith.constant 2 : index
    %c0_24 = arith.constant 0 : index
    %18 = vector.load %arg7[%c0_23, %c2, %c0_24] : memref<18x18x36xf32, #tpu.memory_space<vmem>>, vector<16x16x36xf32>
    %19 = vector.shape_cast %18 : vector<16x16x36xf32> to vector<256x36xf32>
    %c2_25 = arith.constant 2 : index
    %c0_26 = arith.constant 0 : index
    %c0_27 = arith.constant 0 : index
    %20 = vector.load %arg3[%c2_25, %c0_26, %c0_27] : memref<9x36x96xf32, #tpu.memory_space<vmem>>, vector<1x36x96xf32>
    %21 = vector.shape_cast %20 : vector<1x36x96xf32> to vector<36x96xf32>
    %cst_28 = arith.constant dense<0.000000e+00> : vector<256x96xf32>
    %22 = tpu.matmul %19, %21, %cst_28 {dimension_numbers = #tpu.dot_dimension_numbers<[1], [0], [0], [1], [0, 0, 1, 1], [], []>} : vector<256x36xf32>, vector<36x96xf32>, vector<256x96xf32> -> vector<256x96xf32>
    %23 = arith.addf %17, %22 : vector<256x96xf32>
    %c1_29 = arith.constant 1 : index
    %c0_30 = arith.constant 0 : index
    %c0_31 = arith.constant 0 : index
    %24 = vector.load %arg7[%c1_29, %c0_30, %c0_31] : memref<18x18x36xf32, #tpu.memory_space<vmem>>, vector<16x16x36xf32>
    %25 = vector.shape_cast %24 : vector<16x16x36xf32> to vector<256x36xf32>
    %c3 = arith.constant 3 : index
    %c0_32 = arith.constant 0 : index
    %c0_33 = arith.constant 0 : index
    %26 = vector.load %arg3[%c3, %c0_32, %c0_33] : memref<9x36x96xf32, #tpu.memory_space<vmem>>, vector<1x36x96xf32>
    %27 = vector.shape_cast %26 : vector<1x36x96xf32> to vector<36x96xf32>
    %cst_34 = arith.constant dense<0.000000e+00> : vector<256x96xf32>
    %28 = tpu.matmul %25, %27, %cst_34 {dimension_numbers = #tpu.dot_dimension_numbers<[1], [0], [0], [1], [0, 0, 1, 1], [], []>} : vector<256x36xf32>, vector<36x96xf32>, vector<256x96xf32> -> vector<256x96xf32>
    %29 = arith.addf %23, %28 : vector<256x96xf32>
    %c1_35 = arith.constant 1 : index
    %c1_36 = arith.constant 1 : index
    %c0_37 = arith.constant 0 : index
    %30 = vector.load %arg7[%c1_35, %c1_36, %c0_37] : memref<18x18x36xf32, #tpu.memory_space<vmem>>, vector<16x16x36xf32>
    %31 = vector.shape_cast %30 : vector<16x16x36xf32> to vector<256x36xf32>
    %c4 = arith.constant 4 : index
    %c0_38 = arith.constant 0 : index
    %c0_39 = arith.constant 0 : index
    %32 = vector.load %arg3[%c4, %c0_38, %c0_39] : memref<9x36x96xf32, #tpu.memory_space<vmem>>, vector<1x36x96xf32>
    %33 = vector.shape_cast %32 : vector<1x36x96xf32> to vector<36x96xf32>
    %cst_40 = arith.constant dense<0.000000e+00> : vector<256x96xf32>
    %34 = tpu.matmul %31, %33, %cst_40 {dimension_numbers = #tpu.dot_dimension_numbers<[1], [0], [0], [1], [0, 0, 1, 1], [], []>} : vector<256x36xf32>, vector<36x96xf32>, vector<256x96xf32> -> vector<256x96xf32>
    %35 = arith.addf %29, %34 : vector<256x96xf32>
    %c1_41 = arith.constant 1 : index
    %c2_42 = arith.constant 2 : index
    %c0_43 = arith.constant 0 : index
    %36 = vector.load %arg7[%c1_41, %c2_42, %c0_43] : memref<18x18x36xf32, #tpu.memory_space<vmem>>, vector<16x16x36xf32>
    %37 = vector.shape_cast %36 : vector<16x16x36xf32> to vector<256x36xf32>
    %c5 = arith.constant 5 : index
    %c0_44 = arith.constant 0 : index
    %c0_45 = arith.constant 0 : index
    %38 = vector.load %arg3[%c5, %c0_44, %c0_45] : memref<9x36x96xf32, #tpu.memory_space<vmem>>, vector<1x36x96xf32>
    %39 = vector.shape_cast %38 : vector<1x36x96xf32> to vector<36x96xf32>
    %cst_46 = arith.constant dense<0.000000e+00> : vector<256x96xf32>
    %40 = tpu.matmul %37, %39, %cst_46 {dimension_numbers = #tpu.dot_dimension_numbers<[1], [0], [0], [1], [0, 0, 1, 1], [], []>} : vector<256x36xf32>, vector<36x96xf32>, vector<256x96xf32> -> vector<256x96xf32>
    %41 = arith.addf %35, %40 : vector<256x96xf32>
    %c2_47 = arith.constant 2 : index
    %c0_48 = arith.constant 0 : index
    %c0_49 = arith.constant 0 : index
    %42 = vector.load %arg7[%c2_47, %c0_48, %c0_49] : memref<18x18x36xf32, #tpu.memory_space<vmem>>, vector<16x16x36xf32>
    %43 = vector.shape_cast %42 : vector<16x16x36xf32> to vector<256x36xf32>
    %c6 = arith.constant 6 : index
    %c0_50 = arith.constant 0 : index
    %c0_51 = arith.constant 0 : index
    %44 = vector.load %arg3[%c6, %c0_50, %c0_51] : memref<9x36x96xf32, #tpu.memory_space<vmem>>, vector<1x36x96xf32>
    %45 = vector.shape_cast %44 : vector<1x36x96xf32> to vector<36x96xf32>
    %cst_52 = arith.constant dense<0.000000e+00> : vector<256x96xf32>
    %46 = tpu.matmul %43, %45, %cst_52 {dimension_numbers = #tpu.dot_dimension_numbers<[1], [0], [0], [1], [0, 0, 1, 1], [], []>} : vector<256x36xf32>, vector<36x96xf32>, vector<256x96xf32> -> vector<256x96xf32>
    %47 = arith.addf %41, %46 : vector<256x96xf32>
    %c2_53 = arith.constant 2 : index
    %c1_54 = arith.constant 1 : index
    %c0_55 = arith.constant 0 : index
    %48 = vector.load %arg7[%c2_53, %c1_54, %c0_55] : memref<18x18x36xf32, #tpu.memory_space<vmem>>, vector<16x16x36xf32>
    %49 = vector.shape_cast %48 : vector<16x16x36xf32> to vector<256x36xf32>
    %c7 = arith.constant 7 : index
    %c0_56 = arith.constant 0 : index
    %c0_57 = arith.constant 0 : index
    %50 = vector.load %arg3[%c7, %c0_56, %c0_57] : memref<9x36x96xf32, #tpu.memory_space<vmem>>, vector<1x36x96xf32>
    %51 = vector.shape_cast %50 : vector<1x36x96xf32> to vector<36x96xf32>
    %cst_58 = arith.constant dense<0.000000e+00> : vector<256x96xf32>
    %52 = tpu.matmul %49, %51, %cst_58 {dimension_numbers = #tpu.dot_dimension_numbers<[1], [0], [0], [1], [0, 0, 1, 1], [], []>} : vector<256x36xf32>, vector<36x96xf32>, vector<256x96xf32> -> vector<256x96xf32>
    %53 = arith.addf %47, %52 : vector<256x96xf32>
    %c2_59 = arith.constant 2 : index
    %c2_60 = arith.constant 2 : index
    %c0_61 = arith.constant 0 : index
    %54 = vector.load %arg7[%c2_59, %c2_60, %c0_61] : memref<18x18x36xf32, #tpu.memory_space<vmem>>, vector<16x16x36xf32>
    %55 = vector.shape_cast %54 : vector<16x16x36xf32> to vector<256x36xf32>
    %c8 = arith.constant 8 : index
    %c0_62 = arith.constant 0 : index
    %c0_63 = arith.constant 0 : index
    %56 = vector.load %arg3[%c8, %c0_62, %c0_63] : memref<9x36x96xf32, #tpu.memory_space<vmem>>, vector<1x36x96xf32>
    %57 = vector.shape_cast %56 : vector<1x36x96xf32> to vector<36x96xf32>
    %cst_64 = arith.constant dense<0.000000e+00> : vector<256x96xf32>
    %58 = tpu.matmul %55, %57, %cst_64 {dimension_numbers = #tpu.dot_dimension_numbers<[1], [0], [0], [1], [0, 0, 1, 1], [], []>} : vector<256x36xf32>, vector<36x96xf32>, vector<256x96xf32> -> vector<256x96xf32>
    %59 = arith.addf %53, %58 : vector<256x96xf32>
    %c0_65 = arith.constant 0 : index
    %c0_66 = arith.constant 0 : index
    %60 = vector.load %arg5[%c0_65, %c0_66] : memref<1x96xf32, #tpu.memory_space<vmem>>, vector<1x96xf32>
    %61 = vector.broadcast %60 : vector<1x96xf32> to vector<256x96xf32>
    %62 = arith.addf %59, %61 : vector<256x96xf32>
    %63 = vector.extract_strided_slice %62 {offsets = [0, 0], sizes = [256, 32], strides = [1, 1]} : vector<256x96xf32> to vector<256x32xf32>
    %64 = arith.negf %63 : vector<256x32xf32>
    %65 = math.exp %64 : vector<256x32xf32>
    %cst_67 = arith.constant 1.000000e+00 : f32
    %66 = vector.broadcast %cst_67 : f32 to vector<256x32xf32>
    %67 = arith.addf %66, %65 : vector<256x32xf32>
    %68 = arith.divf %66, %67 : vector<256x32xf32>
    %69 = vector.extract_strided_slice %62 {offsets = [0, 32], sizes = [256, 32], strides = [1, 1]} : vector<256x96xf32> to vector<256x32xf32>
    %70 = arith.negf %69 : vector<256x32xf32>
    %71 = math.exp %70 : vector<256x32xf32>
    %cst_68 = arith.constant 1.000000e+00 : f32
    %72 = vector.broadcast %cst_68 : f32 to vector<256x32xf32>
    %73 = arith.addf %72, %71 : vector<256x32xf32>
    %74 = arith.divf %72, %73 : vector<256x32xf32>
    %c0_69 = arith.constant 0 : index
    %c0_70 = arith.constant 0 : index
    %c0_71 = arith.constant 0 : index
    %c0_72 = arith.constant 0 : index
    %75 = vector.load %arg2[%c0_69, %c0_70, %c0_71, %c0_72] : memref<1x16x16x32xf32, #tpu.memory_space<vmem>>, vector<1x16x16x32xf32>
    %76 = vector.shape_cast %75 : vector<1x16x16x32xf32> to vector<16x16x32xf32>
    %77 = vector.shape_cast %76 : vector<16x16x32xf32> to vector<256x32xf32>
    %78 = arith.mulf %74, %77 : vector<256x32xf32>
    %cst_73 = arith.constant 0.000000e+00 : f32
    %79 = vector.broadcast %cst_73 : f32 to vector<18x18x32xf32>
    %c0_74 = arith.constant 0 : index
    %c0_75 = arith.constant 0 : index
    %c0_76 = arith.constant 0 : index
    %80 = vector.load %arg8[%c0_74, %c0_75, %c0_76] : memref<18x18x32xf32, #tpu.memory_space<vmem>>, vector<18x18x32xf32>
    tpu.vector_store %arg8[%c0_74, %c0_75, %c0_76], %79 {strides = array<i32>} : memref<18x18x32xf32, #tpu.memory_space<vmem>>, vector<18x18x32xf32>,
    %81 = vector.shape_cast %78 : vector<256x32xf32> to vector<16x16x32xf32>
    %c1_77 = arith.constant 1 : index
    %c1_78 = arith.constant 1 : index
    %c0_79 = arith.constant 0 : index
    %82 = vector.load %arg8[%c1_77, %c1_78, %c0_79] : memref<18x18x32xf32, #tpu.memory_space<vmem>>, vector<16x16x32xf32>
    tpu.vector_store %arg8[%c1_77, %c1_78, %c0_79], %81 {strides = array<i32>} : memref<18x18x32xf32, #tpu.memory_space<vmem>>, vector<16x16x32xf32>,
    %cst_80 = arith.constant 0.000000e+00 : f32
    %83 = vector.broadcast %cst_80 : f32 to vector<256x32xf32>
    %c0_81 = arith.constant 0 : index
    %c0_82 = arith.constant 0 : index
    %c0_83 = arith.constant 0 : index
    %84 = vector.load %arg8[%c0_81, %c0_82, %c0_83] : memref<18x18x32xf32, #tpu.memory_space<vmem>>, vector<16x16x32xf32>
    %85 = vector.shape_cast %84 : vector<16x16x32xf32> to vector<256x32xf32>
    %c0_84 = arith.constant 0 : index
    %c0_85 = arith.constant 0 : index
    %c0_86 = arith.constant 0 : index
    %86 = vector.load %arg4[%c0_84, %c0_85, %c0_86] : memref<9x32x32xf32, #tpu.memory_space<vmem>>, vector<1x32x32xf32>
    %87 = vector.shape_cast %86 : vector<1x32x32xf32> to vector<32x32xf32>
    %cst_87 = arith.constant dense<0.000000e+00> : vector<256x32xf32>
    %88 = tpu.matmul %85, %87, %cst_87 {dimension_numbers = #tpu.dot_dimension_numbers<[1], [0], [0], [1], [0, 0, 1, 1], [], []>} : vector<256x32xf32>, vector<32x32xf32>, vector<256x32xf32> -> vector<256x32xf32>
    %89 = arith.addf %83, %88 : vector<256x32xf32>
    %c0_88 = arith.constant 0 : index
    %c1_89 = arith.constant 1 : index
    %c0_90 = arith.constant 0 : index
    %90 = vector.load %arg8[%c0_88, %c1_89, %c0_90] : memref<18x18x32xf32, #tpu.memory_space<vmem>>, vector<16x16x32xf32>
    %91 = vector.shape_cast %90 : vector<16x16x32xf32> to vector<256x32xf32>
    %c1_91 = arith.constant 1 : index
    %c0_92 = arith.constant 0 : index
    %c0_93 = arith.constant 0 : index
    %92 = vector.load %arg4[%c1_91, %c0_92, %c0_93] : memref<9x32x32xf32, #tpu.memory_space<vmem>>, vector<1x32x32xf32>
    %93 = vector.shape_cast %92 : vector<1x32x32xf32> to vector<32x32xf32>
    %cst_94 = arith.constant dense<0.000000e+00> : vector<256x32xf32>
    %94 = tpu.matmul %91, %93, %cst_94 {dimension_numbers = #tpu.dot_dimension_numbers<[1], [0], [0], [1], [0, 0, 1, 1], [], []>} : vector<256x32xf32>, vector<32x32xf32>, vector<256x32xf32> -> vector<256x32xf32>
    %95 = arith.addf %89, %94 : vector<256x32xf32>
    %c0_95 = arith.constant 0 : index
    %c2_96 = arith.constant 2 : index
    %c0_97 = arith.constant 0 : index
    %96 = vector.load %arg8[%c0_95, %c2_96, %c0_97] : memref<18x18x32xf32, #tpu.memory_space<vmem>>, vector<16x16x32xf32>
    %97 = vector.shape_cast %96 : vector<16x16x32xf32> to vector<256x32xf32>
    %c2_98 = arith.constant 2 : index
    %c0_99 = arith.constant 0 : index
    %c0_100 = arith.constant 0 : index
    %98 = vector.load %arg4[%c2_98, %c0_99, %c0_100] : memref<9x32x32xf32, #tpu.memory_space<vmem>>, vector<1x32x32xf32>
    %99 = vector.shape_cast %98 : vector<1x32x32xf32> to vector<32x32xf32>
    %cst_101 = arith.constant dense<0.000000e+00> : vector<256x32xf32>
    %100 = tpu.matmul %97, %99, %cst_101 {dimension_numbers = #tpu.dot_dimension_numbers<[1], [0], [0], [1], [0, 0, 1, 1], [], []>} : vector<256x32xf32>, vector<32x32xf32>, vector<256x32xf32> -> vector<256x32xf32>
    %101 = arith.addf %95, %100 : vector<256x32xf32>
    %c1_102 = arith.constant 1 : index
    %c0_103 = arith.constant 0 : index
    %c0_104 = arith.constant 0 : index
    %102 = vector.load %arg8[%c1_102, %c0_103, %c0_104] : memref<18x18x32xf32, #tpu.memory_space<vmem>>, vector<16x16x32xf32>
    %103 = vector.shape_cast %102 : vector<16x16x32xf32> to vector<256x32xf32>
    %c3_105 = arith.constant 3 : index
    %c0_106 = arith.constant 0 : index
    %c0_107 = arith.constant 0 : index
    %104 = vector.load %arg4[%c3_105, %c0_106, %c0_107] : memref<9x32x32xf32, #tpu.memory_space<vmem>>, vector<1x32x32xf32>
    %105 = vector.shape_cast %104 : vector<1x32x32xf32> to vector<32x32xf32>
    %cst_108 = arith.constant dense<0.000000e+00> : vector<256x32xf32>
    %106 = tpu.matmul %103, %105, %cst_108 {dimension_numbers = #tpu.dot_dimension_numbers<[1], [0], [0], [1], [0, 0, 1, 1], [], []>} : vector<256x32xf32>, vector<32x32xf32>, vector<256x32xf32> -> vector<256x32xf32>
    %107 = arith.addf %101, %106 : vector<256x32xf32>
    %c1_109 = arith.constant 1 : index
    %c1_110 = arith.constant 1 : index
    %c0_111 = arith.constant 0 : index
    %108 = vector.load %arg8[%c1_109, %c1_110, %c0_111] : memref<18x18x32xf32, #tpu.memory_space<vmem>>, vector<16x16x32xf32>
    %109 = vector.shape_cast %108 : vector<16x16x32xf32> to vector<256x32xf32>
    %c4_112 = arith.constant 4 : index
    %c0_113 = arith.constant 0 : index
    %c0_114 = arith.constant 0 : index
    %110 = vector.load %arg4[%c4_112, %c0_113, %c0_114] : memref<9x32x32xf32, #tpu.memory_space<vmem>>, vector<1x32x32xf32>
    %111 = vector.shape_cast %110 : vector<1x32x32xf32> to vector<32x32xf32>
    %cst_115 = arith.constant dense<0.000000e+00> : vector<256x32xf32>
    %112 = tpu.matmul %109, %111, %cst_115 {dimension_numbers = #tpu.dot_dimension_numbers<[1], [0], [0], [1], [0, 0, 1, 1], [], []>} : vector<256x32xf32>, vector<32x32xf32>, vector<256x32xf32> -> vector<256x32xf32>
    %113 = arith.addf %107, %112 : vector<256x32xf32>
    %c1_116 = arith.constant 1 : index
    %c2_117 = arith.constant 2 : index
    %c0_118 = arith.constant 0 : index
    %114 = vector.load %arg8[%c1_116, %c2_117, %c0_118] : memref<18x18x32xf32, #tpu.memory_space<vmem>>, vector<16x16x32xf32>
    %115 = vector.shape_cast %114 : vector<16x16x32xf32> to vector<256x32xf32>
    %c5_119 = arith.constant 5 : index
    %c0_120 = arith.constant 0 : index
    %c0_121 = arith.constant 0 : index
    %116 = vector.load %arg4[%c5_119, %c0_120, %c0_121] : memref<9x32x32xf32, #tpu.memory_space<vmem>>, vector<1x32x32xf32>
    %117 = vector.shape_cast %116 : vector<1x32x32xf32> to vector<32x32xf32>
    %cst_122 = arith.constant dense<0.000000e+00> : vector<256x32xf32>
    %118 = tpu.matmul %115, %117, %cst_122 {dimension_numbers = #tpu.dot_dimension_numbers<[1], [0], [0], [1], [0, 0, 1, 1], [], []>} : vector<256x32xf32>, vector<32x32xf32>, vector<256x32xf32> -> vector<256x32xf32>
    %119 = arith.addf %113, %118 : vector<256x32xf32>
    %c2_123 = arith.constant 2 : index
    %c0_124 = arith.constant 0 : index
    %c0_125 = arith.constant 0 : index
    %120 = vector.load %arg8[%c2_123, %c0_124, %c0_125] : memref<18x18x32xf32, #tpu.memory_space<vmem>>, vector<16x16x32xf32>
    %121 = vector.shape_cast %120 : vector<16x16x32xf32> to vector<256x32xf32>
    %c6_126 = arith.constant 6 : index
    %c0_127 = arith.constant 0 : index
    %c0_128 = arith.constant 0 : index
    %122 = vector.load %arg4[%c6_126, %c0_127, %c0_128] : memref<9x32x32xf32, #tpu.memory_space<vmem>>, vector<1x32x32xf32>
    %123 = vector.shape_cast %122 : vector<1x32x32xf32> to vector<32x32xf32>
    %cst_129 = arith.constant dense<0.000000e+00> : vector<256x32xf32>
    %124 = tpu.matmul %121, %123, %cst_129 {dimension_numbers = #tpu.dot_dimension_numbers<[1], [0], [0], [1], [0, 0, 1, 1], [], []>} : vector<256x32xf32>, vector<32x32xf32>, vector<256x32xf32> -> vector<256x32xf32>
    %125 = arith.addf %119, %124 : vector<256x32xf32>
    %c2_130 = arith.constant 2 : index
    %c1_131 = arith.constant 1 : index
    %c0_132 = arith.constant 0 : index
    %126 = vector.load %arg8[%c2_130, %c1_131, %c0_132] : memref<18x18x32xf32, #tpu.memory_space<vmem>>, vector<16x16x32xf32>
    %127 = vector.shape_cast %126 : vector<16x16x32xf32> to vector<256x32xf32>
    %c7_133 = arith.constant 7 : index
    %c0_134 = arith.constant 0 : index
    %c0_135 = arith.constant 0 : index
    %128 = vector.load %arg4[%c7_133, %c0_134, %c0_135] : memref<9x32x32xf32, #tpu.memory_space<vmem>>, vector<1x32x32xf32>
    %129 = vector.shape_cast %128 : vector<1x32x32xf32> to vector<32x32xf32>
    %cst_136 = arith.constant dense<0.000000e+00> : vector<256x32xf32>
    %130 = tpu.matmul %127, %129, %cst_136 {dimension_numbers = #tpu.dot_dimension_numbers<[1], [0], [0], [1], [0, 0, 1, 1], [], []>} : vector<256x32xf32>, vector<32x32xf32>, vector<256x32xf32> -> vector<256x32xf32>
    %131 = arith.addf %125, %130 : vector<256x32xf32>
    %c2_137 = arith.constant 2 : index
    %c2_138 = arith.constant 2 : index
    %c0_139 = arith.constant 0 : index
    %132 = vector.load %arg8[%c2_137, %c2_138, %c0_139] : memref<18x18x32xf32, #tpu.memory_space<vmem>>, vector<16x16x32xf32>
    %133 = vector.shape_cast %132 : vector<16x16x32xf32> to vector<256x32xf32>
    %c8_140 = arith.constant 8 : index
    %c0_141 = arith.constant 0 : index
    %c0_142 = arith.constant 0 : index
    %134 = vector.load %arg4[%c8_140, %c0_141, %c0_142] : memref<9x32x32xf32, #tpu.memory_space<vmem>>, vector<1x32x32xf32>
    %135 = vector.shape_cast %134 : vector<1x32x32xf32> to vector<32x32xf32>
    %cst_143 = arith.constant dense<0.000000e+00> : vector<256x32xf32>
    %136 = tpu.matmul %133, %135, %cst_143 {dimension_numbers = #tpu.dot_dimension_numbers<[1], [0], [0], [1], [0, 0, 1, 1], [], []>} : vector<256x32xf32>, vector<32x32xf32>, vector<256x32xf32> -> vector<256x32xf32>
    %137 = arith.addf %131, %136 : vector<256x32xf32>
    %138 = vector.extract_strided_slice %62 {offsets = [0, 64], sizes = [256, 32], strides = [1, 1]} : vector<256x96xf32> to vector<256x32xf32>
    %139 = arith.addf %138, %137 : vector<256x32xf32>
    %cst_144 = arith.constant 0.000000e+00 : f32
    %140 = vector.broadcast %cst_144 : f32 to vector<256x32xf32>
    %141 = arith.cmpf oge, %139, %140 : vector<256x32xf32>
    %cst_145 = arith.constant 2.000000e-01 : f32
    %142 = vector.broadcast %cst_145 : f32 to vector<256x32xf32>
    %143 = arith.mulf %142, %139 : vector<256x32xf32>
    %144 = arith.select %141, %139, %143 : vector<256x32xi1>, vector<256x32xf32>
    %cst_146 = arith.constant 1.000000e+00 : f32
    %145 = vector.broadcast %cst_146 : f32 to vector<256x32xf32>
    %146 = arith.subf %145, %68 : vector<256x32xf32>
    %147 = arith.mulf %77, %146 : vector<256x32xf32>
    %148 = arith.mulf %144, %68 : vector<256x32xf32>
    %149 = arith.addf %147, %148 : vector<256x32xf32>
    %c0_147 = arith.constant 0 : index
    %c0_148 = arith.constant 0 : index
    %c0_149 = arith.constant 0 : index
    %150 = vector.load %arg6[%c0_147, %c0_148, %c0_149] : memref<1x256x32xf32, #tpu.memory_space<vmem>>, vector<1x256x32xf32>
    %151 = vector.shape_cast %150 : vector<1x256x32xf32> to vector<256x32xf32>
    %152 = vector.shape_cast %149 : vector<256x32xf32> to vector<1x256x32xf32>
    tpu.vector_store %arg6[%c0_147, %c0_148, %c0_149], %152 {strides = array<i32>} : memref<1x256x32xf32, #tpu.memory_space<vmem>>, vector<1x256x32xf32>,
    return
  }
  func.func @transform_0(%arg0: i32) -> (i32, i32, i32, i32) {
    %c0_i32 = arith.constant 0 : i32
    %c0_i32_0 = arith.constant 0 : i32
    %c0_i32_1 = arith.constant 0 : i32
    %c0_i32_2 = arith.constant 0 : i32
    return %arg0, %c0_i32, %c0_i32_0, %c0_i32_1 : i32, i32, i32, i32
  }
  func.func @transform_1(%arg0: i32) -> (i32, i32, i32, i32) {
    %c0_i32 = arith.constant 0 : i32
    %c0_i32_0 = arith.constant 0 : i32
    %c0_i32_1 = arith.constant 0 : i32
    %c0_i32_2 = arith.constant 0 : i32
    return %arg0, %c0_i32, %c0_i32_0, %c0_i32_1 : i32, i32, i32, i32
  }
  func.func @transform_2(%arg0: i32) -> (i32, i32, i32) {
    %c0_i32 = arith.constant 0 : i32
    %c0_i32_0 = arith.constant 0 : i32
    %c0_i32_1 = arith.constant 0 : i32
    %c0_i32_2 = arith.constant 0 : i32
    return %c0_i32, %c0_i32_0, %c0_i32_1 : i32, i32, i32
  }
  func.func @transform_3(%arg0: i32) -> (i32, i32, i32) {
    %c0_i32 = arith.constant 0 : i32
    %c0_i32_0 = arith.constant 0 : i32
    %c0_i32_1 = arith.constant 0 : i32
    %c0_i32_2 = arith.constant 0 : i32
    return %c0_i32, %c0_i32_0, %c0_i32_1 : i32, i32, i32
  }
  func.func @transform_4(%arg0: i32) -> (i32, i32) {
    %c0_i32 = arith.constant 0 : i32
    %c0_i32_0 = arith.constant 0 : i32
    %c0_i32_1 = arith.constant 0 : i32
    return %c0_i32, %c0_i32_0 : i32, i32
  }
  func.func @transform_5(%arg0: i32) -> (i32, i32, i32) {
    %c0_i32 = arith.constant 0 : i32
    %c0_i32_0 = arith.constant 0 : i32
    %c0_i32_1 = arith.constant 0 : i32
    return %arg0, %c0_i32, %c0_i32_0 : i32, i32, i32
  }
}

</mosaic_0001>

<bundles_post_ra>
// kernel: _forward_jit.1
= control target key start
LH: loop header
LB: loop body
LE: loop exit
PB: predicated region body
PF: predicated region fallthrough
CT: control target
= control target key end

     0   :  { %10 = vsyncpa [#allocation5], 0  ;;  %s15497_s0 = inlined_call_operand.vmem [shape: f32[2,16,16,36], index: 0, kind: input, shape index: {}]   ;;  %s15498_s1 = inlined_call_operand.vmem [shape: f32[2,16,16,32], index: 1, kind: input, shape index: {}]   ;;  %s15499_s2 = inlined_call_operand.vmem [shape: f32[9,36,96], index: 2, kind: input, shape index: {}]   ;;  %s15500_s3 = inlined_call_operand.vmem [shape: f32[9,32,32], index: 3, kind: input, shape index: {}]   ;;  %s15501_s4 = inlined_call_operand.vmem [shape: f32[1,96], index: 4, kind: input, shape index: {}]   ;;  %s15502_s5 = inlined_call_operand.hbm [shape: f32[2,256,32], index: 5, kind: output, shape index: {}]  }
   0x1   :  { %12 = vsyncpa [#allocation5 + $0x1], 0  ;;  %s11387_s18 = smov 0   ;;  %s11389_s19 = smov 0  }
   0x2   :  { %s11391_s20 = smov 0   ;;  %s11393_s21 = smov 0  }
   0x3 LB: > { %s11408_s22 = sadd.s32 4294967295, %s11348_s21   ;;  %s8693_s23 = sadd.s32 4294967294, %s11348_s21   ;;  %s11348_s21 = sphi %s11393_s21, %s16091_s21   ;;  %s11344_s20 = sphi %s11391_s20, %s16090_s20   ;;  %s11340_s19 = sphi %s11389_s19, %s16089_s19   ;;  %s11336_s18 = sphi %s11387_s18, %s16088_s18  }
   0x4   : > { %s11412_s24 = sadd.s32 1, %s11348_s21   ;;  %s140_s25 = sadd.s32 1, %s11344_s20 }
   0x5   : > { %s137_s26 = ssub.s32 %s11348_s21, %s11412_s24  ;;  %p150_p0 = scmp.ne.s32.totalorder %s11344_s20, %s11340_s19 }
   0x6   : > { %p138_p1 = scmp.eq.s32.totalorder %s137_s26, 0  ;;  %p151_p2 = scmp.eq.s32.totalorder %s11408_s22, 1 }
   0x7   : > { %p156_p3 = scmp.ne.s32.totalorder %s11340_s19, %s11336_s18  ;;  %p157_p4 = scmp.eq.s32.totalorder %s8693_s23, 1 }
   0x8   : > { %s11423_s27 = scalar_select %p138_p1, %s11344_s20, %s140_s25  }
   0x9   : > { %p11425_p5 = por %p151_p2, %p150_p0  ;;  %p11429_p6 = por %p157_p4, %p156_p3 }
   0xa   : > { %p8696_p7 = scmp.ge.s32.totalorder %s11348_s21, 1  ;;  %p200_p8 = scmp.lt.s32.totalorder %s11348_s21, 3 }
   0xc   : > { %p201_p9 = pnand %p8696_p7, %p200_p8 }
   0xe   : > { %204 = sbr.rel (%p201_p9) target bundleno = 1450 (0x5aa), region = 40 }
  0x13   : > { %v8706_v0 = vld [vmem:[%s15499_s2 + $0x48] sm:$0xf]  ;;  %vm535_vm0 = vcmask 1043456   ;;  %v400_v1 = vld [vmem:[%s15499_s2 + $0x20] sm:$0xf]  ;;  %v11451_v3 = vld [vmem:[%s15499_s2 + $0x18] sm:$0xff] }
  0x14   : > { %v11444_v2 = vld [vmem:[%s15499_s2 + $0x40] sm:$0xff]  ;;  %10057 = vmatprep.subr.msk.mxu0 %vm535_vm0, %v8706_v0  ;;  %10115 = vmatprep.subr.msk.mxu1 %vm535_vm0, %v400_v1  ;;  %vm243_vm1 = vcmask 293888   ;;  %vm246_vm2 = vcmask 287744   ;;  %v11458_v4 = vld [vmem:[%s15499_s2 + $0x38] sm:$0xff]  ;;  %v11463_v5 = vld [vmem:[%s15499_s2 + $0x10] sm:$0xff]  ;;  %v15503_v6 = vmov 0.0  }
  0x15   : > { %10058 = vmatpush3.msk.msra.mxu0 %vm535_vm0, %v8706_v0  ;;  %10116 = vmatpush3.msk.msra.mxu1 %vm535_vm0, %v400_v1  ;;  %244 = vst.msk [vmem:[#allocation2] sm:$0xff] %vm243_vm1, %v15503_v6  ;;  %245 = vst.msk [vmem:[#allocation2 + $0x8] sm:$0xff] %vm243_vm1, %v15503_v6  ;;  %p233_p10 = scmp.lt.s32.totalorder %s11408_s22, 1  ;;  %v8703_v7 = vld [vmem:[%s15499_s2 + $0x30] sm:$0xff]  ;;  %v397_v8 = vld [vmem:[%s15499_s2 + $0x8] sm:$0xff]  ;;  %vm4270_vm3 = vcmask 261120  }
  0x16   : > { %248 = vst.msk [vmem:[#allocation2 + $0x18] sm:$0xff] %vm243_vm1, %v15503_v6  ;;  %249 = vst.msk [vmem:[#allocation2 + $0x20] sm:$0xff] %vm243_vm1, %v15503_v6  ;;  %10059 = vmatprep.subr.mxu0 %v11444_v2  ;;  %10117 = vmatprep.subr.mxu1 %v11451_v3  ;;  %v8702_v9 = vld [vmem:[%s15499_s2 + $0x28] sm:$0xff]  ;;  %v396_v10 = vld [vmem:[%s15499_s2] sm:$0xff]  ;;  %vm4273_vm4 = vcmask 254976   ;;  %s11352_s8 = smov 96  }
  0x17   : > { %251 = vst.msk [vmem:[#allocation2 + $0x30] sm:$0xff] %vm243_vm1, %v15503_v6  ;;  %252 = vst.msk [vmem:[#allocation2 + $0x38] sm:$0xff] %vm243_vm1, %v15503_v6  ;;  %10060 = vmatpush3.msra.mxu0 %v11444_v2  ;;  %10118 = vmatpush3.msra.mxu1 %v11451_v3  ;;  %s11585_s30 = scalar_select %p233_p10, %s11408_s22, 1  ;;  %v8777_v11 = vld [vmem:[%s15499_s2 + $0x70] sm:$0xf]  ;;  %v8776_v22 = vld [vmem:[%s15499_s2 + $0x68] sm:$0xff] }
  0x18   : > { %254 = vst.msk [vmem:[#allocation2 + $0x48] sm:$0xff] %vm243_vm1, %v15503_v6  ;;  %255 = vst.msk [vmem:[#allocation2 + $0x50] sm:$0xff] %vm243_vm1, %v15503_v6  ;;  %10061 = vmatprep.subr.mxu0 %v11458_v4  ;;  %10119 = vmatprep.subr.mxu1 %v11463_v5  ;;  %v8815_v15 = vld [vmem:[%s15499_s2 + $0x98] sm:$0xf]  ;;  %v8814_v23 = vld [vmem:[%s15499_s2 + $0x90] sm:$0xff]  ;;  %s230_s7 = sand.u32 1, %s11340_s19  }
  0x19   : > { %257 = vst.msk [vmem:[#allocation2 + $0x60] sm:$0xff] %vm243_vm1, %v15503_v6  ;;  %258 = vst.msk [vmem:[#allocation2 + $0x68] sm:$0xff] %vm243_vm1, %v15503_v6  ;;  %10062 = vmatpush3.msra.mxu0 %v11458_v4  ;;  %10120 = vmatpush3.msra.mxu1 %v11463_v5  ;;  %s9397_s10 = sshll.u32 %s11585_s30, 8  ;;  %v8775_v36 = vld [vmem:[%s15499_s2 + $0x60] sm:$0xff]  ;;  %v8813_v40 = vld [vmem:[%s15499_s2 + $0x88] sm:$0xff]  ;;  %s11351_s30 = smov 32  }
  0x1a   : > { %260 = vst.msk [vmem:[#allocation2 + $0x78] sm:$0xff] %vm243_vm1, %v15503_v6  ;;  %261 = vst.msk [vmem:[#allocation2 + $0x80] sm:$0xff] %vm243_vm1, %v15503_v6  ;;  %10063 = vmatprep.subr.mxu0 %v8703_v7  ;;  %10121 = vmatprep.subr.mxu1 %v397_v8  ;;  %s11603_s13 = scalar_lea.vmem %s15497_s0, %s9397_s10  ;;  %v8774_v51 = vld [vmem:[%s15499_s2 + $0x58] sm:$0xff]  ;;  %v8812_v52 = vld [vmem:[%s15499_s2 + $0x80] sm:$0xff]  ;;  %s12483_s17 = scalar_lea.vmem %s15498_s1, %s9397_s10 }
  0x1b   : > { %263 = vst.msk [vmem:[#allocation2 + $0x90] sm:$0xff] %vm243_vm1, %v15503_v6  ;;  %264 = vst.msk [vmem:[#allocation2 + $0x98] sm:$0xff] %vm243_vm1, %v15503_v6  ;;  %10064 = vmatpush3.msra.mxu0 %v8703_v7  ;;  %10122 = vmatpush3.msra.mxu1 %v397_v8  ;;  %v299_v12 = vld [vmem:[%s11603_s13] sm:$0xff]  ;;  %v300_v13 = vld [vmem:[%s11603_s13 + $0x8] sm:$0xff]  ;;  %s8697_s9 = sshll.u32 %s230_s7, 8  ;;  %s11354_s15 = smov [#allocation4]  }
  0x1c   : > { %266 = vst.msk [vmem:[#allocation2 + $0xa8] sm:$0xff] %vm243_vm1, %v15503_v6  ;;  %267 = vst.msk [vmem:[#allocation2 + $0xb0] sm:$0xff] %vm243_vm1, %v15503_v6  ;;  %v301_v14 = vld [vmem:[%s11603_s13 + $0x10] sm:$0xff]  ;;  %10065 = vmatprep.subr.mxu0 %v8702_v9  ;;  %10123 = vmatprep.subr.mxu1 %v396_v10  ;;  %v401_v16 = vld [vmem:[#allocation2 + $0x1] sm:$0xff]  ;;  %s11292_s16 = sshll.u32 %s11354_s15, 4  ;;  %s11293_s16 = int_to_ptr.vmem [resolvable:$false] %s11292_s16 }
  0x1d   : > { %269 = vst.msk [vmem:[#allocation2 + $0xc0] sm:$0xff] %vm243_vm1, %v15503_v6  ;;  %270 = vst.msk [vmem:[#allocation2 + $0xc8] sm:$0xff] %vm243_vm1, %v15503_v6  ;;  %v364_v17 = vld [vmem:[#allocation2] sm:$0xff]  ;;  %10066 = vmatpush3.msra.mxu0 %v8702_v9  ;;  %10067 = vmatprep.mubr.msk.f32.mxu0 %vm243_vm1, %v401_v16  ;;  %v365_v19 = vld [vmem:[#allocation2 + $0x8] sm:$0xff]  ;;  %s11294_s10 = scalar_lea.vmem %s11293_s16, 8192 }
  0x1e   : > { %272 = vst.msk [vmem:[#allocation2 + $0xd8] sm:$0xff] %vm243_vm1, %v15503_v6  ;;  %273 = vst.msk [vmem:[#allocation2 + $0xe0] sm:$0xff] %vm243_vm1, %v15503_v6  ;;  %v302_v20 = vld [vmem:[%s11603_s13 + $0x18] sm:$0xff]  ;;  %v303_v21 = vld [vmem:[%s11603_s13 + $0x20] sm:$0xff]  ;;  %10124 = vmatpush3.msra.mxu1 %v396_v10  ;;  %10125 = vmatprep.mubr.msk.f32.mxu1 %vm243_vm1, %v364_v17 }
  0x1f   : > { %275 = vst.msk [vmem:[#allocation2 + $0xf0] sm:$0xff] %vm243_vm1, %v15503_v6  ;;  %276 = vst.msk [vmem:[#allocation2 + $0xf8] sm:$0xff] %vm243_vm1, %v15503_v6  ;;  %v304_v24 = vld [vmem:[%s11603_s13 + $0x28] sm:$0xff]  ;;  %v305_v25 = vld [vmem:[%s11603_s13 + $0x30] sm:$0xff]  ;;  %10126 = vmatmul.mubr.msk.f32.vlgmr.msra.gmra.mxu1 %vm243_vm1, %v365_v19  ;;  %10173 = vmatprep.subr.msk.mxu0 %vm535_vm0, %v8777_v11 }
  0x20   : > { %278 = vst.msk [vmem:[#allocation2 + $0x108] sm:$0xff] %vm243_vm1, %v15503_v6  ;;  %279 = vst.msk [vmem:[#allocation2 + $0x110] sm:$0xff] %vm243_vm1, %v15503_v6  ;;  %v306_v26 = vld [vmem:[%s11603_s13 + $0x38] sm:$0xff]  ;;  %v307_v27 = vld [vmem:[%s11603_s13 + $0x40] sm:$0xff]  ;;  %10231 = vmatprep.subr.msk.mxu1 %vm535_vm0, %v8815_v15 }
  0x21   : > { %281 = vst.msk [vmem:[#allocation2 + $0x120] sm:$0xff] %vm243_vm1, %v15503_v6  ;;  %282 = vst.msk [vmem:[#allocation2 + $0x128] sm:$0xff] %vm243_vm1, %v15503_v6  ;;  %v308_v28 = vld [vmem:[%s11603_s13 + $0x48] sm:$0xff]  ;;  %v309_v29 = vld [vmem:[%s11603_s13 + $0x50] sm:$0xff]  ;;  %10232 = vmatpush3.msk.msra.mxu1 %vm535_vm0, %v8815_v15 }
  0x22   : > { %284 = vst.msk [vmem:[#allocation2 + $0x138] sm:$0xff] %vm243_vm1, %v15503_v6  ;;  %285 = vst.msk [vmem:[#allocation2 + $0x140] sm:$0xff] %vm243_vm1, %v15503_v6  ;;  %v310_v30 = vld [vmem:[%s11603_s13 + $0x58] sm:$0xff]  ;;  %v311_v31 = vld [vmem:[%s11603_s13 + $0x60] sm:$0xff]  ;;  %10233 = vmatprep.subr.mxu1 %v8814_v23 }
  0x23   : > { %287 = vst.msk [vmem:[#allocation2 + $0x150] sm:$0xff] %vm243_vm1, %v15503_v6  ;;  %288 = vst.msk [vmem:[#allocation2 + $0x158] sm:$0xff] %vm243_vm1, %v15503_v6  ;;  %v312_v32 = vld [vmem:[%s11603_s13 + $0x68] sm:$0xff]  ;;  %v313_v33 = vld [vmem:[%s11603_s13 + $0x70] sm:$0xff]  ;;  %10234 = vmatpush3.msra.mxu1 %v8814_v23 }
  0x24   : > { %290 = vst.msk [vmem:[#allocation2 + $0x168] sm:$0xff] %vm243_vm1, %v15503_v6  ;;  %291 = vst.msk [vmem:[#allocation2 + $0x170] sm:$0xff] %vm243_vm1, %v15503_v6  ;;  %v314_v34 = vld [vmem:[%s11603_s13 + $0x78] sm:$0xff]  ;;  %v315_v35 = vld [vmem:[%s11603_s13 + $0x80] sm:$0xff]  ;;  %10235 = vmatprep.subr.mxu1 %v8813_v40 }
  0x25   : > { %293 = vst.msk [vmem:[#allocation2 + $0x180] sm:$0xff] %vm243_vm1, %v15503_v6  ;;  %294 = vst.msk [vmem:[#allocation2 + $0x188] sm:$0xff] %vm243_vm1, %v15503_v6  ;;  %v316_v37 = vld [vmem:[%s11603_s13 + $0x88] sm:$0xff]  ;;  %v317_v38 = vld [vmem:[%s11603_s13 + $0x90] sm:$0xff]  ;;  %10236 = vmatpush3.msra.mxu1 %v8813_v40 }
  0x26   : > { %296 = vst.msk [vmem:[#allocation2 + $0x198] sm:$0xff] %vm243_vm1, %v15503_v6  ;;  %297 = vst.msk [vmem:[#allocation2 + $0x1a0] sm:$0xff] %vm243_vm1, %v15503_v6  ;;  %v318_v39 = vld [vmem:[%s11603_s13 + $0x98] sm:$0xff]  ;;  %10237 = vmatprep.subr.mxu1 %v8812_v52  ;;  %v8773_v57 = vld [vmem:[%s15499_s2 + $0x50] sm:$0xff] }
  0x27   : > { %247 = vst.msk [vmem:[#allocation2 + $0x10] sm:$0x3] %vm246_vm2, %v15503_v6  ;;  %250 = vst.msk [vmem:[#allocation2 + $0x28] sm:$0x3] %vm246_vm2, %v15503_v6  ;;  %10238 = vmatpush3.msra.mxu1 %v8812_v52  ;;  %v8811_v58 = vld [vmem:[%s15499_s2 + $0x78] sm:$0xff]  ;;  %v319_v2 = vld [vmem:[%s11603_s13 + $0xa0] sm:$0xff] }
  0x28   : > { %253 = vst.msk [vmem:[#allocation2 + $0x40] sm:$0x3] %vm246_vm2, %v15503_v6  ;;  %256 = vst.msk [vmem:[#allocation2 + $0x58] sm:$0x3] %vm246_vm2, %v15503_v6  ;;  %v11750_v63 = vld [vmem:[%s15499_s2 + $0xc0] sm:$0xf]  ;;  %10239 = vmatprep.subr.mxu1 %v8811_v58 }
  0x29   : > { %259 = vst.msk [vmem:[#allocation2 + $0x70] sm:$0x3] %vm246_vm2, %v15503_v6  ;;  %262 = vst.msk [vmem:[#allocation2 + $0x88] sm:$0x3] %vm246_vm2, %v15503_v6  ;;  %v320_v3 = vld [vmem:[%s11603_s13 + $0xa8] sm:$0xff]  ;;  %10240 = vmatpush3.msra.mxu1 %v8811_v58  ;;  %v321_v5 = vld [vmem:[%s11603_s13 + $0xb0] sm:$0xff] }
  0x2a   : > { %265 = vst.msk [vmem:[#allocation2 + $0xa0] sm:$0x3] %vm246_vm2, %v15503_v6  ;;  %268 = vst.msk [vmem:[#allocation2 + $0xb8] sm:$0x3] %vm246_vm2, %v15503_v6  ;;  %v322_v7 = vld [vmem:[%s11603_s13 + $0xb8] sm:$0xff]  ;;  %v323_v8 = vld [vmem:[%s11603_s13 + $0xc0] sm:$0xff] }
  0x2b   : > { %271 = vst.msk [vmem:[#allocation2 + $0xd0] sm:$0x3] %vm246_vm2, %v15503_v6  ;;  %274 = vst.msk [vmem:[#allocation2 + $0xe8] sm:$0x3] %vm246_vm2, %v15503_v6  ;;  %v324_v9 = vld [vmem:[%s11603_s13 + $0xc8] sm:$0xff]  ;;  %v325_v10 = vld [vmem:[%s11603_s13 + $0xd0] sm:$0xff] }
  0x2c   : > { %277 = vst.msk [vmem:[#allocation2 + $0x100] sm:$0x3] %vm246_vm2, %v15503_v6  ;;  %280 = vst.msk [vmem:[#allocation2 + $0x118] sm:$0x3] %vm246_vm2, %v15503_v6 }
  0x2d   : > { %283 = vst.msk [vmem:[#allocation2 + $0x130] sm:$0x3] %vm246_vm2, %v15503_v6  ;;  %286 = vst.msk [vmem:[#allocation2 + $0x148] sm:$0x3] %vm246_vm2, %v15503_v6 }
  0x2e   : > { %289 = vst.msk [vmem:[#allocation2 + $0x160] sm:$0x3] %vm246_vm2, %v15503_v6  ;;  %292 = vst.msk [vmem:[#allocation2 + $0x178] sm:$0x3] %vm246_vm2, %v15503_v6  ;;  %v402_v18 = vld [vmem:[#allocation2 + $0x9] sm:$0xff] }
  0x2f   : > { %295 = vst.msk [vmem:[#allocation2 + $0x190] sm:$0x3] %vm246_vm2, %v15503_v6  ;;  %298 = vst.msk [vmem:[#allocation2 + $0x1a8] sm:$0x3] %vm246_vm2, %v15503_v6  ;;  %10068 = vmatmul.mubr.msk.f32.vlgmr.msra.gmra.mxu0 %vm243_vm1, %v402_v18  ;;  %v1089_v6 = vld [vmem:[#allocation2 + $0xa] sm:$0xff] }
  0x30   : > { %332 = vst.msk [vmem:[#allocation2 + $0x19] sm:$0xff] %vm243_vm1, %v299_v12  ;;  %333 = vst.msk [vmem:[#allocation2 + $0x21] sm:$0xff] %vm243_vm1, %v300_v13  ;;  %10174 = vmatpush3.msk.msra.mxu0 %vm535_vm0, %v8777_v11  ;;  %v326_v11 = vld [vmem:[%s11603_s13 + $0xd8] sm:$0xff]  ;;  %v327_v13 = vld [vmem:[%s11603_s13 + $0xe0] sm:$0xff] }
  0x31   : > { %334 = vst.msk [vmem:[#allocation2 + $0x31] sm:$0xff] %vm243_vm1, %v301_v14  ;;  %335 = vst.msk [vmem:[#allocation2 + $0x39] sm:$0xff] %vm243_vm1, %v302_v20  ;;  %10175 = vmatprep.subr.mxu0 %v8776_v22  ;;  %v328_v14 = vld [vmem:[%s11603_s13 + $0xe8] sm:$0xff] }
  0x32   : > { %336 = vst.msk [vmem:[#allocation2 + $0x49] sm:$0xff] %vm243_vm1, %v303_v21  ;;  %337 = vst.msk [vmem:[#allocation2 + $0x51] sm:$0xff] %vm243_vm1, %v304_v24  ;;  %10176 = vmatpush3.msra.mxu0 %v8776_v22 }
  0x33   : > { %338 = vst.msk [vmem:[#allocation2 + $0x61] sm:$0xff] %vm243_vm1, %v305_v25  ;;  %339 = vst.msk [vmem:[#allocation2 + $0x69] sm:$0xff] %vm243_vm1, %v306_v26  ;;  %10177 = vmatprep.subr.mxu0 %v8775_v36 }
  0x34   : > { %340 = vst.msk [vmem:[#allocation2 + $0x79] sm:$0xff] %vm243_vm1, %v307_v27  ;;  %341 = vst.msk [vmem:[#allocation2 + $0x81] sm:$0xff] %vm243_vm1, %v308_v28  ;;  %10178 = vmatpush3.msra.mxu0 %v8775_v36 }
  0x35   : > { %342 = vst.msk [vmem:[#allocation2 + $0x91] sm:$0xff] %vm243_vm1, %v309_v29  ;;  %343 = vst.msk [vmem:[#allocation2 + $0x99] sm:$0xff] %vm243_vm1, %v310_v30  ;;  %10179 = vmatprep.subr.mxu0 %v8774_v51 }
  0x36   : > { %344 = vst.msk [vmem:[#allocation2 + $0xa9] sm:$0xff] %vm243_vm1, %v311_v31  ;;  %345 = vst.msk [vmem:[#allocation2 + $0xb1] sm:$0xff] %vm243_vm1, %v312_v32  ;;  %10180 = vmatpush3.msra.mxu0 %v8774_v51  ;;  %v11857_v31 = vld [vmem:[%s15499_s2 + $0xe8] sm:$0xf] }
  0x37   : > { %346 = vst.msk [vmem:[#allocation2 + $0xc1] sm:$0xff] %vm243_vm1, %v313_v33  ;;  %347 = vst.msk [vmem:[#allocation2 + $0xc9] sm:$0xff] %vm243_vm1, %v314_v34  ;;  %v11668_v41 = vld [vmem:[#allocation2 + $0x19] sm:$0xff]  ;;  %v11672_v43 = vld [vmem:[#allocation2 + $0x21] sm:$0xff]  ;;  %10181 = vmatprep.subr.mxu0 %v8773_v57  ;;  %10347 = vmatprep.subr.msk.mxu1 %vm535_vm0, %v11857_v31 }
  0x38   : > { %348 = vst.msk [vmem:[#allocation2 + $0xd9] sm:$0xff] %vm243_vm1, %v315_v35  ;;  %v11670_v42 = vld [vmem:[#allocation2 + $0x18] sm:$0xff]  ;;  %349 = vst.msk [vmem:[#allocation2 + $0xe1] sm:$0xff] %vm243_vm1, %v316_v37  ;;  %10070 = vmatprep.mubr.msk.f32.mxu0 %vm243_vm1, %v11668_v41  ;;  %v11681_v44 = vld [vmem:[#allocation2 + $0x20] sm:$0xff]  ;;  %10182 = vmatpush3.msra.mxu0 %v8773_v57 }
  0x39   : > { %350 = vst.msk [vmem:[#allocation2 + $0xf1] sm:$0xff] %vm243_vm1, %v317_v38  ;;  %351 = vst.msk [vmem:[#allocation2 + $0xf9] sm:$0xff] %vm243_vm1, %v318_v39  ;;  %10128 = vmatprep.mubr.msk.f32.mxu1 %vm243_vm1, %v11670_v42  ;;  %v11683_v45 = vld [vmem:[#allocation2 + $0x31] sm:$0xff]  ;;  %10071 = vmatmul.mubr.msk.f32.gmra.mxu0 %vm243_vm1, %v11672_v43  ;;  %v11695_v47 = vld [vmem:[#allocation2 + $0x39] sm:$0xff] }
  0x3a   : > { %v11685_v46 = vld [vmem:[#allocation2 + $0x30] sm:$0xff]  ;;  %10129 = vmatmul.mubr.msk.f32.gmra.mxu1 %vm243_vm1, %v11681_v44  ;;  %10073 = vmatprep.mubr.msk.f32.mxu0 %vm243_vm1, %v11683_v45  ;;  %v11697_v48 = vld [vmem:[#allocation2 + $0x38] sm:$0xff]  ;;  %v11701_v50 = vld [vmem:[#allocation2 + $0x48] sm:$0xff]  ;;  %352 = vst.msk [vmem:[#allocation2 + $0x109] sm:$0xff] %vm243_vm1, %v319_v2 }
  0x3b   : > { %15611 = vst [vmem:[#allocation7_spill] sm:$0xff] %v11685_v46  ;;  %10131 = vmatprep.mubr.msk.f32.mxu1 %vm243_vm1, %v11685_v46  ;;  %15612 = vst [vmem:[#allocation8_spill] sm:$0xff] %v11697_v48  ;;  %v11699_v49 = vld [vmem:[#allocation2 + $0x49] sm:$0xff]  ;;  %v11717_v53 = vld [vmem:[#allocation2 + $0x51] sm:$0xff]  ;;  %10289 = vmatprep.subr.msk.mxu0 %vm535_vm0, %v11750_v63 }
  0x3c   : > { %v11719_v54 = vld [vmem:[#allocation2 + $0x50] sm:$0xff]  ;;  %v11721_v55 = vld [vmem:[#allocation2 + $0x61] sm:$0xff]  ;;  %v11743_v61 = vld [vmem:[#allocation2 + $0x79] sm:$0xff]  ;;  %353 = vst.msk [vmem:[#allocation2 + $0x111] sm:$0xff] %vm243_vm1, %v320_v3 }
  0x3d   : > { %10074 = vmatmul.mubr.msk.f32.gmra.mxu0 %vm243_vm1, %v11695_v47  ;;  %v11723_v56 = vld [vmem:[#allocation2 + $0x60] sm:$0xff]  ;;  %v11739_v59 = vld [vmem:[#allocation2 + $0x69] sm:$0xff]  ;;  %v11745_v62 = vld [vmem:[#allocation2 + $0x78] sm:$0xff]  ;;  %354 = vst.msk [vmem:[#allocation2 + $0x121] sm:$0xff] %vm243_vm1, %v321_v5 }
  0x3e   : > { %10132 = vmatmul.mubr.msk.f32.gmra.mxu1 %vm243_vm1, %v11697_v48  ;;  %10076 = vmatprep.mubr.msk.f32.mxu0 %vm243_vm1, %v11699_v49  ;;  %v11741_v60 = vld [vmem:[#allocation2 + $0x68] sm:$0xff]  ;;  %v11754_v1 = vld [vmem:[#allocation2 + $0x80] sm:$0xff]  ;;  %v11762_v4 = vld [vmem:[#allocation2 + $0x91] sm:$0xff]  ;;  %355 = vst.msk [vmem:[#allocation2 + $0x129] sm:$0xff] %vm243_vm1, %v322_v7 }
  0x3f   : > { %10134 = vmatprep.mubr.msk.f32.mxu1 %vm243_vm1, %v11701_v50  ;;  %v11752_v0 = vld [vmem:[#allocation2 + $0x81] sm:$0xff]  ;;  %356 = vst.msk [vmem:[#allocation2 + $0x139] sm:$0xff] %vm243_vm1, %v323_v8  ;;  %v11779_v12 = vld [vmem:[#allocation2 + $0x90] sm:$0xff]  ;;  %357 = vst.msk [vmem:[#allocation2 + $0x141] sm:$0xff] %vm243_vm1, %v324_v9 }
  0x40   : > { %358 = vst.msk [vmem:[#allocation2 + $0x151] sm:$0xff] %vm243_vm1, %v325_v10  ;;  %359 = vst.msk [vmem:[#allocation2 + $0x159] sm:$0xff] %vm243_vm1, %v326_v11  ;;  %v11798_v15 = vld [vmem:[#allocation2 + $0x99] sm:$0xff]  ;;  %v11802_v17 = vld [vmem:[#allocation2 + $0xa9] sm:$0xff] }
  0x41   : > { %10077 = vmatmul.mubr.msk.f32.gmra.mxu0 %vm243_vm1, %v11717_v53  ;;  %360 = vst.msk [vmem:[#allocation2 + $0x169] sm:$0xff] %vm243_vm1, %v327_v13  ;;  %361 = vst.msk [vmem:[#allocation2 + $0x171] sm:$0xff] %vm243_vm1, %v328_v14  ;;  %v11800_v16 = vld [vmem:[#allocation2 + $0x98] sm:$0xff]  ;;  %v11804_v18 = vld [vmem:[#allocation2 + $0xa8] sm:$0xff] }
  0x42   : > { %10135 = vmatmul.mubr.msk.f32.gmra.mxu1 %vm243_vm1, %v11719_v54  ;;  %10079 = vmatprep.mubr.msk.f32.mxu0 %vm243_vm1, %v11721_v55  ;;  %v11814_v19 = vld [vmem:[#allocation2 + $0xb1] sm:$0xff]  ;;  %v11818_v21 = vld [vmem:[#allocation2 + $0xc1] sm:$0xff]  ;;  %v11830_v23 = vld [vmem:[#allocation2 + $0xc9] sm:$0xff] }
  0x43   : > { %10137 = vmatprep.mubr.msk.f32.mxu1 %vm243_vm1, %v11723_v56  ;;  %v11816_v20 = vld [vmem:[#allocation2 + $0xb0] sm:$0xff]  ;;  %v11820_v22 = vld [vmem:[#allocation2 + $0xc0] sm:$0xff]  ;;  %v11832_v24 = vld [vmem:[#allocation2 + $0xc8] sm:$0xff] }
  0x44   : > { %v11834_v25 = vld [vmem:[#allocation2 + $0xd9] sm:$0xff]  ;;  %v11846_v27 = vld [vmem:[#allocation2 + $0xe1] sm:$0xff]  ;;  %v11850_v29 = vld [vmem:[#allocation2 + $0xf1] sm:$0xff] }
  0x45   : > { %10080 = vmatmul.mubr.msk.f32.gmra.mxu0 %vm243_vm1, %v11739_v59  ;;  %v11836_v26 = vld [vmem:[#allocation2 + $0xd8] sm:$0xff]  ;;  %v11848_v28 = vld [vmem:[#allocation2 + $0xe0] sm:$0xff]  ;;  %v11852_v30 = vld [vmem:[#allocation2 + $0xf0] sm:$0xff] }
  0x46   : > { %10138 = vmatmul.mubr.msk.f32.gmra.mxu1 %vm243_vm1, %v11741_v60  ;;  %10082 = vmatprep.mubr.msk.f32.mxu0 %vm243_vm1, %v11743_v61  ;;  %v11863_v32 = vld [vmem:[#allocation2 + $0xf9] sm:$0xff]  ;;  %v329_v34 = vld [vmem:[%s11603_s13 + $0xf0] sm:$0xff]  ;;  %v11875_v37 = vld [vmem:[#allocation2 + $0x108] sm:$0xff] }
  0x47   : > { %10140 = vmatprep.mubr.msk.f32.mxu1 %vm243_vm1, %v11745_v62  ;;  %v11869_v33 = vld [vmem:[#allocation2 + $0xf8] sm:$0xff]  ;;  %v11873_v36 = vld [vmem:[#allocation2 + $0x109] sm:$0xff]  ;;  %362 = vst.msk [vmem:[#allocation2 + $0x181] sm:$0xff] %vm243_vm1, %v329_v34  ;;  %v11893_v40 = vld [vmem:[#allocation2 + $0x121] sm:$0xff] }
  0x48   : > { %v330_v35 = vld [vmem:[%s11603_s13 + $0xf8] sm:$0xff]  ;;  %v11891_v39 = vld [vmem:[#allocation2 + $0x110] sm:$0xff]  ;;  %v11895_v51 = vld [vmem:[#allocation2 + $0x120] sm:$0xff]  ;;  %s9399_s13 = sshll.u32 %s11408_s22, 12  ;;  %s15457_s22 = scalar_lea.sflag [#allocation5], %s230_s7 }
  0x49   : > { %10083 = vmatmul.mubr.msk.f32.gmra.mxu0 %vm243_vm1, %v11752_v0  ;;  %363 = vst.msk [vmem:[#allocation2 + $0x189] sm:$0xff] %vm243_vm1, %v330_v35  ;;  %v11889_v38 = vld [vmem:[#allocation2 + $0x111] sm:$0xff]  ;;  %v11905_v52 = vld [vmem:[#allocation2 + $0x129] sm:$0xff]  ;;  %v11909_v58 = vld [vmem:[#allocation2 + $0x139] sm:$0xff] }
  0x4a   : > { %10141 = vmatmul.mubr.msk.f32.gmra.mxu1 %vm243_vm1, %v11754_v1  ;;  %10085 = vmatprep.mubr.msk.f32.mxu0 %vm243_vm1, %v11762_v4  ;;  %v11907_v57 = vld [vmem:[#allocation2 + $0x128] sm:$0xff]  ;;  %v11911_v2 = vld [vmem:[#allocation2 + $0x138] sm:$0xff]  ;;  %v11923_v5 = vld [vmem:[#allocation2 + $0x140] sm:$0xff] }
  0x4b   : > { %10143 = vmatprep.mubr.msk.f32.mxu1 %vm243_vm1, %v11779_v12  ;;  %v11921_v3 = vld [vmem:[#allocation2 + $0x141] sm:$0xff]  ;;  %v11925_v7 = vld [vmem:[#allocation2 + $0x151] sm:$0xff]  ;;  %v11937_v9 = vld [vmem:[#allocation2 + $0x159] sm:$0xff] }
  0x4c   : > { %v11927_v8 = vld [vmem:[#allocation2 + $0x150] sm:$0xff]  ;;  %15613 = vst [vmem:[#allocation9_spill] sm:$0xff] %v11937_v9  ;;  %v11939_v10 = vld [vmem:[#allocation2 + $0x158] sm:$0xff]  ;;  %v11943_v13 = vld [vmem:[#allocation2 + $0x168] sm:$0xff] }
  0x4d   : > { %10086 = vmatmul.mubr.msk.f32.gmra.mxu0 %vm243_vm1, %v11798_v15  ;;  %v11941_v11 = vld [vmem:[#allocation2 + $0x169] sm:$0xff]  ;;  %v11953_v14 = vld [vmem:[#allocation2 + $0x171] sm:$0xff] }
  0x4e   : > { %10144 = vmatmul.mubr.msk.f32.gmra.mxu1 %vm243_vm1, %v11800_v16  ;;  %10088 = vmatprep.mubr.msk.f32.mxu0 %vm243_vm1, %v11802_v17  ;;  %15614 = vst [vmem:[#allocation10_spill] sm:$0xff] %v11941_v11  ;;  %v11955_v34 = vld [vmem:[#allocation2 + $0x170] sm:$0xff]  ;;  %v1088_v35 = vld [vmem:[#allocation2 + $0x2] sm:$0xff] }
  0x4f   : > { %10146 = vmatprep.mubr.msk.f32.mxu1 %vm243_vm1, %v11804_v18 }
  0x51   : > { %10089 = vmatmul.mubr.msk.f32.gmra.mxu0 %vm243_vm1, %v11814_v19 }
  0x52   : > { %10147 = vmatmul.mubr.msk.f32.gmra.mxu1 %vm243_vm1, %v11816_v20  ;;  %10091 = vmatprep.mubr.msk.f32.mxu0 %vm243_vm1, %v11818_v21 }
  0x53   : > { %10149 = vmatprep.mubr.msk.f32.mxu1 %vm243_vm1, %v11820_v22 }
  0x55   : > { %10092 = vmatmul.mubr.msk.f32.gmra.mxu0 %vm243_vm1, %v11830_v23 }
  0x56   : > { %10150 = vmatmul.mubr.msk.f32.gmra.mxu1 %vm243_vm1, %v11832_v24  ;;  %10094 = vmatprep.mubr.msk.f32.mxu0 %vm243_vm1, %v11834_v25 }
  0x57   : > { %10152 = vmatprep.mubr.msk.f32.mxu1 %vm243_vm1, %v11836_v26 }
  0x59   : > { %10095 = vmatmul.mubr.msk.f32.gmra.mxu0 %vm243_vm1, %v11846_v27 }
  0x5a   : > { %10153 = vmatmul.mubr.msk.f32.gmra.mxu1 %vm243_vm1, %v11848_v28  ;;  %10097 = vmatprep.mubr.msk.f32.mxu0 %vm243_vm1, %v11850_v29 }
  0x5b   : > { %10155 = vmatprep.mubr.msk.f32.mxu1 %vm243_vm1, %v11852_v30 }
  0x5d   : > { %10098 = vmatmul.mubr.msk.f32.gmra.mxu0 %vm243_vm1, %v11863_v32 }
  0x5e   : > { %10156 = vmatmul.mubr.msk.f32.gmra.mxu1 %vm243_vm1, %v11869_v33  ;;  %10100 = vmatprep.mubr.msk.f32.mxu0 %vm243_vm1, %v11873_v36 }
  0x5f   : > { %10158 = vmatprep.mubr.msk.f32.mxu1 %vm243_vm1, %v11875_v37 }
  0x61   : > { %10101 = vmatmul.mubr.msk.f32.gmra.mxu0 %vm243_vm1, %v11889_v38 }
  0x62   : > { %10159 = vmatmul.mubr.msk.f32.gmra.mxu1 %vm243_vm1, %v11891_v39  ;;  %10103 = vmatprep.mubr.msk.f32.mxu0 %vm243_vm1, %v11893_v40 }
  0x63   : > { %10161 = vmatprep.mubr.msk.f32.mxu1 %vm243_vm1, %v11895_v51 }
  0x65   : > { %10104 = vmatmul.mubr.msk.f32.gmra.mxu0 %vm243_vm1, %v11905_v52 }
  0x66   : > { %10162 = vmatmul.mubr.msk.f32.gmra.mxu1 %vm243_vm1, %v11907_v57  ;;  %10106 = vmatprep.mubr.msk.f32.mxu0 %vm243_vm1, %v11909_v58 }
  0x67   : > { %10164 = vmatprep.mubr.msk.f32.mxu1 %vm243_vm1, %v11911_v2 }
  0x69   : > { %10107 = vmatmul.mubr.msk.f32.gmra.mxu0 %vm243_vm1, %v11921_v3 }
  0x6a   : > { %10165 = vmatmul.mubr.msk.f32.gmra.mxu1 %vm243_vm1, %v11923_v5  ;;  %10109 = vmatprep.mubr.msk.f32.mxu0 %vm243_vm1, %v11925_v7 }
  0x6b   : > { %10167 = vmatprep.mubr.msk.f32.mxu1 %vm243_vm1, %v11927_v8 }
  0x6d   : > { %10110 = vmatmul.mubr.msk.f32.gmra.mxu0 %vm243_vm1, %v11937_v9  ;;  %v8852_v9 = vld [vmem:[%s15499_s2 + $0xb8] sm:$0xff] }
  0x6e   : > { %10168 = vmatmul.mubr.msk.f32.gmra.mxu1 %vm243_vm1, %v11939_v10  ;;  %10112 = vmatprep.mubr.msk.f32.mxu0 %vm243_vm1, %v11941_v11  ;;  %v11964_v11 = vld [vmem:[#allocation2 + $0x1a] sm:$0xff] }
  0x6f   : > { %10170 = vmatprep.mubr.msk.f32.mxu1 %vm243_vm1, %v11943_v13 }
  0x71   : > { %10113 = vmatmul.mubr.msk.f32.gmra.mxu0 %vm243_vm1, %v11953_v14 }
  0x72   : > { %10171 = vmatmul.mubr.msk.f32.gmra.mxu1 %vm243_vm1, %v11955_v34  ;;  %10183 = vmatprep.mubr.msk.f32.mxu0 %vm243_vm1, %v1088_v35  ;;  %v11976_v35 = vld [vmem:[#allocation2 + $0x22] sm:$0xff] }
  0x73   : > { %10241 = vmatprep.mubr.msk.f32.mxu1 %vm243_vm1, %v11670_v42  ;;  %v11980_v42 = vld [vmem:[#allocation2 + $0x32] sm:$0xff] }
  0x75   : > { %10184 = vmatmul.mubr.msk.f32.vlgmr.msra.gmra.mxu0 %vm243_vm1, %v1089_v6  ;;  %v8851_v6 = vld [vmem:[%s15499_s2 + $0xb0] sm:$0xff] }
  0x76   : > { %10242 = vmatmul.mubr.msk.f32.vlgmr.msra.gmra.mxu1 %vm243_vm1, %v11681_v44  ;;  %10290 = vmatpush3.msk.msra.mxu0 %vm535_vm0, %v11750_v63  ;;  %v8890_v44 = vld [vmem:[%s15499_s2 + $0xe0] sm:$0xff] }
  0x77   : > { %10186 = vmatprep.mubr.msk.f32.mxu0 %vm243_vm1, %v11964_v11  ;;  %10244 = vmatprep.mubr.msk.f32.mxu1 %vm243_vm1, %v11685_v46  ;;  %v11996_v63 = vld [vmem:[#allocation2 + $0x3a] sm:$0xff] }
  0x78   : > { %10291 = vmatprep.subr.mxu0 %v8852_v9  ;;  %10348 = vmatpush3.msk.msra.mxu1 %vm535_vm0, %v11857_v31  ;;  %v8850_v31 = vld [vmem:[%s15499_s2 + $0xa8] sm:$0xff]  ;;  %v12175_v46 = vld [vmem:[#allocation2 + $0x180] sm:$0xff] }
  0x79   : > { %10292 = vmatpush3.msra.mxu0 %v8852_v9  ;;  %v12000_v9 = vld [vmem:[#allocation2 + $0x4a] sm:$0xff]  ;;  %10349 = vmatprep.subr.mxu1 %v8890_v44 }
  0x7a   : > { %10187 = vmatmul.mubr.msk.f32.gmra.mxu0 %vm243_vm1, %v11976_v35  ;;  %10245 = vmatmul.mubr.msk.f32.gmra.mxu1 %vm243_vm1, %v11697_v48  ;;  %v8889_v48 = vld [vmem:[%s15499_s2 + $0xd8] sm:$0xff] }
  0x7b   : > { %10189 = vmatprep.mubr.msk.f32.mxu0 %vm243_vm1, %v11980_v42  ;;  %10247 = vmatprep.mubr.msk.f32.mxu1 %vm243_vm1, %v11701_v50  ;;  %v12014_v50 = vld [vmem:[#allocation2 + $0x52] sm:$0xff] }
  0x7c   : > { %10293 = vmatprep.subr.mxu0 %v8851_v6  ;;  %10350 = vmatpush3.msra.mxu1 %v8890_v44  ;;  %v8849_v44 = vld [vmem:[%s15499_s2 + $0xa0] sm:$0xff] }
  0x7d   : > { %10294 = vmatpush3.msra.mxu0 %v8851_v6  ;;  %v12018_v6 = vld [vmem:[#allocation2 + $0x62] sm:$0xff]  ;;  %10351 = vmatprep.subr.mxu1 %v8889_v48 }
  0x7e   : > { %10190 = vmatmul.mubr.msk.f32.gmra.mxu0 %vm243_vm1, %v11996_v63  ;;  %10248 = vmatmul.mubr.msk.f32.gmra.mxu1 %vm243_vm1, %v11719_v54  ;;  %v8888_v54 = vld [vmem:[%s15499_s2 + $0xd0] sm:$0xff] }
  0x7f   : > { %10192 = vmatprep.mubr.msk.f32.mxu0 %vm243_vm1, %v12000_v9  ;;  %10250 = vmatprep.mubr.msk.f32.mxu1 %vm243_vm1, %v11723_v56  ;;  %v12032_v56 = vld [vmem:[#allocation2 + $0x6a] sm:$0xff] }
  0x80   : > { %10295 = vmatprep.subr.mxu0 %v8850_v31  ;;  %10352 = vmatpush3.msra.mxu1 %v8889_v48  ;;  %v12041_v48 = vld [vmem:[%s15499_s2 + $0x110] sm:$0xf] }
  0x81   : > { %10296 = vmatpush3.msra.mxu0 %v8850_v31  ;;  %v12036_v31 = vld [vmem:[#allocation2 + $0x7a] sm:$0xff]  ;;  %10353 = vmatprep.subr.mxu1 %v8888_v54 }
  0x82   : > { %10193 = vmatmul.mubr.msk.f32.gmra.mxu0 %vm243_vm1, %v12014_v50  ;;  %10251 = vmatmul.mubr.msk.f32.gmra.mxu1 %vm243_vm1, %v11741_v60  ;;  %v8887_v60 = vld [vmem:[%s15499_s2 + $0xc8] sm:$0xff] }
  0x83   : > { %10195 = vmatprep.mubr.msk.f32.mxu0 %vm243_vm1, %v12018_v6  ;;  %10253 = vmatprep.mubr.msk.f32.mxu1 %vm243_vm1, %v11745_v62  ;;  %v12052_v62 = vld [vmem:[#allocation2 + $0x82] sm:$0xff] }
  0x84   : > { %10297 = vmatprep.subr.mxu0 %v8849_v44  ;;  %10354 = vmatpush3.msra.mxu1 %v8888_v54  ;;  %v12063_v54 = vld [vmem:[%s15499_s2 + $0x138] sm:$0xf] }
  0x85   : > { %10298 = vmatpush3.msra.mxu0 %v8849_v44  ;;  %v12056_v44 = vld [vmem:[#allocation2 + $0x92] sm:$0xff]  ;;  %10355 = vmatprep.subr.mxu1 %v8887_v60 }
  0x86   : > { %10196 = vmatmul.mubr.msk.f32.gmra.mxu0 %vm243_vm1, %v12032_v56  ;;  %10254 = vmatmul.mubr.msk.f32.gmra.mxu1 %vm243_vm1, %v11754_v1  ;;  %v12071_v1 = vld [vmem:[#allocation2 + $0x9a] sm:$0xff] }
  0x87   : > { %10198 = vmatprep.mubr.msk.f32.mxu0 %vm243_vm1, %v12036_v31  ;;  %10256 = vmatprep.mubr.msk.f32.mxu1 %vm243_vm1, %v11779_v12  ;;  %v12075_v12 = vld [vmem:[#allocation2 + $0xaa] sm:$0xff] }
  0x88   : > { %10405 = vmatprep.subr.msk.mxu0 %vm535_vm0, %v12041_v48  ;;  %10356 = vmatpush3.msra.mxu1 %v8887_v60  ;;  %v12101_v60 = vld [vmem:[#allocation2 + $0xda] sm:$0xff] }
  0x89   : > { %10463 = vmatprep.subr.msk.mxu1 %vm535_vm0, %v12063_v54 }
  0x8a   : > { %10199 = vmatmul.mubr.msk.f32.gmra.mxu0 %vm243_vm1, %v12052_v62  ;;  %10257 = vmatmul.mubr.msk.f32.gmra.mxu1 %vm243_vm1, %v11800_v16  ;;  %v12085_v16 = vld [vmem:[#allocation2 + $0xb2] sm:$0xff] }
  0x8b   : > { %10201 = vmatprep.mubr.msk.f32.mxu0 %vm243_vm1, %v12056_v44  ;;  %10259 = vmatprep.mubr.msk.f32.mxu1 %vm243_vm1, %v11804_v18  ;;  %v12089_v18 = vld [vmem:[#allocation2 + $0xc2] sm:$0xff] }
  0x8e   : > { %10202 = vmatmul.mubr.msk.f32.gmra.mxu0 %vm243_vm1, %v12071_v1  ;;  %10260 = vmatmul.mubr.msk.f32.gmra.mxu1 %vm243_vm1, %v11816_v20  ;;  %v12097_v20 = vld [vmem:[#allocation2 + $0xca] sm:$0xff] }
  0x8f   : > { %10204 = vmatprep.mubr.msk.f32.mxu0 %vm243_vm1, %v12075_v12  ;;  %10262 = vmatprep.mubr.msk.f32.mxu1 %vm243_vm1, %v11820_v22  ;;  %v12109_v22 = vld [vmem:[#allocation2 + $0xe2] sm:$0xff] }
  0x92   : > { %10205 = vmatmul.mubr.msk.f32.gmra.mxu0 %vm243_vm1, %v12085_v16  ;;  %10263 = vmatmul.mubr.msk.f32.gmra.mxu1 %vm243_vm1, %v11832_v24  ;;  %v12113_v24 = vld [vmem:[#allocation2 + $0xf2] sm:$0xff] }
  0x93   : > { %10207 = vmatprep.mubr.msk.f32.mxu0 %vm243_vm1, %v12089_v18  ;;  %10265 = vmatprep.mubr.msk.f32.mxu1 %vm243_vm1, %v11836_v26  ;;  %v12121_v26 = vld [vmem:[#allocation2 + $0xfa] sm:$0xff] }
  0x96   : > { %10208 = vmatmul.mubr.msk.f32.gmra.mxu0 %vm243_vm1, %v12097_v20  ;;  %10266 = vmatmul.mubr.msk.f32.gmra.mxu1 %vm243_vm1, %v11848_v28  ;;  %v12125_v28 = vld [vmem:[#allocation2 + $0x10a] sm:$0xff] }
  0x97   : > { %10210 = vmatprep.mubr.msk.f32.mxu0 %vm243_vm1, %v12101_v60  ;;  %10268 = vmatprep.mubr.msk.f32.mxu1 %vm243_vm1, %v11852_v30  ;;  %v12133_v30 = vld [vmem:[#allocation2 + $0x112] sm:$0xff] }
  0x9a   : > { %10211 = vmatmul.mubr.msk.f32.gmra.mxu0 %vm243_vm1, %v12109_v22  ;;  %10269 = vmatmul.mubr.msk.f32.gmra.mxu1 %vm243_vm1, %v11869_v33  ;;  %v12137_v33 = vld [vmem:[#allocation2 + $0x122] sm:$0xff] }
  0x9b   : > { %10213 = vmatprep.mubr.msk.f32.mxu0 %vm243_vm1, %v12113_v24  ;;  %10271 = vmatprep.mubr.msk.f32.mxu1 %vm243_vm1, %v11875_v37  ;;  %v12145_v37 = vld [vmem:[#allocation2 + $0x12a] sm:$0xff] }
  0x9e   : > { %10214 = vmatmul.mubr.msk.f32.gmra.mxu0 %vm243_vm1, %v12121_v26  ;;  %10272 = vmatmul.mubr.msk.f32.gmra.mxu1 %vm243_vm1, %v11891_v39  ;;  %v12149_v39 = vld [vmem:[#allocation2 + $0x13a] sm:$0xff] }
  0x9f   : > { %10216 = vmatprep.mubr.msk.f32.mxu0 %vm243_vm1, %v12125_v28  ;;  %10274 = vmatprep.mubr.msk.f32.mxu1 %vm243_vm1, %v11895_v51  ;;  %v12157_v51 = vld [vmem:[#allocation2 + $0x142] sm:$0xff] }
  0xa2   : > { %10217 = vmatmul.mubr.msk.f32.gmra.mxu0 %vm243_vm1, %v12133_v30  ;;  %10275 = vmatmul.mubr.msk.f32.gmra.mxu1 %vm243_vm1, %v11907_v57  ;;  %v12161_v57 = vld [vmem:[#allocation2 + $0x152] sm:$0xff] }
  0xa3   : > { %10219 = vmatprep.mubr.msk.f32.mxu0 %vm243_vm1, %v12137_v33  ;;  %10277 = vmatprep.mubr.msk.f32.mxu1 %vm243_vm1, %v11911_v2  ;;  %v12169_v2 = vld [vmem:[#allocation2 + $0x15a] sm:$0xff] }
  0xa6   : > { %10220 = vmatmul.mubr.msk.f32.gmra.mxu0 %vm243_vm1, %v12145_v37  ;;  %10278 = vmatmul.mubr.msk.f32.gmra.mxu1 %vm243_vm1, %v11923_v5  ;;  %v12173_v5 = vld [vmem:[#allocation2 + $0x16a] sm:$0xff] }
  0xa7   : > { %10222 = vmatprep.mubr.msk.f32.mxu0 %vm243_vm1, %v12149_v39  ;;  %10280 = vmatprep.mubr.msk.f32.mxu1 %vm243_vm1, %v11927_v8  ;;  %v12183_v8 = vld [vmem:[#allocation2 + $0x172] sm:$0xff] }
  0xaa   : > { %10223 = vmatmul.mubr.msk.f32.gmra.mxu0 %vm243_vm1, %v12157_v51  ;;  %10281 = vmatmul.mubr.msk.f32.gmra.mxu1 %vm243_vm1, %v11939_v10  ;;  %v12187_v10 = vld [vmem:[#allocation2 + $0x188] sm:$0xff] }
  0xab   : > { %10225 = vmatprep.mubr.msk.f32.mxu0 %vm243_vm1, %v12161_v57  ;;  %10283 = vmatprep.mubr.msk.f32.mxu1 %vm243_vm1, %v11943_v13  ;;  %v8928_v13 = vld [vmem:[%s15499_s2 + $0x108] sm:$0xff] }
  0xae   : > { %10226 = vmatmul.mubr.msk.f32.gmra.mxu0 %vm243_vm1, %v12169_v2  ;;  %10284 = vmatmul.mubr.msk.f32.gmra.mxu1 %vm243_vm1, %v11955_v34  ;;  %v2669_v34 = vld [vmem:[#allocation2 + $0x60] sm:$0xff] }
  0xaf   : > { %10228 = vmatprep.mubr.msk.f32.mxu0 %vm243_vm1, %v12173_v5  ;;  %10286 = vmatprep.mubr.msk.f32.mxu1 %vm243_vm1, %v12175_v46 }
  0xb2   : > { %10229 = vmatmul.mubr.msk.f32.gmra.mxu0 %vm243_vm1, %v12183_v8  ;;  %10287 = vmatmul.mubr.msk.f32.gmra.mxu1 %vm243_vm1, %v12187_v10 }
  0xb3   : > { %10299 = vmatprep.mubr.msk.f32.mxu0 %vm243_vm1, %v11668_v41  ;;  %10357 = vmatprep.mubr.msk.f32.mxu1 %vm243_vm1, %v11964_v11  ;;  %v8927_v41 = vld [vmem:[%s15499_s2 + $0x100] sm:$0xff]  ;;  %v2668_v11 = vld [vmem:[#allocation2 + $0x50] sm:$0xff] }
  0xb6   : > { %10300 = vmatmul.mubr.msk.f32.vlgmr.msra.gmra.mxu0 %vm243_vm1, %v11672_v43  ;;  %10358 = vmatmul.mubr.msk.f32.vlgmr.msra.gmra.mxu1 %vm243_vm1, %v11976_v35  ;;  %v8966_v43 = vld [vmem:[%s15499_s2 + $0x130] sm:$0xff]  ;;  %v3063_v35 = vld [vmem:[#allocation2 + $0x61] sm:$0xff] }
  0xb7   : > { %10406 = vmatpush3.msk.msra.mxu0 %vm535_vm0, %v12041_v48  ;;  %10302 = vmatprep.mubr.msk.f32.mxu0 %vm243_vm1, %v11683_v45  ;;  %v8926_v45 = vld [vmem:[%s15499_s2 + $0xf8] sm:$0xff] }
  0xb8   : > { %10360 = vmatprep.mubr.msk.f32.mxu1 %vm243_vm1, %v11980_v42  ;;  %10407 = vmatprep.subr.mxu0 %v8928_v13  ;;  %v9003_v42 = vld [vmem:[%s15499_s2 + $0x150] sm:$0xff] }
  0xb9   : > { %10408 = vmatpush3.msra.mxu0 %v8928_v13  ;;  %10464 = vmatpush3.msk.msra.mxu1 %vm535_vm0, %v12063_v54  ;;  %v2675_v13 = vld [vmem:[#allocation2 + $0xa8] sm:$0xff] }
  0xba   : > { %10303 = vmatmul.mubr.msk.f32.gmra.mxu0 %vm243_vm1, %v11695_v47  ;;  %10361 = vmatmul.mubr.msk.f32.gmra.mxu1 %vm243_vm1, %v11996_v63  ;;  %v8965_v47 = vld [vmem:[%s15499_s2 + $0x128] sm:$0xff] }
  0xbb   : > { %10305 = vmatprep.mubr.msk.f32.mxu0 %vm243_vm1, %v11699_v49  ;;  %10363 = vmatprep.mubr.msk.f32.mxu1 %vm243_vm1, %v12000_v9  ;;  %v8925_v49 = vld [vmem:[%s15499_s2 + $0xf0] sm:$0xff] }
  0xbc   : > { %10409 = vmatprep.subr.mxu0 %v8927_v41  ;;  %10465 = vmatprep.subr.mxu1 %v8966_v43 }
  0xbd   : > { %10410 = vmatpush3.msra.mxu0 %v8927_v41  ;;  %10466 = vmatpush3.msra.mxu1 %v8966_v43  ;;  %v3069_v41 = vld [vmem:[#allocation2 + $0xa9] sm:$0xff] }
  0xbe   : > { %10306 = vmatmul.mubr.msk.f32.gmra.mxu0 %vm243_vm1, %v11717_v53  ;;  %10364 = vmatmul.mubr.msk.f32.gmra.mxu1 %vm243_vm1, %v12014_v50  ;;  %v8964_v53 = vld [vmem:[%s15499_s2 + $0x120] sm:$0xff] }
  0xbf   : > { %10308 = vmatprep.mubr.msk.f32.mxu0 %vm243_vm1, %v11721_v55  ;;  %10366 = vmatprep.mubr.msk.f32.mxu1 %vm243_vm1, %v12018_v6  ;;  %v12257_v55 = vld [vmem:[%s15499_s2 + $0x160] sm:$0xf]  ;;  %v2670_v6 = vld [vmem:[#allocation2 + $0x68] sm:$0xff] }
  0xc0   : > { %10411 = vmatprep.subr.mxu0 %v8926_v45  ;;  %10467 = vmatprep.subr.mxu1 %v8965_v47 }
  0xc1   : > { %10412 = vmatpush3.msra.mxu0 %v8926_v45  ;;  %10468 = vmatpush3.msra.mxu1 %v8965_v47 }
  0xc2   : > { %10309 = vmatmul.mubr.msk.f32.gmra.mxu0 %vm243_vm1, %v11739_v59  ;;  %10367 = vmatmul.mubr.msk.f32.gmra.mxu1 %vm243_vm1, %v12032_v56  ;;  %v8963_v59 = vld [vmem:[%s15499_s2 + $0x118] sm:$0xff]  ;;  %v3064_v56 = vld [vmem:[#allocation2 + $0x69] sm:$0xff] }
  0xc3   : > { %10311 = vmatprep.mubr.msk.f32.mxu0 %vm243_vm1, %v11743_v61  ;;  %10369 = vmatprep.mubr.msk.f32.mxu1 %vm243_vm1, %v12036_v31  ;;  %v15615_v61 = vld [vmem:[#allocation9_spill] sm:$0xff] }
  0xc4   : > { %10413 = vmatprep.subr.mxu0 %v8925_v49  ;;  %10469 = vmatprep.subr.mxu1 %v8964_v53 }
  0xc5   : > { %10414 = vmatpush3.msra.mxu0 %v8925_v49  ;;  %10470 = vmatpush3.msra.mxu1 %v8964_v53  ;;  %v2676_v53 = vld [vmem:[#allocation2 + $0xb0] sm:$0xff] }
  0xc6   : > { %10312 = vmatmul.mubr.msk.f32.gmra.mxu0 %vm243_vm1, %v11752_v0  ;;  %10370 = vmatmul.mubr.msk.f32.gmra.mxu1 %vm243_vm1, %v12052_v62  ;;  %v15616_v0 = vld [vmem:[#allocation10_spill] sm:$0xff] }
  0xc7   : > { %10314 = vmatprep.mubr.msk.f32.mxu0 %vm243_vm1, %v11762_v4  ;;  %10372 = vmatprep.mubr.msk.f32.mxu1 %vm243_vm1, %v12056_v44  ;;  %v12344_v4 = vld [vmem:[#allocation2 + $0x181] sm:$0xff]  ;;  %v2671_v62 = vld [vmem:[#allocation2 + $0x78] sm:$0xff] }
  0xc8   : > { %10521 = vmatprep.subr.msk.mxu0 %vm535_vm0, %v12257_v55  ;;  %10471 = vmatprep.subr.mxu1 %v8963_v59  ;;  %v3065_v44 = vld [vmem:[#allocation2 + $0x79] sm:$0xff] }
  0xc9   : > { %10472 = vmatpush3.msra.mxu1 %v8963_v59 }
  0xca   : > { %10315 = vmatmul.mubr.msk.f32.gmra.mxu0 %vm243_vm1, %v11798_v15  ;;  %10373 = vmatmul.mubr.msk.f32.gmra.mxu1 %vm243_vm1, %v12071_v1  ;;  %v12346_v15 = vld [vmem:[#allocation2 + $0x182] sm:$0xff] }
  0xcb   : > { %10317 = vmatprep.mubr.msk.f32.mxu0 %vm243_vm1, %v11802_v17  ;;  %10375 = vmatprep.mubr.msk.f32.mxu1 %vm243_vm1, %v12075_v12  ;;  %v12354_v17 = vld [vmem:[#allocation2 + $0x189] sm:$0xff] }
  0xcc   : > { %v9002_v1 = vld [vmem:[%s15499_s2 + $0x148] sm:$0xff] }
  0xce   : > { %10318 = vmatmul.mubr.msk.f32.gmra.mxu0 %vm243_vm1, %v11814_v19  ;;  %10376 = vmatmul.mubr.msk.f32.gmra.mxu1 %vm243_vm1, %v12085_v16  ;;  %v12358_v19 = vld [vmem:[#allocation2 + $0x18a] sm:$0xff] }
  0xcf   : > { %10320 = vmatprep.mubr.msk.f32.mxu0 %vm243_vm1, %v11818_v21  ;;  %10378 = vmatprep.mubr.msk.f32.mxu1 %vm243_vm1, %v12089_v18  ;;  %v3059_v21 = vld [vmem:[#allocation2 + $0x31] sm:$0xff] }
  0xd2   : > { %10321 = vmatmul.mubr.msk.f32.gmra.mxu0 %vm243_vm1, %v11830_v23  ;;  %10379 = vmatmul.mubr.msk.f32.gmra.mxu1 %vm243_vm1, %v12097_v20  ;;  %v15617_v23 = vld [vmem:[#allocation7_spill] sm:$0xff] }
  0xd3   : > { %10323 = vmatprep.mubr.msk.f32.mxu0 %vm243_vm1, %v11834_v25  ;;  %10381 = vmatprep.mubr.msk.f32.mxu1 %vm243_vm1, %v12101_v60  ;;  %v3060_v25 = vld [vmem:[#allocation2 + $0x39] sm:$0xff]  ;;  %v3066_v60 = vld [vmem:[#allocation2 + $0x81] sm:$0xff] }
  0xd4   : > { %v2672_v20 = vld [vmem:[#allocation2 + $0x80] sm:$0xff] }
  0xd6   : > { %10324 = vmatmul.mubr.msk.f32.gmra.mxu0 %vm243_vm1, %v11846_v27  ;;  %10382 = vmatmul.mubr.msk.f32.gmra.mxu1 %vm243_vm1, %v12109_v22 }
  0xd7   : > { %10326 = vmatprep.mubr.msk.f32.mxu0 %vm243_vm1, %v11850_v29  ;;  %10384 = vmatprep.mubr.msk.f32.mxu1 %vm243_vm1, %v12113_v24 }
  0xda   : > { %10327 = vmatmul.mubr.msk.f32.gmra.mxu0 %vm243_vm1, %v11863_v32  ;;  %10385 = vmatmul.mubr.msk.f32.gmra.mxu1 %vm243_vm1, %v12121_v26  ;;  %v2667_v32 = vld [vmem:[#allocation2 + $0x48] sm:$0xff]  ;;  %v2673_v26 = vld [vmem:[#allocation2 + $0x90] sm:$0xff] }
  0xdb   : > { %10329 = vmatprep.mubr.msk.f32.mxu0 %vm243_vm1, %v11873_v36  ;;  %10387 = vmatprep.mubr.msk.f32.mxu1 %vm243_vm1, %v12125_v28  ;;  %v3067_v28 = vld [vmem:[#allocation2 + $0x91] sm:$0xff] }
  0xde   : > { %10330 = vmatmul.mubr.msk.f32.gmra.mxu0 %vm243_vm1, %v11889_v38  ;;  %10388 = vmatmul.mubr.msk.f32.gmra.mxu1 %vm243_vm1, %v12133_v30  ;;  %v3061_v38 = vld [vmem:[#allocation2 + $0x49] sm:$0xff] }
  0xdf   : > { %10332 = vmatprep.mubr.msk.f32.mxu0 %vm243_vm1, %v11893_v40  ;;  %10390 = vmatprep.mubr.msk.f32.mxu1 %vm243_vm1, %v12137_v33  ;;  %v10127_v29 = vpop.f32.mrf.mxu1  ;;  %v9004_v40 = vld [vmem:[%s15499_s2 + $0x158] sm:$0xff]  ;;  %v9001_v33 = vld [vmem:[%s15499_s2 + $0x140] sm:$0xff] }
  0xe2   : > { %10333 = vmatmul.mubr.msk.f32.gmra.mxu0 %vm243_vm1, %v11905_v52  ;;  %10391 = vmatmul.mubr.msk.f32.gmra.mxu1 %vm243_vm1, %v12145_v37  ;;  %v15618_v52 = vld [vmem:[#allocation8_spill] sm:$0xff] }
  0xe3   : > { %10335 = vmatprep.mubr.msk.f32.mxu0 %vm243_vm1, %v11909_v58  ;;  %10393 = vmatprep.mubr.msk.f32.mxu1 %vm243_vm1, %v12149_v39 }
  0xe6   : > { %10336 = vmatmul.mubr.msk.f32.gmra.mxu0 %vm243_vm1, %v11921_v3  ;;  %10394 = vmatmul.mubr.msk.f32.gmra.mxu1 %vm243_vm1, %v12157_v51  ;;  %v929_v3 = vpop.f32.mrf.mxu1 }
  0xe7   : > { %10338 = vmatprep.mubr.msk.f32.mxu0 %vm243_vm1, %v11925_v7  ;;  %10396 = vmatprep.mubr.msk.f32.mxu1 %vm243_vm1, %v12161_v57  ;;  %v2674_v57 = vld [vmem:[#allocation2 + $0x98] sm:$0xff] }
  0xea   : > { %10339 = vmatmul.mubr.msk.f32.gmra.mxu0 %vm243_vm1, %v15615_v61  ;;  %10397 = vmatmul.mubr.msk.f32.gmra.mxu1 %vm243_vm1, %v12169_v2  ;;  %v3068_v2 = vld [vmem:[#allocation2 + $0x99] sm:$0xff] }
  0xeb   : > { %10341 = vmatprep.mubr.msk.f32.mxu0 %vm243_vm1, %v15616_v0  ;;  %10399 = vmatprep.mubr.msk.f32.mxu1 %vm243_vm1, %v12173_v5  ;;  %v2677_v0 = vld [vmem:[#allocation2 + $0xc0] sm:$0xff] }
  0xee   : > { %10342 = vmatmul.mubr.msk.f32.gmra.mxu0 %vm243_vm1, %v11953_v14  ;;  %10400 = vmatmul.mubr.msk.f32.gmra.mxu1 %vm243_vm1, %v12183_v8  ;;  %v3062_v14 = vld [vmem:[#allocation2 + $0x51] sm:$0xff] }
  0xef   : > { %10344 = vmatprep.mubr.msk.f32.mxu0 %vm243_vm1, %v12344_v4  ;;  %10402 = vmatprep.mubr.msk.f32.mxu1 %vm243_vm1, %v12346_v15  ;;  %v10069_v27 = vpop.f32.mrf.mxu0 }
  0xf0   : > { %v12367_v36 = vadd.f32 %v10127_v29, %v10069_v27 }
  0xf1   : > { %v605_v58 = vpop.f32.mrf.mxu0 }
  0xf2   : > { %10345 = vmatmul.mubr.msk.f32.gmra.mxu0 %vm243_vm1, %v12354_v17  ;;  %10403 = vmatmul.mubr.msk.f32.gmra.mxu1 %vm243_vm1, %v12358_v19  ;;  %v12377_v7 = vadd.f32 %v929_v3, %v605_v58  ;;  %v2679_v58 = vld [vmem:[#allocation2 + $0xd8] sm:$0xff] }
  0xf3   : > { %10415 = vmatprep.mubr.msk.f32.mxu0 %vm243_vm1, %v15617_v23  ;;  %10473 = vmatprep.mubr.msk.f32.mxu1 %vm243_vm1, %v3059_v21  ;;  %v3071_v21 = vld [vmem:[#allocation2 + $0xc1] sm:$0xff]  ;;  %v3073_v3 = vld [vmem:[#allocation2 + $0xd9] sm:$0xff] }
  0xf6   : > { %10416 = vmatmul.mubr.msk.f32.vlgmr.msra.gmra.mxu0 %vm243_vm1, %v15618_v52  ;;  %10474 = vmatmul.mubr.msk.f32.vlgmr.msra.gmra.mxu1 %vm243_vm1, %v3060_v25 }
  0xf7   : > { %10522 = vmatpush3.msk.msra.mxu0 %vm535_vm0, %v12257_v55  ;;  %10418 = vmatprep.mubr.msk.f32.mxu0 %vm243_vm1, %v2667_v32  ;;  %v3070_v55 = vld [vmem:[#allocation2 + $0xb1] sm:$0xff]  ;;  %v2678_v32 = vld [vmem:[#allocation2 + $0xc8] sm:$0xff] }
  0xf8   : > { %10476 = vmatprep.mubr.msk.f32.mxu1 %vm243_vm1, %v3061_v38  ;;  %10523 = vmatprep.subr.mxu0 %v9004_v40  ;;  %v3072_v38 = vld [vmem:[#allocation2 + $0xc9] sm:$0xff] }
  0xf9   : > { %10524 = vmatpush3.msra.mxu0 %v9004_v40  ;;  %v10072_v63 = vpop.f32.mrf.mxu0 }
  0xfa   : > { %v10130_v9 = vpop.f32.mrf.mxu1  ;;  %10419 = vmatmul.mubr.msk.f32.gmra.mxu0 %vm243_vm1, %v2668_v11  ;;  %10477 = vmatmul.mubr.msk.f32.gmra.mxu1 %vm243_vm1, %v3062_v14 }
  0xfb   : > { %v12386_v50 = vadd.f32 %v10130_v9, %v10072_v63  ;;  %10421 = vmatprep.mubr.msk.f32.mxu0 %vm243_vm1, %v2669_v34  ;;  %10479 = vmatprep.mubr.msk.f32.mxu1 %vm243_vm1, %v3063_v35  ;;  %v615_v31 = vpop.f32.mrf.mxu0  ;;  %v3074_v63 = vld [vmem:[#allocation2 + $0xe1] sm:$0xff] }
  0xfc   : > { %v939_v48 = vpop.f32.mrf.mxu1  ;;  %10525 = vmatprep.subr.mxu0 %v9003_v42 }
  0xfd   : > { %v12390_v54 = vadd.f32 %v939_v48, %v615_v31  ;;  %10526 = vmatpush3.msra.mxu0 %v9003_v42  ;;  %v10075_v12 = vpop.f32.mrf.mxu0  ;;  %v2680_v42 = vld [vmem:[#allocation2 + $0xe0] sm:$0xff]  ;;  %v3075_v31 = vld [vmem:[#allocation2 + $0xf1] sm:$0xff] }
  0xfe   : > { %v10133_v16 = vpop.f32.mrf.mxu1  ;;  %10422 = vmatmul.mubr.msk.f32.gmra.mxu0 %vm243_vm1, %v2670_v6  ;;  %10480 = vmatmul.mubr.msk.f32.gmra.mxu1 %vm243_vm1, %v3064_v56  ;;  %v2681_v56 = vld [vmem:[#allocation2 + $0xf0] sm:$0xff] }
  0xff   : > { %v12397_v18 = vadd.f32 %v10133_v16, %v10075_v12  ;;  %10424 = vmatprep.mubr.msk.f32.mxu0 %vm243_vm1, %v2671_v62  ;;  %10482 = vmatprep.mubr.msk.f32.mxu1 %vm243_vm1, %v3065_v44  ;;  %v625_v22 = vpop.f32.mrf.mxu0  ;;  %v2682_v12 = vld [vmem:[#allocation2 + $0xf8] sm:$0xff] }
 0x100   : > { %v949_v24 = vpop.f32.mrf.mxu1  ;;  %10527 = vmatprep.subr.mxu0 %v9002_v1  ;;  %v3076_v16 = vld [vmem:[#allocation2 + $0xf9] sm:$0xff] }
 0x101   : > { %v12401_v30 = vadd.f32 %v949_v24, %v625_v22  ;;  %10528 = vmatpush3.msra.mxu0 %v9002_v1  ;;  %v10078_v37 = vpop.f32.mrf.mxu0  ;;  %v2683_v22 = vld [vmem:[#allocation2 + $0x108] sm:$0xff] }
 0x102   : > { %v10136_v39 = vpop.f32.mrf.mxu1  ;;  %10425 = vmatmul.mubr.msk.f32.gmra.mxu0 %vm243_vm1, %v2672_v20  ;;  %10483 = vmatmul.mubr.msk.f32.gmra.mxu1 %vm243_vm1, %v3066_v60  ;;  %v3077_v24 = vld [vmem:[#allocation2 + $0x109] sm:$0xff] }
 0x103   : > { %v12408_v51 = vadd.f32 %v10136_v39, %v10078_v37  ;;  %10427 = vmatprep.mubr.msk.f32.mxu0 %vm243_vm1, %v2673_v26  ;;  %10485 = vmatprep.mubr.msk.f32.mxu1 %vm243_vm1, %v3067_v28  ;;  %v635_v5 = vpop.f32.mrf.mxu0  ;;  %v2684_v39 = vld [vmem:[#allocation2 + $0x110] sm:$0xff] }
 0x104   : > { %v959_v8 = vpop.f32.mrf.mxu1  ;;  %10529 = vmatprep.subr.mxu0 %v9001_v33 }
 0x105   : > { %v12412_v43 = vadd.f32 %v959_v8, %v635_v5  ;;  %10530 = vmatpush3.msra.mxu0 %v9001_v33  ;;  %v10081_v45 = vpop.f32.mrf.mxu0  ;;  %v2685_v8 = vld [vmem:[#allocation2 + $0x120] sm:$0xff] }
 0x106   : > { %v10139_v47 = vpop.f32.mrf.mxu1  ;;  %10428 = vmatmul.mubr.msk.f32.gmra.mxu0 %vm243_vm1, %v2674_v57  ;;  %10486 = vmatmul.mubr.msk.f32.gmra.mxu1 %vm243_vm1, %v3068_v2  ;;  %v3078_v57 = vld [vmem:[#allocation2 + $0x111] sm:$0xff] }
 0x107   : > { %v12416_v49 = vadd.f32 %v10139_v47, %v10081_v45  ;;  %10430 = vmatprep.mubr.msk.f32.mxu0 %vm243_vm1, %v2675_v13  ;;  %10488 = vmatprep.mubr.msk.f32.mxu1 %vm243_vm1, %v3069_v41  ;;  %v645_v59 = vpop.f32.mrf.mxu0  ;;  %v3079_v13 = vld [vmem:[#allocation2 + $0x121] sm:$0xff] }
 0x108   : > { %v969_v61 = vpop.f32.mrf.mxu1 }
 0x109   : > { %v12420_v23 = vadd.f32 %v969_v61, %v645_v59  ;;  %v10084_v25 = vpop.f32.mrf.mxu0 }
 0x10a   : > { %v10142_v27 = vpop.f32.mrf.mxu1  ;;  %10431 = vmatmul.mubr.msk.f32.gmra.mxu0 %vm243_vm1, %v2676_v53  ;;  %10489 = vmatmul.mubr.msk.f32.gmra.mxu1 %vm243_vm1, %v3070_v55  ;;  %v2686_v53 = vld [vmem:[#allocation2 + $0x128] sm:$0xff] }
 0x10b   : > { %v12424_v29 = vadd.f32 %v10142_v27, %v10084_v25  ;;  %10433 = vmatprep.mubr.msk.f32.mxu0 %vm243_vm1, %v2677_v0  ;;  %10491 = vmatprep.mubr.msk.f32.mxu1 %vm243_vm1, %v3071_v21  ;;  %v655_v40 = vpop.f32.mrf.mxu0  ;;  %v3080_v55 = vld [vmem:[#allocation2 + $0x129] sm:$0xff]  ;;  %v2687_v0 = vld [vmem:[#allocation2 + $0x138] sm:$0xff] }
 0x10c   : > { %v979_v52 = vpop.f32.mrf.mxu1  ;;  %v3081_v21 = vld [vmem:[#allocation2 + $0x139] sm:$0xff] }
 0x10d   : > { %v12428_v11 = vadd.f32 %v979_v52, %v655_v40  ;;  %v10087_v14 = vpop.f32.mrf.mxu0  ;;  %v3082_v40 = vld [vmem:[#allocation2 + $0x141] sm:$0xff] }
 0x10e   : > { %v10145_v34 = vpop.f32.mrf.mxu1  ;;  %10434 = vmatmul.mubr.msk.f32.gmra.mxu0 %vm243_vm1, %v2678_v32  ;;  %10492 = vmatmul.mubr.msk.f32.gmra.mxu1 %vm243_vm1, %v3072_v38  ;;  %v2688_v38 = vld [vmem:[#allocation2 + $0x140] sm:$0xff] }
 0x10f   : > { %v12432_v35 = vadd.f32 %v10145_v34, %v10087_v14  ;;  %10436 = vmatprep.mubr.msk.f32.mxu0 %vm243_vm1, %v2679_v58  ;;  %10494 = vmatprep.mubr.msk.f32.mxu1 %vm243_vm1, %v3073_v3  ;;  %v665_v9 = vpop.f32.mrf.mxu0  ;;  %v2689_v3 = vld [vmem:[#allocation2 + $0x150] sm:$0xff] }
 0x110   : > { %v989_v6 = vpop.f32.mrf.mxu1  ;;  %v3083_v14 = vld [vmem:[#allocation2 + $0x151] sm:$0xff] }
 0x111   : > { %v12436_v48 = vadd.f32 %v989_v6, %v665_v9  ;;  %v10090_v62 = vpop.f32.mrf.mxu0  ;;  %v2690_v9 = vld [vmem:[#allocation2 + $0x158] sm:$0xff] }
 0x112   : > { %v10148_v44 = vpop.f32.mrf.mxu1  ;;  %10437 = vmatmul.mubr.msk.f32.gmra.mxu0 %vm243_vm1, %v2680_v42  ;;  %10495 = vmatmul.mubr.msk.f32.gmra.mxu1 %vm243_vm1, %v3074_v63  ;;  %v3084_v6 = vld [vmem:[#allocation2 + $0x159] sm:$0xff] }
 0x113   : > { %v12440_v1 = vadd.f32 %v10148_v44, %v10090_v62  ;;  %10439 = vmatprep.mubr.msk.f32.mxu0 %vm243_vm1, %v2681_v56  ;;  %10497 = vmatprep.mubr.msk.f32.mxu1 %vm243_vm1, %v3075_v31  ;;  %v675_v20 = vpop.f32.mrf.mxu0  ;;  %v4078_v56 = vld [vmem:[%s12483_s17] sm:$0xff]  ;;  %v2691_v44 = vld [vmem:[#allocation2 + $0x168] sm:$0xff] }
 0x114   : > { %v999_v60 = vpop.f32.mrf.mxu1  ;;  %4142 = vrot.lane.b32.xlu0 %v4078_v56, %s11351_s30  ;;  %v4085_v56 = vld [vmem:[%s12483_s17 + $0x38] sm:$0xff] }
 0x115   : > { %v12444_v26 = vadd.f32 %v999_v60, %v675_v20  ;;  %v10093_v28 = vpop.f32.mrf.mxu0  ;;  %v2692_v60 = vld [vmem:[#allocation2 + $0x170] sm:$0xff] }
 0x116   : > { %v10151_v33 = vpop.f32.mrf.mxu1  ;;  %10440 = vmatmul.mubr.msk.f32.gmra.mxu0 %vm243_vm1, %v2682_v12  ;;  %10498 = vmatmul.mubr.msk.f32.gmra.mxu1 %vm243_vm1, %v3076_v16  ;;  %v3085_v12 = vld [vmem:[#allocation2 + $0x169] sm:$0xff] }
 0x117   : > { %v12448_v37 = vadd.f32 %v10151_v33, %v10093_v28  ;;  %10442 = vmatprep.mubr.msk.f32.mxu0 %vm243_vm1, %v2683_v22  ;;  %10500 = vmatprep.mubr.msk.f32.mxu1 %vm243_vm1, %v3077_v24  ;;  %v12452_v2 = vpop.f32.mrf.mxu0  ;;  %v3086_v24 = vld [vmem:[#allocation2 + $0x171] sm:$0xff]  ;;  %v4079_v33 = vld [vmem:[%s12483_s17 + $0x8] sm:$0xff] }
 0x118   : > { %v12454_v5 = vpop.f32.mrf.mxu1  ;;  %v4080_v28 = vld [vmem:[%s12483_s17 + $0x10] sm:$0xff]  ;;  %4144 = vrot.lane.b32.xlu0 %v4079_v33, %s11351_s30 }
 0x119   : > { %v10096_v41 = vpop.f32.mrf.mxu0  ;;  %4146 = vrot.lane.b32.xlu1 %v4080_v28, %s11351_s30  ;;  %v3456_v33 = vld [vmem:[#allocation2 + $0x52] sm:$0xff] }
 0x11a   : > { %v10154_v45 = vpop.f32.mrf.mxu1  ;;  %10443 = vmatmul.mubr.msk.f32.gmra.mxu0 %vm243_vm1, %v2684_v39  ;;  %10501 = vmatmul.mubr.msk.f32.gmra.mxu1 %vm243_vm1, %v3078_v57 }
 0x11b   : > { %v12458_v47 = vadd.f32 %v10154_v45, %v10096_v41  ;;  %10445 = vmatprep.mubr.msk.f32.mxu0 %vm243_vm1, %v2685_v8  ;;  %10503 = vmatprep.mubr.msk.f32.mxu1 %vm243_vm1, %v3079_v13  ;;  %v12462_v59 = vpop.f32.mrf.mxu0  ;;  %v4081_v45 = vld [vmem:[%s12483_s17 + $0x18] sm:$0xff] }
 0x11c   : > { %v12464_v61 = vpop.f32.mrf.mxu1 }
 0x11d   : > { %v10099_v25 = vpop.f32.mrf.mxu0  ;;  %4148 = vrot.lane.b32.xlu1 %v4081_v45, %s11351_s30 }
 0x11e   : > { %v10157_v27 = vpop.f32.mrf.mxu1  ;;  %10446 = vmatmul.mubr.msk.f32.gmra.mxu0 %vm243_vm1, %v2686_v53  ;;  %10504 = vmatmul.mubr.msk.f32.gmra.mxu1 %vm243_vm1, %v3080_v55 }
 0x11f   : > { %v12468_v32 = vadd.f32 %v10157_v27, %v10099_v25  ;;  %10448 = vmatprep.mubr.msk.f32.mxu0 %vm243_vm1, %v2687_v0  ;;  %10506 = vmatprep.mubr.msk.f32.mxu1 %vm243_vm1, %v3081_v21  ;;  %v12472_v52 = vpop.f32.mrf.mxu0  ;;  %v2695_v0 = vld [vmem:[#allocation2 + $0x198] sm:$0xff] }
 0x120   : > { %v12474_v58 = vpop.f32.mrf.mxu1  ;;  %v3089_v21 = vld [vmem:[#allocation2 + $0x199] sm:$0xff] }
 0x121   : > { %v10102_v34 = vpop.f32.mrf.mxu0 }
 0x122   : > { %v10160_v42 = vpop.f32.mrf.mxu1  ;;  %10449 = vmatmul.mubr.msk.f32.gmra.mxu0 %vm243_vm1, %v2688_v38  ;;  %10507 = vmatmul.mubr.msk.f32.gmra.mxu1 %vm243_vm1, %v3082_v40  ;;  %v3090_v38 = vld [vmem:[#allocation2 + $0x1a1] sm:$0xff] }
 0x123   : > { %v12485_v63 = vadd.f32 %v10160_v42, %v10102_v34  ;;  %10451 = vmatprep.mubr.msk.f32.mxu0 %vm243_vm1, %v2689_v3  ;;  %10509 = vmatprep.mubr.msk.f32.mxu1 %vm243_vm1, %v3083_v14  ;;  %v12490_v31 = vpop.f32.mrf.mxu0  ;;  %v4083_v40 = vld [vmem:[%s12483_s17 + $0x28] sm:$0xff]  ;;  %v3453_v34 = vld [vmem:[#allocation2 + $0x32] sm:$0xff] }
 0x124   : > { %v12492_v62 = vpop.f32.mrf.mxu1  ;;  %4152 = vrot.lane.b32.xlu1 %v4083_v40, %s11351_s30  ;;  %v3458_v40 = vld [vmem:[#allocation2 + $0x6a] sm:$0xff] }
 0x125   : > { %v10105_v16 = vpop.f32.mrf.mxu0 }
 0x126   : > { %v10163_v20 = vpop.f32.mrf.mxu1  ;;  %10452 = vmatmul.mubr.msk.f32.gmra.mxu0 %vm243_vm1, %v2690_v9  ;;  %10510 = vmatmul.mubr.msk.f32.gmra.mxu1 %vm243_vm1, %v3084_v6  ;;  %v3454_v6 = vld [vmem:[#allocation2 + $0x3a] sm:$0xff] }
 0x127   : > { %v12497_v22 = vadd.f32 %v10163_v20, %v10105_v16  ;;  %10454 = vmatprep.mubr.msk.f32.mxu0 %vm243_vm1, %v2691_v44  ;;  %10512 = vmatprep.mubr.msk.f32.mxu1 %vm243_vm1, %v3085_v12  ;;  %v12503_v39 = vpop.f32.mrf.mxu0  ;;  %v3455_v16 = vld [vmem:[#allocation2 + $0x4a] sm:$0xff] }
 0x128   : > { %v12505_v57 = vpop.f32.mrf.mxu1  ;;  %4156 = vrot.lane.b32.xlu1 %v4085_v56, %s11351_s30  ;;  %v4084_v20 = vld [vmem:[%s12483_s17 + $0x30] sm:$0xff] }
 0x129   : > { %v10108_v8 = vpop.f32.mrf.mxu0 }
 0x12a   : > { %v10166_v13 = vpop.f32.mrf.mxu1  ;;  %10455 = vmatmul.mubr.msk.f32.gmra.mxu0 %vm243_vm1, %v2692_v60  ;;  %10513 = vmatmul.mubr.msk.f32.gmra.mxu1 %vm243_vm1, %v3086_v24 }
 0x12b   : > { %v12511_v41 = vadd.f32 %v10166_v13, %v10108_v8  ;;  %10457 = vmatprep.mubr.msk.f32.mxu0 %vm243_vm1, %v12175_v46  ;;  %10515 = vmatprep.mubr.msk.f32.mxu1 %vm243_vm1, %v12344_v4  ;;  %v12518_v53 = vpop.f32.mrf.mxu0  ;;  %v2696_v4 = vld [vmem:[#allocation2 + $0x1a0] sm:$0xff]  ;;  %v4087_v8 = vld [vmem:[%s12483_s17 + $0x48] sm:$0xff] }
 0x12c   : > { %v12520_v55 = vpop.f32.mrf.mxu1  ;;  %4160 = vrot.lane.b32.xlu1 %v4087_v8, %s11351_s30 }
 0x12d   : > { %v10111_v25 = vpop.f32.mrf.mxu0 }
 0x12e   : > { %v10169_v27 = vpop.f32.mrf.mxu1  ;;  %10458 = vmatmul.mubr.msk.f32.gmra.mxu0 %vm243_vm1, %v12187_v10  ;;  %10516 = vmatmul.mubr.msk.f32.gmra.mxu1 %vm243_vm1, %v12354_v17  ;;  %v4082_v10 = vld [vmem:[%s12483_s17 + $0x20] sm:$0xff] }
 0x12f   : > { %v12527_v46 = vadd.f32 %v10169_v27, %v10111_v25  ;;  %10460 = vmatprep.mubr.msk.f32.mxu0 %vm243_vm1, %v2695_v0  ;;  %10518 = vmatprep.mubr.msk.f32.mxu1 %vm243_vm1, %v3089_v21  ;;  %v12532_v3 = vpop.f32.mrf.mxu0  ;;  %v3457_v0 = vld [vmem:[#allocation2 + $0x62] sm:$0xff] }
 0x130   : > { %v12534_v14 = vpop.f32.mrf.mxu1  ;;  %4150 = vrot.lane.b32.xlu0 %v4082_v10, %s11351_s30 }
 0x131   : > { %v10114_v17 = vpop.f32.mrf.mxu0 }
 0x132   : > { %v10172_v42 = vpop.f32.mrf.mxu1  ;;  %10461 = vmatmul.mubr.msk.f32.gmra.mxu0 %vm243_vm1, %v2696_v4  ;;  %10519 = vmatmul.mubr.msk.f32.gmra.mxu1 %vm243_vm1, %v3090_v38 }
 0x133   : > { %v12540_v9 = vadd.f32 %v10172_v42, %v10114_v17  ;;  %10531 = vmatprep.mubr.msk.f32.mxu0 %vm243_vm1, %v3453_v34  ;;  %v12545_v44 = vpop.f32.mrf.mxu0  ;;  %v4089_v34 = vld [vmem:[%s12483_s17 + $0x58] sm:$0xff] }
 0x134   : > { %v12547_v12 = vpop.f32.mrf.mxu1  ;;  %4154 = vrot.lane.b32.xlu0 %v4084_v20, %s11351_s30  ;;  %v3459_v17 = vld [vmem:[#allocation2 + $0x7a] sm:$0xff]  ;;  %4164 = vrot.lane.b32.xlu1 %v4089_v34, %s11351_s30  ;;  %v3463_v34 = vld [vmem:[#allocation2 + $0xaa] sm:$0xff] }
 0x135   : > { %v10185_v60 = vpop.f32.mrf.mxu0 }
 0x136   : > { %10532 = vmatmul.mubr.msk.f32.vlgmr.msra.gmra.mxu0 %vm243_vm1, %v3454_v6  ;;  %v10243_v24 = vpop.f32.mrf.mxu1  ;;  %v1451_v28 = vadd.f32 %v10185_v60, %v12367_v36  ;;  %v4086_v36 = vld [vmem:[%s12483_s17 + $0x40] sm:$0xff] }
 0x137   : > { %10534 = vmatprep.mubr.msk.f32.mxu0 %vm243_vm1, %v3455_v16  ;;  %v1291_v13 = vpop.f32.mrf.mxu0  ;;  %v3460_v60 = vld [vmem:[#allocation2 + $0x82] sm:$0xff] }
 0x138   : > { %v12556_v45 = vpop.f32.mrf.mxu1  ;;  %v12560_v21 = vadd.f32 %v1291_v13, %v12377_v7  ;;  %v12562_v25 = vadd.f32 %v10243_v24, %v1451_v28  ;;  %4158 = vrot.lane.b32.xlu0 %v4086_v36, %s11351_s30  ;;  %v4091_v24 = vld [vmem:[%s12483_s17 + $0x68] sm:$0xff] }
 0x139   : > { %4168 = vrot.lane.b32.xlu1 %v4091_v24, %s11351_s30 }
 0x13a   : > { %v10188_v27 = vpop.f32.mrf.mxu0  ;;  %10535 = vmatmul.mubr.msk.f32.gmra.mxu0 %vm243_vm1, %v3456_v33  ;;  %v10246_v4 = vpop.f32.mrf.mxu1  ;;  %v3461_v33 = vld [vmem:[#allocation2 + $0x92] sm:$0xff] }
 0x13b   : > { %v1453_v38 = vadd.f32 %v10188_v27, %v12386_v50  ;;  %10537 = vmatprep.mubr.msk.f32.mxu0 %vm243_vm1, %v3457_v0  ;;  %v4088_v50 = vld [vmem:[%s12483_s17 + $0x50] sm:$0xff] }
 0x13c   : > { %v1301_v10 = vpop.f32.mrf.mxu0  ;;  %v12570_v7 = vpop.f32.mrf.mxu1  ;;  %4162 = vrot.lane.b32.xlu0 %v4088_v50, %s11351_s30 }
 0x13d   : > { %v12574_v42 = vadd.f32 %v1301_v10, %v12390_v54  ;;  %v12576_v6 = vadd.f32 %v10246_v4, %v1453_v38  ;;  %v3462_v4 = vld [vmem:[#allocation2 + $0x9a] sm:$0xff] }
 0x13e   : > { %v10191_v56 = vpop.f32.mrf.mxu0  ;;  %10538 = vmatmul.mubr.msk.f32.gmra.mxu0 %vm243_vm1, %v3458_v40  ;;  %v10249_v16 = vpop.f32.mrf.mxu1  ;;  %v4093_v38 = vld [vmem:[%s12483_s17 + $0x78] sm:$0xff] }
 0x13f   : > { %v1455_v20 = vadd.f32 %v10191_v56, %v12397_v18  ;;  %10540 = vmatprep.mubr.msk.f32.mxu0 %vm243_vm1, %v3459_v17  ;;  %v4090_v18 = vld [vmem:[%s12483_s17 + $0x60] sm:$0xff]  ;;  %4172 = vrot.lane.b32.xlu1 %v4093_v38, %s11351_s30  ;;  %v4097_v38 = vld [vmem:[%s12483_s17 + $0x98] sm:$0xff] }
 0x140   : > { %v1311_v28 = vpop.f32.mrf.mxu0  ;;  %v12584_v54 = vpop.f32.mrf.mxu1  ;;  %4166 = vrot.lane.b32.xlu0 %v4090_v18, %s11351_s30 }
 0x141   : > { %v12588_v8 = vadd.f32 %v1311_v28, %v12401_v30  ;;  %v12590_v13 = vadd.f32 %v10249_v16, %v1455_v20  ;;  %v3464_v20 = vld [vmem:[#allocation2 + $0xb2] sm:$0xff]  ;;  %v3465_v28 = vld [vmem:[#allocation2 + $0xc2] sm:$0xff] }
 0x142   : > { %v10194_v0 = vpop.f32.mrf.mxu0  ;;  %10541 = vmatmul.mubr.msk.f32.gmra.mxu0 %vm243_vm1, %v3460_v60  ;;  %v10252_v36 = vpop.f32.mrf.mxu1  ;;  %v4095_v60 = vld [vmem:[%s12483_s17 + $0x88] sm:$0xff] }
 0x143   : > { %v1457_v27 = vadd.f32 %v10194_v0, %v12408_v51  ;;  %10543 = vmatprep.mubr.msk.f32.mxu0 %vm243_vm1, %v3461_v33  ;;  %v4092_v51 = vld [vmem:[%s12483_s17 + $0x70] sm:$0xff]  ;;  %4176 = vrot.lane.b32.xlu1 %v4095_v60, %s11351_s30  ;;  %v3468_v60 = vld [vmem:[#allocation2 + $0xe2] sm:$0xff] }
 0x144   : > { %v1321_v40 = vpop.f32.mrf.mxu0  ;;  %v12598_v30 = vpop.f32.mrf.mxu1  ;;  %4170 = vrot.lane.b32.xlu0 %v4092_v51, %s11351_s30 }
 0x145   : > { %v12602_v10 = vadd.f32 %v1321_v40, %v12412_v43  ;;  %v12604_v17 = vadd.f32 %v10252_v36, %v1457_v27 }
 0x146   : > { %v10197_v50 = vpop.f32.mrf.mxu0  ;;  %10544 = vmatmul.mubr.msk.f32.gmra.mxu0 %vm243_vm1, %v3462_v4  ;;  %v10255_v56 = vpop.f32.mrf.mxu1  ;;  %v3466_v4 = vld [vmem:[#allocation2 + $0xca] sm:$0xff] }
 0x147   : > { %v1459_v16 = vadd.f32 %v10197_v50, %v12416_v49  ;;  %10546 = vmatprep.mubr.msk.f32.mxu0 %vm243_vm1, %v3463_v34  ;;  %v4094_v49 = vld [vmem:[%s12483_s17 + $0x80] sm:$0xff]  ;;  %4180 = vrot.lane.b32.xlu1 %v4097_v38, %s11351_s30 }
 0x148   : > { %v1331_v24 = vpop.f32.mrf.mxu0  ;;  %v12612_v43 = vpop.f32.mrf.mxu1  ;;  %4174 = vrot.lane.b32.xlu0 %v4094_v49, %s11351_s30  ;;  %v3467_v34 = vld [vmem:[#allocation2 + $0xda] sm:$0xff]  ;;  %v3469_v49 = vld [vmem:[#allocation2 + $0xf2] sm:$0xff] }
 0x149   : > { %v12616_v33 = vadd.f32 %v1331_v24, %v12420_v23  ;;  %v12618_v18 = vadd.f32 %v10255_v56, %v1459_v16  ;;  %v4099_v24 = vld [vmem:[%s12483_s17 + $0xa8] sm:$0xff] }
 0x14a   : > { %v10200_v0 = vpop.f32.mrf.mxu0  ;;  %10547 = vmatmul.mubr.msk.f32.gmra.mxu0 %vm243_vm1, %v3464_v20  ;;  %v10258_v36 = vpop.f32.mrf.mxu1 }
 0x14b   : > { %v1461_v27 = vadd.f32 %v10200_v0, %v12424_v29  ;;  %10549 = vmatprep.mubr.msk.f32.mxu0 %vm243_vm1, %v3465_v28  ;;  %v4096_v29 = vld [vmem:[%s12483_s17 + $0x90] sm:$0xff]  ;;  %4184 = vrot.lane.b32.xlu1 %v4099_v24, %s11351_s30 }
 0x14c   : > { %v1341_v40 = vpop.f32.mrf.mxu0  ;;  %v12626_v23 = vpop.f32.mrf.mxu1  ;;  %4178 = vrot.lane.b32.xlu0 %v4096_v29, %s11351_s30 }
 0x14d   : > { %v12630_v51 = vadd.f32 %v1341_v40, %v12428_v11  ;;  %v12632_v50 = vadd.f32 %v10258_v36, %v1461_v27  ;;  %v3470_v40 = vld [vmem:[#allocation2 + $0xfa] sm:$0xff] }
 0x14e   : > { %v10203_v56 = vpop.f32.mrf.mxu0  ;;  %10550 = vmatmul.mubr.msk.f32.gmra.mxu0 %vm243_vm1, %v3466_v4  ;;  %v10261_v16 = vpop.f32.mrf.mxu1 }
 0x14f   : > { %v1463_v20 = vadd.f32 %v10203_v56, %v12432_v35  ;;  %10552 = vmatprep.mubr.msk.f32.mxu0 %vm243_vm1, %v3467_v34  ;;  %v4098_v35 = vld [vmem:[%s12483_s17 + $0xa0] sm:$0xff]  ;;  %v4101_v34 = vld [vmem:[%s12483_s17 + $0xb8] sm:$0xff]  ;;  %v3471_v56 = vld [vmem:[#allocation2 + $0x10a] sm:$0xff] }
 0x150   : > { %v1351_v28 = vpop.f32.mrf.mxu0  ;;  %v12640_v11 = vpop.f32.mrf.mxu1  ;;  %4182 = vrot.lane.b32.xlu0 %v4098_v35, %s11351_s30  ;;  %4188 = vrot.lane.b32.xlu1 %v4101_v34, %s11351_s30  ;;  %v4103_v35 = vld [vmem:[%s12483_s17 + $0xc8] sm:$0xff] }
 0x151   : > { %15619 = vst [vmem:[#allocation9_spill] sm:$0xff] %v12640_v11  ;;  %v12644_v0 = vadd.f32 %v1351_v28, %v12436_v48  ;;  %v12646_v36 = vadd.f32 %v10261_v16, %v1463_v20 }
 0x152   : > { %v10206_v27 = vpop.f32.mrf.mxu0  ;;  %10553 = vmatmul.mubr.msk.f32.gmra.mxu0 %vm243_vm1, %v3468_v60  ;;  %v10264_v4 = vpop.f32.mrf.mxu1 }
 0x153   : > { %15620 = vst [vmem:[#allocation10_spill] sm:$0xff] %v12644_v0  ;;  %v1465_v38 = vadd.f32 %v10206_v27, %v12440_v1  ;;  %10555 = vmatprep.mubr.msk.f32.mxu0 %vm243_vm1, %v3469_v49  ;;  %v4100_v1 = vld [vmem:[%s12483_s17 + $0xb0] sm:$0xff] }
 0x154   : > { %v1361_v29 = vpop.f32.mrf.mxu0  ;;  %v12654_v48 = vpop.f32.mrf.mxu1  ;;  %v3472_v49 = vld [vmem:[#allocation2 + $0x112] sm:$0xff]  ;;  %4186 = vrot.lane.b32.xlu0 %v4100_v1, %s11351_s30  ;;  %4192 = vrot.lane.b32.xlu1 %v4103_v35, %s11351_s30 }
 0x155   : > { %15621 = vst [vmem:[#allocation7_spill] sm:$0xff] %v12654_v48  ;;  %v12658_v16 = vadd.f32 %v1361_v29, %v12444_v26  ;;  %v12660_v20 = vadd.f32 %v10264_v4, %v1465_v38  ;;  %v3473_v4 = vld [vmem:[#allocation2 + $0x122] sm:$0xff]  ;;  %v4105_v1 = vld [vmem:[%s12483_s17 + $0xd8] sm:$0xff] }
 0x156   : > { %v10209_v60 = vpop.f32.mrf.mxu0  ;;  %10556 = vmatmul.mubr.msk.f32.gmra.mxu0 %vm243_vm1, %v3470_v40  ;;  %v10267_v24 = vpop.f32.mrf.mxu1  ;;  %v4102_v40 = vld [vmem:[%s12483_s17 + $0xc0] sm:$0xff] }
 0x157   : > { %15622 = vst [vmem:[#allocation8_spill] sm:$0xff] %v12658_v16  ;;  %v1467_v28 = vadd.f32 %v10209_v60, %v12448_v37  ;;  %10558 = vmatprep.mubr.msk.f32.mxu0 %vm243_vm1, %v3471_v56  ;;  %v3474_v56 = vld [vmem:[#allocation2 + $0x12a] sm:$0xff] }
 0x158   : > { %v12668_v27 = vpop.f32.mrf.mxu0  ;;  %v12670_v26 = vpop.f32.mrf.mxu1  ;;  %4190 = vrot.lane.b32.xlu0 %v4102_v40, %s11351_s30  ;;  %4196 = vrot.lane.b32.xlu1 %v4105_v1, %s11351_s30  ;;  %v3476_v40 = vld [vmem:[#allocation2 + $0x142] sm:$0xff]  ;;  %v3477_v1 = vld [vmem:[#allocation2 + $0x152] sm:$0xff]  ;;  %v3479_v16 = vld [vmem:[#allocation2 + $0x16a] sm:$0xff] }
 0x159   : > { %15623 = vst [vmem:[#allocation11_spill] sm:$0xff] %v12670_v26  ;;  %v12673_v38 = vadd.f32 %v10267_v24, %v1467_v28  ;;  %v3475_v24 = vld [vmem:[#allocation2 + $0x13a] sm:$0xff] }
 0x15a   : > { %v10212_v34 = vpop.f32.mrf.mxu0  ;;  %10559 = vmatmul.mubr.msk.f32.gmra.mxu0 %vm243_vm1, %v3472_v49  ;;  %v10270_v37 = vpop.f32.mrf.mxu1  ;;  %v4104_v49 = vld [vmem:[%s12483_s17 + $0xd0] sm:$0xff] }
 0x15b   : > { %v1469_v29 = vadd.f32 %v10212_v34, %v12458_v47  ;;  %10561 = vmatprep.mubr.msk.f32.mxu0 %vm243_vm1, %v3473_v4  ;;  %v4107_v34 = vld [vmem:[%s12483_s17 + $0xe8] sm:$0xff] }
 0x15c   : > { %v12681_v60 = vpop.f32.mrf.mxu0  ;;  %v12683_v35 = vpop.f32.mrf.mxu1  ;;  %4194 = vrot.lane.b32.xlu0 %v4104_v49, %s11351_s30  ;;  %4200 = vrot.lane.b32.xlu1 %v4107_v34, %s11351_s30 }
 0x15d   : > { %15624 = vst [vmem:[#allocation12_spill] sm:$0xff] %v12683_v35  ;;  %v12686_v28 = vadd.f32 %v10270_v37, %v1469_v29  ;;  %v4106_v29 = vld [vmem:[%s12483_s17 + $0xe0] sm:$0xff] }
 0x15e   : > { %v10215_v26 = vpop.f32.mrf.mxu0  ;;  %10562 = vmatmul.mubr.msk.f32.gmra.mxu0 %vm243_vm1, %v3474_v56  ;;  %v10273_v47 = vpop.f32.mrf.mxu1 }
 0x15f   : > { %v1471_v4 = vadd.f32 %v10215_v26, %v12468_v32  ;;  %10564 = vmatprep.mubr.msk.f32.mxu0 %vm243_vm1, %v3475_v24  ;;  %v3478_v24 = vld [vmem:[#allocation2 + $0x15a] sm:$0xff] }
 0x160   : > { %v12694_v35 = vpop.f32.mrf.mxu0  ;;  %v12696_v48 = vpop.f32.mrf.mxu1  ;;  %4198 = vrot.lane.b32.xlu0 %v4106_v29, %s11351_s30 }
 0x161   : > { %15625 = vst [vmem:[#allocation13_spill] sm:$0xff] %v12696_v48  ;;  %v12699_v37 = vadd.f32 %v10273_v47, %v1471_v4 }
 0x162   : > { %v10218_v56 = vpop.f32.mrf.mxu0  ;;  %10565 = vmatmul.mubr.msk.f32.gmra.mxu0 %vm243_vm1, %v3476_v40  ;;  %v10276_v32 = vpop.f32.mrf.mxu1 }
 0x163   : > { %v1473_v26 = vadd.f32 %v10218_v56, %v12485_v63  ;;  %10567 = vmatprep.mubr.msk.f32.mxu0 %vm243_vm1, %v3477_v1  ;;  %v3480_v63 = vld [vmem:[#allocation2 + $0x172] sm:$0xff] }
 0x164   : > { %v12706_v49 = vpop.f32.mrf.mxu0  ;;  %v12708_v48 = vpop.f32.mrf.mxu1 }
 0x165   : > { %15626 = vst [vmem:[#allocation14_spill] sm:$0xff] %v12708_v48  ;;  %v12710_v34 = vadd.f32 %v10276_v32, %v1473_v26 }
 0x166   : > { %v10221_v47 = vpop.f32.mrf.mxu0  ;;  %10568 = vmatmul.mubr.msk.f32.gmra.mxu0 %vm243_vm1, %v3478_v24  ;;  %v10279_v4 = vpop.f32.mrf.mxu1 }
 0x167   : > { %v1475_v40 = vadd.f32 %v10221_v47, %v12497_v22  ;;  %10570 = vmatprep.mubr.msk.f32.mxu0 %vm243_vm1, %v3479_v16  ;;  %v3483_v16 = vld [vmem:[#allocation2 + $0x19a] sm:$0xff] }
 0x168   : > { %v12715_v1 = vpop.f32.mrf.mxu0  ;;  %v12717_v56 = vpop.f32.mrf.mxu1 }
 0x169   : > { %15627 = vst [vmem:[#allocation15_spill] sm:$0xff] %v12717_v56  ;;  %v12719_v29 = vadd.f32 %v10279_v4, %v1475_v40 }
 0x16a   : > { %v10224_v11 = vpop.f32.mrf.mxu0  ;;  %10571 = vmatmul.mubr.msk.f32.gmra.mxu0 %vm243_vm1, %v3480_v63  ;;  %v10282_v32 = vpop.f32.mrf.mxu1 }
 0x16b   : > { %v1477_v26 = vadd.f32 %v10224_v11, %v12511_v41  ;;  %10573 = vmatprep.mubr.msk.f32.mxu0 %vm243_vm1, %v12346_v15  ;;  %v3484_v41 = vld [vmem:[#allocation2 + $0x1a2] sm:$0xff] }
 0x16c   : > { %v12725_v24 = vpop.f32.mrf.mxu0  ;;  %v12727_v22 = vpop.f32.mrf.mxu1 }
 0x16d   : > { %15628 = vst [vmem:[#allocation16_spill] sm:$0xff] %v12727_v22  ;;  %v12729_v47 = vadd.f32 %v10282_v32, %v1477_v26 }
 0x16e   : > { %v10227_v48 = vpop.f32.mrf.mxu0  ;;  %10574 = vmatmul.mubr.msk.f32.gmra.mxu0 %vm243_vm1, %v12358_v19  ;;  %v10285_v4 = vpop.f32.mrf.mxu1 }
 0x16f   : > { %v1479_v40 = vadd.f32 %v10227_v48, %v12527_v46  ;;  %10576 = vmatprep.mubr.msk.f32.mxu0 %vm243_vm1, %v3483_v16 }
 0x170   : > { %v12735_v11 = vpop.f32.mrf.mxu0  ;;  %v12737_v15 = vpop.f32.mrf.mxu1 }
 0x171   : > { %15629 = vst [vmem:[#allocation17_spill] sm:$0xff] %v12737_v15  ;;  %v12739_v63 = vadd.f32 %v10285_v4, %v1479_v40 }
 0x172   : > { %v10230_v22 = vpop.f32.mrf.mxu0  ;;  %10577 = vmatmul.mubr.msk.f32.gmra.mxu0 %vm243_vm1, %v3484_v41  ;;  %v10288_v32 = vpop.f32.mrf.mxu1 }
 0x173   : > { %v1481_v26 = vadd.f32 %v10230_v22, %v12540_v9 }
 0x174   : > { %v12743_v56 = vpop.f32.mrf.mxu0  ;;  %v12745_v19 = vpop.f32.mrf.mxu1 }
 0x175   : > { %15630 = vst [vmem:[#allocation18_spill] sm:$0xff] %v12745_v19  ;;  %v12747_v46 = vadd.f32 %v10288_v32, %v1481_v26 }
 0x176   : > { %v10301_v48 = vpop.f32.mrf.mxu0  ;;  %v12749_v16 = vpop.f32.mrf.mxu1 }
 0x177   : > { %15631 = vst [vmem:[#allocation19_spill] sm:$0xff] %v12749_v16  ;;  %v12752_v0 = vadd.f32 %v10301_v48, %v12562_v25 }
 0x178   : > { %v12754_v4 = vpop.f32.mrf.mxu0  ;;  %v12756_v40 = vpop.f32.mrf.mxu1 }
 0x179   : > { %15632 = vst [vmem:[#allocation20_spill] sm:$0xff] %v12752_v0  ;;  %15633 = vst [vmem:[#allocation21_spill] sm:$0xff] %v12756_v40 }
 0x17a   : > { %v10304_v41 = vpop.f32.mrf.mxu0  ;;  %v12758_v15 = vpop.f32.mrf.mxu1 }
 0x17b   : > { %15634 = vst [vmem:[#allocation22_spill] sm:$0xff] %v12758_v15  ;;  %v12761_v9 = vadd.f32 %v10304_v41, %v12576_v6 }
 0x17c   : > { %v12763_v22 = vpop.f32.mrf.mxu0  ;;  %v12765_v32 = vpop.f32.mrf.mxu1 }
 0x17d   : > { %15635 = vst [vmem:[#allocation23_spill] sm:$0xff] %v12761_v9  ;;  %15636 = vst [vmem:[#allocation24_spill] sm:$0xff] %v12765_v32 }
 0x17e   : > { %v10307_v26 = vpop.f32.mrf.mxu0  ;;  %v12767_v19 = vpop.f32.mrf.mxu1 }
 0x17f   : > { %15637 = vst [vmem:[#allocation25_spill] sm:$0xff] %v12767_v19  ;;  %v12770_v25 = vadd.f32 %v10307_v26, %v12590_v13 }
 0x180   : > { %v12772_v48 = vpop.f32.mrf.mxu0  ;;  %v12774_v16 = vpop.f32.mrf.mxu1 }
 0x181   : > { %15638 = vst [vmem:[#allocation26_spill] sm:$0xff] %v12770_v25  ;;  %15639 = vst [vmem:[#allocation27_spill] sm:$0xff] %v12774_v16 }
 0x182   : > { %v10310_v40 = vpop.f32.mrf.mxu0  ;;  %v12776_v0 = vpop.f32.mrf.mxu1 }
 0x183   : > { %15640 = vst [vmem:[#allocation28_spill] sm:$0xff] %v12776_v0  ;;  %v12779_v6 = vadd.f32 %v10310_v40, %v12604_v17 }
 0x184   : > { %v12781_v41 = vpop.f32.mrf.mxu0  ;;  %v12783_v15 = vpop.f32.mrf.mxu1 }
 0x185   : > { %15641 = vst [vmem:[#allocation29_spill] sm:$0xff] %v12779_v6  ;;  %15642 = vst [vmem:[#allocation30_spill] sm:$0xff] %v12783_v15 }
 0x186   : > { %v10313_v32 = vpop.f32.mrf.mxu0  ;;  %v12785_v9 = vpop.f32.mrf.mxu1 }
 0x187   : > { %15643 = vst [vmem:[#allocation31_spill] sm:$0xff] %v12785_v9  ;;  %v12788_v13 = vadd.f32 %v10313_v32, %v12618_v18 }
 0x188   : > { %v12790_v26 = vpop.f32.mrf.mxu0  ;;  %v12792_v19 = vpop.f32.mrf.mxu1 }
 0x189   : > { %15644 = vst [vmem:[#allocation32_spill] sm:$0xff] %v12788_v13  ;;  %15645 = vst [vmem:[#allocation33_spill] sm:$0xff] %v12792_v19 }
 0x18a   : > { %v10316_v16 = vpop.f32.mrf.mxu0  ;;  %v12794_v25 = vpop.f32.mrf.mxu1 }
 0x18b   : > { %15646 = vst [vmem:[#allocation34_spill] sm:$0xff] %v12794_v25  ;;  %v12797_v17 = vadd.f32 %v10316_v16, %v12632_v50 }
 0x18c   : > { %v12799_v40 = vpop.f32.mrf.mxu0  ;;  %v12801_v0 = vpop.f32.mrf.mxu1 }
 0x18d   : > { %15647 = vst [vmem:[#allocation35_spill] sm:$0xff] %v12797_v17  ;;  %15648 = vst [vmem:[#allocation36_spill] sm:$0xff] %v12801_v0 }
 0x18e   : > { %v10319_v15 = vpop.f32.mrf.mxu0  ;;  %v12803_v6 = vpop.f32.mrf.mxu1 }
 0x18f   : > { %15649 = vst [vmem:[#allocation37_spill] sm:$0xff] %v12803_v6  ;;  %v12806_v18 = vadd.f32 %v10319_v15, %v12646_v36 }
 0x190   : > { %v12808_v32 = vpop.f32.mrf.mxu0  ;;  %v12810_v9 = vpop.f32.mrf.mxu1 }
 0x191   : > { %15650 = vst [vmem:[#allocation38_spill] sm:$0xff] %v12806_v18  ;;  %15651 = vst [vmem:[#allocation39_spill] sm:$0xff] %v12810_v9 }
 0x192   : > { %v10322_v19 = vpop.f32.mrf.mxu0  ;;  %v12812_v13 = vpop.f32.mrf.mxu1 }
 0x193   : > { %15652 = vst [vmem:[#allocation40_spill] sm:$0xff] %v12812_v13  ;;  %v12815_v50 = vadd.f32 %v10322_v19, %v12660_v20 }
 0x194   : > { %v12817_v16 = vpop.f32.mrf.mxu0  ;;  %v12819_v25 = vpop.f32.mrf.mxu1 }
 0x195   : > { %15653 = vst [vmem:[#allocation41_spill] sm:$0xff] %v12815_v50  ;;  %15654 = vst [vmem:[#allocation42_spill] sm:$0xff] %v12819_v25 }
 0x196   : > { %v10325_v0 = vpop.f32.mrf.mxu0  ;;  %v12821_v17 = vpop.f32.mrf.mxu1 }
 0x197   : > { %15655 = vst [vmem:[#allocation43_spill] sm:$0xff] %v12821_v17  ;;  %v12824_v36 = vadd.f32 %v10325_v0, %v12673_v38 }
 0x198   : > { %v12826_v15 = vpop.f32.mrf.mxu0  ;;  %v12828_v6 = vpop.f32.mrf.mxu1 }
 0x199   : > { %15656 = vst [vmem:[#allocation44_spill] sm:$0xff] %v12824_v36  ;;  %15657 = vst [vmem:[#allocation45_spill] sm:$0xff] %v12828_v6 }
 0x19a   : > { %v10328_v9 = vpop.f32.mrf.mxu0  ;;  %v12830_v18 = vpop.f32.mrf.mxu1 }
 0x19b   : > { %15658 = vst [vmem:[#allocation46_spill] sm:$0xff] %v12830_v18  ;;  %v12833_v20 = vadd.f32 %v10328_v9, %v12686_v28 }
 0x19c   : > { %v12835_v19 = vpop.f32.mrf.mxu0  ;;  %v12837_v13 = vpop.f32.mrf.mxu1 }
 0x19d   : > { %15659 = vst [vmem:[#allocation47_spill] sm:$0xff] %v12833_v20  ;;  %15660 = vst [vmem:[#allocation48_spill] sm:$0xff] %v12837_v13 }
 0x19e   : > { %v10331_v25 = vpop.f32.mrf.mxu0  ;;  %v12839_v50 = vpop.f32.mrf.mxu1 }
 0x19f   : > { %15661 = vst [vmem:[#allocation49_spill] sm:$0xff] %v12839_v50  ;;  %v12842_v0 = vadd.f32 %v10331_v25, %v12699_v37 }
 0x1a0   : > { %v12844_v38 = vpop.f32.mrf.mxu0  ;;  %v12846_v17 = vpop.f32.mrf.mxu1 }
 0x1a1   : > { %15662 = vst [vmem:[#allocation50_spill] sm:$0xff] %v12842_v0  ;;  %15663 = vst [vmem:[#allocation51_spill] sm:$0xff] %v12846_v17 }
 0x1a2   : > { %v10334_v6 = vpop.f32.mrf.mxu0  ;;  %v12848_v36 = vpop.f32.mrf.mxu1 }
 0x1a3   : > { %15664 = vst [vmem:[#allocation52_spill] sm:$0xff] %v12848_v36  ;;  %v12851_v28 = vadd.f32 %v10334_v6, %v12710_v34 }
 0x1a4   : > { %v12853_v9 = vpop.f32.mrf.mxu0  ;;  %v12855_v18 = vpop.f32.mrf.mxu1 }
 0x1a5   : > { %15665 = vst [vmem:[#allocation53_spill] sm:$0xff] %v12851_v28  ;;  %15666 = vst [vmem:[#allocation54_spill] sm:$0xff] %v12855_v18 }
 0x1a6   : > { %v10337_v13 = vpop.f32.mrf.mxu0  ;;  %v12857_v20 = vpop.f32.mrf.mxu1 }
 0x1a7   : > { %15667 = vst [vmem:[#allocation55_spill] sm:$0xff] %v12857_v20  ;;  %v12860_v37 = vadd.f32 %v10337_v13, %v12719_v29 }
 0x1a8   : > { %v12862_v25 = vpop.f32.mrf.mxu0  ;;  %v12864_v50 = vpop.f32.mrf.mxu1 }
 0x1a9   : > { %15668 = vst [vmem:[#allocation56_spill] sm:$0xff] %v12860_v37  ;;  %15669 = vst [vmem:[#allocation57_spill] sm:$0xff] %v12862_v25 }
 0x1aa   : > { %15670 = vst [vmem:[#allocation58_spill] sm:$0xff] %v12864_v50  ;;  %v10340_v17 = vpop.f32.mrf.mxu0  ;;  %v12866_v0 = vpop.f32.mrf.mxu1 }
 0x1ab   : > { %15671 = vst [vmem:[#allocation59_spill] sm:$0xff] %v12866_v0  ;;  %v12869_v34 = vadd.f32 %v10340_v17, %v12729_v47 }
 0x1ac   : > { %v12871_v6 = vpop.f32.mrf.mxu0  ;;  %v12873_v36 = vpop.f32.mrf.mxu1 }
 0x1ad   : > { %15672 = vst [vmem:[#allocation60_spill] sm:$0xff] %v12869_v34  ;;  %15673 = vst [vmem:[#allocation61_spill] sm:$0xff] %v12871_v6 }
 0x1ae   : > { %15674 = vst [vmem:[#allocation62_spill] sm:$0xff] %v12873_v36  ;;  %v10343_v18 = vpop.f32.mrf.mxu0  ;;  %v12875_v28 = vpop.f32.mrf.mxu1 }
 0x1af   : > { %15675 = vst [vmem:[#allocation63_spill] sm:$0xff] %v12875_v28  ;;  %v12878_v29 = vadd.f32 %v10343_v18, %v12739_v63 }
 0x1b0   : > { %v12880_v13 = vpop.f32.mrf.mxu0  ;;  %v12882_v20 = vpop.f32.mrf.mxu1 }
 0x1b1   : > { %15676 = vst [vmem:[#allocation64_spill] sm:$0xff] %v12878_v29  ;;  %15677 = vst [vmem:[#allocation65_spill] sm:$0xff] %v12880_v13 }
 0x1b2   : > { %15678 = vst [vmem:[#allocation66_spill] sm:$0xff] %v12882_v20  ;;  %v10346_v50 = vpop.f32.mrf.mxu0  ;;  %v10404_v37 = vpop.f32.mrf.mxu1 }
 0x1b3   : > { %v2269_v0 = vadd.f32 %v10346_v50, %v12747_v46 }
 0x1b4   : > { %v12885_v47 = vpop.f32.mrf.mxu0  ;;  %v12887_v17 = vpop.f32.mrf.mxu1 }
 0x1b5   : > { %15679 = vst [vmem:[#allocation67_spill] sm:$0xff] %v12885_v47  ;;  %15680 = vst [vmem:[#allocation68_spill] sm:$0xff] %v12887_v17  ;;  %v12889_v34 = vadd.f32 %v10404_v37, %v2269_v0 }
 0x1b6   : > { %v12891_v36 = vpop.f32.mrf.mxu0  ;;  %v12893_v28 = vpop.f32.mrf.mxu1 }
 0x1b8   : > { %v12895_v63 = vpop.f32.mrf.mxu0  ;;  %v12897_v18 = vpop.f32.mrf.mxu1 }
 0x1b9   : > { %15681 = vst [vmem:[#allocation69_spill] sm:$0xff] %v12897_v18 }
 0x1ba   : > { %v12899_v29 = vpop.f32.mrf.mxu0  ;;  %v12901_v20 = vpop.f32.mrf.mxu1 }
 0x1bb   : > { %15682 = vst [vmem:[#allocation70_spill] sm:$0xff] %v12901_v20 }
 0x1bc   : > { %v12903_v13 = vpop.f32.mrf.mxu0  ;;  %v12907_v50 = vpop.f32.mrf.mxu1 }
 0x1bd   : > { %15683 = vst [vmem:[#allocation71_spill] sm:$0xff] %v12903_v13  ;;  %15685 = vst [vmem:[#allocation73_spill] sm:$0xff] %v12907_v50 }
 0x1be   : > { %v12905_v46 = vpop.f32.mrf.mxu0  ;;  %v12913_v17 = vpop.f32.mrf.mxu1 }
 0x1bf   : > { %15684 = vst [vmem:[#allocation72_spill] sm:$0xff] %v12905_v46  ;;  %15688 = vst [vmem:[#allocation76_spill] sm:$0xff] %v12913_v17 }
 0x1c0   : > { %v12909_v0 = vpop.f32.mrf.mxu0  ;;  %v12919_v25 = vpop.f32.mrf.mxu1 }
 0x1c1   : > { %15686 = vst [vmem:[#allocation74_spill] sm:$0xff] %v12909_v0  ;;  %15691 = vst [vmem:[#allocation79_spill] sm:$0xff] %v12919_v25 }
 0x1c2   : > { %v12911_v37 = vpop.f32.mrf.mxu0  ;;  %v12925_v13 = vpop.f32.mrf.mxu1 }
 0x1c3   : > { %15687 = vst [vmem:[#allocation75_spill] sm:$0xff] %v12911_v37 }
 0x1c4   : > { %v12915_v47 = vpop.f32.mrf.mxu0  ;;  %v12931_v0 = vpop.f32.mrf.mxu1 }
 0x1c5   : > { %15689 = vst [vmem:[#allocation77_spill] sm:$0xff] %v12915_v47 }
 0x1c6   : > { %v12917_v6 = vpop.f32.mrf.mxu0  ;;  %v12937_v47 = vpop.f32.mrf.mxu1 }
 0x1c7   : > { %15690 = vst [vmem:[#allocation78_spill] sm:$0xff] %v12917_v6  ;;  %15698 = vst [vmem:[#allocation86_spill] sm:$0xff] %v12937_v47 }
 0x1c8   : > { %v12921_v18 = vpop.f32.mrf.mxu0 }
 0x1c9   : > { %15692 = vst [vmem:[#allocation80_spill] sm:$0xff] %v12921_v18  ;;  %v12943_v18 = vpop.f32.mrf.mxu1 }
 0x1ca   : > { %v12923_v20 = vpop.f32.mrf.mxu0  ;;  %15701 = vst [vmem:[#allocation89_spill] sm:$0xff] %v12943_v18 }
 0x1cb   : > { %15693 = vst [vmem:[#allocation81_spill] sm:$0xff] %v12923_v20 }
 0x1cc   : > { %v12927_v46 = vpop.f32.mrf.mxu0 }
 0x1cd   : > { %15694 = vst [vmem:[#allocation82_spill] sm:$0xff] %v12927_v46  ;;  %v9075_v46 = vld [vmem:[%s15500_s3 + $0x38] sm:$0xff] }
 0x1ce   : > { %v12929_v50 = vpop.f32.mrf.mxu0  ;;  %10579 = vmatprep.subr.mxu1 %v9075_v46 }
 0x1cf   : > { %15695 = vst [vmem:[#allocation83_spill] sm:$0xff] %v12929_v50  ;;  %10580 = vmatpush3.msra.mxu1 %v9075_v46  ;;  %v4522_v46 = vld [vmem:[%s15500_s3 + $0x18] sm:$0xff] }
 0x1d0   : > { %v12933_v37 = vpop.f32.mrf.mxu0  ;;  %10635 = vmatprep.subr.mxu0 %v4522_v46 }
 0x1d1   : > { %15696 = vst [vmem:[#allocation84_spill] sm:$0xff] %v12933_v37  ;;  %v12952_v37 = vpop.f32.mrf.mxu1  ;;  %10636 = vmatpush3.msra.mxu0 %v4522_v46  ;;  %v1020_v46 = vadd.f32 %v12464_v61, %v12462_v59  ;;  %v1844_v59 = vadd.f32 %v12556_v45, %v12560_v21  ;;  %v1846_v61 = vadd.f32 %v12570_v7, %v12574_v42  ;;  %v15712_v42 = vld [vmem:[#allocation10_spill] sm:$0xff] }
 0x1d2   : > { %v12935_v17 = vpop.f32.mrf.mxu0  ;;  %15704 = vst [vmem:[#allocation92_spill] sm:$0xff] %v12952_v37  ;;  %v9072_v37 = vld [vmem:[%s15500_s3 + $0x20] sm:$0xff] }
 0x1d3   : > { %15697 = vst [vmem:[#allocation85_spill] sm:$0xff] %v12935_v17 }
 0x1d4   : > { %v12939_v6 = vpop.f32.mrf.mxu0 }
 0x1d5   : > { %15699 = vst [vmem:[#allocation87_spill] sm:$0xff] %v12939_v6  ;;  %v12962_v6 = vld [vmem:[%s15500_s3 + $0x28] sm:$0xff] }
 0x1d6   : > { %v12941_v25 = vpop.f32.mrf.mxu0 }
 0x1d7   : > { %15700 = vst [vmem:[#allocation88_spill] sm:$0xff] %v12941_v25  ;;  %v9074_v25 = vld [vmem:[%s15500_s3 + $0x30] sm:$0xff] }
 0x1d8   : > { %v12948_v20 = vpop.f32.mrf.mxu0  ;;  %10581 = vmatprep.subr.mxu1 %v9074_v25 }
 0x1d9   : > { %15702 = vst [vmem:[#allocation90_spill] sm:$0xff] %v12948_v20  ;;  %10582 = vmatpush3.msra.mxu1 %v9074_v25 }
 0x1da   : > { %v12950_v50 = vpop.f32.mrf.mxu0  ;;  %10583 = vmatprep.subr.mxu1 %v12962_v6 }
 0x1db   : > { %15703 = vst [vmem:[#allocation91_spill] sm:$0xff] %v12950_v50  ;;  %v15707_v50 = vmov 0.0   ;;  %10584 = vmatpush3.msra.mxu1 %v12962_v6  ;;  %v1030_v6 = vadd.f32 %v12474_v58, %v12472_v52  ;;  %v1848_v58 = vadd.f32 %v12584_v54, %v12588_v8  ;;  %v15713_v54 = vld [vmem:[#allocation9_spill] sm:$0xff] }
 0x1dc   : > { %v12954_v17 = vpop.f32.mrf.mxu0  ;;  %4276 = vst.msk [vmem:[#allocation3 + $0x20] sm:$0xff] %vm4270_vm3, %v15707_v50  ;;  %4271 = vst.msk [vmem:[#allocation3] sm:$0xff] %vm4270_vm3, %v15707_v50  ;;  %10585 = vmatprep.subr.mxu1 %v9072_v37  ;;  %v1856_v8 = vadd.f32 %v15713_v54, %v15712_v42 }
 0x1dd   : > { %15705 = vst [vmem:[#allocation93_spill] sm:$0xff] %v12954_v17  ;;  %v12972_v17 = vld [vmem:[%s15500_s3 + $0x10] sm:$0xff]  ;;  %4277 = vst.msk [vmem:[#allocation3 + $0x28] sm:$0x3] %vm4273_vm4, %v15707_v50  ;;  %10586 = vmatpush3.msra.mxu1 %v9072_v37  ;;  %v1060_v37 = vadd.f32 %v12520_v55, %v12518_v53 }
 0x1de   : > { %v12964_v20 = vpop.f32.mrf.mxu0  ;;  %4272 = vst.msk [vmem:[#allocation3 + $0x8] sm:$0xff] %vm4270_vm3, %v15707_v50  ;;  %4275 = vst.msk [vmem:[#allocation3 + $0x18] sm:$0xff] %vm4270_vm3, %v15707_v50  ;;  %10637 = vmatprep.subr.mxu0 %v12972_v17 }
 0x1df   : > { %15706 = vst [vmem:[#allocation94_spill] sm:$0xff] %v12964_v20  ;;  %4274 = vst.msk [vmem:[#allocation3 + $0x10] sm:$0x3] %vm4273_vm4, %v15707_v50  ;;  %v13082_v20 = vpop.f32.mrf.mxu1  ;;  %10638 = vmatpush3.msra.mxu0 %v12972_v17  ;;  %v1050_v17 = vadd.f32 %v12505_v57, %v12503_v39  ;;  %v1470_v39 = vadd.f32 %v12694_v35, %v1030_v6  ;;  %v1850_v57 = vadd.f32 %v12598_v30, %v12602_v10  ;;  %v15714_v30 = vld [vmem:[#allocation8_spill] sm:$0xff]  ;;  %v15715_v10 = vld [vmem:[#allocation7_spill] sm:$0xff] }
 0x1e0   : > { %4278 = vst.msk [vmem:[#allocation3 + $0x30] sm:$0xff] %vm4270_vm3, %v15707_v50  ;;  %4279 = vst.msk [vmem:[#allocation3 + $0x38] sm:$0xff] %vm4270_vm3, %v15707_v50  ;;  %v13087_v18 = vpop.f32.mrf.mxu0  ;;  %v2240_v35 = vadd.f32 %v12763_v22, %v1846_v61  ;;  %v15721_v6 = vld [vmem:[#allocation16_spill] sm:$0xff] }
 0x1e1   : > { %4280 = vst.msk [vmem:[#allocation3 + $0x40] sm:$0x3] %vm4273_vm4, %v15707_v50  ;;  %4283 = vst.msk [vmem:[#allocation3 + $0x58] sm:$0x3] %vm4273_vm4, %v15707_v50  ;;  %v13095_v25 = vpop.f32.mrf.mxu1  ;;  %v1474_v55 = vadd.f32 %v12715_v1, %v1050_v17  ;;  %v15718_v1 = vld [vmem:[#allocation13_spill] sm:$0xff]  ;;  %v15724_v61 = vld [vmem:[#allocation20_spill] sm:$0xff] }
 0x1e2   : > { %4281 = vst.msk [vmem:[#allocation3 + $0x48] sm:$0xff] %vm4270_vm3, %v15707_v50  ;;  %4282 = vst.msk [vmem:[#allocation3 + $0x50] sm:$0xff] %vm4270_vm3, %v15707_v50  ;;  %v13092_v47 = vpop.f32.mrf.mxu0 }
 0x1e3   : > { %4284 = vst.msk [vmem:[#allocation3 + $0x60] sm:$0xff] %vm4270_vm3, %v15707_v50  ;;  %4285 = vst.msk [vmem:[#allocation3 + $0x68] sm:$0xff] %vm4270_vm3, %v15707_v50 }
 0x1e4   : > { %4286 = vst.msk [vmem:[#allocation3 + $0x70] sm:$0x3] %vm4273_vm4, %v15707_v50  ;;  %4289 = vst.msk [vmem:[#allocation3 + $0x88] sm:$0x3] %vm4273_vm4, %v15707_v50 }
 0x1e5   : > { %4287 = vst.msk [vmem:[#allocation3 + $0x78] sm:$0xff] %vm4270_vm3, %v15707_v50  ;;  %4288 = vst.msk [vmem:[#allocation3 + $0x80] sm:$0xff] %vm4270_vm3, %v15707_v50 }
 0x1e6   : > { %4290 = vst.msk [vmem:[#allocation3 + $0x90] sm:$0xff] %vm4270_vm3, %v15707_v50  ;;  %4291 = vst.msk [vmem:[#allocation3 + $0x98] sm:$0xff] %vm4270_vm3, %v15707_v50 }
 0x1e7   : > { %4292 = vst.msk [vmem:[#allocation3 + $0xa0] sm:$0x3] %vm4273_vm4, %v15707_v50  ;;  %4295 = vst.msk [vmem:[#allocation3 + $0xb8] sm:$0x3] %vm4273_vm4, %v15707_v50 }
 0x1e8   : > { %4293 = vst.msk [vmem:[#allocation3 + $0xa8] sm:$0xff] %vm4270_vm3, %v15707_v50  ;;  %4294 = vst.msk [vmem:[#allocation3 + $0xb0] sm:$0xff] %vm4270_vm3, %v15707_v50 }
 0x1e9   : > { %4296 = vst.msk [vmem:[#allocation3 + $0xc0] sm:$0xff] %vm4270_vm3, %v15707_v50  ;;  %4297 = vst.msk [vmem:[#allocation3 + $0xc8] sm:$0xff] %vm4270_vm3, %v15707_v50 }
 0x1ea   : > { %4298 = vst.msk [vmem:[#allocation3 + $0xd0] sm:$0x3] %vm4273_vm4, %v15707_v50  ;;  %4301 = vst.msk [vmem:[#allocation3 + $0xe8] sm:$0x3] %vm4273_vm4, %v15707_v50 }
 0x1eb   : > { %4299 = vst.msk [vmem:[#allocation3 + $0xd8] sm:$0xff] %vm4270_vm3, %v15707_v50  ;;  %4300 = vst.msk [vmem:[#allocation3 + $0xe0] sm:$0xff] %vm4270_vm3, %v15707_v50 }
 0x1ec   : > { %4302 = vst.msk [vmem:[#allocation3 + $0xf0] sm:$0xff] %vm4270_vm3, %v15707_v50  ;;  %4303 = vst.msk [vmem:[#allocation3 + $0xf8] sm:$0xff] %vm4270_vm3, %v15707_v50 }
 0x1ed   : > { %4304 = vst.msk [vmem:[#allocation3 + $0x100] sm:$0x3] %vm4273_vm4, %v15707_v50  ;;  %4307 = vst.msk [vmem:[#allocation3 + $0x118] sm:$0x3] %vm4273_vm4, %v15707_v50 }
 0x1ee   : > { %4305 = vst.msk [vmem:[#allocation3 + $0x108] sm:$0xff] %vm4270_vm3, %v15707_v50  ;;  %4306 = vst.msk [vmem:[#allocation3 + $0x110] sm:$0xff] %vm4270_vm3, %v15707_v50 }
 0x1ef   : > { %4308 = vst.msk [vmem:[#allocation3 + $0x120] sm:$0xff] %vm4270_vm3, %v15707_v50  ;;  %4309 = vst.msk [vmem:[#allocation3 + $0x128] sm:$0xff] %vm4270_vm3, %v15707_v50 }
 0x1f0   : > { %4310 = vst.msk [vmem:[#allocation3 + $0x130] sm:$0x3] %vm4273_vm4, %v15707_v50  ;;  %4313 = vst.msk [vmem:[#allocation3 + $0x148] sm:$0x3] %vm4273_vm4, %v15707_v50 }
 0x1f1   : > { %4311 = vst.msk [vmem:[#allocation3 + $0x138] sm:$0xff] %vm4270_vm3, %v15707_v50  ;;  %4312 = vst.msk [vmem:[#allocation3 + $0x140] sm:$0xff] %vm4270_vm3, %v15707_v50 }
 0x1f2   : > { %4314 = vst.msk [vmem:[#allocation3 + $0x150] sm:$0xff] %vm4270_vm3, %v15707_v50  ;;  %4315 = vst.msk [vmem:[#allocation3 + $0x158] sm:$0xff] %vm4270_vm3, %v15707_v50 }
 0x1f3   : > { %4316 = vst.msk [vmem:[#allocation3 + $0x160] sm:$0x3] %vm4273_vm4, %v15707_v50  ;;  %4319 = vst.msk [vmem:[#allocation3 + $0x178] sm:$0x3] %vm4273_vm4, %v15707_v50 }
 0x1f4   : > { %4317 = vst.msk [vmem:[#allocation3 + $0x168] sm:$0xff] %vm4270_vm3, %v15707_v50  ;;  %4318 = vst.msk [vmem:[#allocation3 + $0x170] sm:$0xff] %vm4270_vm3, %v15707_v50 }
 0x1f5   : > { %4320 = vst.msk [vmem:[#allocation3 + $0x180] sm:$0xff] %vm4270_vm3, %v15707_v50  ;;  %4321 = vst.msk [vmem:[#allocation3 + $0x188] sm:$0xff] %vm4270_vm3, %v15707_v50 }
 0x1f6   : > { %4322 = vst.msk [vmem:[#allocation3 + $0x190] sm:$0x3] %vm4273_vm4, %v15707_v50  ;;  %4325 = vst.msk [vmem:[#allocation3 + $0x1a8] sm:$0x3] %vm4273_vm4, %v15707_v50 }
 0x1f7   : > { %4323 = vst.msk [vmem:[#allocation3 + $0x198] sm:$0xff] %vm4270_vm3, %v15707_v50  ;;  %4324 = vst.msk [vmem:[#allocation3 + $0x1a0] sm:$0xff] %vm4270_vm3, %v15707_v50  ;;  %v13097_v50 = vpop.f32.mrf.mxu0 }
 0x1f8   : > { %15708 = vst [vmem:[#allocation95_spill] sm:$0xff] %v13082_v20  ;;  %15709 = vst [vmem:[#allocation96_spill] sm:$0xff] %v13087_v18  ;;  %v1010_v18 = vadd.f32 %v12454_v5, %v12452_v2  ;;  %v1070_v2 = vadd.f32 %v12534_v14, %v12532_v3  ;;  %v1080_v5 = vadd.f32 %v12547_v12, %v12545_v44 }
 0x1f9   : > { %15710 = vst [vmem:[#allocation97_spill] sm:$0xff] %v13092_v47  ;;  %15711 = vst [vmem:[#allocation98_spill] sm:$0xff] %v13097_v50  ;;  %v13103_v20 = vpop.f32.mrf.mxu0  ;;  %v1040_v47 = vadd.f32 %v12492_v62, %v12490_v31  ;;  %v13113_v50 = vpop.f32.mrf.mxu1  ;;  %v1468_v62 = vadd.f32 %v12681_v60, %v1020_v46  ;;  %v1476_v3 = vadd.f32 %v12725_v24, %v1060_v37  ;;  %v15722_v37 = vld [vmem:[#allocation17_spill] sm:$0xff] }
 0x1fa   : > { %v1466_v31 = vadd.f32 %v12668_v27, %v1010_v18  ;;  %v1852_v44 = vadd.f32 %v12612_v43, %v12616_v33  ;;  %v1854_v12 = vadd.f32 %v12626_v23, %v12630_v51  ;;  %v1478_v45 = vadd.f32 %v12735_v11, %v1070_v2  ;;  %v15716_v33 = vld [vmem:[#allocation11_spill] sm:$0xff]  ;;  %v15717_v51 = vld [vmem:[#allocation12_spill] sm:$0xff]  ;;  %v15719_v11 = vld [vmem:[#allocation14_spill] sm:$0xff] }
 0x1fb   : > { %v13123_v52 = vpop.f32.mrf.mxu0  ;;  %v1472_v53 = vadd.f32 %v12706_v49, %v1040_v47  ;;  %v1480_v21 = vadd.f32 %v12743_v56, %v1080_v5  ;;  %v13143_v7 = vpop.f32.mrf.mxu1  ;;  %v1858_v27 = vadd.f32 %v15715_v10, %v15714_v30  ;;  %v2238_v60 = vadd.f32 %v12754_v4, %v1844_v59  ;;  %v15720_v18 = vld [vmem:[#allocation15_spill] sm:$0xff]  ;;  %v15723_v5 = vld [vmem:[#allocation18_spill] sm:$0xff]  ;;  %v15731_v30 = vld [vmem:[#allocation25_spill] sm:$0xff] }
 0x1fc   : > { %v1860_v23 = vadd.f32 %v15716_v33, %v1466_v31  ;;  %v1862_v49 = vadd.f32 %v15717_v51, %v1468_v62  ;;  %v1864_v56 = vadd.f32 %v15718_v1, %v1470_v39  ;;  %v2242_v24 = vadd.f32 %v12772_v48, %v1848_v58  ;;  %v15725_v31 = vld [vmem:[#allocation19_spill] sm:$0xff]  ;;  %v15726_v39 = vld [vmem:[#allocation21_spill] sm:$0xff] }
 0x1fd   : > { %v13135_v14 = vpop.f32.mrf.mxu0  ;;  %v1866_v47 = vadd.f32 %v15719_v11, %v1472_v53  ;;  %v1868_v46 = vadd.f32 %v15720_v18, %v1474_v55  ;;  %v13160_v17 = vadd.f32 %v15721_v6, %v1476_v3  ;;  %v2244_v4 = vadd.f32 %v12781_v41, %v1850_v57  ;;  %v13174_v62 = vpop.f32.mrf.mxu1  ;;  %v15727_v55 = vld [vmem:[#allocation23_spill] sm:$0xff]  ;;  %v15728_v3 = vld [vmem:[#allocation22_spill] sm:$0xff]  ;;  %v15729_v57 = vld [vmem:[#allocation24_spill] sm:$0xff] }
 0x1fe   : > { %v13166_v2 = vadd.f32 %v15722_v37, %v1478_v45  ;;  %v13169_v59 = vadd.f32 %v15723_v5, %v1480_v21  ;;  %v2633_v48 = vadd.f32 %v15725_v31, %v15724_v61  ;;  %v2246_v58 = vadd.f32 %v12790_v26, %v1852_v44  ;;  %v15730_v21 = vld [vmem:[#allocation26_spill] sm:$0xff]  ;;  %v15732_v33 = vld [vmem:[#allocation27_spill] sm:$0xff]  ;;  %v15733_v1 = vld [vmem:[#allocation29_spill] sm:$0xff] }
 0x1ff   : > { %v13151_v43 = vpop.f32.mrf.mxu0  ;;  %v2632_v53 = vadd.f32 %v15726_v39, %v2238_v60  ;;  %v2635_v41 = vadd.f32 %v15728_v3, %v15727_v55  ;;  %v2634_v42 = vadd.f32 %v15729_v57, %v2240_v35  ;;  %v2248_v45 = vadd.f32 %v12799_v40, %v1854_v12  ;;  %v15734_v60 = vld [vmem:[#allocation28_spill] sm:$0xff]  ;;  %v15735_v18 = vld [vmem:[#allocation30_spill] sm:$0xff]  ;;  %v15737_v35 = vld [vmem:[#allocation31_spill] sm:$0xff] }
 0x200   : > { %v2637_v10 = vadd.f32 %v15731_v30, %v15730_v21  ;;  %v2636_v51 = vadd.f32 %v15732_v33, %v2242_v24  ;;  %v2250_v26 = vadd.f32 %v12808_v32, %v1856_v8  ;;  %v3028_v44 = vadd.f32 %v12891_v36, %v2633_v48  ;;  %v15736_v37 = vld [vmem:[#allocation32_spill] sm:$0xff]  ;;  %v15738_v61 = vld [vmem:[#allocation33_spill] sm:$0xff]  ;;  %v13201_v36 = vpop.f32.mrf.mxu1  ;;  %v15740_v48 = vld [vmem:[#allocation34_spill] sm:$0xff] }
 0x201   : > { %v13163_v22 = vpop.f32.mrf.mxu0  ;;  %v2639_v11 = vadd.f32 %v15734_v60, %v15733_v1  ;;  %v2638_v6 = vadd.f32 %v15735_v18, %v2244_v4  ;;  %v13193_v5 = vadd.f32 %v15737_v35, %v15736_v37  ;;  %v2252_v40 = vadd.f32 %v12817_v16, %v1858_v27  ;;  %v15739_v4 = vld [vmem:[#allocation35_spill] sm:$0xff]  ;;  %v15741_v55 = vld [vmem:[#allocation36_spill] sm:$0xff]  ;;  %v15742_v16 = vld [vmem:[#allocation38_spill] sm:$0xff] }
 0x202   : > { %v13197_v31 = vadd.f32 %v15738_v61, %v2246_v58  ;;  %v2254_v24 = vadd.f32 %v12826_v15, %v1860_v23  ;;  %v3027_v32 = vadd.f32 %v12895_v63, %v2632_v53  ;;  %v13208_v39 = vadd.f32 %v15740_v48, %v15739_v4  ;;  %v15743_v27 = vld [vmem:[#allocation37_spill] sm:$0xff]  ;;  %v15744_v63 = vld [vmem:[#allocation39_spill] sm:$0xff]  ;;  %v15747_v1 = vld [vmem:[#allocation42_spill] sm:$0xff] }
 0x203   : > { %v13181_v54 = vpop.f32.mrf.mxu0  ;;  %v13211_v3 = vadd.f32 %v15741_v55, %v2248_v45  ;;  %v13215_v58 = vadd.f32 %v15743_v27, %v15742_v16  ;;  %v2256_v15 = vadd.f32 %v12835_v19, %v1862_v49  ;;  %v13221_v53 = vadd.f32 %v15744_v63, %v2250_v26  ;;  %v15745_v30 = vld [vmem:[#allocation41_spill] sm:$0xff]  ;;  %v15746_v45 = vld [vmem:[#allocation40_spill] sm:$0xff]  ;;  %v15749_v19 = vld [vmem:[#allocation43_spill] sm:$0xff] }
 0x204   : > { %v3422_v57 = vadd.f32 %v12893_v28, %v3028_v44  ;;  %v3030_v21 = vadd.f32 %v12899_v29, %v2635_v41  ;;  %v13228_v33 = vadd.f32 %v15746_v45, %v15745_v30  ;;  %v13231_v60 = vadd.f32 %v15747_v1, %v2252_v40  ;;  %v15748_v18 = vld [vmem:[#allocation44_spill] sm:$0xff]  ;;  %v15750_v28 = vld [vmem:[#allocation45_spill] sm:$0xff]  ;;  %v15752_v44 = vld [vmem:[#allocation71_spill] sm:$0xff]  ;;  %v13248_v40 = vpop.f32.mrf.mxu1 }
 0x205   : > { %v10462_v12 = vpop.f32.mrf.mxu0  ;;  %v13235_v49 = vadd.f32 %v15749_v19, %v15748_v18  ;;  %v2260_v26 = vadd.f32 %v12853_v9, %v1866_v47  ;;  %v13244_v29 = vadd.f32 %v15750_v28, %v2254_v24  ;;  %v3029_v35 = vadd.f32 %v15752_v44, %v2634_v42  ;;  %v15753_v61 = vld [vmem:[#allocation47_spill] sm:$0xff]  ;;  %v15754_v4 = vld [vmem:[#allocation46_spill] sm:$0xff]  ;;  %v15755_v9 = vld [vmem:[#allocation48_spill] sm:$0xff] }
 0x206   : > { %v13204_v8 = vadd.f32 %v10462_v12, %v12889_v34  ;;  %v2258_v34 = vadd.f32 %v12844_v38, %v1864_v56  ;;  %v13241_v38 = vld [vmem:[%s15501_s4] ss:$0 sm:$0xff]  ;;  %v15751_v56 = vld [vmem:[#allocation69_spill] sm:$0xff]  ;;  %v13252_v48 = vadd.f32 %v15754_v4, %v15753_v61  ;;  %v13255_v47 = vadd.f32 %v15755_v9, %v2256_v15  ;;  %v15756_v55 = vld [vmem:[#allocation50_spill] sm:$0xff] }
 0x207   : > { %v13218_v23 = vpop.f32.mrf.mxu0  ;;  %v3421_v41 = vadd.f32 %v15751_v56, %v3027_v32  ;;  %v15757_v16 = vld [vmem:[#allocation49_spill] sm:$0xff]  ;;  %v15758_v24 = vld [vmem:[#allocation72_spill] sm:$0xff]  ;;  %v15759_v32 = vld [vmem:[#allocation51_spill] sm:$0xff] }
 0x208   : > { %v13259_v27 = vadd.f32 %v15757_v16, %v15756_v55  ;;  %v3032_v63 = vadd.f32 %v15758_v24, %v2637_v10  ;;  %v13263_v45 = vadd.f32 %v15759_v32, %v2258_v34  ;;  %v15760_v42 = vld [vmem:[#allocation70_spill] sm:$0xff]  ;;  %v15762_v19 = vld [vmem:[#allocation53_spill] sm:$0xff]  ;;  %v13279_v16 = vpop.f32.mrf.mxu1  ;;  %v15769_v24 = vld [vmem:[#allocation56_spill] sm:$0xff] }
 0x209   : > { %v10533_v37 = vpop.f32.mrf.mxu0  ;;  %v3424_v1 = vadd.f32 %v15760_v42, %v3030_v21  ;;  %v15764_v28 = vld [vmem:[#allocation54_spill] sm:$0xff]  ;;  %v15765_v44 = vld [vmem:[#allocation57_spill] sm:$0xff]  ;;  %v15772_v42 = vld [vmem:[#allocation76_spill] sm:$0xff] }
 0x20a   : > { %v3816_v12 = vadd.f32 %v10533_v37, %v3422_v57  ;;  %v15763_v37 = vld [vmem:[#allocation52_spill] sm:$0xff]  ;;  %v13274_v56 = vadd.f32 %v15764_v28, %v2260_v26  ;;  %v2262_v61 = vadd.f32 %v15765_v44, %v1868_v46  ;;  %v15766_v10 = vld [vmem:[#allocation74_spill] sm:$0xff]  ;;  %v15767_v34 = vld [vmem:[#allocation73_spill] sm:$0xff] }
 0x20b   : > { %v3656_v30 = vpop.f32.mrf.mxu0  ;;  %v13271_v15 = vadd.f32 %v15763_v37, %v15762_v19  ;;  %v3031_v4 = vadd.f32 %v15766_v10, %v2636_v51  ;;  %v3423_v55 = vadd.f32 %v15767_v34, %v3029_v35  ;;  %v15771_v26 = vld [vmem:[#allocation61_spill] sm:$0xff]  ;;  %v3426_v51 = vadd.f32 %v15772_v42, %v3032_v63  ;;  %v15773_v19 = vld [vmem:[#allocation75_spill] sm:$0xff]  ;;  %v15775_v10 = vld [vmem:[#allocation58_spill] sm:$0xff] }
 0x20c   : > { %v13267_v57 = vadd.f32 %v13241_v38, %v3816_v12  ;;  %v3815_v18 = vadd.f32 %v3656_v30, %v3421_v41  ;;  %v15770_v30 = vld [vmem:[#allocation55_spill] sm:$0xff]  ;;  %v2264_v46 = vadd.f32 %v15771_v26, %v13160_v17  ;;  %v3034_v37 = vadd.f32 %v15773_v19, %v2639_v11  ;;  %v15776_v34 = vld [vmem:[#allocation65_spill] sm:$0xff]  ;;  %v15780_v19 = vld [vmem:[#allocation60_spill] sm:$0xff] }
 0x20d   : > { %v10536_v9 = vpop.f32.mrf.mxu0  ;;  %v13287_v32 = vadd.f32 %v15770_v30, %v15769_v24  ;;  %v2266_v17 = vadd.f32 %v15776_v34, %v13166_v2  ;;  %v15777_v24 = vld [vmem:[#allocation79_spill] sm:$0xff]  ;;  %v15778_v30 = vld [vmem:[#allocation77_spill] sm:$0xff] }
 0x20e   : > { %15761 = vst [vmem:[#allocation10_spill] sm:$0xff] %v13267_v57  ;;  %v9041_v21 = vmul.f32 -1.442695, %v13267_v57  ;;  %v13283_v41 = vadd.f32 %v13241_v38, %v3815_v18  ;;  %v3818_v12 = vadd.f32 %v10536_v9, %v3424_v1  ;;  %v13297_v1 = vpop.permute.xlu1 %4146  ;;  %v13300_v9 = vadd.f32 %v15775_v10, %v2262_v61  ;;  %v15781_v61 = vld [vmem:[#allocation59_spill] sm:$0xff]  ;;  %v15782_v10 = vld [vmem:[#allocation62_spill] sm:$0xff] }
 0x20f   : > { %v3666_v35 = vpop.f32.mrf.mxu0  ;;  %v3425_v63 = vadd.f32 %v15777_v24, %v3031_v4  ;;  %v3033_v11 = vadd.f32 %v15778_v30, %v2638_v6  ;;  %v13317_v2 = vadd.f32 %v15782_v10, %v2264_v46  ;;  %v3428_v4 = vadd.f32 %v12925_v13, %v3034_v37  ;;  %v15783_v6 = vld [vmem:[#allocation78_spill] sm:$0xff]  ;;  %v13326_v30 = vpop.permute.xlu0 %4142 }
 0x210   : > { %15768 = vst [vmem:[#allocation9_spill] sm:$0xff] %v13283_v41  ;;  %11128 = vpow2.f32 %v9041_v21  ;;  %v9040_v28 = vmul.f32 -1.442695, %v13283_v41  ;;  %v13295_v44 = vadd.f32 %v13241_v38, %v3818_v12  ;;  %v3817_v18 = vadd.f32 %v3666_v35, %v3423_v55  ;;  %v13306_v21 = vpop.f32.mrf.mxu1  ;;  %v15787_v46 = vld [vmem:[#allocation66_spill] sm:$0xff] }
 0x211   : > { %v10539_v26 = vpop.f32.mrf.mxu0  ;;  %v13314_v35 = vadd.f32 %v15781_v61, %v15780_v19  ;;  %v3036_v34 = vadd.f32 %v15783_v6, %v13193_v5  ;;  %v15786_v19 = vld [vmem:[#allocation63_spill] sm:$0xff]  ;;  %v13333_v10 = vadd.f32 %v15787_v46, %v2266_v17  ;;  %v3427_v13 = vadd.f32 %v12931_v0, %v3033_v11  ;;  %v15788_v5 = vld [vmem:[#allocation80_spill] sm:$0xff]  ;;  %v15791_v46 = vld [vmem:[#allocation86_spill] sm:$0xff] }
 0x212   : > { %15774 = vst [vmem:[#allocation8_spill] sm:$0xff] %v13295_v44  ;;  %11130 = vpow2.f32 %v9040_v28  ;;  %v9043_v12 = vmul.f32 -1.442695, %v13295_v44  ;;  %v13310_v55 = vadd.f32 %v13241_v38, %v3817_v18  ;;  %v3820_v42 = vadd.f32 %v10539_v26, %v3426_v51  ;;  %v15785_v26 = vld [vmem:[#allocation64_spill] sm:$0xff]  ;;  %v13338_v6 = vpop.f32.mrf.mxu1  ;;  %v15790_v17 = vld [vmem:[#allocation67_spill] sm:$0xff]  ;;  %v15792_v11 = vld [vmem:[#allocation81_spill] sm:$0xff] }
 0x213   : > { %v3676_v24 = vpop.f32.mrf.mxu0  ;;  %v13330_v61 = vadd.f32 %v15786_v19, %v15785_v26  ;;  %v3035_v37 = vadd.f32 %v15788_v5, %v13197_v31  ;;  %v13344_v26 = vpop.permute.xlu1 %4148  ;;  %v2268_v19 = vadd.f32 %v15790_v17, %v13169_v59  ;;  %v3430_v0 = vadd.f32 %v15791_v46, %v3036_v34  ;;  %v15793_v5 = vld [vmem:[#allocation82_spill] sm:$0xff]  ;;  %v15796_v59 = vld [vmem:[#allocation83_spill] sm:$0xff]  ;;  %v15797_v34 = vld [vmem:[#allocation84_spill] sm:$0xff] }
 0x214   : > { %15779 = vst [vmem:[#allocation7_spill] sm:$0xff] %v13310_v55  ;;  %11132 = vpow2.f32 %v9043_v12  ;;  %v9042_v28 = vmul.f32 -1.442695, %v13310_v55  ;;  %v13324_v18 = vadd.f32 %v13241_v38, %v3820_v42  ;;  %v3819_v51 = vadd.f32 %v3676_v24, %v3425_v63 }
 0x215   : > { %v10542_v12 = vpop.f32.mrf.mxu0  ;;  %v3038_v31 = vadd.f32 %v15792_v11, %v13208_v39  ;;  %v3037_v55 = vadd.f32 %v15793_v5, %v13211_v3  ;;  %v3040_v17 = vadd.f32 %v15796_v59, %v13215_v58  ;;  %v3039_v46 = vadd.f32 %v15797_v34, %v13221_v53  ;;  %v15798_v39 = vld [vmem:[#allocation85_spill] sm:$0xff]  ;;  %v13364_v5 = vpop.f32.mrf.mxu1  ;;  %v15802_v59 = vld [vmem:[#allocation95_spill] sm:$0xff] }
 0x216   : > { %15784 = vst [vmem:[#allocation11_spill] sm:$0xff] %v13324_v18  ;;  %11134 = vpow2.f32 %v9042_v28  ;;  %v9045_v63 = vmul.f32 -1.442695, %v13324_v18  ;;  %v13342_v42 = vadd.f32 %v13241_v38, %v3819_v51  ;;  %v3822_v24 = vadd.f32 %v10542_v12, %v3428_v4  ;;  %v15795_v12 = vld [vmem:[#allocation89_spill] sm:$0xff] }
 0x217   : > { %v3686_v28 = vpop.f32.mrf.mxu0  ;;  %v3429_v44 = vadd.f32 %v15795_v12, %v3035_v37  ;;  %v3042_v11 = vadd.f32 %v15798_v39, %v13228_v33  ;;  %v13370_v37 = vpop.permute.xlu0 %4144  ;;  %v15801_v12 = vld [vmem:[#allocation92_spill] sm:$0xff]  ;;  %v3431_v34 = vadd.f32 %v15802_v59, %v3037_v55  ;;  %v15803_v33 = vld [vmem:[#allocation87_spill] sm:$0xff] }
 0x218   : > { %15789 = vst [vmem:[#allocation12_spill] sm:$0xff] %v13342_v42  ;;  %11136 = vpow2.f32 %v9045_v63  ;;  %v9044_v18 = vmul.f32 -1.442695, %v13342_v42  ;;  %v13355_v51 = vadd.f32 %v13241_v38, %v3822_v24  ;;  %v3821_v4 = vadd.f32 %v3686_v28, %v3427_v13  ;;  %v15800_v28 = vld [vmem:[#allocation68_spill] sm:$0xff] }
 0x219   : > { %v10545_v3 = vpop.f32.mrf.mxu0  ;;  %v13373_v58 = vadd.f32 %v15800_v28, %v2268_v19  ;;  %v3432_v53 = vadd.f32 %v15801_v12, %v3038_v31  ;;  %v3041_v39 = vadd.f32 %v15803_v33, %v13231_v60  ;;  %v3434_v19 = vadd.f32 %v13095_v25, %v3040_v17  ;;  %v15805_v28 = vld [vmem:[#allocation88_spill] sm:$0xff] }
 0x21a   : > { %15794 = vst [vmem:[#allocation13_spill] sm:$0xff] %v13355_v51  ;;  %11138 = vpow2.f32 %v9044_v18  ;;  %v9047_v63 = vmul.f32 -1.442695, %v13355_v51  ;;  %v13368_v24 = vadd.f32 %v13241_v38, %v3821_v4  ;;  %v3824_v13 = vadd.f32 %v10545_v3, %v3430_v0  ;;  %v13383_v3 = vpop.permute.xlu1 %4152 }
 0x21b   : > { %v3696_v42 = vpop.f32.mrf.mxu0  ;;  %v3433_v31 = vadd.f32 %v13113_v50, %v3039_v46  ;;  %v3436_v55 = vadd.f32 %v13143_v7, %v3042_v11  ;;  %v3044_v60 = vadd.f32 %v15805_v28, %v13235_v49  ;;  %v3435_v50 = vadd.f32 %v13174_v62, %v3041_v39  ;;  %v15807_v7 = vld [vmem:[#allocation90_spill] sm:$0xff]  ;;  %v15808_v49 = vld [vmem:[#allocation91_spill] sm:$0xff] }
 0x21c   : > { %15799 = vst [vmem:[#allocation14_spill] sm:$0xff] %v13368_v24  ;;  %11140 = vpow2.f32 %v9047_v63  ;;  %v9046_v18 = vmul.f32 -1.442695, %v13368_v24  ;;  %v13381_v4 = vadd.f32 %v13241_v38, %v3824_v13  ;;  %v3823_v0 = vadd.f32 %v3696_v42, %v3429_v44  ;;  %v13390_v63 = vpop.f32.mrf.mxu1  ;;  %v13396_v42 = vpop.permute.xlu0 %4150  ;;  %v15809_v24 = vld [vmem:[#allocation93_spill] sm:$0xff] }
 0x21d   : > { %v11129_v51 = vpop.eup %11128  ;;  %v10548_v12 = vpop.f32.mrf.mxu0  ;;  %v3043_v17 = vadd.f32 %v15807_v7, %v13244_v29  ;;  %v3046_v46 = vadd.f32 %v15808_v49, %v13252_v48  ;;  %v3045_v62 = vadd.f32 %v15809_v24, %v13255_v47 }
 0x21e   : > { %15804 = vst [vmem:[#allocation15_spill] sm:$0xff] %v13381_v4  ;;  %v3983_v59 = vadd.f32 1.0, %v11129_v51  ;;  %11142 = vpow2.f32 %v9046_v18  ;;  %v9049_v13 = vmul.f32 -1.442695, %v13381_v4  ;;  %v13394_v44 = vadd.f32 %v13241_v38, %v3823_v0  ;;  %v13412_v48 = vpop.f32.mrf.mxu1 }
 0x21f   : > { %v11131_v25 = vpop.eup %11130  ;;  %v3826_v11 = vadd.f32 %v10548_v12, %v3432_v53  ;;  %v3706_v33 = vpop.f32.mrf.mxu0  ;;  %v13405_v4 = vadd.f32 %v13201_v36, %v3044_v60  ;;  %v13420_v60 = vadd.f32 %v13248_v40, %v3043_v17  ;;  %v13423_v47 = vadd.f32 %v13279_v16, %v3046_v46  ;;  %v15813_v17 = vld [vmem:[#allocation94_spill] sm:$0xff] }
 0x220   : > { %15806 = vst [vmem:[#allocation16_spill] sm:$0xff] %v13394_v44  ;;  %11144 = vrcp.f32 %v3983_v59  ;;  %v3982_v51 = vadd.f32 1.0, %v11131_v25  ;;  %v9048_v18 = vmul.f32 -1.442695, %v13394_v44  ;;  %v3825_v28 = vadd.f32 %v3706_v33, %v3431_v34  ;;  %v13417_v59 = vpop.permute.xlu1 %4156  ;;  %v4520_v25 = vld [vmem:[%s15500_s3 + $0x8] sm:$0xff]  ;;  %v13433_v40 = vpop.permute.xlu0 %4154 }
 0x221   : > { %v11133_v0 = vpop.eup %11132  ;;  %11146 = vpow2.f32 %v9049_v13  ;;  %v13410_v29 = vadd.f32 %v13241_v38, %v3826_v11  ;;  %v10551_v39 = vpop.f32.mrf.mxu0  ;;  %10639 = vmatprep.subr.mxu0 %v4520_v25  ;;  %v3048_v46 = vadd.f32 %v15813_v17, %v13259_v27  ;;  %v13438_v11 = vadd.f32 %v13306_v21, %v3045_v62  ;;  %v15814_v21 = vld [vmem:[#allocation96_spill] sm:$0xff] }
 0x222   : > { %11148 = vrcp.f32 %v3982_v51  ;;  %v3985_v53 = vadd.f32 1.0, %v11133_v0  ;;  %v13415_v12 = vadd.f32 %v13241_v38, %v3825_v28  ;;  %v3828_v34 = vadd.f32 %v10551_v39, %v3434_v19  ;;  %10640 = vmatpush3.msra.mxu0 %v4520_v25  ;;  %v13443_v28 = vpop.f32.mrf.mxu1  ;;  %v4487_v25 = vld [vmem:[#allocation3] sm:$0xff] }
 0x223   : > { %15810 = vst [vmem:[#allocation17_spill] sm:$0xff] %v13410_v29  ;;  %v11135_v36 = vpop.eup %11134  ;;  %11150 = vpow2.f32 %v9048_v18  ;;  %v9051_v24 = vmul.f32 -1.442695, %v13410_v29  ;;  %v3716_v13 = vpop.f32.mrf.mxu0  ;;  %v4519_v18 = vld [vmem:[%s15500_s3] sm:$0xff]  ;;  %v3047_v62 = vadd.f32 %v15814_v21, %v13263_v45  ;;  %10643 = vmatprep.mubr.msk.f32.mxu0 %vm4270_vm3, %v4487_v25  ;;  %v4488_v45 = vld [vmem:[#allocation3 + $0x8] sm:$0xff] }
 0x224   : > { %15811 = vst [vmem:[#allocation18_spill] sm:$0xff] %v13415_v12  ;;  %11152 = vrcp.f32 %v3985_v53  ;;  %v3984_v7 = vadd.f32 1.0, %v11135_v36  ;;  %v9050_v19 = vmul.f32 -1.442695, %v13415_v12  ;;  %v13431_v49 = vadd.f32 %v13241_v38, %v3828_v34  ;;  %10641 = vmatprep.subr.mxu0 %v4519_v18 }
 0x225   : > { %v11137_v16 = vpop.eup %11136  ;;  %11154 = vpow2.f32 %v9051_v24  ;;  %v3827_v33 = vadd.f32 %v3716_v13, %v3433_v31  ;;  %v10554_v51 = vpop.f32.mrf.mxu0  ;;  %v15815_v31 = vld [vmem:[#allocation97_spill] sm:$0xff]  ;;  %10642 = vmatpush3.msra.mxu0 %v4519_v18 }
 0x226   : > { %15812 = vst [vmem:[#allocation20_spill] sm:$0xff] %v13431_v49  ;;  %11156 = vrcp.f32 %v3984_v7  ;;  %v3987_v0 = vadd.f32 1.0, %v11137_v16  ;;  %v9053_v39 = vmul.f32 -1.442695, %v13431_v49  ;;  %v3830_v53 = vadd.f32 %v10554_v51, %v3436_v55  ;;  %v4523_v13 = vld [vmem:[#allocation3 + $0x1] sm:$0xff]  ;;  %v4524_v7 = vld [vmem:[#allocation3 + $0x9] sm:$0xff]  ;;  %v13456_v51 = vpop.permute.xlu1 %4160  ;;  %10644 = vmatmul.mubr.msk.f32.vlgmr.msra.gmra.mxu0 %vm4270_vm3, %v4488_v45 }
 0x227   : > { %v11139_v27 = vpop.eup %11138  ;;  %v3050_v34 = vadd.f32 %v15815_v31, %v13271_v15  ;;  %11158 = vpow2.f32 %v9050_v19  ;;  %v13451_v36 = vadd.f32 %v13241_v38, %v3827_v33  ;;  %v3726_v24 = vpop.f32.mrf.mxu0  ;;  %10587 = vmatprep.mubr.msk.f32.mxu1 %vm4270_vm3, %v4523_v13  ;;  %v13461_v19 = vadd.f32 %v13338_v6, %v3048_v46  ;;  %v15818_v33 = vld [vmem:[#allocation98_spill] sm:$0xff] }
 0x228   : > { %11160 = vrcp.f32 %v3987_v0  ;;  %v3986_v16 = vadd.f32 1.0, %v11139_v27  ;;  %v13454_v55 = vadd.f32 %v13241_v38, %v3830_v53  ;;  %v3829_v17 = vadd.f32 %v3726_v24, %v3435_v50  ;;  %10588 = vmatmul.mubr.msk.f32.vlgmr.msra.gmra.mxu1 %vm4270_vm3, %v4524_v7  ;;  %v9143_v50 = vld [vmem:[%s15500_s3 + $0x58] sm:$0xff]  ;;  %v3382_v27 = vpop.f32.mrf.mxu1 }
 0x229   : > { %15816 = vst [vmem:[#allocation19_spill] sm:$0xff] %v13451_v36  ;;  %v11141_v15 = vpop.eup %11140  ;;  %v3049_v18 = vadd.f32 %v15818_v33, %v13274_v56  ;;  %11162 = vpow2.f32 %v9053_v39  ;;  %v9052_v0 = vmul.f32 -1.442695, %v13451_v36  ;;  %v10557_v53 = vpop.f32.mrf.mxu0  ;;  %10691 = vmatprep.subr.mxu1 %v9143_v50  ;;  %v3441_v31 = vadd.f32 %v13364_v5, %v3047_v62 }
 0x22a   : > { %15817 = vst [vmem:[#allocation21_spill] sm:$0xff] %v13454_v55  ;;  %11164 = vrcp.f32 %v3986_v16  ;;  %v3989_v21 = vadd.f32 1.0, %v11141_v15  ;;  %v9055_v6 = vmul.f32 -1.442695, %v13454_v55  ;;  %v13473_v46 = vadd.f32 %v13241_v38, %v3829_v17  ;;  %v13475_v56 = vpop.permute.xlu0 %4158  ;;  %10692 = vmatpush3.msra.mxu1 %v9143_v50 }
 0x22b   : > { %v11143_v39 = vpop.eup %11142  ;;  %v13479_v24 = vadd.f32 %v13390_v63, %v3050_v34  ;;  %11166 = vpow2.f32 %v9052_v0  ;;  %v3832_v13 = vadd.f32 %v10557_v53, %v13405_v4  ;;  %v3736_v25 = vpop.f32.mrf.mxu0  ;;  %v3052_v15 = vadd.f32 %v13103_v20, %v13287_v32 }
 0x22c   : > { %15819 = vst [vmem:[#allocation23_spill] sm:$0xff] %v13473_v46  ;;  %11168 = vrcp.f32 %v3989_v21  ;;  %v3988_v7 = vadd.f32 1.0, %v11143_v39  ;;  %v9054_v16 = vmul.f32 -1.442695, %v13473_v46  ;;  %v3831_v17 = vadd.f32 %v3736_v25, %v13420_v60  ;;  %v10514_v34 = vpop.f32.mrf.mxu1  ;;  %v13500_v20 = vpop.permute.xlu1 %4164 }
 0x22d   : > { %v13484_v45 = vpop.eup %11144  ;;  %v13489_v5 = vadd.f32 %v13412_v48, %v3049_v18  ;;  %11170 = vpow2.f32 %v9055_v6  ;;  %v13492_v63 = vadd.f32 %v13241_v38, %v3832_v13  ;;  %v10560_v4 = vpop.f32.mrf.mxu0  ;;  %v3051_v48 = vadd.f32 %v13123_v52, %v13300_v9 }
 0x22e   : > { %15820 = vst [vmem:[#allocation22_spill] sm:$0xff] %v13484_v45  ;;  %v11147_v62 = vpop.eup %11146  ;;  %11172 = vrcp.f32 %v3988_v7  ;;  %v13495_v33 = vadd.f32 %v13241_v38, %v3831_v17  ;;  %v4239_v60 = vmul.f32 %v13484_v45, %v13370_v37  ;;  %v3834_v0 = vadd.f32 %v10560_v4, %v13423_v47  ;;  %v13515_v52 = vpop.permute.xlu0 %4162 }
 0x22f   : > { %15821 = vst [vmem:[#allocation24_spill] sm:$0xff] %v13492_v63  ;;  %v13502_v32 = vpop.eup %11148  ;;  %v3991_v18 = vadd.f32 1.0, %v11147_v62  ;;  %11174 = vpow2.f32 %v9054_v16  ;;  %v9057_v53 = vmul.f32 -1.442695, %v13492_v63  ;;  %v3746_v50 = vpop.f32.mrf.mxu0  ;;  %v3446_v13 = vadd.f32 %v13443_v28, %v3052_v15 }
 0x230   : > { %15822 = vst [vmem:[#allocation26_spill] sm:$0xff] %v13495_v33  ;;  %15823 = vst [vmem:[#allocation25_spill] sm:$0xff] %v13502_v32  ;;  %v11151_v21 = vpop.eup %11150  ;;  %v4238_v6 = vmul.f32 %v13502_v32, %v13326_v30  ;;  %v9056_v37 = vmul.f32 -1.442695, %v13495_v33  ;;  %v13511_v47 = vadd.f32 %v13241_v38, %v3834_v0  ;;  %v3833_v39 = vadd.f32 %v3746_v50, %v13438_v11  ;;  %v13522_v17 = vpop.f32.mrf.mxu1 }
 0x231   : > { %4360 = vrot.lane.b32.xlu1 %v4239_v60, %s11352_s8  ;;  %v13517_v9 = vpop.eup %11152  ;;  %v3054_v25 = vadd.f32 %v13135_v14, %v13314_v35  ;;  %11176 = vrcp.f32 %v3991_v18  ;;  %v3990_v30 = vadd.f32 1.0, %v11151_v21  ;;  %v10563_v7 = vpop.f32.mrf.mxu0  ;;  %v13533_v14 = vadd.f32 %v3382_v27, %v3051_v48 }
 0x232   : > { %15824 = vst [vmem:[#allocation27_spill] sm:$0xff] %v13511_v47  ;;  %15825 = vst [vmem:[#allocation29_spill] sm:$0xff] %v13517_v9  ;;  %v11155_v16 = vpop.eup %11154  ;;  %11178 = vpow2.f32 %v9057_v53  ;;  %v9059_v11 = vmul.f32 -1.442695, %v13511_v47  ;;  %v13526_v4 = vadd.f32 %v13241_v38, %v3833_v39  ;;  %v4241_v62 = vmul.f32 %v13517_v9, %v13344_v26  ;;  %4358 = vrot.lane.b32.xlu0 %v4238_v6, %s11352_s8  ;;  %v13540_v26 = vpop.permute.xlu1 %4168 }
 0x233   : > { %v13531_v28 = vpop.eup %11156  ;;  %11180 = vrcp.f32 %v3990_v30  ;;  %v3993_v35 = vadd.f32 1.0, %v11155_v16  ;;  %v3836_v15 = vadd.f32 %v10563_v7, %v13461_v19  ;;  %v3756_v60 = vpop.f32.mrf.mxu0  ;;  %v3053_v27 = vadd.f32 %v13151_v43, %v13317_v2 }
 0x234   : > { %15826 = vst [vmem:[#allocation28_spill] sm:$0xff] %v13526_v4  ;;  %15827 = vst [vmem:[#allocation30_spill] sm:$0xff] %v13531_v28  ;;  %v11159_v0 = vpop.eup %11158  ;;  %11182 = vpow2.f32 %v9056_v37  ;;  %v4240_v18 = vmul.f32 %v13531_v28, %v13297_v1  ;;  %v9058_v53 = vmul.f32 -1.442695, %v13526_v4  ;;  %v3835_v50 = vadd.f32 %v3756_v60, %v3441_v31  ;;  %v10517_v1 = vpop.f32.mrf.mxu1 }
 0x235   : > { %4364 = vrot.lane.b32.xlu1 %v4241_v62, %s11352_s8  ;;  %v13542_v21 = vpop.eup %11160  ;;  %11184 = vrcp.f32 %v3993_v35  ;;  %v3992_v19 = vadd.f32 1.0, %v11159_v0  ;;  %v13547_v48 = vadd.f32 %v13241_v38, %v3836_v15  ;;  %v10566_v6 = vpop.f32.mrf.mxu0  ;;  %v3448_v7 = vadd.f32 %v10514_v34, %v3054_v25 }
 0x236   : > { %15828 = vst [vmem:[#allocation32_spill] sm:$0xff] %v13542_v21  ;;  %v11163_v37 = vpop.eup %11162  ;;  %11186 = vpow2.f32 %v9059_v11  ;;  %v13550_v31 = vadd.f32 %v13241_v38, %v3835_v50  ;;  %v4243_v39 = vmul.f32 %v13542_v21, %v13383_v3  ;;  %v3838_v30 = vadd.f32 %v10566_v6, %v13479_v24  ;;  %4362 = vrot.lane.b32.xlu0 %v4240_v18, %s11352_s8  ;;  %v13556_v43 = vpop.permute.xlu0 %4166 }
 0x237   : > { %15829 = vst [vmem:[#allocation31_spill] sm:$0xff] %v13547_v48  ;;  %v13558_v2 = vpop.eup %11164  ;;  %11188 = vrcp.f32 %v3992_v19  ;;  %v3995_v16 = vadd.f32 1.0, %v11163_v37  ;;  %v9061_v62 = vmul.f32 -1.442695, %v13547_v48  ;;  %v3766_v11 = vpop.f32.mrf.mxu0  ;;  %v3056_v34 = vadd.f32 %v13163_v22, %v13330_v61  ;;  %v9142_v22 = vld [vmem:[%s15500_s3 + $0x50] sm:$0xff] }
 0x238   : > { %15830 = vst [vmem:[#allocation33_spill] sm:$0xff] %v13550_v31  ;;  %15831 = vst [vmem:[#allocation35_spill] sm:$0xff] %v13558_v2  ;;  %v11167_v35 = vpop.eup %11166  ;;  %11190 = vpow2.f32 %v9058_v53  ;;  %v9060_v15 = vmul.f32 -1.442695, %v13550_v31  ;;  %v13563_v3 = vadd.f32 %v13241_v38, %v3838_v30  ;;  %v4242_v24 = vmul.f32 %v13558_v2, %v13396_v42  ;;  %v3402_v50 = vpop.f32.mrf.mxu1  ;;  %10693 = vmatprep.subr.mxu1 %v9142_v22 }
 0x239   : > { %4368 = vrot.lane.b32.xlu1 %v4243_v39, %s11352_s8  ;;  %v13568_v60 = vpop.eup %11168  ;;  %11192 = vrcp.f32 %v3995_v16  ;;  %v3994_v25 = vadd.f32 1.0, %v11167_v35  ;;  %v3837_v0 = vadd.f32 %v3766_v11, %v13489_v5  ;;  %v10569_v18 = vpop.f32.mrf.mxu0  ;;  %v3055_v5 = vadd.f32 %v13181_v54, %v13333_v10  ;;  %10694 = vmatpush3.msra.mxu1 %v9142_v22 }
 0x23a   : > { %15832 = vst [vmem:[#allocation34_spill] sm:$0xff] %v13563_v3  ;;  %15833 = vst [vmem:[#allocation36_spill] sm:$0xff] %v13568_v60  ;;  %v11171_v53 = vpop.eup %11170  ;;  %11194 = vpow2.f32 %v9061_v62  ;;  %v9063_v19 = vmul.f32 -1.442695, %v13563_v3  ;;  %v4245_v42 = vmul.f32 %v13568_v60, %v13417_v59  ;;  %v3840_v6 = vadd.f32 %v10569_v18, %v3446_v13  ;;  %4366 = vrot.lane.b32.xlu0 %v4242_v24, %s11352_s8  ;;  %v13577_v37 = vpop.permute.xlu1 %4172 }
 0x23b   : > { %v13582_v61 = vpop.eup %11172  ;;  %11196 = vrcp.f32 %v3994_v25  ;;  %v3997_v39 = vadd.f32 1.0, %v11171_v53  ;;  %v13587_v30 = vadd.f32 %v13241_v38, %v3837_v0  ;;  %v3776_v59 = vpop.f32.mrf.mxu0  ;;  %v3447_v10 = vadd.f32 %v13522_v17, %v3053_v27 }
 0x23c   : > { %15834 = vst [vmem:[#allocation38_spill] sm:$0xff] %v13582_v61  ;;  %v11175_v13 = vpop.eup %11174  ;;  %11198 = vpow2.f32 %v9060_v15  ;;  %v13590_v16 = vadd.f32 %v13241_v38, %v3840_v6  ;;  %v4244_v62 = vmul.f32 %v13582_v61, %v13433_v40  ;;  %v3839_v11 = vadd.f32 %v3776_v59, %v13533_v14  ;;  %v13596_v54 = vpop.permute.xlu0 %4170 }
 0x23d   : > { %15835 = vst [vmem:[#allocation37_spill] sm:$0xff] %v13587_v30  ;;  %4372 = vrot.lane.b32.xlu1 %v4245_v42, %s11352_s8  ;;  %11200 = vrcp.f32 %v3997_v39  ;;  %v3996_v35 = vadd.f32 1.0, %v11175_v13  ;;  %v9062_v24 = vmul.f32 -1.442695, %v13587_v30  ;;  %v10572_v15 = vpop.f32.mrf.mxu0  ;;  %v10520_v0 = vpop.f32.mrf.mxu1  ;;  %v3450_v42 = vadd.f32 %v10517_v1, %v3056_v34 }
 0x23e   : > { %15836 = vst [vmem:[#allocation39_spill] sm:$0xff] %v13590_v16  ;;  %v13600_v25 = vpop.eup %11176  ;;  %11202 = vpow2.f32 %v9063_v19  ;;  %v9065_v40 = vmul.f32 -1.442695, %v13590_v16  ;;  %v13604_v14 = vadd.f32 %v13241_v38, %v3839_v11  ;;  %v3842_v18 = vadd.f32 %v10572_v15, %v3448_v7  ;;  %4370 = vrot.lane.b32.xlu0 %v4244_v62, %s11352_s8  ;;  %v13615_v7 = vpop.permute.xlu1 %4176 }
 0x23f   : > { %15837 = vst [vmem:[#allocation41_spill] sm:$0xff] %v13600_v25  ;;  %v11179_v53 = vpop.eup %11178  ;;  %v3449_v17 = vadd.f32 %v3402_v50, %v3055_v5  ;;  %11204 = vrcp.f32 %v3996_v35  ;;  %v4247_v27 = vmul.f32 %v13600_v25, %v13456_v51  ;;  %v3786_v6 = vpop.f32.mrf.mxu0  ;;  %v3057_v1 = vadd.f32 %v13218_v23, %v13373_v58 }
 0x240   : > { %15838 = vst [vmem:[#allocation40_spill] sm:$0xff] %v13604_v14  ;;  %v13609_v22 = vpop.eup %11180  ;;  %v3999_v39 = vadd.f32 1.0, %v11179_v53  ;;  %11206 = vpow2.f32 %v9062_v24  ;;  %v9064_v19 = vmul.f32 -1.442695, %v13604_v14  ;;  %v13613_v59 = vadd.f32 %v13241_v38, %v3842_v18  ;;  %v3412_v62 = vpop.f32.mrf.mxu1 }
 0x241   : > { %15839 = vst [vmem:[#allocation42_spill] sm:$0xff] %v13609_v22  ;;  %v11183_v13 = vpop.eup %11182  ;;  %11208 = vpow2.f32 %v9065_v40  ;;  %v4246_v51 = vmul.f32 %v13609_v22, %v13475_v56  ;;  %v3841_v34 = vadd.f32 %v3786_v6, %v3447_v10  ;;  %4376 = vrot.lane.b32.xlu1 %v4247_v27, %s11352_s8  ;;  %v10575_v50 = vpop.f32.mrf.mxu0  ;;  %v3452_v23 = vadd.f32 %v10520_v0, %v13204_v8 }
 0x242   : > { %15840 = vst [vmem:[#allocation44_spill] sm:$0xff] %v13613_v59  ;;  %v13622_v5 = vpop.eup %11184  ;;  %11210 = vrcp.f32 %v3999_v39  ;;  %v3998_v11 = vadd.f32 1.0, %v11183_v13  ;;  %v9067_v35 = vmul.f32 -1.442695, %v13613_v59  ;;  %v3844_v24 = vadd.f32 %v10575_v50, %v3450_v42  ;;  %v13625_v15 = vpop.permute.xlu0 %4174 }
 0x243   : > { %15841 = vst [vmem:[#allocation43_spill] sm:$0xff] %v13622_v5  ;;  %v11187_v18 = vpop.eup %11186  ;;  %11212 = vpow2.f32 %v9064_v19  ;;  %v13629_v58 = vadd.f32 %v13241_v38, %v3841_v34  ;;  %v4249_v56 = vmul.f32 %v13622_v5, %v13500_v20  ;;  %4374 = vrot.lane.b32.xlu0 %v4246_v51, %s11352_s8  ;;  %v3796_v10 = vpop.f32.mrf.mxu0  ;;  %v3451_v8 = vadd.f32 %v3412_v62, %v3057_v1 }
 0x244   : > { %v13634_v40 = vpop.eup %11188  ;;  %11214 = vrcp.f32 %v3998_v11  ;;  %v4001_v53 = vadd.f32 1.0, %v11187_v18  ;;  %v13637_v42 = vadd.f32 %v13241_v38, %v3844_v24  ;;  %v3843_v27 = vadd.f32 %v3796_v10, %v3449_v17  ;;  %v4181_v17 = vpop.permute.xlu1 %4180 }
 0x245   : > { %15842 = vst [vmem:[#allocation45_spill] sm:$0xff] %v13629_v58  ;;  %15843 = vst [vmem:[#allocation69_spill] sm:$0xff] %v13634_v40  ;;  %v11191_v6 = vpop.eup %11190  ;;  %11216 = vpow2.f32 %v9067_v35  ;;  %v9066_v0 = vmul.f32 -1.442695, %v13629_v58  ;;  %v4248_v39 = vmul.f32 %v13634_v40, %v13515_v52  ;;  %4380 = vrot.lane.b32.xlu1 %v4249_v56, %s11352_s8  ;;  %v10578_v20 = vpop.f32.mrf.mxu0 }
 0x246   : > { %15844 = vst [vmem:[#allocation71_spill] sm:$0xff] %v13637_v42  ;;  %v13643_v19 = vpop.eup %11192  ;;  %11218 = vrcp.f32 %v4001_v53  ;;  %v4000_v13 = vadd.f32 1.0, %v11191_v6  ;;  %v9069_v51 = vmul.f32 -1.442695, %v13637_v42  ;;  %v13647_v34 = vadd.f32 %v13241_v38, %v3843_v27  ;;  %v4179_v56 = vpop.permute.xlu0 %4178 }
 0x247   : > { %15845 = vst [vmem:[#allocation47_spill] sm:$0xff] %v13643_v19  ;;  %v11195_v1 = vpop.eup %11194  ;;  %11220 = vpow2.f32 %v9066_v0  ;;  %v4251_v50 = vmul.f32 %v13643_v19, %v13540_v26  ;;  %v3846_v62 = vadd.f32 %v10578_v20, %v3452_v23  ;;  %4378 = vrot.lane.b32.xlu0 %v4248_v39, %s11352_s8  ;;  %v3806_v52 = vpop.f32.mrf.mxu0 }
 0x248   : > { %15846 = vst [vmem:[#allocation46_spill] sm:$0xff] %v13647_v34  ;;  %v13652_v11 = vpop.eup %11196  ;;  %11222 = vrcp.f32 %v4000_v13  ;;  %v4003_v35 = vadd.f32 1.0, %v11195_v1  ;;  %v9068_v24 = vmul.f32 -1.442695, %v13647_v34  ;;  %v3845_v18 = vadd.f32 %v3806_v52, %v3451_v8  ;;  %v4185_v13 = vpop.permute.xlu1 %4184 }
 0x249   : > { %15847 = vst [vmem:[#allocation48_spill] sm:$0xff] %v13652_v11  ;;  %v11199_v10 = vpop.eup %11198  ;;  %11224 = vpow2.f32 %v9069_v51  ;;  %v13656_v53 = vadd.f32 %v13241_v38, %v3846_v62  ;;  %v4250_v26 = vmul.f32 %v13652_v11, %v13556_v43  ;;  %4384 = vrot.lane.b32.xlu1 %v4251_v50, %s11352_s8  ;;  %v9141_v43 = vld [vmem:[%s15500_s3 + $0x48] sm:$0xff] }
 0x24a   : > { %v13661_v23 = vpop.eup %11200  ;;  %11226 = vrcp.f32 %v4003_v35  ;;  %v4002_v27 = vadd.f32 1.0, %v11199_v10  ;;  %v13664_v6 = vadd.f32 %v13241_v38, %v3845_v18  ;;  %10695 = vmatprep.subr.mxu1 %v9141_v43  ;;  %v4183_v50 = vpop.permute.xlu0 %4182 }
 0x24b   : > { %15848 = vst [vmem:[#allocation50_spill] sm:$0xff] %v13656_v53  ;;  %15849 = vst [vmem:[#allocation49_spill] sm:$0xff] %v13661_v23  ;;  %v11203_v0 = vpop.eup %11202  ;;  %11228 = vpow2.f32 %v9068_v24  ;;  %v4253_v8 = vmul.f32 %v13661_v23, %v13577_v37  ;;  %4382 = vrot.lane.b32.xlu0 %v4250_v26, %s11352_s8  ;;  %10696 = vmatpush3.msra.mxu1 %v9141_v43 }
 0x24c   : > { %15850 = vst [vmem:[#allocation72_spill] sm:$0xff] %v13664_v6  ;;  %v13672_v39 = vpop.eup %11204  ;;  %11230 = vrcp.f32 %v4002_v27  ;;  %v4005_v20 = vadd.f32 1.0, %v11203_v0  ;;  %v4189_v27 = vpop.permute.xlu1 %4188  ;;  %v9070_v33 = vmul.f32 -1.442695, %v13664_v6 }
 0x24d   : > { %15851 = vst [vmem:[#allocation51_spill] sm:$0xff] %v13672_v39  ;;  %v11207_v51 = vpop.eup %11206  ;;  %v4252_v38 = vmul.f32 %v13672_v39, %v13596_v54  ;;  %4388 = vrot.lane.b32.xlu1 %v4253_v8, %s11352_s8 }
 0x24e   : > { %v11209_v37 = vpop.eup %11208  ;;  %11232 = vrcp.f32 %v4005_v20  ;;  %v4004_v1 = vadd.f32 1.0, %v11207_v51 }
 0x24f   : > { %v13677_v62 = vpop.eup %11210  ;;  %v4007_v52 = vadd.f32 1.0, %v11209_v37  ;;  %4386 = vrot.lane.b32.xlu0 %v4252_v38, %s11352_s8 }
 0x250   : > { %15852 = vst [vmem:[#allocation70_spill] sm:$0xff] %v13677_v62  ;;  %v11213_v35 = vpop.eup %11212  ;;  %11234 = vrcp.f32 %v4004_v1  ;;  %v4255_v24 = vmul.f32 %v13677_v62, %v13615_v7  ;;  %v4187_v7 = vpop.permute.xlu0 %4186 }
 0x251   : > { %v13682_v18 = vpop.eup %11214  ;;  %11236 = vrcp.f32 %v4007_v52  ;;  %v4006_v54 = vadd.f32 1.0, %v11213_v35 }
 0x252   : > { %15853 = vst [vmem:[#allocation53_spill] sm:$0xff] %v13682_v18  ;;  %v11217_v10 = vpop.eup %11216  ;;  %v4254_v26 = vmul.f32 %v13682_v18, %v13625_v15  ;;  %4392 = vrot.lane.b32.xlu1 %v4255_v24, %s11352_s8 }
 0x253   : > { %v13687_v0 = vpop.eup %11218  ;;  %11238 = vrcp.f32 %v4006_v54  ;;  %v4009_v8 = vadd.f32 1.0, %v11217_v10 }
 0x254   : > { %15854 = vst [vmem:[#allocation52_spill] sm:$0xff] %v13687_v0  ;;  %v11221_v43 = vpop.eup %11220  ;;  %v4257_v20 = vmul.f32 %v13687_v0, %v4181_v17  ;;  %4390 = vrot.lane.b32.xlu0 %v4254_v26, %s11352_s8  ;;  %v4193_v17 = vpop.permute.xlu1 %4192 }
 0x255   : > { %v13691_v51 = vpop.eup %11222  ;;  %11240 = vrcp.f32 %v4009_v8  ;;  %v4008_v38 = vadd.f32 1.0, %v11221_v43  ;;  %v9140_v43 = vld [vmem:[%s15500_s3 + $0x40] sm:$0xff] }
 0x256   : > { %15855 = vst [vmem:[#allocation54_spill] sm:$0xff] %v13691_v51  ;;  %v11225_v37 = vpop.eup %11224  ;;  %v4256_v15 = vmul.f32 %v13691_v51, %v4179_v56  ;;  %4396 = vrot.lane.b32.xlu1 %v4257_v20, %s11352_s8  ;;  %v4191_v56 = vpop.permute.xlu0 %4190  ;;  %10697 = vmatprep.subr.mxu1 %v9140_v43 }
 0x257   : > { %v13695_v1 = vpop.eup %11226  ;;  %11242 = vrcp.f32 %v4008_v38  ;;  %v4011_v52 = vadd.f32 1.0, %v11225_v37  ;;  %10698 = vmatpush3.msra.mxu1 %v9140_v43 }
 0x258   : > { %15856 = vst [vmem:[#allocation57_spill] sm:$0xff] %v13695_v1  ;;  %v11229_v35 = vpop.eup %11228  ;;  %v4259_v24 = vmul.f32 %v13695_v1, %v4185_v13  ;;  %4394 = vrot.lane.b32.xlu0 %v4256_v15, %s11352_s8  ;;  %v4197_v37 = vpop.permute.xlu1 %4196 }
 0x259   : > { %v13699_v54 = vpop.eup %11230  ;;  %11244 = vrcp.f32 %v4011_v52  ;;  %v4010_v10 = vadd.f32 1.0, %v11229_v35 }
 0x25a   : > { %15857 = vst [vmem:[#allocation74_spill] sm:$0xff] %v13699_v54  ;;  %v4258_v26 = vmul.f32 %v13699_v54, %v4183_v50  ;;  %4400 = vrot.lane.b32.xlu1 %v4259_v24, %s11352_s8 }
 0x25b   : > { %v13703_v8 = vpop.eup %11232  ;;  %11246 = vrcp.f32 %v4010_v10 }
 0x25c   : > { %15858 = vst [vmem:[#allocation73_spill] sm:$0xff] %v13703_v8  ;;  %v4261_v13 = vmul.f32 %v13703_v8, %v4189_v27  ;;  %4398 = vrot.lane.b32.xlu0 %v4258_v26, %s11352_s8  ;;  %v4195_v27 = vpop.permute.xlu0 %4194 }
 0x25d   : > { %v13710_v20 = vpop.eup %11234 }
 0x25e   : > { %15859 = vst [vmem:[#allocation56_spill] sm:$0xff] %v13710_v20  ;;  %v13712_v38 = vpop.eup %11236  ;;  %v4260_v50 = vmul.f32 %v13710_v20, %v4187_v7  ;;  %4404 = vrot.lane.b32.xlu1 %v4261_v13, %s11352_s8  ;;  %v4201_v7 = vpop.permute.xlu1 %4200 }
 0x25f   : > { %15860 = vst [vmem:[#allocation55_spill] sm:$0xff] %v13712_v38  ;;  %v4263_v15 = vmul.f32 %v13712_v38, %v4193_v17  ;;  %v9179_v17 = vld [vmem:[%s15500_s3 + $0x78] sm:$0xff] }
 0x260   : > { %v13717_v52 = vpop.eup %11238  ;;  %4402 = vrot.lane.b32.xlu0 %v4260_v50, %s11352_s8  ;;  %10747 = vmatprep.subr.mxu0 %v9179_v17  ;;  %v4199_v50 = vpop.permute.xlu0 %4198 }
 0x261   : > { %15861 = vst [vmem:[#allocation61_spill] sm:$0xff] %v13717_v52  ;;  %v4262_v35 = vmul.f32 %v13717_v52, %v4191_v56  ;;  %v9178_v56 = vld [vmem:[%s15500_s3 + $0x70] sm:$0xff]  ;;  %10748 = vmatpush3.msra.mxu0 %v9179_v17  ;;  %v4109_v17 = vld [vmem:[%s12483_s17 + $0xf8] sm:$0xff] }
 0x262   : > { %v13721_v24 = vpop.eup %11240  ;;  %4408 = vrot.lane.b32.xlu1 %v4263_v15, %s11352_s8  ;;  %10749 = vmatprep.subr.mxu0 %v9178_v56 }
 0x263   : > { %15862 = vst [vmem:[#allocation76_spill] sm:$0xff] %v13721_v24  ;;  %v4265_v10 = vmul.f32 %v13721_v24, %v4197_v37  ;;  %10750 = vmatpush3.msra.mxu0 %v9178_v56 }
 0x264   : > { %v13725_v26 = vpop.eup %11242  ;;  %4406 = vrot.lane.b32.xlu0 %v4262_v35, %s11352_s8 }
 0x265   : > { %15863 = vst [vmem:[#allocation75_spill] sm:$0xff] %v13725_v26  ;;  %v4264_v43 = vmul.f32 %v13725_v26, %v4195_v27  ;;  %v9177_v27 = vld [vmem:[%s15500_s3 + $0x68] sm:$0xff] }
 0x266   : > { %v13735_v13 = vpop.eup %11244  ;;  %4412 = vrot.lane.b32.xlu1 %v4265_v10, %s11352_s8  ;;  %10751 = vmatprep.subr.mxu0 %v9177_v27  ;;  %v9176_v10 = vld [vmem:[%s15500_s3 + $0x60] sm:$0xff] }
 0x267   : > { %15864 = vst [vmem:[#allocation58_spill] sm:$0xff] %v13735_v13  ;;  %v4267_v37 = vmul.f32 %v13735_v13, %v4201_v7  ;;  %10752 = vmatpush3.msra.mxu0 %v9177_v27  ;;  %v13753_v7 = vld [vmem:[%s15500_s3 + $0x98] sm:$0xff] }
 0x268   : > { %v13739_v15 = vpop.eup %11246  ;;  %4410 = vrot.lane.b32.xlu0 %v4264_v43, %s11352_s8  ;;  %10753 = vmatprep.subr.mxu0 %v9176_v10  ;;  %v4108_v43 = vld [vmem:[%s12483_s17 + $0xf0] sm:$0xff] }
 0x269   : > { %15865 = vst [vmem:[#allocation65_spill] sm:$0xff] %v13739_v15  ;;  %v4266_v35 = vmul.f32 %v13739_v15, %v4199_v50  ;;  %10803 = vmatprep.subr.mxu1 %v13753_v7  ;;  %10754 = vmatpush3.msra.mxu0 %v9176_v10 }
 0x26a   : > { %4416 = vrot.lane.b32.xlu1 %v4267_v37, %s11352_s8 }
 0x26c   : > { %4414 = vrot.lane.b32.xlu0 %v4266_v35, %s11352_s8  ;;  %v13768_v35 = vld [vmem:[%s15500_s3 + $0xb8] sm:$0xff] }
 0x26d   : > { %10859 = vmatprep.subr.mxu0 %v13768_v35 }
 0x26e   : > { %4204 = vrot.lane.b32.xlu1 %v4109_v17, %s11351_s30 }
 0x270   : > { %4202 = vrot.lane.b32.xlu0 %v4108_v43, %s11351_s30  ;;  %s11353_s30 = smov 64  }
 0x2a3   : > { %v4361_v56 = vpop.permute.xlu1 %4360 }
 0x2a4   : > { %4456 = vst.msk [vmem:[#allocation3 + $0x21] sm:$0xff] %vm4270_vm3, %v4361_v56  ;;  %v4359_v50 = vpop.permute.xlu0 %4358 }
 0x2a5   : > { %4455 = vst.msk [vmem:[#allocation3 + $0x19] sm:$0xff] %vm4270_vm3, %v4359_v50 }
 0x2a7   : > { %v4365_v37 = vpop.permute.xlu1 %4364 }
 0x2a8   : > { %4458 = vst.msk [vmem:[#allocation3 + $0x39] sm:$0xff] %vm4270_vm3, %v4365_v37  ;;  %v4363_v27 = vpop.permute.xlu0 %4362 }
 0x2a9   : > { %4457 = vst.msk [vmem:[#allocation3 + $0x31] sm:$0xff] %vm4270_vm3, %v4363_v27 }
 0x2ab   : > { %v4369_v10 = vpop.permute.xlu1 %4368  ;;  %v13783_v37 = vld [vmem:[#allocation3 + $0x21] sm:$0xff] }
 0x2ac   : > { %4460 = vst.msk [vmem:[#allocation3 + $0x51] sm:$0xff] %vm4270_vm3, %v4369_v10  ;;  %v4367_v17 = vpop.permute.xlu0 %4366  ;;  %v13772_v43 = vld [vmem:[#allocation3 + $0x19] sm:$0xff]  ;;  %15867 = vst [vmem:[#allocation77_spill] sm:$0xff] %v13783_v37 }
 0x2ad   : > { %15866 = vst [vmem:[#allocation79_spill] sm:$0xff] %v13772_v43  ;;  %v13774_v56 = vld [vmem:[#allocation3 + $0x18] sm:$0xff]  ;;  %v13776_v50 = vld [vmem:[#allocation3 + $0x20] sm:$0xff]  ;;  %4459 = vst.msk [vmem:[#allocation3 + $0x49] sm:$0xff] %vm4270_vm3, %v4367_v17  ;;  %10590 = vmatprep.mubr.msk.f32.mxu1 %vm4270_vm3, %v13772_v43 }
 0x2ae   : > { %10646 = vmatprep.mubr.msk.f32.mxu0 %vm4270_vm3, %v13774_v56  ;;  %10591 = vmatmul.mubr.msk.f32.gmra.mxu1 %vm4270_vm3, %v13783_v37 }
 0x2af   : > { %10647 = vmatmul.mubr.msk.f32.gmra.mxu0 %vm4270_vm3, %v13776_v50  ;;  %v4373_v27 = vpop.permute.xlu1 %4372  ;;  %v13801_v58 = vld [vmem:[#allocation3 + $0x39] sm:$0xff] }
 0x2b0   : > { %4462 = vst.msk [vmem:[#allocation3 + $0x69] sm:$0xff] %vm4270_vm3, %v4373_v27  ;;  %v4371_v10 = vpop.permute.xlu0 %4370  ;;  %v13790_v34 = vld [vmem:[#allocation3 + $0x31] sm:$0xff]  ;;  %15869 = vst [vmem:[#allocation59_spill] sm:$0xff] %v13801_v58 }
 0x2b1   : > { %15868 = vst [vmem:[#allocation60_spill] sm:$0xff] %v13790_v34  ;;  %v13792_v17 = vld [vmem:[#allocation3 + $0x30] sm:$0xff]  ;;  %v13794_v42 = vld [vmem:[#allocation3 + $0x38] sm:$0xff]  ;;  %4461 = vst.msk [vmem:[#allocation3 + $0x61] sm:$0xff] %vm4270_vm3, %v4371_v10  ;;  %10593 = vmatprep.mubr.msk.f32.mxu1 %vm4270_vm3, %v13790_v34 }
 0x2b2   : > { %10649 = vmatprep.mubr.msk.f32.mxu0 %vm4270_vm3, %v13792_v17  ;;  %10594 = vmatmul.mubr.msk.f32.gmra.mxu1 %vm4270_vm3, %v13801_v58 }
 0x2b3   : > { %10650 = vmatmul.mubr.msk.f32.gmra.mxu0 %vm4270_vm3, %v13794_v42  ;;  %v4377_v27 = vpop.permute.xlu1 %4376  ;;  %v13818_v30 = vld [vmem:[#allocation3 + $0x51] sm:$0xff] }
 0x2b4   : > { %4464 = vst.msk [vmem:[#allocation3 + $0x81] sm:$0xff] %vm4270_vm3, %v4377_v27  ;;  %v13808_v59 = vld [vmem:[#allocation3 + $0x49] sm:$0xff]  ;;  %15871 = vst [vmem:[#allocation78_spill] sm:$0xff] %v13818_v30 }
 0x2b5   : > { %15870 = vst [vmem:[#allocation62_spill] sm:$0xff] %v13808_v59  ;;  %v13810_v10 = vld [vmem:[#allocation3 + $0x48] sm:$0xff]  ;;  %v13812_v14 = vld [vmem:[#allocation3 + $0x50] sm:$0xff]  ;;  %v4375_v16 = vpop.permute.xlu0 %4374  ;;  %10596 = vmatprep.mubr.msk.f32.mxu1 %vm4270_vm3, %v13808_v59 }
 0x2b6   : > { %10652 = vmatprep.mubr.msk.f32.mxu0 %vm4270_vm3, %v13810_v10  ;;  %4463 = vst.msk [vmem:[#allocation3 + $0x79] sm:$0xff] %vm4270_vm3, %v4375_v16  ;;  %10597 = vmatmul.mubr.msk.f32.gmra.mxu1 %vm4270_vm3, %v13818_v30 }
 0x2b7   : > { %10653 = vmatmul.mubr.msk.f32.gmra.mxu0 %vm4270_vm3, %v13812_v14  ;;  %v4381_v27 = vpop.permute.xlu1 %4380  ;;  %v13836_v16 = vld [vmem:[#allocation3 + $0x69] sm:$0xff] }
 0x2b8   : > { %4466 = vst.msk [vmem:[#allocation3 + $0x99] sm:$0xff] %vm4270_vm3, %v4381_v27  ;;  %v13826_v3 = vld [vmem:[#allocation3 + $0x61] sm:$0xff]  ;;  %15873 = vst [vmem:[#allocation63_spill] sm:$0xff] %v13836_v16  ;;  %v9071_v27 = vmul.f32 -1.442695, %v13656_v53 }
 0x2b9   : > { %15872 = vst [vmem:[#allocation64_spill] sm:$0xff] %v13826_v3  ;;  %v13828_v31 = vld [vmem:[#allocation3 + $0x60] sm:$0xff]  ;;  %v13830_v48 = vld [vmem:[#allocation3 + $0x68] sm:$0xff]  ;;  %v4379_v4 = vpop.permute.xlu0 %4378  ;;  %10599 = vmatprep.mubr.msk.f32.mxu1 %vm4270_vm3, %v13826_v3 }
 0x2ba   : > { %10655 = vmatprep.mubr.msk.f32.mxu0 %vm4270_vm3, %v13828_v31  ;;  %4465 = vst.msk [vmem:[#allocation3 + $0x91] sm:$0xff] %vm4270_vm3, %v4379_v4  ;;  %10600 = vmatmul.mubr.msk.f32.gmra.mxu1 %vm4270_vm3, %v13836_v16  ;;  %11248 = vpow2.f32 %v9071_v27 }
 0x2bb   : > { %10656 = vmatmul.mubr.msk.f32.gmra.mxu0 %vm4270_vm3, %v13830_v48  ;;  %v4385_v47 = vpop.permute.xlu1 %4384  ;;  %v13857_v4 = vld [vmem:[#allocation3 + $0x81] sm:$0xff]  ;;  %11250 = vpow2.f32 %v9070_v33 }
 0x2bc   : > { %4468 = vst.msk [vmem:[#allocation3 + $0xb1] sm:$0xff] %vm4270_vm3, %v4385_v47  ;;  %15875 = vst [vmem:[#allocation80_spill] sm:$0xff] %v13857_v4 }
 0x2bd   : > { %v4383_v63 = vpop.permute.xlu0 %4382  ;;  %v13846_v46 = vld [vmem:[#allocation3 + $0x79] sm:$0xff] }
 0x2be   : > { %15874 = vst [vmem:[#allocation66_spill] sm:$0xff] %v13846_v46  ;;  %v13848_v55 = vld [vmem:[#allocation3 + $0x78] sm:$0xff]  ;;  %v13850_v36 = vld [vmem:[#allocation3 + $0x80] sm:$0xff]  ;;  %4467 = vst.msk [vmem:[#allocation3 + $0xa9] sm:$0xff] %vm4270_vm3, %v4383_v63  ;;  %10602 = vmatprep.mubr.msk.f32.mxu1 %vm4270_vm3, %v13846_v46 }
 0x2bf   : > { %10658 = vmatprep.mubr.msk.f32.mxu0 %vm4270_vm3, %v13848_v55  ;;  %v4389_v47 = vpop.permute.xlu1 %4388  ;;  %10603 = vmatmul.mubr.msk.f32.gmra.mxu1 %vm4270_vm3, %v13857_v4  ;;  %v13875_v27 = vld [vmem:[#allocation3 + $0x99] sm:$0xff] }
 0x2c0   : > { %10659 = vmatmul.mubr.msk.f32.gmra.mxu0 %vm4270_vm3, %v13850_v36  ;;  %4470 = vst.msk [vmem:[#allocation3 + $0xc9] sm:$0xff] %vm4270_vm3, %v4389_v47  ;;  %15877 = vst [vmem:[#allocation86_spill] sm:$0xff] %v13875_v27 }
 0x2c1   : > { %v4387_v63 = vpop.permute.xlu0 %4386  ;;  %v13864_v6 = vld [vmem:[#allocation3 + $0x91] sm:$0xff] }
 0x2c2   : > { %15876 = vst [vmem:[#allocation67_spill] sm:$0xff] %v13864_v6  ;;  %v13866_v53 = vld [vmem:[#allocation3 + $0x90] sm:$0xff]  ;;  %v13868_v49 = vld [vmem:[#allocation3 + $0x98] sm:$0xff]  ;;  %4469 = vst.msk [vmem:[#allocation3 + $0xc1] sm:$0xff] %vm4270_vm3, %v4387_v63  ;;  %10605 = vmatprep.mubr.msk.f32.mxu1 %vm4270_vm3, %v13864_v6 }
 0x2c3   : > { %10661 = vmatprep.mubr.msk.f32.mxu0 %vm4270_vm3, %v13866_v53  ;;  %10606 = vmatmul.mubr.msk.f32.gmra.mxu1 %vm4270_vm3, %v13875_v27  ;;  %v13892_v44 = vld [vmem:[#allocation3 + $0xb1] sm:$0xff] }
 0x2c4   : > { %10662 = vmatmul.mubr.msk.f32.gmra.mxu0 %vm4270_vm3, %v13868_v49  ;;  %v4393_v33 = vpop.permute.xlu1 %4392  ;;  %15879 = vst [vmem:[#allocation82_spill] sm:$0xff] %v13892_v44 }
 0x2c5   : > { %4472 = vst.msk [vmem:[#allocation3 + $0xe1] sm:$0xff] %vm4270_vm3, %v4393_v33  ;;  %v13882_v47 = vld [vmem:[#allocation3 + $0xa9] sm:$0xff] }
 0x2c6   : > { %15878 = vst [vmem:[#allocation81_spill] sm:$0xff] %v13882_v47  ;;  %v13884_v63 = vld [vmem:[#allocation3 + $0xa8] sm:$0xff]  ;;  %v13886_v12 = vld [vmem:[#allocation3 + $0xb0] sm:$0xff]  ;;  %v4391_v29 = vpop.permute.xlu0 %4390  ;;  %10608 = vmatprep.mubr.msk.f32.mxu1 %vm4270_vm3, %v13882_v47 }
 0x2c7   : > { %10664 = vmatprep.mubr.msk.f32.mxu0 %vm4270_vm3, %v13884_v63  ;;  %4471 = vst.msk [vmem:[#allocation3 + $0xd9] sm:$0xff] %vm4270_vm3, %v4391_v29  ;;  %10609 = vmatmul.mubr.msk.f32.gmra.mxu1 %vm4270_vm3, %v13892_v44  ;;  %v13910_v29 = vld [vmem:[#allocation3 + $0xc9] sm:$0xff] }
 0x2c8   : > { %10665 = vmatmul.mubr.msk.f32.gmra.mxu0 %vm4270_vm3, %v13886_v12  ;;  %v4397_v33 = vpop.permute.xlu1 %4396  ;;  %15881 = vst [vmem:[#allocation83_spill] sm:$0xff] %v13910_v29 }
 0x2c9   : > { %4474 = vst.msk [vmem:[#allocation3 + $0xf9] sm:$0xff] %vm4270_vm3, %v4397_v33  ;;  %v13900_v41 = vld [vmem:[#allocation3 + $0xc1] sm:$0xff]  ;;  %v11249_v33 = vpop.eup %11248 }
 0x2ca   : > { %15880 = vst [vmem:[#allocation89_spill] sm:$0xff] %v13900_v41  ;;  %v13902_v57 = vld [vmem:[#allocation3 + $0xc0] sm:$0xff]  ;;  %v13904_v47 = vld [vmem:[#allocation3 + $0xc8] sm:$0xff]  ;;  %v4395_v27 = vpop.permute.xlu0 %4394  ;;  %10611 = vmatprep.mubr.msk.f32.mxu1 %vm4270_vm3, %v13900_v41  ;;  %v11251_v6 = vpop.eup %11250  ;;  %v4013_v3 = vadd.f32 1.0, %v11249_v33 }
 0x2cb   : > { %10667 = vmatprep.mubr.msk.f32.mxu0 %vm4270_vm3, %v13902_v57  ;;  %4473 = vst.msk [vmem:[#allocation3 + $0xf1] sm:$0xff] %vm4270_vm3, %v4395_v27  ;;  %10612 = vmatmul.mubr.msk.f32.gmra.mxu1 %vm4270_vm3, %v13910_v29  ;;  %v4012_v29 = vadd.f32 1.0, %v11251_v6 }
 0x2cc   : > { %10668 = vmatmul.mubr.msk.f32.gmra.mxu0 %vm4270_vm3, %v13904_v47  ;;  %v4401_v44 = vpop.permute.xlu1 %4400  ;;  %v13929_v27 = vld [vmem:[#allocation3 + $0xe1] sm:$0xff]  ;;  %11252 = vrcp.f32 %v4013_v3 }
 0x2cd   : > { %4476 = vst.msk [vmem:[#allocation3 + $0x111] sm:$0xff] %vm4270_vm3, %v4401_v44  ;;  %15883 = vst [vmem:[#allocation85_spill] sm:$0xff] %v13929_v27  ;;  %11254 = vrcp.f32 %v4012_v29 }
 0x2ce   : > { %v4399_v4 = vpop.permute.xlu0 %4398  ;;  %v13918_v41 = vld [vmem:[#allocation3 + $0xd9] sm:$0xff] }
 0x2cf   : > { %15882 = vst [vmem:[#allocation84_spill] sm:$0xff] %v13918_v41  ;;  %v13920_v46 = vld [vmem:[#allocation3 + $0xd8] sm:$0xff]  ;;  %v13922_v16 = vld [vmem:[#allocation3 + $0xe0] sm:$0xff]  ;;  %4475 = vst.msk [vmem:[#allocation3 + $0x109] sm:$0xff] %vm4270_vm3, %v4399_v4  ;;  %10614 = vmatprep.mubr.msk.f32.mxu1 %vm4270_vm3, %v13918_v41 }
 0x2d0   : > { %10670 = vmatprep.mubr.msk.f32.mxu0 %vm4270_vm3, %v13920_v46  ;;  %v4405_v44 = vpop.permute.xlu1 %4404  ;;  %10615 = vmatmul.mubr.msk.f32.gmra.mxu1 %vm4270_vm3, %v13929_v27  ;;  %v13947_v27 = vld [vmem:[#allocation3 + $0xf9] sm:$0xff] }
 0x2d1   : > { %10671 = vmatmul.mubr.msk.f32.gmra.mxu0 %vm4270_vm3, %v13922_v16  ;;  %4478 = vst.msk [vmem:[#allocation3 + $0x129] sm:$0xff] %vm4270_vm3, %v4405_v44  ;;  %15885 = vst [vmem:[#allocation92_spill] sm:$0xff] %v13947_v27 }
 0x2d2   : > { %v4403_v33 = vpop.permute.xlu0 %4402  ;;  %v13936_v4 = vld [vmem:[#allocation3 + $0xf1] sm:$0xff] }
 0x2d3   : > { %15884 = vst [vmem:[#allocation68_spill] sm:$0xff] %v13936_v4  ;;  %v13938_v30 = vld [vmem:[#allocation3 + $0xf0] sm:$0xff]  ;;  %v13940_v41 = vld [vmem:[#allocation3 + $0xf8] sm:$0xff]  ;;  %4477 = vst.msk [vmem:[#allocation3 + $0x121] sm:$0xff] %vm4270_vm3, %v4403_v33  ;;  %10617 = vmatprep.mubr.msk.f32.mxu1 %vm4270_vm3, %v13936_v4 }
 0x2d4   : > { %10673 = vmatprep.mubr.msk.f32.mxu0 %vm4270_vm3, %v13938_v30  ;;  %v4409_v6 = vpop.permute.xlu1 %4408  ;;  %10618 = vmatmul.mubr.msk.f32.gmra.mxu1 %vm4270_vm3, %v13947_v27  ;;  %v13965_v27 = vld [vmem:[#allocation3 + $0x111] sm:$0xff] }
 0x2d5   : > { %10674 = vmatmul.mubr.msk.f32.gmra.mxu0 %vm4270_vm3, %v13940_v41  ;;  %4480 = vst.msk [vmem:[#allocation3 + $0x141] sm:$0xff] %vm4270_vm3, %v4409_v6  ;;  %15887 = vst [vmem:[#allocation87_spill] sm:$0xff] %v13965_v27 }
 0x2d6   : > { %v4407_v3 = vpop.permute.xlu0 %4406  ;;  %v13954_v44 = vld [vmem:[#allocation3 + $0x109] sm:$0xff] }
 0x2d7   : > { %15886 = vst [vmem:[#allocation95_spill] sm:$0xff] %v13954_v44  ;;  %v13956_v33 = vld [vmem:[#allocation3 + $0x108] sm:$0xff]  ;;  %v13958_v4 = vld [vmem:[#allocation3 + $0x110] sm:$0xff]  ;;  %4479 = vst.msk [vmem:[#allocation3 + $0x139] sm:$0xff] %vm4270_vm3, %v4407_v3  ;;  %10620 = vmatprep.mubr.msk.f32.mxu1 %vm4270_vm3, %v13954_v44 }
 0x2d8   : > { %10676 = vmatprep.mubr.msk.f32.mxu0 %vm4270_vm3, %v13956_v33  ;;  %v4413_v29 = vpop.permute.xlu1 %4412  ;;  %10621 = vmatmul.mubr.msk.f32.gmra.mxu1 %vm4270_vm3, %v13965_v27  ;;  %v13983_v27 = vld [vmem:[#allocation3 + $0x129] sm:$0xff] }
 0x2d9   : > { %10677 = vmatmul.mubr.msk.f32.gmra.mxu0 %vm4270_vm3, %v13958_v4  ;;  %4482 = vst.msk [vmem:[#allocation3 + $0x159] sm:$0xff] %vm4270_vm3, %v4413_v29  ;;  %15889 = vst [vmem:[#allocation90_spill] sm:$0xff] %v13983_v27  ;;  %v14003_v37 = vpop.eup %11252 }
 0x2da   : > { %v4411_v6 = vpop.permute.xlu0 %4410  ;;  %v13972_v59 = vld [vmem:[#allocation3 + $0x121] sm:$0xff]  ;;  %15892 = vst [vmem:[#allocation94_spill] sm:$0xff] %v14003_v37 }
 0x2db   : > { %15888 = vst [vmem:[#allocation88_spill] sm:$0xff] %v13972_v59  ;;  %v13974_v3 = vld [vmem:[#allocation3 + $0x120] sm:$0xff]  ;;  %v13976_v44 = vld [vmem:[#allocation3 + $0x128] sm:$0xff]  ;;  %4481 = vst.msk [vmem:[#allocation3 + $0x151] sm:$0xff] %vm4270_vm3, %v4411_v6  ;;  %10623 = vmatprep.mubr.msk.f32.mxu1 %vm4270_vm3, %v13972_v59 }
 0x2dc   : > { %10679 = vmatprep.mubr.msk.f32.mxu0 %vm4270_vm3, %v13974_v3  ;;  %v4417_v58 = vpop.permute.xlu1 %4416  ;;  %10624 = vmatmul.mubr.msk.f32.gmra.mxu1 %vm4270_vm3, %v13983_v27  ;;  %v14001_v27 = vld [vmem:[#allocation3 + $0x141] sm:$0xff] }
 0x2dd   : > { %10680 = vmatmul.mubr.msk.f32.gmra.mxu0 %vm4270_vm3, %v13976_v44  ;;  %4484 = vst.msk [vmem:[#allocation3 + $0x171] sm:$0xff] %vm4270_vm3, %v4417_v58  ;;  %15891 = vst [vmem:[#allocation93_spill] sm:$0xff] %v14001_v27 }
 0x2de   : > { %v4415_v29 = vpop.permute.xlu0 %4414  ;;  %v13990_v34 = vld [vmem:[#allocation3 + $0x139] sm:$0xff] }
 0x2df   : > { %15890 = vst [vmem:[#allocation91_spill] sm:$0xff] %v13990_v34  ;;  %v13992_v6 = vld [vmem:[#allocation3 + $0x138] sm:$0xff]  ;;  %v13994_v59 = vld [vmem:[#allocation3 + $0x140] sm:$0xff]  ;;  %4483 = vst.msk [vmem:[#allocation3 + $0x169] sm:$0xff] %vm4270_vm3, %v4415_v29  ;;  %10626 = vmatprep.mubr.msk.f32.mxu1 %vm4270_vm3, %v13990_v34  ;;  %v14010_v29 = vpop.eup %11254 }
 0x2e0   : > { %10682 = vmatprep.mubr.msk.f32.mxu0 %vm4270_vm3, %v13992_v6  ;;  %v4205_v58 = vpop.permute.xlu1 %4204  ;;  %10627 = vmatmul.mubr.msk.f32.gmra.mxu1 %vm4270_vm3, %v14001_v27  ;;  %15893 = vst [vmem:[#allocation96_spill] sm:$0xff] %v14010_v29  ;;  %v14022_v27 = vld [vmem:[#allocation3 + $0x159] sm:$0xff] }
 0x2e1   : > { %10683 = vmatmul.mubr.msk.f32.gmra.mxu0 %vm4270_vm3, %v13994_v59  ;;  %v4269_v43 = vmul.f32 %v14003_v37, %v4205_v58  ;;  %15894 = vst [vmem:[#allocation97_spill] sm:$0xff] %v14022_v27  ;;  %v5202_v37 = vld [vmem:[#allocation3 + $0x2] sm:$0xff] }
 0x2e2   : > { %v4203_v15 = vpop.permute.xlu0 %4202  ;;  %v14012_v34 = vld [vmem:[#allocation3 + $0x151] sm:$0xff] }
 0x2e3   : > { %v14014_v13 = vld [vmem:[#allocation3 + $0x150] sm:$0xff]  ;;  %v14016_v26 = vld [vmem:[#allocation3 + $0x158] sm:$0xff]  ;;  %v4268_v24 = vmul.f32 %v14010_v29, %v4203_v15  ;;  %4420 = vrot.lane.b32.xlu1 %v4269_v43, %s11352_s8  ;;  %10629 = vmatprep.mubr.msk.f32.mxu1 %vm4270_vm3, %v14012_v34 }
 0x2e4   : > { %10685 = vmatprep.mubr.msk.f32.mxu0 %vm4270_vm3, %v14014_v13  ;;  %10630 = vmatmul.mubr.msk.f32.gmra.mxu1 %vm4270_vm3, %v14022_v27  ;;  %v14041_v29 = vld [vmem:[#allocation3 + $0x171] sm:$0xff] }
 0x2e5   : > { %10686 = vmatmul.mubr.msk.f32.gmra.mxu0 %vm4270_vm3, %v14016_v26  ;;  %4418 = vrot.lane.b32.xlu0 %v4268_v24, %s11352_s8  ;;  %v5203_v24 = vld [vmem:[#allocation3 + $0xa] sm:$0xff]  ;;  %s15447_s8 = scalar_lea.hbm %s15502_s5, %s9399_s13 }
 0x2e6   : > { %v14031_v58 = vld [vmem:[#allocation3 + $0x169] sm:$0xff]  ;;  %v10645_v27 = vpop.f32.mrf.mxu0 }
 0x2e7   : > { %15895 = vst [vmem:[#allocation98_spill] sm:$0xff] %v14031_v58  ;;  %v14033_v15 = vld [vmem:[#allocation3 + $0x168] sm:$0xff]  ;;  %v14035_v43 = vld [vmem:[#allocation3 + $0x170] sm:$0xff]  ;;  %8287 = vrot.lane.b32.xlu1 %v13484_v45, %s11353_s30  ;;  %10632 = vmatprep.mubr.msk.f32.mxu1 %vm4270_vm3, %v14031_v58 }
 0x2e8   : > { %10688 = vmatprep.mubr.msk.f32.mxu0 %vm4270_vm3, %v14033_v15  ;;  %10633 = vmatmul.mubr.msk.f32.gmra.mxu1 %vm4270_vm3, %v14041_v29  ;;  %v10589_v45 = vpop.f32.mrf.mxu1 }
 0x2e9   : > { %10689 = vmatmul.mubr.msk.f32.gmra.mxu0 %vm4270_vm3, %v14035_v43  ;;  %8285 = vrot.lane.b32.xlu0 %v13502_v32, %s11353_s30  ;;  %v14054_v58 = vadd.f32 %v10645_v27, %v10589_v45  ;;  %v14062_v32 = vld [vmem:[#allocation3 + $0x1a] sm:$0xff]  ;;  %v14075_v45 = vld [vmem:[#allocation3 + $0x22] sm:$0xff]  ;;  %v14098_v27 = vld [vmem:[#allocation3 + $0x4a] sm:$0xff] }
 0x2ea   : > { %10755 = vmatprep.mubr.msk.f32.mxu0 %vm4270_vm3, %v13774_v56  ;;  %10699 = vmatprep.mubr.msk.f32.mxu1 %vm4270_vm3, %v5202_v37  ;;  %v9214_v56 = vld [vmem:[%s15500_s3 + $0x90] sm:$0xff] }
 0x2eb   : > { %15896 = vst [vmem:[#allocation99_spill] sm:$0xff] %v14054_v58  ;;  %8291 = vrot.lane.b32.xlu1 %v13517_v9, %s11353_s30  ;;  %v14094_v37 = vld [vmem:[#allocation3 + $0x3a] sm:$0xff]  ;;  %v15906_v58 = vld [vmem:[#allocation59_spill] sm:$0xff] }
 0x2ec   : > { %10700 = vmatmul.mubr.msk.f32.vlgmr.msra.gmra.mxu1 %vm4270_vm3, %v5203_v24  ;;  %v9212_v24 = vld [vmem:[%s15500_s3 + $0x80] sm:$0xff]  ;;  %v9285_v9 = vld [vmem:[%s15500_s3 + $0xc8] sm:$0xff] }
 0x2ed   : > { %10756 = vmatmul.mubr.msk.f32.vlgmr.msra.gmra.mxu0 %vm4270_vm3, %v13776_v50  ;;  %10804 = vmatpush3.msra.mxu1 %v13753_v7  ;;  %v14079_v7 = vld [vmem:[#allocation3 + $0x32] sm:$0xff] }
 0x2ee   : > { %10702 = vmatprep.mubr.msk.f32.mxu1 %vm4270_vm3, %v14062_v32  ;;  %10758 = vmatprep.mubr.msk.f32.mxu0 %vm4270_vm3, %v13792_v17  ;;  %v9213_v50 = vld [vmem:[%s15500_s3 + $0x88] sm:$0xff] }
 0x2ef   : > { %8289 = vrot.lane.b32.xlu0 %v13531_v28, %s11353_s30  ;;  %8295 = vrot.lane.b32.xlu1 %v13542_v21, %s11353_s30  ;;  %v14299_v21 = vld [vmem:[#allocation3 + $0x152] sm:$0xff]  ;;  %v15904_v28 = vld [vmem:[#allocation77_spill] sm:$0xff] }
 0x2f0   : > { %10703 = vmatmul.mubr.msk.f32.gmra.mxu1 %vm4270_vm3, %v14075_v45  ;;  %10805 = vmatprep.subr.mxu1 %v9214_v56 }
 0x2f1   : > { %10759 = vmatmul.mubr.msk.f32.gmra.mxu0 %vm4270_vm3, %v13794_v42  ;;  %10705 = vmatprep.mubr.msk.f32.mxu1 %vm4270_vm3, %v14079_v7 }
 0x2f2   : > { %10761 = vmatprep.mubr.msk.f32.mxu0 %vm4270_vm3, %v13810_v10  ;;  %10806 = vmatpush3.msra.mxu1 %v9214_v56  ;;  %v14113_v56 = vld [vmem:[#allocation3 + $0x52] sm:$0xff] }
 0x2f3   : > { %8293 = vrot.lane.b32.xlu0 %v13558_v2, %s11353_s30  ;;  %8299 = vrot.lane.b32.xlu1 %v13568_v60, %s11353_s30  ;;  %v14117_v60 = vld [vmem:[#allocation3 + $0x62] sm:$0xff] }
 0x2f4   : > { %10706 = vmatmul.mubr.msk.f32.gmra.mxu1 %vm4270_vm3, %v14094_v37  ;;  %10807 = vmatprep.subr.mxu1 %v9213_v50  ;;  %v14295_v2 = vld [vmem:[#allocation3 + $0x142] sm:$0xff] }
 0x2f5   : > { %10762 = vmatmul.mubr.msk.f32.gmra.mxu0 %vm4270_vm3, %v13812_v14  ;;  %10708 = vmatprep.mubr.msk.f32.mxu1 %vm4270_vm3, %v14098_v27 }
 0x2f6   : > { %10764 = vmatprep.mubr.msk.f32.mxu0 %vm4270_vm3, %v13828_v31  ;;  %10808 = vmatpush3.msra.mxu1 %v9213_v50  ;;  %v14129_v50 = vld [vmem:[#allocation3 + $0x6a] sm:$0xff] }
 0x2f7   : > { %8297 = vrot.lane.b32.xlu0 %v13582_v61, %s11353_s30  ;;  %8303 = vrot.lane.b32.xlu1 %v13600_v25, %s11353_s30  ;;  %v14134_v25 = vld [vmem:[%s15500_s3 + $0xd8] sm:$0xff]  ;;  %v14138_v61 = vld [vmem:[#allocation3 + $0x7a] sm:$0xff] }
 0x2f8   : > { %10709 = vmatmul.mubr.msk.f32.gmra.mxu1 %vm4270_vm3, %v14113_v56  ;;  %10809 = vmatprep.subr.mxu1 %v9212_v24 }
 0x2f9   : > { %10765 = vmatmul.mubr.msk.f32.gmra.mxu0 %vm4270_vm3, %v13830_v48  ;;  %10711 = vmatprep.mubr.msk.f32.mxu1 %vm4270_vm3, %v14117_v60 }
 0x2fa   : > { %10767 = vmatprep.mubr.msk.f32.mxu0 %vm4270_vm3, %v13848_v55  ;;  %10810 = vmatpush3.msra.mxu1 %v9212_v24  ;;  %v9250_v24 = vld [vmem:[%s15500_s3 + $0xb0] sm:$0xff] }
 0x2fb   : > { %8301 = vrot.lane.b32.xlu0 %v13609_v22, %s11353_s30  ;;  %8307 = vrot.lane.b32.xlu1 %v13622_v5, %s11353_s30  ;;  %v14159_v5 = vld [vmem:[#allocation3 + $0x92] sm:$0xff]  ;;  %v14178_v22 = vld [vmem:[#allocation3 + $0xaa] sm:$0xff] }
 0x2fc   : > { %10712 = vmatmul.mubr.msk.f32.gmra.mxu1 %vm4270_vm3, %v14129_v50  ;;  %10860 = vmatpush3.msra.mxu0 %v13768_v35  ;;  %v14155_v35 = vld [vmem:[#allocation3 + $0x82] sm:$0xff] }
 0x2fd   : > { %10768 = vmatmul.mubr.msk.f32.gmra.mxu0 %vm4270_vm3, %v13850_v36  ;;  %10714 = vmatprep.mubr.msk.f32.mxu1 %vm4270_vm3, %v14138_v61 }
 0x2fe   : > { %10770 = vmatprep.mubr.msk.f32.mxu0 %vm4270_vm3, %v13866_v53  ;;  %10915 = vmatprep.subr.mxu1 %v14134_v25 }
 0x2ff   : > { %8305 = vrot.lane.b32.xlu0 %v13634_v40, %s11353_s30  ;;  %8311 = vrot.lane.b32.xlu1 %v13643_v19, %s11353_s30  ;;  %v9249_v40 = vld [vmem:[%s15500_s3 + $0xa8] sm:$0xff] }
 0x300   : > { %10715 = vmatmul.mubr.msk.f32.gmra.mxu1 %vm4270_vm3, %v14155_v35  ;;  %10861 = vmatprep.subr.mxu0 %v9250_v24  ;;  %v14174_v19 = vld [vmem:[#allocation3 + $0x9a] sm:$0xff] }
 0x301   : > { %10771 = vmatmul.mubr.msk.f32.gmra.mxu0 %vm4270_vm3, %v13868_v49  ;;  %10717 = vmatprep.mubr.msk.f32.mxu1 %vm4270_vm3, %v14159_v5 }
 0x302   : > { %10773 = vmatprep.mubr.msk.f32.mxu0 %vm4270_vm3, %v13884_v63  ;;  %10862 = vmatpush3.msra.mxu0 %v9250_v24  ;;  %v9248_v24 = vld [vmem:[%s15500_s3 + $0xa0] sm:$0xff] }
 0x303   : > { %8309 = vrot.lane.b32.xlu0 %v13652_v11, %s11353_s30  ;;  %8315 = vrot.lane.b32.xlu1 %v13661_v23, %s11353_s30  ;;  %v14193_v23 = vld [vmem:[#allocation3 + $0xb2] sm:$0xff]  ;;  %v14197_v11 = vld [vmem:[#allocation3 + $0xc2] sm:$0xff] }
 0x304   : > { %10718 = vmatmul.mubr.msk.f32.gmra.mxu1 %vm4270_vm3, %v14174_v19  ;;  %10863 = vmatprep.subr.mxu0 %v9249_v40 }
 0x305   : > { %10774 = vmatmul.mubr.msk.f32.gmra.mxu0 %vm4270_vm3, %v13886_v12  ;;  %10720 = vmatprep.mubr.msk.f32.mxu1 %vm4270_vm3, %v14178_v22 }
 0x306   : > { %10776 = vmatprep.mubr.msk.f32.mxu0 %vm4270_vm3, %v13902_v57  ;;  %10864 = vmatpush3.msra.mxu0 %v9249_v40  ;;  %v14206_v40 = vld [vmem:[%s15500_s3 + $0xf8] sm:$0xff] }
 0x307   : > { %8313 = vrot.lane.b32.xlu0 %v13672_v39, %s11353_s30  ;;  %8319 = vrot.lane.b32.xlu1 %v13677_v62, %s11353_s30  ;;  %v14214_v62 = vld [vmem:[#allocation3 + $0xca] sm:$0xff]  ;;  %v14218_v39 = vld [vmem:[#allocation3 + $0xda] sm:$0xff] }
 0x308   : > { %10721 = vmatmul.mubr.msk.f32.gmra.mxu1 %vm4270_vm3, %v14193_v23  ;;  %10865 = vmatprep.subr.mxu0 %v9248_v24 }
 0x309   : > { %10777 = vmatmul.mubr.msk.f32.gmra.mxu0 %vm4270_vm3, %v13904_v47  ;;  %10723 = vmatprep.mubr.msk.f32.mxu1 %vm4270_vm3, %v14197_v11 }
 0x30a   : > { %10779 = vmatprep.mubr.msk.f32.mxu0 %vm4270_vm3, %v13920_v46  ;;  %10866 = vmatpush3.msra.mxu0 %v9248_v24  ;;  %v14231_v24 = vld [vmem:[#allocation3 + $0xe2] sm:$0xff] }
 0x30b   : > { %8317 = vrot.lane.b32.xlu0 %v13682_v18, %s11353_s30  ;;  %8323 = vrot.lane.b32.xlu1 %v13687_v0, %s11353_s30  ;;  %v14235_v0 = vld [vmem:[#allocation3 + $0xf2] sm:$0xff]  ;;  %v14283_v18 = vld [vmem:[#allocation3 + $0x13a] sm:$0xff] }
 0x30c   : > { %10724 = vmatmul.mubr.msk.f32.gmra.mxu1 %vm4270_vm3, %v14214_v62  ;;  %10971 = vmatprep.subr.mxu0 %v14206_v40 }
 0x30d   : > { %10780 = vmatmul.mubr.msk.f32.gmra.mxu0 %vm4270_vm3, %v13922_v16  ;;  %10726 = vmatprep.mubr.msk.f32.mxu1 %vm4270_vm3, %v14218_v39 }
 0x30e   : > { %10782 = vmatprep.mubr.msk.f32.mxu0 %vm4270_vm3, %v13938_v30 }
 0x30f   : > { %8321 = vrot.lane.b32.xlu0 %v13691_v51, %s11353_s30  ;;  %8327 = vrot.lane.b32.xlu1 %v13695_v1, %s11353_s30  ;;  %v14247_v1 = vld [vmem:[#allocation3 + $0xfa] sm:$0xff]  ;;  %v14251_v51 = vld [vmem:[#allocation3 + $0x10a] sm:$0xff] }
 0x310   : > { %10727 = vmatmul.mubr.msk.f32.gmra.mxu1 %vm4270_vm3, %v14231_v24 }
 0x311   : > { %10783 = vmatmul.mubr.msk.f32.gmra.mxu0 %vm4270_vm3, %v13940_v41  ;;  %10729 = vmatprep.mubr.msk.f32.mxu1 %vm4270_vm3, %v14235_v0 }
 0x312   : > { %10785 = vmatprep.mubr.msk.f32.mxu0 %vm4270_vm3, %v13956_v33 }
 0x313   : > { %8325 = vrot.lane.b32.xlu0 %v13699_v54, %s11353_s30  ;;  %8331 = vrot.lane.b32.xlu1 %v13703_v8, %s11353_s30  ;;  %v14263_v8 = vld [vmem:[#allocation3 + $0x112] sm:$0xff]  ;;  %v14267_v54 = vld [vmem:[#allocation3 + $0x122] sm:$0xff] }
 0x314   : > { %10730 = vmatmul.mubr.msk.f32.gmra.mxu1 %vm4270_vm3, %v14247_v1 }
 0x315   : > { %10786 = vmatmul.mubr.msk.f32.gmra.mxu0 %vm4270_vm3, %v13958_v4  ;;  %10732 = vmatprep.mubr.msk.f32.mxu1 %vm4270_vm3, %v14251_v51 }
 0x316   : > { %10788 = vmatprep.mubr.msk.f32.mxu0 %vm4270_vm3, %v13974_v3 }
 0x317   : > { %8329 = vrot.lane.b32.xlu0 %v13710_v20, %s11353_s30  ;;  %8335 = vrot.lane.b32.xlu1 %v13712_v38, %s11353_s30  ;;  %v15897_v38 = vld [vmem:[#allocation76_spill] sm:$0xff]  ;;  %v14279_v20 = vld [vmem:[#allocation3 + $0x12a] sm:$0xff] }
 0x318   : > { %10733 = vmatmul.mubr.msk.f32.gmra.mxu1 %vm4270_vm3, %v14263_v8 }
 0x319   : > { %10789 = vmatmul.mubr.msk.f32.gmra.mxu0 %vm4270_vm3, %v13976_v44  ;;  %10735 = vmatprep.mubr.msk.f32.mxu1 %vm4270_vm3, %v14267_v54 }
 0x31a   : > { %10791 = vmatprep.mubr.msk.f32.mxu0 %vm4270_vm3, %v13992_v6 }
 0x31b   : > { %8333 = vrot.lane.b32.xlu0 %v13717_v52, %s11353_s30  ;;  %8339 = vrot.lane.b32.xlu1 %v15897_v38, %s11353_s30  ;;  %v15898_v52 = vld [vmem:[#allocation75_spill] sm:$0xff]  ;;  %v15899_v38 = vld [vmem:[#allocation58_spill] sm:$0xff] }
 0x31c   : > { %10736 = vmatmul.mubr.msk.f32.gmra.mxu1 %vm4270_vm3, %v14279_v20 }
 0x31d   : > { %10792 = vmatmul.mubr.msk.f32.gmra.mxu0 %vm4270_vm3, %v13994_v59  ;;  %10738 = vmatprep.mubr.msk.f32.mxu1 %vm4270_vm3, %v14283_v18  ;;  %v15900_v59 = vld [vmem:[#allocation65_spill] sm:$0xff] }
 0x31e   : > { %10794 = vmatprep.mubr.msk.f32.mxu0 %vm4270_vm3, %v14014_v13 }
 0x31f   : > { %8337 = vrot.lane.b32.xlu0 %v15898_v52, %s11353_s30  ;;  %8343 = vrot.lane.b32.xlu1 %v15899_v38, %s11353_s30  ;;  %v14309_v38 = vld [vmem:[#allocation3 + $0x15a] sm:$0xff]  ;;  %v14313_v52 = vld [vmem:[#allocation3 + $0x16a] sm:$0xff] }
 0x320   : > { %10739 = vmatmul.mubr.msk.f32.gmra.mxu1 %vm4270_vm3, %v14295_v2  ;;  %15901 = vst [vmem:[#allocation100_spill] sm:$0xff] %v14313_v52 }
 0x321   : > { %10795 = vmatmul.mubr.msk.f32.gmra.mxu0 %vm4270_vm3, %v14016_v26  ;;  %10741 = vmatprep.mubr.msk.f32.mxu1 %vm4270_vm3, %v14299_v21  ;;  %v14319_v26 = vld [vmem:[#allocation3 + $0x172] sm:$0xff] }
 0x322   : > { %10797 = vmatprep.mubr.msk.f32.mxu0 %vm4270_vm3, %v14033_v15  ;;  %15902 = vst [vmem:[#allocation101_spill] sm:$0xff] %v14319_v26  ;;  %v15903_v15 = vld [vmem:[#allocation79_spill] sm:$0xff] }
 0x323   : > { %8341 = vrot.lane.b32.xlu0 %v15900_v59, %s11353_s30  ;;  %v9286_v59 = vld [vmem:[%s15500_s3 + $0xd0] sm:$0xff] }
 0x324   : > { %10742 = vmatmul.mubr.msk.f32.gmra.mxu1 %vm4270_vm3, %v14309_v38 }
 0x325   : > { %10798 = vmatmul.mubr.msk.f32.gmra.mxu0 %vm4270_vm3, %v14035_v43  ;;  %10744 = vmatprep.mubr.msk.f32.mxu1 %vm4270_vm3, %v14313_v52  ;;  %v15905_v43 = vld [vmem:[#allocation60_spill] sm:$0xff]  ;;  %v15916_v52 = vld [vmem:[#allocation82_spill] sm:$0xff] }
 0x328   : > { %10745 = vmatmul.mubr.msk.f32.gmra.mxu1 %vm4270_vm3, %v14319_v26  ;;  %v15910_v26 = vld [vmem:[#allocation63_spill] sm:$0xff] }
 0x329   : > { %10811 = vmatprep.mubr.msk.f32.mxu1 %vm4270_vm3, %v15903_v15  ;;  %v9284_v15 = vld [vmem:[%s15500_s3 + $0xc0] sm:$0xff] }
 0x32c   : > { %10812 = vmatmul.mubr.msk.f32.vlgmr.msra.gmra.mxu1 %vm4270_vm3, %v15904_v28  ;;  %v15907_v28 = vld [vmem:[#allocation62_spill] sm:$0xff] }
 0x32d   : > { %10916 = vmatpush3.msra.mxu1 %v14134_v25  ;;  %10814 = vmatprep.mubr.msk.f32.mxu1 %vm4270_vm3, %v15905_v43  ;;  %v9359_v25 = vld [vmem:[%s15500_s3 + $0x118] sm:$0xff] }
 0x32e   : > { %10917 = vmatprep.subr.mxu1 %v9286_v59  ;;  %v15908_v43 = vld [vmem:[#allocation78_spill] sm:$0xff] }
 0x32f   : > { %10918 = vmatpush3.msra.mxu1 %v9286_v59  ;;  %v15909_v59 = vld [vmem:[#allocation64_spill] sm:$0xff] }
 0x330   : > { %10815 = vmatmul.mubr.msk.f32.gmra.mxu1 %vm4270_vm3, %v15906_v58  ;;  %10919 = vmatprep.subr.mxu1 %v9285_v9  ;;  %v15911_v58 = vld [vmem:[#allocation66_spill] sm:$0xff] }
 0x331   : > { %10817 = vmatprep.mubr.msk.f32.mxu1 %vm4270_vm3, %v15907_v28  ;;  %10920 = vmatpush3.msra.mxu1 %v9285_v9  ;;  %v15912_v9 = vld [vmem:[#allocation80_spill] sm:$0xff]  ;;  %v15913_v28 = vld [vmem:[#allocation67_spill] sm:$0xff] }
 0x332   : > { %10921 = vmatprep.subr.mxu1 %v9284_v15 }
 0x333   : > { %10922 = vmatpush3.msra.mxu1 %v9284_v15  ;;  %v15914_v15 = vld [vmem:[#allocation86_spill] sm:$0xff] }
 0x334   : > { %10818 = vmatmul.mubr.msk.f32.gmra.mxu1 %vm4270_vm3, %v15908_v43  ;;  %11027 = vmatprep.subr.mxu1 %v9359_v25  ;;  %v15915_v43 = vld [vmem:[#allocation81_spill] sm:$0xff] }
 0x335   : > { %10820 = vmatprep.mubr.msk.f32.mxu1 %vm4270_vm3, %v15909_v59  ;;  %v15917_v59 = vld [vmem:[#allocation89_spill] sm:$0xff] }
 0x338   : > { %10821 = vmatmul.mubr.msk.f32.gmra.mxu1 %vm4270_vm3, %v15910_v26  ;;  %v15918_v26 = vld [vmem:[#allocation83_spill] sm:$0xff] }
 0x339   : > { %10823 = vmatprep.mubr.msk.f32.mxu1 %vm4270_vm3, %v15911_v58  ;;  %v15919_v58 = vld [vmem:[#allocation84_spill] sm:$0xff] }
 0x33c   : > { %10824 = vmatmul.mubr.msk.f32.gmra.mxu1 %vm4270_vm3, %v15912_v9  ;;  %v15920_v9 = vld [vmem:[#allocation85_spill] sm:$0xff] }
 0x33d   : > { %10826 = vmatprep.mubr.msk.f32.mxu1 %vm4270_vm3, %v15913_v28  ;;  %v15921_v28 = vld [vmem:[#allocation68_spill] sm:$0xff] }
 0x340   : > { %10827 = vmatmul.mubr.msk.f32.gmra.mxu1 %vm4270_vm3, %v15914_v15  ;;  %v15922_v15 = vld [vmem:[#allocation92_spill] sm:$0xff] }
 0x341   : > { %10829 = vmatprep.mubr.msk.f32.mxu1 %vm4270_vm3, %v15915_v43  ;;  %v15923_v43 = vld [vmem:[#allocation95_spill] sm:$0xff] }
 0x344   : > { %10830 = vmatmul.mubr.msk.f32.gmra.mxu1 %vm4270_vm3, %v15916_v52  ;;  %v15924_v52 = vld [vmem:[#allocation87_spill] sm:$0xff] }
 0x345   : > { %10832 = vmatprep.mubr.msk.f32.mxu1 %vm4270_vm3, %v15917_v59 }
 0x348   : > { %10833 = vmatmul.mubr.msk.f32.gmra.mxu1 %vm4270_vm3, %v15918_v26  ;;  %v15925_v26 = vld [vmem:[#allocation88_spill] sm:$0xff] }
 0x349   : > { %10835 = vmatprep.mubr.msk.f32.mxu1 %vm4270_vm3, %v15919_v58 }
 0x34c   : > { %10836 = vmatmul.mubr.msk.f32.gmra.mxu1 %vm4270_vm3, %v15920_v9  ;;  %v15926_v9 = vld [vmem:[#allocation90_spill] sm:$0xff] }
 0x34d   : > { %10838 = vmatprep.mubr.msk.f32.mxu1 %vm4270_vm3, %v15921_v28  ;;  %v15927_v28 = vld [vmem:[#allocation91_spill] sm:$0xff] }
 0x350   : > { %10839 = vmatmul.mubr.msk.f32.gmra.mxu1 %vm4270_vm3, %v15922_v15  ;;  %v15928_v15 = vld [vmem:[#allocation93_spill] sm:$0xff] }
 0x351   : > { %10841 = vmatprep.mubr.msk.f32.mxu1 %vm4270_vm3, %v15923_v43 }
 0x354   : > { %10842 = vmatmul.mubr.msk.f32.gmra.mxu1 %vm4270_vm3, %v15924_v52 }
 0x355   : > { %v4421_v59 = vpop.permute.xlu1 %4420  ;;  %10844 = vmatprep.mubr.msk.f32.mxu1 %vm4270_vm3, %v15925_v26  ;;  %v15930_v26 = vld [vmem:[#allocation98_spill] sm:$0xff] }
 0x356   : > { %4486 = vst.msk [vmem:[#allocation3 + $0x189] sm:$0xff] %vm4270_vm3, %v4421_v59  ;;  %v15929_v59 = vld [vmem:[#allocation97_spill] sm:$0xff] }
 0x357   : > { %v4419_v58 = vpop.permute.xlu0 %4418 }
 0x358   : > { %4485 = vst.msk [vmem:[#allocation3 + $0x181] sm:$0xff] %vm4270_vm3, %v4419_v58  ;;  %10845 = vmatmul.mubr.msk.f32.gmra.mxu1 %vm4270_vm3, %v15926_v9  ;;  %v9322_v58 = vld [vmem:[%s15500_s3 + $0xf0] sm:$0xff] }
 0x359   : > { %10847 = vmatprep.mubr.msk.f32.mxu1 %vm4270_vm3, %v15927_v28 }
 0x35c   : > { %10848 = vmatmul.mubr.msk.f32.gmra.mxu1 %vm4270_vm3, %v15928_v15 }
 0x35d   : > { %10850 = vmatprep.mubr.msk.f32.mxu1 %vm4270_vm3, %v14012_v34 }
 0x35f   : > { %v14392_v43 = vld [vmem:[#allocation3 + $0x180] sm:$0xff]  ;;  %v14394_v52 = vld [vmem:[#allocation3 + $0x188] sm:$0xff] }
 0x360   : > { %10800 = vmatprep.mubr.msk.f32.mxu0 %vm4270_vm3, %v14392_v43  ;;  %10851 = vmatmul.mubr.msk.f32.gmra.mxu1 %vm4270_vm3, %v15929_v59  ;;  %v14408_v34 = vld [vmem:[#allocation3 + $0x181] sm:$0xff] }
 0x361   : > { %10801 = vmatmul.mubr.msk.f32.gmra.mxu0 %vm4270_vm3, %v14394_v52  ;;  %10853 = vmatprep.mubr.msk.f32.mxu1 %vm4270_vm3, %v15930_v26 }
 0x362   : > { %10867 = vmatprep.mubr.msk.f32.mxu0 %vm4270_vm3, %v14062_v32  ;;  %v14420_v32 = vld [vmem:[#allocation3 + $0x189] sm:$0xff] }
 0x364   : > { %10854 = vmatmul.mubr.msk.f32.gmra.mxu1 %vm4270_vm3, %v14041_v29  ;;  %v9321_v29 = vld [vmem:[%s15500_s3 + $0xe8] sm:$0xff] }
 0x365   : > { %10856 = vmatprep.mubr.msk.f32.mxu1 %vm4270_vm3, %v14408_v34  ;;  %10868 = vmatmul.mubr.msk.f32.vlgmr.msra.gmra.mxu0 %vm4270_vm3, %v14075_v45  ;;  %v9320_v45 = vld [vmem:[%s15500_s3 + $0xe0] sm:$0xff] }
 0x366   : > { %10870 = vmatprep.mubr.msk.f32.mxu0 %vm4270_vm3, %v14079_v7  ;;  %10972 = vmatpush3.msra.mxu0 %v14206_v40  ;;  %v14436_v7 = vpop.f32.mrf.mxu1  ;;  %v14438_v40 = vpop.f32.mrf.mxu0 }
 0x367   : > { %10973 = vmatprep.subr.mxu0 %v9322_v58 }
 0x368   : > { %10857 = vmatmul.mubr.msk.f32.gmra.mxu1 %vm4270_vm3, %v14420_v32  ;;  %10974 = vmatpush3.msra.mxu0 %v9322_v58 }
 0x369   : > { %10871 = vmatmul.mubr.msk.f32.gmra.mxu0 %vm4270_vm3, %v14094_v37  ;;  %10923 = vmatprep.mubr.msk.f32.mxu1 %vm4270_vm3, %v13792_v17  ;;  %v9358_v17 = vld [vmem:[%s15500_s3 + $0x110] sm:$0xff] }
 0x36a   : > { %10873 = vmatprep.mubr.msk.f32.mxu0 %vm4270_vm3, %v14098_v27  ;;  %10975 = vmatprep.subr.mxu0 %v9321_v29 }
 0x36b   : > { %10976 = vmatpush3.msra.mxu0 %v9321_v29 }
 0x36c   : > { %10924 = vmatmul.mubr.msk.f32.vlgmr.msra.gmra.mxu1 %vm4270_vm3, %v13794_v42  ;;  %10977 = vmatprep.subr.mxu0 %v9320_v45 }
 0x36d   : > { %11028 = vmatpush3.msra.mxu1 %v9359_v25  ;;  %10874 = vmatmul.mubr.msk.f32.gmra.mxu0 %vm4270_vm3, %v14113_v56 }
 0x36e   : > { %10926 = vmatprep.mubr.msk.f32.mxu1 %vm4270_vm3, %v13810_v10  ;;  %10876 = vmatprep.mubr.msk.f32.mxu0 %vm4270_vm3, %v14117_v60  ;;  %v10592_v37 = vpop.f32.mrf.mxu1  ;;  %v9357_v10 = vld [vmem:[%s15500_s3 + $0x108] sm:$0xff] }
 0x36f   : > { %v10648_v27 = vpop.f32.mrf.mxu0  ;;  %11029 = vmatprep.subr.mxu1 %v9358_v17  ;;  %10978 = vmatpush3.msra.mxu0 %v9320_v45 }
 0x370   : > { %v14451_v9 = vadd.f32 %v10648_v27, %v10592_v37  ;;  %10927 = vmatmul.mubr.msk.f32.gmra.mxu1 %vm4270_vm3, %v13812_v14  ;;  %v14455_v42 = vpop.f32.mrf.mxu1 }
 0x371   : > { %v14457_v25 = vpop.f32.mrf.mxu0  ;;  %10877 = vmatmul.mubr.msk.f32.gmra.mxu0 %vm4270_vm3, %v14129_v50  ;;  %10929 = vmatprep.mubr.msk.f32.mxu1 %vm4270_vm3, %v13828_v31  ;;  %v9356_v31 = vld [vmem:[%s15500_s3 + $0x100] sm:$0xff] }
 0x372   : > { %10879 = vmatprep.mubr.msk.f32.mxu0 %vm4270_vm3, %v14138_v61  ;;  %v10595_v60 = vpop.f32.mrf.mxu1  ;;  %11030 = vmatpush3.msra.mxu1 %v9358_v17 }
 0x373   : > { %v10651_v56 = vpop.f32.mrf.mxu0  ;;  %11031 = vmatprep.subr.mxu1 %v9357_v10 }
 0x374   : > { %v14468_v14 = vadd.f32 %v10651_v56, %v10595_v60  ;;  %10930 = vmatmul.mubr.msk.f32.gmra.mxu1 %vm4270_vm3, %v13830_v48  ;;  %v14472_v28 = vpop.f32.mrf.mxu1  ;;  %v6786_v60 = vld [vmem:[#allocation3 + $0x140] sm:$0xff] }
 0x375   : > { %v14474_v15 = vpop.f32.mrf.mxu0  ;;  %10880 = vmatmul.mubr.msk.f32.gmra.mxu0 %vm4270_vm3, %v14155_v35  ;;  %10932 = vmatprep.mubr.msk.f32.mxu1 %vm4270_vm3, %v13848_v55 }
 0x376   : > { %10882 = vmatprep.mubr.msk.f32.mxu0 %vm4270_vm3, %v14159_v5  ;;  %v10598_v61 = vpop.f32.mrf.mxu1  ;;  %11032 = vmatpush3.msra.mxu1 %v9357_v10 }
 0x377   : > { %v10654_v50 = vpop.f32.mrf.mxu0  ;;  %11033 = vmatprep.subr.mxu1 %v9356_v31 }
 0x378   : > { %v14485_v48 = vadd.f32 %v10654_v50, %v10598_v61  ;;  %10933 = vmatmul.mubr.msk.f32.gmra.mxu1 %vm4270_vm3, %v13850_v36  ;;  %v14489_v59 = vpop.f32.mrf.mxu1  ;;  %v15931_v61 = vld [vmem:[#allocation100_spill] sm:$0xff] }
 0x379   : > { %v14491_v26 = vpop.f32.mrf.mxu0  ;;  %10883 = vmatmul.mubr.msk.f32.gmra.mxu0 %vm4270_vm3, %v14174_v19  ;;  %10935 = vmatprep.mubr.msk.f32.mxu1 %vm4270_vm3, %v13866_v53  ;;  %v6788_v50 = vld [vmem:[#allocation3 + $0x158] sm:$0xff] }
 0x37a   : > { %10885 = vmatprep.mubr.msk.f32.mxu0 %vm4270_vm3, %v14178_v22  ;;  %v10601_v55 = vpop.f32.mrf.mxu1  ;;  %11034 = vmatpush3.msra.mxu1 %v9356_v31 }
 0x37b   : > { %v10657_v5 = vpop.f32.mrf.mxu0 }
 0x37c   : > { %v14499_v35 = vadd.f32 %v10657_v5, %v10601_v55  ;;  %10936 = vmatmul.mubr.msk.f32.gmra.mxu1 %vm4270_vm3, %v13868_v49  ;;  %v14503_v36 = vpop.f32.mrf.mxu1 }
 0x37d   : > { %v14505_v58 = vpop.f32.mrf.mxu0  ;;  %10886 = vmatmul.mubr.msk.f32.gmra.mxu0 %vm4270_vm3, %v14193_v23  ;;  %10938 = vmatprep.mubr.msk.f32.mxu1 %vm4270_vm3, %v13884_v63 }
 0x37e   : > { %10888 = vmatprep.mubr.msk.f32.mxu0 %vm4270_vm3, %v14197_v11 }
 0x37f   : > { %v10604_v22 = vpop.f32.mrf.mxu1 }
 0x380   : > { %v10660_v19 = vpop.f32.mrf.mxu0  ;;  %10939 = vmatmul.mubr.msk.f32.gmra.mxu1 %vm4270_vm3, %v13886_v12 }
 0x381   : > { %v14513_v53 = vadd.f32 %v10660_v19, %v10604_v22  ;;  %10889 = vmatmul.mubr.msk.f32.gmra.mxu0 %vm4270_vm3, %v14214_v62  ;;  %10941 = vmatprep.mubr.msk.f32.mxu1 %vm4270_vm3, %v13902_v57  ;;  %v14521_v49 = vpop.f32.mrf.mxu1  ;;  %v6789_v22 = vld [vmem:[#allocation3 + $0x168] sm:$0xff] }
 0x382   : > { %v14523_v23 = vpop.f32.mrf.mxu0  ;;  %10891 = vmatprep.mubr.msk.f32.mxu0 %vm4270_vm3, %v14218_v39 }
 0x383   : > { %v10607_v11 = vpop.f32.mrf.mxu1 }
 0x384   : > { %v10663_v63 = vpop.f32.mrf.mxu0  ;;  %10942 = vmatmul.mubr.msk.f32.gmra.mxu1 %vm4270_vm3, %v13904_v47 }
 0x385   : > { %v14529_v29 = vadd.f32 %v10663_v63, %v10607_v11  ;;  %10892 = vmatmul.mubr.msk.f32.gmra.mxu0 %vm4270_vm3, %v14231_v24  ;;  %10944 = vmatprep.mubr.msk.f32.mxu1 %vm4270_vm3, %v13920_v46  ;;  %v14535_v57 = vpop.f32.mrf.mxu1  ;;  %v15932_v11 = vld [vmem:[#allocation101_spill] sm:$0xff] }
 0x386   : > { %v14537_v12 = vpop.f32.mrf.mxu0  ;;  %10894 = vmatprep.mubr.msk.f32.mxu0 %vm4270_vm3, %v14235_v0 }
 0x387   : > { %v10610_v39 = vpop.f32.mrf.mxu1 }
 0x388   : > { %v10666_v62 = vpop.f32.mrf.mxu0  ;;  %10945 = vmatmul.mubr.msk.f32.gmra.mxu1 %vm4270_vm3, %v13922_v16 }
 0x389   : > { %v14543_v47 = vadd.f32 %v10666_v62, %v10610_v39  ;;  %10895 = vmatmul.mubr.msk.f32.gmra.mxu0 %vm4270_vm3, %v14247_v1  ;;  %10947 = vmatprep.mubr.msk.f32.mxu1 %vm4270_vm3, %v13938_v30  ;;  %v14549_v46 = vpop.f32.mrf.mxu1  ;;  %v6790_v62 = vld [vmem:[#allocation3 + $0x170] sm:$0xff] }
 0x38a   : > { %v14551_v24 = vpop.f32.mrf.mxu0  ;;  %10897 = vmatprep.mubr.msk.f32.mxu0 %vm4270_vm3, %v14251_v51 }
 0x38b   : > { %v10613_v0 = vpop.f32.mrf.mxu1 }
 0x38c   : > { %v10669_v45 = vpop.f32.mrf.mxu0  ;;  %10948 = vmatmul.mubr.msk.f32.gmra.mxu1 %vm4270_vm3, %v13940_v41 }
 0x38d   : > { %v14557_v16 = vadd.f32 %v10669_v45, %v10613_v0  ;;  %10898 = vmatmul.mubr.msk.f32.gmra.mxu0 %vm4270_vm3, %v14263_v8  ;;  %10950 = vmatprep.mubr.msk.f32.mxu1 %vm4270_vm3, %v13956_v33  ;;  %v4802_v30 = vpop.f32.mrf.mxu1 }
 0x38e   : > { %v5123_v1 = vpop.f32.mrf.mxu0  ;;  %10900 = vmatprep.mubr.msk.f32.mxu0 %vm4270_vm3, %v14267_v54 }
 0x38f   : > { %v14565_v17 = vadd.f32 %v5123_v1, %v4802_v30  ;;  %v14615_v30 = vld [vmem:[#allocation3 + $0x18a] sm:$0xff] }
 0x390   : > { %v10616_v51 = vpop.f32.mrf.mxu1  ;;  %10951 = vmatmul.mubr.msk.f32.gmra.mxu1 %vm4270_vm3, %v13958_v4 }
 0x391   : > { %v10672_v37 = vpop.f32.mrf.mxu0  ;;  %10901 = vmatmul.mubr.msk.f32.gmra.mxu0 %vm4270_vm3, %v14279_v20  ;;  %10953 = vmatprep.mubr.msk.f32.mxu1 %vm4270_vm3, %v13974_v3 }
 0x392   : > { %v14569_v41 = vadd.f32 %v10672_v37, %v10616_v51  ;;  %v4812_v8 = vpop.f32.mrf.mxu1  ;;  %10903 = vmatprep.mubr.msk.f32.mxu0 %vm4270_vm3, %v14283_v18  ;;  %v7153_v51 = vld [vmem:[#allocation3 + $0x31] sm:$0xff] }
 0x393   : > { %v5133_v33 = vpop.f32.mrf.mxu0 }
 0x394   : > { %v14577_v54 = vadd.f32 %v5133_v33, %v4812_v8  ;;  %v10619_v27 = vpop.f32.mrf.mxu1  ;;  %10954 = vmatmul.mubr.msk.f32.gmra.mxu1 %vm4270_vm3, %v13976_v44  ;;  %v6793_v33 = vld [vmem:[#allocation3 + $0x198] sm:$0xff] }
 0x395   : > { %v10675_v10 = vpop.f32.mrf.mxu0  ;;  %10904 = vmatmul.mubr.msk.f32.gmra.mxu0 %vm4270_vm3, %v14295_v2  ;;  %10956 = vmatprep.mubr.msk.f32.mxu1 %vm4270_vm3, %v13992_v6 }
 0x396   : > { %v14581_v4 = vadd.f32 %v10675_v10, %v10619_v27  ;;  %v4822_v20 = vpop.f32.mrf.mxu1  ;;  %10906 = vmatprep.mubr.msk.f32.mxu0 %vm4270_vm3, %v14299_v21 }
 0x397   : > { %v5143_v3 = vpop.f32.mrf.mxu0 }
 0x398   : > { %v14589_v18 = vadd.f32 %v5143_v3, %v4822_v20  ;;  %v10622_v56 = vpop.f32.mrf.mxu1  ;;  %10957 = vmatmul.mubr.msk.f32.gmra.mxu1 %vm4270_vm3, %v6786_v60  ;;  %v7154_v20 = vld [vmem:[#allocation3 + $0x39] sm:$0xff]  ;;  %v7155_v60 = vld [vmem:[#allocation3 + $0x49] sm:$0xff] }
 0x399   : > { %v10678_v31 = vpop.f32.mrf.mxu0  ;;  %10907 = vmatmul.mubr.msk.f32.gmra.mxu0 %vm4270_vm3, %v14309_v38  ;;  %10959 = vmatprep.mubr.msk.f32.mxu1 %vm4270_vm3, %v14014_v13  ;;  %v14608_v38 = vld [vmem:[#allocation3 + $0x182] sm:$0xff] }
 0x39a   : > { %v14592_v44 = vadd.f32 %v10678_v31, %v10622_v56  ;;  %v4832_v2 = vpop.f32.mrf.mxu1  ;;  %10909 = vmatprep.mubr.msk.f32.mxu0 %vm4270_vm3, %v15931_v61 }
 0x39b   : > { %v5153_v6 = vpop.f32.mrf.mxu0 }
 0x39c   : > { %v14600_v21 = vadd.f32 %v5153_v6, %v4832_v2  ;;  %v10625_v55 = vpop.f32.mrf.mxu1  ;;  %10960 = vmatmul.mubr.msk.f32.gmra.mxu1 %vm4270_vm3, %v6788_v50  ;;  %v7543_v50 = vld [vmem:[#allocation3 + $0x32] sm:$0xff] }
 0x39d   : > { %v10681_v5 = vpop.f32.mrf.mxu0  ;;  %10910 = vmatmul.mubr.msk.f32.gmra.mxu0 %vm4270_vm3, %v15932_v11  ;;  %10962 = vmatprep.mubr.msk.f32.mxu1 %vm4270_vm3, %v6789_v22 }
 0x39e   : > { %v14603_v19 = vadd.f32 %v10681_v5, %v10625_v55  ;;  %v4842_v13 = vpop.f32.mrf.mxu1  ;;  %10912 = vmatprep.mubr.msk.f32.mxu0 %vm4270_vm3, %v14608_v38  ;;  %v7157_v5 = vld [vmem:[#allocation3 + $0x61] sm:$0xff] }
 0x39f   : > { %v5163_v63 = vpop.f32.mrf.mxu0 }
 0x3a0   : > { %v14612_v39 = vadd.f32 %v5163_v63, %v4842_v13  ;;  %v10628_v0 = vpop.f32.mrf.mxu1  ;;  %10963 = vmatmul.mubr.msk.f32.gmra.mxu1 %vm4270_vm3, %v6790_v62  ;;  %v7544_v63 = vld [vmem:[#allocation3 + $0x3a] sm:$0xff] }
 0x3a1   : > { %v10684_v45 = vpop.f32.mrf.mxu0  ;;  %10913 = vmatmul.mubr.msk.f32.gmra.mxu0 %vm4270_vm3, %v14615_v30  ;;  %10965 = vmatprep.mubr.msk.f32.mxu1 %vm4270_vm3, %v14392_v43  ;;  %v6794_v43 = vld [vmem:[#allocation3 + $0x1a0] sm:$0xff] }
 0x3a2   : > { %v14617_v1 = vadd.f32 %v10684_v45, %v10628_v0  ;;  %v4852_v37 = vpop.f32.mrf.mxu1  ;;  %10979 = vmatprep.mubr.msk.f32.mxu0 %vm4270_vm3, %v7153_v51  ;;  %v7158_v45 = vld [vmem:[#allocation3 + $0x69] sm:$0xff] }
 0x3a3   : > { %v5173_v8 = vpop.f32.mrf.mxu0  ;;  %v7545_v51 = vld [vmem:[#allocation3 + $0x4a] sm:$0xff] }
 0x3a4   : > { %v14624_v27 = vadd.f32 %v5173_v8, %v4852_v37  ;;  %v10631_v10 = vpop.f32.mrf.mxu1  ;;  %10966 = vmatmul.mubr.msk.f32.gmra.mxu1 %vm4270_vm3, %v14394_v52  ;;  %v7156_v52 = vld [vmem:[#allocation3 + $0x51] sm:$0xff]  ;;  %v5044_v37 = vadd.f32 %v14438_v40, %v14436_v7  ;;  %v7160_v7 = vld [vmem:[#allocation3 + $0x81] sm:$0xff] }
 0x3a5   : > { %v10687_v3 = vpop.f32.mrf.mxu0  ;;  %10980 = vmatmul.mubr.msk.f32.vlgmr.msra.gmra.mxu0 %vm4270_vm3, %v7154_v20  ;;  %10968 = vmatprep.mubr.msk.f32.mxu1 %vm4270_vm3, %v6793_v33  ;;  %v15933_v8 = vld [vmem:[#allocation99_spill] sm:$0xff]  ;;  %v7159_v20 = vld [vmem:[#allocation3 + $0x79] sm:$0xff]  ;;  %v7547_v40 = vld [vmem:[#allocation3 + $0x62] sm:$0xff] }
 0x3a6   : > { %v14630_v56 = vadd.f32 %v10687_v3, %v10631_v10  ;;  %v4862_v31 = vpop.f32.mrf.mxu1  ;;  %10982 = vmatprep.mubr.msk.f32.mxu0 %vm4270_vm3, %v7155_v60 }
 0x3a7   : > { %v5183_v2 = vpop.f32.mrf.mxu0 }
 0x3a8   : > { %v14633_v6 = vadd.f32 %v5183_v2, %v4862_v31  ;;  %v10634_v61 = vpop.f32.mrf.mxu1  ;;  %10969 = vmatmul.mubr.msk.f32.gmra.mxu1 %vm4270_vm3, %v6794_v43  ;;  %v7546_v2 = vld [vmem:[#allocation3 + $0x52] sm:$0xff] }
 0x3a9   : > { %v10690_v55 = vpop.f32.mrf.mxu0  ;;  %10983 = vmatmul.mubr.msk.f32.gmra.mxu0 %vm4270_vm3, %v7156_v52  ;;  %11035 = vmatprep.mubr.msk.f32.mxu1 %vm4270_vm3, %v7543_v50  ;;  %v5054_v52 = vadd.f32 %v14457_v25, %v14455_v42  ;;  %v7162_v42 = vld [vmem:[#allocation3 + $0x99] sm:$0xff] }
 0x3aa   : > { %v14638_v22 = vadd.f32 %v10690_v55, %v10634_v61  ;;  %v4872_v11 = vpop.f32.mrf.mxu1  ;;  %10985 = vmatprep.mubr.msk.f32.mxu0 %vm4270_vm3, %v7157_v5  ;;  %v7549_v25 = vld [vmem:[#allocation3 + $0x7a] sm:$0xff] }
 0x3ab   : > { %v5193_v13 = vpop.f32.mrf.mxu0 }
 0x3ac   : > { %v14641_v62 = vadd.f32 %v5193_v13, %v4872_v11  ;;  %v10701_v0 = vpop.f32.mrf.mxu1  ;;  %11036 = vmatmul.mubr.msk.f32.vlgmr.msra.gmra.mxu1 %vm4270_vm3, %v7544_v63  ;;  %v7161_v11 = vld [vmem:[#allocation3 + $0x91] sm:$0xff] }
 0x3ad   : > { %v5561_v33 = vadd.f32 %v10701_v0, %v15933_v8  ;;  %v10757_v10 = vpop.f32.mrf.mxu0  ;;  %10986 = vmatmul.mubr.msk.f32.gmra.mxu0 %vm4270_vm3, %v7158_v45  ;;  %11038 = vmatprep.mubr.msk.f32.mxu1 %vm4270_vm3, %v7545_v51  ;;  %v7548_v51 = vld [vmem:[#allocation3 + $0x6a] sm:$0xff] }
 0x3ae   : > { %v5401_v3 = vpop.f32.mrf.mxu1  ;;  %10988 = vmatprep.mubr.msk.f32.mxu0 %vm4270_vm3, %v7159_v20  ;;  %v7163_v20 = vld [vmem:[#allocation3 + $0xa9] sm:$0xff] }
 0x3af   : > { %v14650_v60 = vadd.f32 %v10757_v10, %v5561_v33  ;;  %v5560_v43 = vadd.f32 %v5401_v3, %v5044_v37  ;;  %v5791_v31 = vpop.f32.mrf.mxu0 }
 0x3b0   : > { %v10704_v61 = vpop.f32.mrf.mxu1  ;;  %11039 = vmatmul.mubr.msk.f32.gmra.mxu1 %vm4270_vm3, %v7546_v2 }
 0x3b1   : > { %v14655_v50 = vadd.f32 %v5791_v31, %v5560_v43  ;;  %v5563_v55 = vadd.f32 %v10704_v61, %v14451_v9  ;;  %v10760_v5 = vpop.f32.mrf.mxu0  ;;  %10989 = vmatmul.mubr.msk.f32.gmra.mxu0 %vm4270_vm3, %v7160_v7  ;;  %11041 = vmatprep.mubr.msk.f32.mxu1 %vm4270_vm3, %v7547_v40  ;;  %v5064_v9 = vadd.f32 %v14474_v15, %v14472_v28  ;;  %v7550_v61 = vld [vmem:[#allocation3 + $0x82] sm:$0xff]  ;;  %v7164_v28 = vld [vmem:[#allocation3 + $0xb1] sm:$0xff] }
 0x3b2   : > { %v5411_v13 = vpop.f32.mrf.mxu1  ;;  %10991 = vmatprep.mubr.msk.f32.mxu0 %vm4270_vm3, %v7161_v11  ;;  %v7551_v15 = vld [vmem:[#allocation3 + $0x92] sm:$0xff] }
 0x3b3   : > { %v14661_v63 = vadd.f32 %v10760_v5, %v5563_v55  ;;  %v5562_v0 = vadd.f32 %v5411_v13, %v5054_v52  ;;  %v5801_v45 = vpop.f32.mrf.mxu0  ;;  %v7165_v5 = vld [vmem:[#allocation3 + $0xc1] sm:$0xff] }
 0x3b4   : > { %v10707_v37 = vpop.f32.mrf.mxu1  ;;  %11042 = vmatmul.mubr.msk.f32.gmra.mxu1 %vm4270_vm3, %v7548_v51  ;;  %v7552_v51 = vld [vmem:[#allocation3 + $0x9a] sm:$0xff] }
 0x3b5   : > { %v14666_v8 = vadd.f32 %v5801_v45, %v5562_v0  ;;  %v5565_v33 = vadd.f32 %v10707_v37, %v14468_v14  ;;  %v10763_v10 = vpop.f32.mrf.mxu0  ;;  %10992 = vmatmul.mubr.msk.f32.gmra.mxu0 %vm4270_vm3, %v7162_v42  ;;  %11044 = vmatprep.mubr.msk.f32.mxu1 %vm4270_vm3, %v7549_v25  ;;  %v5074_v14 = vadd.f32 %v14491_v26, %v14489_v59  ;;  %v7166_v59 = vld [vmem:[#allocation3 + $0xc9] sm:$0xff] }
 0x3b6   : > { %v5421_v3 = vpop.f32.mrf.mxu1  ;;  %10994 = vmatprep.mubr.msk.f32.mxu0 %vm4270_vm3, %v7163_v20  ;;  %v7553_v26 = vld [vmem:[#allocation3 + $0xaa] sm:$0xff] }
 0x3b7   : > { %v14672_v43 = vadd.f32 %v10763_v10, %v5565_v33  ;;  %v5564_v31 = vadd.f32 %v5421_v3, %v5064_v9  ;;  %v5811_v2 = vpop.f32.mrf.mxu0  ;;  %v7167_v33 = vld [vmem:[#allocation3 + $0xd9] sm:$0xff] }
 0x3b8   : > { %v10710_v7 = vpop.f32.mrf.mxu1  ;;  %11045 = vmatmul.mubr.msk.f32.gmra.mxu1 %vm4270_vm3, %v7550_v61 }
 0x3b9   : > { %v14677_v40 = vadd.f32 %v5811_v2, %v5564_v31  ;;  %v5567_v52 = vadd.f32 %v10710_v7, %v14485_v48  ;;  %v10766_v55 = vpop.f32.mrf.mxu0  ;;  %10995 = vmatmul.mubr.msk.f32.gmra.mxu0 %vm4270_vm3, %v7164_v28  ;;  %11047 = vmatprep.mubr.msk.f32.mxu1 %vm4270_vm3, %v7551_v15  ;;  %v5084_v48 = vadd.f32 %v14505_v58, %v14503_v36  ;;  %v7554_v2 = vld [vmem:[#allocation3 + $0xb2] sm:$0xff]  ;;  %v7168_v36 = vld [vmem:[#allocation3 + $0xe1] sm:$0xff] }
 0x3ba   : > { %v5431_v11 = vpop.f32.mrf.mxu1  ;;  %10997 = vmatprep.mubr.msk.f32.mxu0 %vm4270_vm3, %v7165_v5  ;;  %v7555_v58 = vld [vmem:[#allocation3 + $0xc2] sm:$0xff] }
 0x3bb   : > { %v14683_v13 = vadd.f32 %v10766_v55, %v5567_v52  ;;  %v5566_v0 = vadd.f32 %v5431_v11, %v5074_v14  ;;  %v5821_v45 = vpop.f32.mrf.mxu0  ;;  %v7169_v14 = vld [vmem:[#allocation3 + $0xf1] sm:$0xff] }
 0x3bc   : > { %v10713_v37 = vpop.f32.mrf.mxu1  ;;  %11048 = vmatmul.mubr.msk.f32.gmra.mxu1 %vm4270_vm3, %v7552_v51 }
 0x3bd   : > { %v14688_v42 = vadd.f32 %v5821_v45, %v5566_v0  ;;  %v5569_v25 = vadd.f32 %v10713_v37, %v14499_v35  ;;  %v10769_v9 = vpop.f32.mrf.mxu0  ;;  %10998 = vmatmul.mubr.msk.f32.gmra.mxu0 %vm4270_vm3, %v7166_v59  ;;  %11050 = vmatprep.mubr.msk.f32.mxu1 %vm4270_vm3, %v7553_v26  ;;  %v5094_v35 = vadd.f32 %v14523_v23, %v14521_v49  ;;  %v7556_v0 = vld [vmem:[#allocation3 + $0xca] sm:$0xff]  ;;  %v7170_v49 = vld [vmem:[#allocation3 + $0xf9] sm:$0xff] }
 0x3be   : > { %v5441_v10 = vpop.f32.mrf.mxu1  ;;  %11000 = vmatprep.mubr.msk.f32.mxu0 %vm4270_vm3, %v7167_v33  ;;  %v7557_v23 = vld [vmem:[#allocation3 + $0xda] sm:$0xff]  ;;  %v7171_v26 = vld [vmem:[#allocation3 + $0x109] sm:$0xff] }
 0x3bf   : > { %v14694_v20 = vadd.f32 %v10769_v9, %v5569_v25  ;;  %v5568_v3 = vadd.f32 %v5441_v10, %v5084_v48  ;;  %v5831_v31 = vpop.f32.mrf.mxu0  ;;  %v7558_v10 = vld [vmem:[#allocation3 + $0xe2] sm:$0xff] }
 0x3c0   : > { %v10716_v61 = vpop.f32.mrf.mxu1  ;;  %11051 = vmatmul.mubr.msk.f32.gmra.mxu1 %vm4270_vm3, %v7554_v2 }
 0x3c1   : > { %v14699_v7 = vadd.f32 %v5831_v31, %v5568_v3  ;;  %v5571_v28 = vadd.f32 %v10716_v61, %v14513_v53  ;;  %v10772_v15 = vpop.f32.mrf.mxu0  ;;  %11001 = vmatmul.mubr.msk.f32.gmra.mxu0 %vm4270_vm3, %v7168_v36  ;;  %11053 = vmatprep.mubr.msk.f32.mxu1 %vm4270_vm3, %v7555_v58  ;;  %v5104_v53 = vadd.f32 %v14537_v12, %v14535_v57  ;;  %v7172_v57 = vld [vmem:[#allocation3 + $0x111] sm:$0xff]  ;;  %v7173_v36 = vld [vmem:[#allocation3 + $0x121] sm:$0xff] }
 0x3c2   : > { %v5451_v52 = vpop.f32.mrf.mxu1  ;;  %11003 = vmatprep.mubr.msk.f32.mxu0 %vm4270_vm3, %v7169_v14  ;;  %v7559_v12 = vld [vmem:[#allocation3 + $0xf2] sm:$0xff]  ;;  %v7560_v14 = vld [vmem:[#allocation3 + $0xfa] sm:$0xff] }
 0x3c3   : > { %v14705_v55 = vadd.f32 %v10772_v15, %v5571_v28  ;;  %v5570_v5 = vadd.f32 %v5451_v52, %v5094_v35  ;;  %v5841_v11 = vpop.f32.mrf.mxu0 }
 0x3c4   : > { %v10719_v45 = vpop.f32.mrf.mxu1  ;;  %11054 = vmatmul.mubr.msk.f32.gmra.mxu1 %vm4270_vm3, %v7556_v0  ;;  %v7175_v0 = vld [vmem:[#allocation3 + $0x139] sm:$0xff] }
 0x3c5   : > { %v14710_v51 = vadd.f32 %v5841_v11, %v5570_v5  ;;  %v5573_v37 = vadd.f32 %v10719_v45, %v14529_v29  ;;  %v10775_v59 = vpop.f32.mrf.mxu0  ;;  %11004 = vmatmul.mubr.msk.f32.gmra.mxu0 %vm4270_vm3, %v7170_v49  ;;  %11056 = vmatprep.mubr.msk.f32.mxu1 %vm4270_vm3, %v7557_v23  ;;  %v5114_v29 = vadd.f32 %v14551_v24, %v14549_v46  ;;  %v7174_v46 = vld [vmem:[#allocation3 + $0x129] sm:$0xff] }
 0x3c6   : > { %v5461_v48 = vpop.f32.mrf.mxu1  ;;  %11006 = vmatprep.mubr.msk.f32.mxu0 %vm4270_vm3, %v7171_v26  ;;  %v7561_v24 = vld [vmem:[#allocation3 + $0x10a] sm:$0xff]  ;;  %v7176_v26 = vld [vmem:[#allocation3 + $0x141] sm:$0xff] }
 0x3c7   : > { %v14716_v25 = vadd.f32 %v10775_v59, %v5573_v37  ;;  %v5572_v9 = vadd.f32 %v5461_v48, %v5104_v53  ;;  %v5851_v33 = vpop.f32.mrf.mxu0  ;;  %v7562_v37 = vld [vmem:[#allocation3 + $0x112] sm:$0xff] }
 0x3c8   : > { %v10722_v3 = vpop.f32.mrf.mxu1  ;;  %11057 = vmatmul.mubr.msk.f32.gmra.mxu1 %vm4270_vm3, %v7558_v10  ;;  %v7177_v10 = vld [vmem:[#allocation3 + $0x151] sm:$0xff] }
 0x3c9   : > { %v14721_v31 = vadd.f32 %v5851_v33, %v5572_v9  ;;  %v5575_v2 = vadd.f32 %v10722_v3, %v14543_v47  ;;  %v10778_v61 = vpop.f32.mrf.mxu0  ;;  %11007 = vmatmul.mubr.msk.f32.gmra.mxu0 %vm4270_vm3, %v7172_v57  ;;  %11059 = vmatprep.mubr.msk.f32.mxu1 %vm4270_vm3, %v7559_v12 }
 0x3ca   : > { %v5471_v58 = vpop.f32.mrf.mxu1  ;;  %11009 = vmatprep.mubr.msk.f32.mxu0 %vm4270_vm3, %v7173_v36 }
 0x3cb   : > { %v14727_v35 = vadd.f32 %v10778_v61, %v5575_v2  ;;  %v5574_v28 = vadd.f32 %v5471_v58, %v5114_v29  ;;  %v5861_v15 = vpop.f32.mrf.mxu0  ;;  %v7564_v29 = vld [vmem:[#allocation3 + $0x12a] sm:$0xff]  ;;  %v7178_v61 = vld [vmem:[#allocation3 + $0x159] sm:$0xff] }
 0x3cc   : > { %v10725_v52 = vpop.f32.mrf.mxu1  ;;  %11060 = vmatmul.mubr.msk.f32.gmra.mxu1 %vm4270_vm3, %v7560_v14 }
 0x3cd   : > { %v14730_v47 = vadd.f32 %v5861_v15, %v5574_v28  ;;  %v5577_v5 = vadd.f32 %v10725_v52, %v14557_v16  ;;  %v10781_v11 = vpop.f32.mrf.mxu0  ;;  %11010 = vmatmul.mubr.msk.f32.gmra.mxu0 %vm4270_vm3, %v7174_v46  ;;  %11062 = vmatprep.mubr.msk.f32.mxu1 %vm4270_vm3, %v7561_v24  ;;  %v7563_v16 = vld [vmem:[#allocation3 + $0x122] sm:$0xff] }
 0x3ce   : > { %v5481_v45 = vpop.f32.mrf.mxu1  ;;  %11012 = vmatprep.mubr.msk.f32.mxu0 %vm4270_vm3, %v7175_v0  ;;  %v7179_v15 = vld [vmem:[#allocation3 + $0x169] sm:$0xff] }
 0x3cf   : > { %v14736_v49 = vadd.f32 %v10781_v11, %v5577_v5  ;;  %v5576_v23 = vadd.f32 %v5481_v45, %v14565_v17  ;;  %v5871_v53 = vpop.f32.mrf.mxu0  ;;  %v7566_v24 = vld [vmem:[#allocation3 + $0x142] sm:$0xff]  ;;  %v7180_v11 = vld [vmem:[#allocation3 + $0x171] sm:$0xff] }
 0x3d0   : > { %v10728_v59 = vpop.f32.mrf.mxu1  ;;  %11063 = vmatmul.mubr.msk.f32.gmra.mxu1 %vm4270_vm3, %v7562_v37 }
 0x3d1   : > { %v14740_v48 = vadd.f32 %v5871_v53, %v5576_v23  ;;  %v5579_v9 = vadd.f32 %v10728_v59, %v14569_v41  ;;  %v10784_v33 = vpop.f32.mrf.mxu0  ;;  %11013 = vmatmul.mubr.msk.f32.gmra.mxu0 %vm4270_vm3, %v7176_v26  ;;  %11065 = vmatprep.mubr.msk.f32.mxu1 %vm4270_vm3, %v7563_v16  ;;  %v7565_v41 = vld [vmem:[#allocation3 + $0x13a] sm:$0xff] }
 0x3d2   : > { %v5491_v3 = vpop.f32.mrf.mxu1  ;;  %11015 = vmatprep.mubr.msk.f32.mxu0 %vm4270_vm3, %v7177_v10  ;;  %v7568_v26 = vld [vmem:[#allocation3 + $0x15a] sm:$0xff] }
 0x3d3   : > { %v14746_v17 = vadd.f32 %v10784_v33, %v5579_v9  ;;  %v5578_v57 = vadd.f32 %v5491_v3, %v14577_v54  ;;  %v5881_v12 = vpop.f32.mrf.mxu0  ;;  %v7183_v16 = vld [vmem:[#allocation3 + $0x199] sm:$0xff] }
 0x3d4   : > { %v10731_v2 = vpop.f32.mrf.mxu1  ;;  %11066 = vmatmul.mubr.msk.f32.gmra.mxu1 %vm4270_vm3, %v7564_v29 }
 0x3d5   : > { %v14750_v36 = vadd.f32 %v5881_v12, %v5578_v57  ;;  %v5581_v58 = vadd.f32 %v10731_v2, %v14581_v4  ;;  %v10787_v28 = vpop.f32.mrf.mxu0  ;;  %11016 = vmatmul.mubr.msk.f32.gmra.mxu0 %vm4270_vm3, %v7178_v61  ;;  %11068 = vmatprep.mubr.msk.f32.mxu1 %vm4270_vm3, %v7565_v41  ;;  %v7567_v4 = vld [vmem:[#allocation3 + $0x152] sm:$0xff] }
 0x3d6   : > { %v5501_v14 = vpop.f32.mrf.mxu1  ;;  %11018 = vmatprep.mubr.msk.f32.mxu0 %vm4270_vm3, %v7179_v15  ;;  %v7570_v2 = vld [vmem:[#allocation3 + $0x172] sm:$0xff] }
 0x3d7   : > { %v14756_v54 = vadd.f32 %v10787_v28, %v5581_v58  ;;  %v5580_v52 = vadd.f32 %v5501_v14, %v14589_v18  ;;  %v5891_v46 = vpop.f32.mrf.mxu0  ;;  %v7573_v28 = vld [vmem:[#allocation3 + $0x19a] sm:$0xff] }
 0x3d8   : > { %v10734_v5 = vpop.f32.mrf.mxu1  ;;  %11069 = vmatmul.mubr.msk.f32.gmra.mxu1 %vm4270_vm3, %v7566_v24 }
 0x3d9   : > { %v14760_v0 = vadd.f32 %v5891_v46, %v5580_v52  ;;  %v5583_v45 = vadd.f32 %v10734_v5, %v14592_v44  ;;  %v10790_v23 = vpop.f32.mrf.mxu0  ;;  %11019 = vmatmul.mubr.msk.f32.gmra.mxu0 %vm4270_vm3, %v7180_v11  ;;  %11071 = vmatprep.mubr.msk.f32.mxu1 %vm4270_vm3, %v7567_v4  ;;  %v7569_v44 = vld [vmem:[#allocation3 + $0x16a] sm:$0xff]  ;;  %v7574_v5 = vld [vmem:[#allocation3 + $0x1a2] sm:$0xff] }
 0x3da   : > { %v5511_v53 = vpop.f32.mrf.mxu1  ;;  %11021 = vmatprep.mubr.msk.f32.mxu0 %vm4270_vm3, %v14408_v34 }
 0x3db   : > { %v14767_v18 = vadd.f32 %v10790_v23, %v5583_v45  ;;  %v5582_v37 = vadd.f32 %v5511_v53, %v14600_v21  ;;  %v5901_v59 = vpop.f32.mrf.mxu0  ;;  %v7184_v21 = vld [vmem:[#allocation3 + $0x1a1] sm:$0xff] }
 0x3dc   : > { %v10737_v9 = vpop.f32.mrf.mxu1  ;;  %11072 = vmatmul.mubr.msk.f32.gmra.mxu1 %vm4270_vm3, %v7568_v26 }
 0x3dd   : > { %v14771_v33 = vadd.f32 %v5901_v59, %v5582_v37  ;;  %v5585_v10 = vadd.f32 %v10737_v9, %v14603_v19  ;;  %v10793_v3 = vpop.f32.mrf.mxu0  ;;  %11022 = vmatmul.mubr.msk.f32.gmra.mxu0 %vm4270_vm3, %v14420_v32  ;;  %11074 = vmatprep.mubr.msk.f32.mxu1 %vm4270_vm3, %v7569_v44 }
 0x3de   : > { %v5521_v34 = vpop.f32.mrf.mxu1  ;;  %11024 = vmatprep.mubr.msk.f32.mxu0 %vm4270_vm3, %v7183_v16 }
 0x3df   : > { %v14778_v57 = vadd.f32 %v10793_v3, %v5585_v10  ;;  %v5584_v12 = vadd.f32 %v5521_v34, %v14612_v39  ;;  %v5911_v29 = vpop.f32.mrf.mxu0 }
 0x3e0   : > { %v10740_v61 = vpop.f32.mrf.mxu1  ;;  %11075 = vmatmul.mubr.msk.f32.gmra.mxu1 %vm4270_vm3, %v7570_v2 }
 0x3e1   : > { %v14782_v19 = vadd.f32 %v5911_v29, %v5584_v12  ;;  %v5587_v41 = vadd.f32 %v10740_v61, %v14617_v1  ;;  %v10796_v32 = vpop.f32.mrf.mxu0  ;;  %11025 = vmatmul.mubr.msk.f32.gmra.mxu0 %vm4270_vm3, %v7184_v21  ;;  %11077 = vmatprep.mubr.msk.f32.mxu1 %vm4270_vm3, %v14608_v38 }
 0x3e2   : > { %v5531_v58 = vpop.f32.mrf.mxu1 }
 0x3e3   : > { %v14788_v15 = vadd.f32 %v10796_v32, %v5587_v41  ;;  %v5586_v39 = vadd.f32 %v5531_v58, %v14624_v27  ;;  %v5921_v14 = vpop.f32.mrf.mxu0 }
 0x3e4   : > { %v10743_v52 = vpop.f32.mrf.mxu1  ;;  %11078 = vmatmul.mubr.msk.f32.gmra.mxu1 %vm4270_vm3, %v14615_v30 }
 0x3e5   : > { %v14793_v46 = vadd.f32 %v5921_v14, %v5586_v39  ;;  %v5589_v1 = vadd.f32 %v10743_v52, %v14630_v56  ;;  %v10799_v24 = vpop.f32.mrf.mxu0  ;;  %11080 = vmatprep.mubr.msk.f32.mxu1 %vm4270_vm3, %v7573_v28 }
 0x3e6   : > { %v5541_v38 = vpop.f32.mrf.mxu1 }
 0x3e7   : > { %v14797_v11 = vadd.f32 %v10799_v24, %v5589_v1  ;;  %v5588_v4 = vadd.f32 %v5541_v38, %v14633_v6  ;;  %v5931_v45 = vpop.f32.mrf.mxu0 }
 0x3e8   : > { %v10746_v27 = vpop.f32.mrf.mxu1  ;;  %11081 = vmatmul.mubr.msk.f32.gmra.mxu1 %vm4270_vm3, %v7574_v5 }
 0x3e9   : > { %v14801_v23 = vadd.f32 %v5931_v45, %v5588_v4  ;;  %v5591_v30 = vadd.f32 %v10746_v27, %v14638_v22 }
 0x3ea   : > { %v5551_v53 = vpop.f32.mrf.mxu1 }
 0x3eb   : > { %v5590_v56 = vadd.f32 %v5551_v53, %v14641_v62 }
 0x3ec   : > { %v10813_v37 = vpop.f32.mrf.mxu1 }
 0x3ed   : > { %v14806_v59 = vadd.f32 %v10813_v37, %v14650_v60 }
 0x3ee   : > { %v6181_v26 = vpop.f32.mrf.mxu1 }
 0x3ef   : > { %v14809_v16 = vadd.f32 %v6181_v26, %v14655_v50 }
 0x3f0   : > { %v10816_v6 = vpop.f32.mrf.mxu1 }
 0x3f1   : > { %v14812_v9 = vadd.f32 %v10816_v6, %v14661_v63 }
 0x3f2   : > { %v6191_v44 = vpop.f32.mrf.mxu1 }
 0x3f3   : > { %v14815_v10 = vadd.f32 %v6191_v44, %v14666_v8 }
 0x3f4   : > { %v10819_v22 = vpop.f32.mrf.mxu1 }
 0x3f5   : > { %v14818_v3 = vadd.f32 %v10819_v22, %v14672_v43 }
 0x3f6   : > { %v6201_v62 = vpop.f32.mrf.mxu1 }
 0x3f7   : > { %v14821_v60 = vadd.f32 %v6201_v62, %v14677_v40 }
 0x3f8   : > { %v10822_v34 = vpop.f32.mrf.mxu1 }
 0x3f9   : > { %v14824_v50 = vadd.f32 %v10822_v34, %v14683_v13 }
 0x3fa   : > { %v6211_v21 = vpop.f32.mrf.mxu1 }
 0x3fb   : > { %v14827_v63 = vadd.f32 %v6211_v21, %v14688_v42 }
 0x3fc   : > { %v10825_v12 = vpop.f32.mrf.mxu1 }
 0x3fd   : > { %v14830_v8 = vadd.f32 %v10825_v12, %v14694_v20 }
 0x3fe   : > { %v6221_v29 = vpop.f32.mrf.mxu1 }
 0x3ff   : > { %v14833_v43 = vadd.f32 %v6221_v29, %v14699_v7 }
 0x400   : > { %v10828_v2 = vpop.f32.mrf.mxu1 }
 0x401   : > { %v14836_v40 = vadd.f32 %v10828_v2, %v14705_v55 }
 0x402   : > { %v6231_v61 = vpop.f32.mrf.mxu1 }
 0x403   : > { %v14839_v13 = vadd.f32 %v6231_v61, %v14710_v51 }
 0x404   : > { %v10831_v41 = vpop.f32.mrf.mxu1 }
 0x405   : > { %v14842_v42 = vadd.f32 %v10831_v41, %v14716_v25 }
 0x406   : > { %v6241_v32 = vpop.f32.mrf.mxu1 }
 0x407   : > { %v14845_v20 = vadd.f32 %v6241_v32, %v14721_v31 }
 0x408   : > { %v10834_v58 = vpop.f32.mrf.mxu1 }
 0x409   : > { %v14848_v7 = vadd.f32 %v10834_v58, %v14727_v35 }
 0x40a   : > { %v6251_v28 = vpop.f32.mrf.mxu1 }
 0x40b   : > { %v14851_v55 = vadd.f32 %v6251_v28, %v14730_v47 }
 0x40c   : > { %v10837_v39 = vpop.f32.mrf.mxu1 }
 0x40d   : > { %v14854_v51 = vadd.f32 %v10837_v39, %v14736_v49 }
 0x40e   : > { %v6261_v14 = vpop.f32.mrf.mxu1 }
 0x40f   : > { %v14857_v25 = vadd.f32 %v6261_v14, %v14740_v48 }
 0x410   : > { %v10840_v52 = vpop.f32.mrf.mxu1 }
 0x411   : > { %v14860_v31 = vadd.f32 %v10840_v52, %v14746_v17 }
 0x412   : > { %v6271_v1 = vpop.f32.mrf.mxu1 }
 0x413   : > { %15934 = vst [vmem:[#allocation79_spill] sm:$0xff] %v14860_v31  ;;  %v14863_v35 = vadd.f32 %v6271_v1, %v14750_v36 }
 0x414   : > { %v10843_v24 = vpop.f32.mrf.mxu1 }
 0x415   : > { %15935 = vst [vmem:[#allocation77_spill] sm:$0xff] %v14863_v35  ;;  %v14866_v47 = vadd.f32 %v10843_v24, %v14756_v54 }
 0x416   : > { %v6281_v5 = vpop.f32.mrf.mxu1 }
 0x417   : > { %15936 = vst [vmem:[#allocation60_spill] sm:$0xff] %v14866_v47  ;;  %v14869_v49 = vadd.f32 %v6281_v5, %v14760_v0 }
 0x418   : > { %v10846_v38 = vpop.f32.mrf.mxu1 }
 0x419   : > { %15937 = vst [vmem:[#allocation59_spill] sm:$0xff] %v14869_v49  ;;  %v14872_v48 = vadd.f32 %v10846_v38, %v14767_v18 }
 0x41a   : > { %v6291_v4 = vpop.f32.mrf.mxu1 }
 0x41b   : > { %15938 = vst [vmem:[#allocation62_spill] sm:$0xff] %v14872_v48  ;;  %v14875_v17 = vadd.f32 %v6291_v4, %v14771_v33 }
 0x41c   : > { %v10849_v45 = vpop.f32.mrf.mxu1 }
 0x41d   : > { %15939 = vst [vmem:[#allocation78_spill] sm:$0xff] %v14875_v17  ;;  %v14878_v36 = vadd.f32 %v10849_v45, %v14778_v57 }
 0x41e   : > { %v6301_v27 = vpop.f32.mrf.mxu1 }
 0x41f   : > { %15940 = vst [vmem:[#allocation64_spill] sm:$0xff] %v14878_v36  ;;  %v14881_v54 = vadd.f32 %v6301_v27, %v14782_v19 }
 0x420   : > { %v10852_v53 = vpop.f32.mrf.mxu1 }
 0x421   : > { %15941 = vst [vmem:[#allocation63_spill] sm:$0xff] %v14881_v54  ;;  %v14884_v0 = vadd.f32 %v10852_v53, %v14788_v15  ;;  %v10802_v37 = vpop.f32.mrf.mxu0 }
 0x422   : > { %v5981_v26 = vadd.f32 %v10802_v37, %v5591_v30  ;;  %v6311_v18 = vpop.f32.mrf.mxu1 }
 0x423   : > { %15942 = vst [vmem:[#allocation66_spill] sm:$0xff] %v14884_v0  ;;  %v14887_v6 = vadd.f32 %v6311_v18, %v14793_v46  ;;  %v5941_v33 = vpop.f32.mrf.mxu0 }
 0x424   : > { %v5980_v44 = vadd.f32 %v5941_v33, %v5590_v56  ;;  %v10855_v22 = vpop.f32.mrf.mxu1 }
 0x425   : > { %15943 = vst [vmem:[#allocation80_spill] sm:$0xff] %v14887_v6  ;;  %v14890_v57 = vadd.f32 %v10855_v22, %v14797_v11  ;;  %v14892_v62 = vpop.f32.mrf.mxu0 }
 0x426   : > { %v6321_v19 = vpop.f32.mrf.mxu1 }
 0x427   : > { %15944 = vst [vmem:[#allocation67_spill] sm:$0xff] %v14890_v57  ;;  %v14895_v34 = vadd.f32 %v6321_v19, %v14801_v23  ;;  %v14897_v15 = vpop.f32.mrf.mxu0 }
 0x428   : > { %v10858_v21 = vpop.f32.mrf.mxu1 }
 0x429   : > { %15945 = vst [vmem:[#allocation86_spill] sm:$0xff] %v14895_v34  ;;  %v14899_v30 = vadd.f32 %v10858_v21, %v5981_v26  ;;  %v14901_v12 = vpop.f32.mrf.mxu0 }
 0x42a   : > { %v6331_v46 = vpop.f32.mrf.mxu1 }
 0x42b   : > { %15946 = vst [vmem:[#allocation81_spill] sm:$0xff] %v14899_v30  ;;  %v14903_v29 = vadd.f32 %v6331_v46, %v5980_v44  ;;  %v14905_v56 = vpop.f32.mrf.mxu0 }
 0x42c   : > { %v14907_v11 = vpop.f32.mrf.mxu1 }
 0x42d   : > { %15947 = vst [vmem:[#allocation82_spill] sm:$0xff] %v14903_v29  ;;  %v14909_v2 = vpop.f32.mrf.mxu0 }
 0x42e   : > { %v14911_v61 = vpop.f32.mrf.mxu1 }
 0x42f   : > { %v14913_v23 = vpop.f32.mrf.mxu0 }
 0x430   : > { %v14915_v41 = vpop.f32.mrf.mxu1 }
 0x431   : > { %v14917_v32 = vpop.f32.mrf.mxu0 }
 0x432   : > { %v14919_v58 = vpop.f32.mrf.mxu1 }
 0x433   : > { %v14921_v28 = vpop.f32.mrf.mxu0 }
 0x434   : > { %v14923_v39 = vpop.f32.mrf.mxu1 }
 0x435   : > { %v14925_v14 = vpop.f32.mrf.mxu0 }
 0x436   : > { %v14927_v52 = vpop.f32.mrf.mxu1 }
 0x437   : > { %v14929_v1 = vpop.f32.mrf.mxu0 }
 0x438   : > { %v14931_v24 = vpop.f32.mrf.mxu1 }
 0x439   : > { %v14933_v5 = vpop.f32.mrf.mxu0 }
 0x43a   : > { %v14935_v38 = vpop.f32.mrf.mxu1 }
 0x43b   : > { %v14937_v4 = vpop.f32.mrf.mxu0 }
 0x43c   : > { %v14939_v45 = vpop.f32.mrf.mxu1 }
 0x43d   : > { %v14941_v27 = vpop.f32.mrf.mxu0 }
 0x43e   : > { %v14943_v53 = vpop.f32.mrf.mxu1 }
 0x43f   : > { %v14945_v37 = vpop.f32.mrf.mxu0 }
 0x440   : > { %v14947_v26 = vpop.f32.mrf.mxu1 }
 0x441   : > { %v14949_v18 = vpop.f32.mrf.mxu0 }
 0x442   : > { %v14951_v33 = vpop.f32.mrf.mxu1 }
 0x443   : > { %v14953_v44 = vpop.f32.mrf.mxu0 }
 0x444   : > { %v14955_v22 = vpop.f32.mrf.mxu1 }
 0x445   : > { %v14957_v19 = vpop.f32.mrf.mxu0 }
 0x446   : > { %v14959_v21 = vpop.f32.mrf.mxu1 }
 0x447   : > { %v14961_v46 = vpop.f32.mrf.mxu0 }
 0x448   : > { %15948 = vst [vmem:[#allocation89_spill] sm:$0xff] %v14961_v46  ;;  %v14963_v29 = vpop.f32.mrf.mxu1 }
 0x449   : > { %v14965_v30 = vpop.f32.mrf.mxu0 }
 0x44a   : > { %15949 = vst [vmem:[#allocation83_spill] sm:$0xff] %v14965_v30  ;;  %v14967_v34 = vpop.f32.mrf.mxu1 }
 0x44b   : > { %v14969_v57 = vpop.f32.mrf.mxu0 }
 0x44c   : > { %15950 = vst [vmem:[#allocation84_spill] sm:$0xff] %v14969_v57  ;;  %v14971_v6 = vpop.f32.mrf.mxu1 }
 0x44d   : > { %15951 = vst [vmem:[#allocation85_spill] sm:$0xff] %v14971_v6  ;;  %v14973_v0 = vpop.f32.mrf.mxu0 }
 0x44e   : > { %15952 = vst [vmem:[#allocation68_spill] sm:$0xff] %v14973_v0  ;;  %v14975_v54 = vpop.f32.mrf.mxu1 }
 0x44f   : > { %15953 = vst [vmem:[#allocation92_spill] sm:$0xff] %v14975_v54  ;;  %v14977_v36 = vpop.f32.mrf.mxu0 }
 0x450   : > { %15954 = vst [vmem:[#allocation95_spill] sm:$0xff] %v14977_v36  ;;  %v14979_v17 = vpop.f32.mrf.mxu1 }
 0x451   : > { %15955 = vst [vmem:[#allocation87_spill] sm:$0xff] %v14979_v17  ;;  %v14981_v48 = vpop.f32.mrf.mxu0 }
 0x452   : > { %15956 = vst [vmem:[#allocation88_spill] sm:$0xff] %v14981_v48  ;;  %v14983_v49 = vpop.f32.mrf.mxu1 }
 0x453   : > { %15957 = vst [vmem:[#allocation90_spill] sm:$0xff] %v14983_v49  ;;  %v14985_v47 = vpop.f32.mrf.mxu0 }
 0x454   : > { %15958 = vst [vmem:[#allocation91_spill] sm:$0xff] %v14985_v47  ;;  %v14987_v35 = vpop.f32.mrf.mxu1 }
 0x455   : > { %15959 = vst [vmem:[#allocation93_spill] sm:$0xff] %v14987_v35  ;;  %v14989_v30 = vpop.f32.mrf.mxu0 }
 0x456   : > { %15960 = vst [vmem:[#allocation97_spill] sm:$0xff] %v14989_v30  ;;  %v14991_v57 = vpop.f32.mrf.mxu1 }
 0x457   : > { %15961 = vst [vmem:[#allocation98_spill] sm:$0xff] %v14991_v57  ;;  %v14993_v31 = vpop.f32.mrf.mxu0 }
 0x458   : > { %15962 = vst [vmem:[#allocation100_spill] sm:$0xff] %v14993_v31  ;;  %v14995_v0 = vpop.f32.mrf.mxu1 }
 0x459   : > { %15963 = vst [vmem:[#allocation101_spill] sm:$0xff] %v14995_v0  ;;  %v14997_v54 = vpop.f32.mrf.mxu0 }
 0x45a   : > { %15964 = vst [vmem:[#allocation99_spill] sm:$0xff] %v14997_v54  ;;  %v14999_v36 = vpop.f32.mrf.mxu1 }
 0x45b   : > { %15965 = vst [vmem:[#allocation102_spill] sm:$0xff] %v14999_v36  ;;  %v15001_v17 = vpop.f32.mrf.mxu0 }
 0x45c   : > { %15966 = vst [vmem:[#allocation103_spill] sm:$0xff] %v15001_v17  ;;  %v15003_v48 = vpop.f32.mrf.mxu1 }
 0x45d   : > { %15967 = vst [vmem:[#allocation104_spill] sm:$0xff] %v15003_v48  ;;  %v15005_v49 = vpop.f32.mrf.mxu0 }
 0x45e   : > { %15968 = vst [vmem:[#allocation105_spill] sm:$0xff] %v15005_v49  ;;  %v15007_v47 = vpop.f32.mrf.mxu1  ;;  %v6731_v49 = vadd.f32 %v14892_v62, %v14806_v59  ;;  %v6732_v59 = vadd.f32 %v14905_v56, %v14815_v10  ;;  %v6734_v10 = vadd.f32 %v14913_v23, %v14821_v60  ;;  %v6736_v60 = vadd.f32 %v14921_v28, %v14827_v63 }
 0x45f   : > { %15969 = vst [vmem:[#allocation106_spill] sm:$0xff] %v15007_v47  ;;  %v15009_v35 = vpop.f32.mrf.mxu0  ;;  %v6738_v63 = vadd.f32 %v14929_v1, %v14833_v43  ;;  %v6740_v43 = vadd.f32 %v14937_v4, %v14839_v13  ;;  %v6742_v13 = vadd.f32 %v14945_v37, %v14845_v20  ;;  %v6744_v20 = vadd.f32 %v14953_v44, %v14851_v55  ;;  %v15090_v55 = vpop.permute.xlu1 %8287 }
 0x460   : > { %15970 = vst [vmem:[#allocation107_spill] sm:$0xff] %v15009_v35  ;;  %v15011_v30 = vpop.f32.mrf.mxu1  ;;  %v6730_v35 = vadd.f32 %v14897_v15, %v14809_v16 }
 0x461   : > { %15971 = vst [vmem:[#allocation108_spill] sm:$0xff] %v15011_v30  ;;  %v15013_v57 = vpop.f32.mrf.mxu0 }
 0x462   : > { %15972 = vst [vmem:[#allocation109_spill] sm:$0xff] %v15013_v57  ;;  %v15015_v31 = vpop.f32.mrf.mxu1  ;;  %v7122_v57 = vadd.f32 %v14907_v11, %v6731_v49  ;;  %v6735_v11 = vadd.f32 %v14909_v2, %v14818_v3  ;;  %v6737_v3 = vadd.f32 %v14917_v32, %v14824_v50  ;;  %v6739_v50 = vadd.f32 %v14925_v14, %v14830_v8 }
 0x463   : > { %15973 = vst [vmem:[#allocation110_spill] sm:$0xff] %v15015_v31  ;;  %v15017_v0 = vpop.f32.mrf.mxu0  ;;  %v7127_v32 = vadd.f32 %v14935_v38, %v6736_v60  ;;  %v6741_v8 = vadd.f32 %v14933_v5, %v14836_v40  ;;  %v7129_v14 = vadd.f32 %v14943_v53, %v6738_v63  ;;  %v6743_v40 = vadd.f32 %v14941_v27, %v14842_v42 }
 0x464   : > { %15974 = vst [vmem:[#allocation111_spill] sm:$0xff] %v15017_v0  ;;  %v15019_v54 = vpop.f32.mrf.mxu1  ;;  %v6733_v0 = vadd.f32 %v14901_v12, %v14812_v9  ;;  %v7130_v28 = vadd.f32 %v14939_v45, %v6739_v50  ;;  %v7131_v5 = vadd.f32 %v14951_v33, %v6740_v43  ;;  %v6745_v42 = vadd.f32 %v14949_v18, %v14848_v7  ;;  %v15106_v43 = vpop.permute.xlu1 %8291 }
 0x465   : > { %15975 = vst [vmem:[#allocation112_spill] sm:$0xff] %v15019_v54  ;;  %v10981_v36 = vpop.f32.mrf.mxu0  ;;  %v7121_v54 = vadd.f32 %v14911_v61, %v6730_v35  ;;  %v7132_v1 = vadd.f32 %v14947_v26, %v6741_v8  ;;  %v7134_v4 = vadd.f32 %v14955_v22, %v6743_v40  ;;  %v7133_v27 = vadd.f32 %v14959_v21, %v6742_v13  ;;  %v15986_v8 = vld [vmem:[#allocation87_spill] sm:$0xff] }
 0x466   : > { %v15021_v17 = vpop.f32.mrf.mxu1  ;;  %v7124_v62 = vadd.f32 %v14915_v41, %v6733_v0  ;;  %v7126_v0 = vadd.f32 %v14923_v39, %v6735_v11  ;;  %v7136_v37 = vadd.f32 %v14963_v29, %v6745_v42  ;;  %v6747_v7 = vadd.f32 %v14957_v19, %v14854_v51  ;;  %v15979_v29 = vld [vmem:[#allocation89_spill] sm:$0xff]  ;;  %v15991_v13 = vld [vmem:[#allocation95_spill] sm:$0xff] }
 0x467   : > { %15976 = vst [vmem:[#allocation113_spill] sm:$0xff] %v15021_v17  ;;  %v7352_v48 = vpop.f32.mrf.mxu0  ;;  %v7512_v17 = vadd.f32 %v10981_v36, %v7122_v57  ;;  %v7135_v18 = vadd.f32 %v14967_v34, %v6744_v20  ;;  %v6746_v44 = vadd.f32 %v15979_v29, %v14857_v25  ;;  %v15096_v34 = vpop.permute.xlu0 %8285 }
 0x468   : > { %v15025_v47 = vpop.f32.mrf.mxu1 }
 0x469   : > { %15977 = vst [vmem:[#allocation114_spill] sm:$0xff] %v15025_v47  ;;  %v10984_v30 = vpop.f32.mrf.mxu0  ;;  %v7511_v47 = vadd.f32 %v7352_v48, %v7121_v54 }
 0x46a   : > { %v15030_v31 = vpop.f32.mrf.mxu1  ;;  %v7514_v9 = vadd.f32 %v10984_v30, %v7124_v62 }
 0x46b   : > { %15978 = vst [vmem:[#allocation115_spill] sm:$0xff] %v15030_v31  ;;  %v7362_v6 = vpop.f32.mrf.mxu0  ;;  %v7123_v31 = vadd.f32 %v14919_v58, %v6732_v59 }
 0x46c   : > { %v11037_v46 = vpop.f32.mrf.mxu1 }
 0x46d   : > { %v7902_v16 = vadd.f32 %v11037_v46, %v7512_v17  ;;  %v10987_v15 = vpop.f32.mrf.mxu0  ;;  %v7513_v48 = vadd.f32 %v7362_v6, %v7123_v31  ;;  %v7128_v31 = vadd.f32 %v14931_v24, %v6737_v3 }
 0x46e   : > { %v7742_v49 = vpop.f32.mrf.mxu1  ;;  %v7516_v30 = vadd.f32 %v10987_v15, %v7126_v0 }
 0x46f   : > { %v7901_v12 = vadd.f32 %v7742_v49, %v7511_v47  ;;  %7967 = vrot.lane.b32.xlu1 %v7902_v16, %s11353_s30  ;;  %v7372_v35 = vpop.f32.mrf.mxu0  ;;  %v7125_v47 = vadd.f32 %v14927_v52, %v6734_v10 }
 0x470   : > { %v11040_v36 = vpop.f32.mrf.mxu1 }
 0x471   : > { %v7904_v17 = vadd.f32 %v11040_v36, %v7514_v9  ;;  %7965 = vrot.lane.b32.xlu0 %v7901_v12, %s11353_s30  ;;  %v10990_v54 = vpop.f32.mrf.mxu0  ;;  %v7515_v6 = vadd.f32 %v7372_v35, %v7125_v47 }
 0x472   : > { %v7752_v57 = vpop.f32.mrf.mxu1  ;;  %v7518_v39 = vadd.f32 %v10990_v54, %v7128_v31 }
 0x473   : > { %v7903_v56 = vadd.f32 %v7752_v57, %v7513_v48  ;;  %7971 = vrot.lane.b32.xlu1 %v7904_v17, %s11353_s30  ;;  %v7382_v2 = vpop.f32.mrf.mxu0 }
 0x474   : > { %v11043_v61 = vpop.f32.mrf.mxu1  ;;  %v7517_v24 = vadd.f32 %v7382_v2, %v7127_v32  ;;  %v15981_v32 = vld [vmem:[#allocation79_spill] sm:$0xff] }
 0x475   : > { %v7906_v23 = vadd.f32 %v11043_v61, %v7516_v30  ;;  %7969 = vrot.lane.b32.xlu0 %v7903_v56, %s11353_s30  ;;  %v10993_v41 = vpop.f32.mrf.mxu0 }
 0x476   : > { %v7762_v58 = vpop.f32.mrf.mxu1  ;;  %v7520_v38 = vadd.f32 %v10993_v41, %v7130_v28 }
 0x477   : > { %v7905_v52 = vadd.f32 %v7762_v58, %v7515_v6  ;;  %7975 = vrot.lane.b32.xlu1 %v7906_v23, %s11353_s30  ;;  %v7392_v46 = vpop.f32.mrf.mxu0  ;;  %v15980_v23 = vld [vmem:[#allocation85_spill] sm:$0xff] }
 0x478   : > { %v11046_v59 = vpop.f32.mrf.mxu1  ;;  %v7519_v45 = vadd.f32 %v7392_v46, %v7129_v14  ;;  %v7138_v41 = vadd.f32 %v15980_v23, %v6747_v7  ;;  %v15983_v46 = vld [vmem:[#allocation92_spill] sm:$0xff]  ;;  %v15996_v7 = vld [vmem:[#allocation78_spill] sm:$0xff] }
 0x479   : > { %v7908_v62 = vadd.f32 %v11046_v59, %v7518_v39  ;;  %7973 = vrot.lane.b32.xlu0 %v7905_v52, %s11353_s30  ;;  %v10996_v16 = vpop.f32.mrf.mxu0  ;;  %v15982_v39 = vld [vmem:[#allocation83_spill] sm:$0xff]  ;;  %v7137_v59 = vadd.f32 %v15983_v46, %v6746_v44 }
 0x47a   : > { %v7772_v15 = vpop.f32.mrf.mxu1  ;;  %v7522_v53 = vadd.f32 %v10996_v16, %v7132_v1  ;;  %v6749_v52 = vadd.f32 %v15982_v39, %v15981_v32  ;;  %v15985_v16 = vld [vmem:[#allocation84_spill] sm:$0xff] }
 0x47b   : > { %v7907_v49 = vadd.f32 %v7772_v15, %v7517_v24  ;;  %7979 = vrot.lane.b32.xlu1 %v7908_v62, %s11353_s30  ;;  %v7402_v11 = vpop.f32.mrf.mxu0  ;;  %v15984_v62 = vld [vmem:[#allocation77_spill] sm:$0xff]  ;;  %v15987_v1 = vld [vmem:[#allocation60_spill] sm:$0xff] }
 0x47c   : > { %v11049_v9 = vpop.f32.mrf.mxu1  ;;  %v7521_v26 = vadd.f32 %v7402_v11, %v7131_v5  ;;  %v6748_v15 = vadd.f32 %v15985_v16, %v15984_v62  ;;  %v7140_v14 = vadd.f32 %v15986_v8, %v6749_v52 }
 0x47d   : > { %v7910_v12 = vadd.f32 %v11049_v9, %v7520_v38  ;;  %7977 = vrot.lane.b32.xlu0 %v7907_v49, %s11353_s30  ;;  %v10999_v35 = vpop.f32.mrf.mxu0 }
 0x47e   : > { %v7782_v36 = vpop.f32.mrf.mxu1  ;;  %v7524_v33 = vadd.f32 %v10999_v35, %v7134_v4  ;;  %v15989_v35 = vld [vmem:[#allocation90_spill] sm:$0xff] }
 0x47f   : > { %v7909_v10 = vadd.f32 %v7782_v36, %v7519_v45  ;;  %7983 = vrot.lane.b32.xlu1 %v7910_v12, %s11353_s30  ;;  %v7412_v0 = vpop.f32.mrf.mxu0  ;;  %v15988_v45 = vld [vmem:[#allocation68_spill] sm:$0xff]  ;;  %v7139_v36 = vadd.f32 %v15989_v35, %v6748_v15 }
 0x480   : > { %v11052_v48 = vpop.f32.mrf.mxu1  ;;  %v7523_v22 = vadd.f32 %v7412_v0, %v7133_v27  ;;  %v6751_v12 = vadd.f32 %v15988_v45, %v15987_v1  ;;  %v15112_v0 = vpop.permute.xlu0 %8289  ;;  %v16007_v1 = vld [vmem:[#allocation106_spill] sm:$0xff] }
 0x481   : > { %v7912_v17 = vadd.f32 %v11052_v48, %v7522_v53  ;;  %7981 = vrot.lane.b32.xlu0 %v7909_v10, %s11353_s30  ;;  %v11002_v54 = vpop.f32.mrf.mxu0  ;;  %v15990_v48 = vld [vmem:[#allocation59_spill] sm:$0xff] }
 0x482   : > { %v7792_v57 = vpop.f32.mrf.mxu1  ;;  %v7526_v21 = vadd.f32 %v11002_v54, %v7136_v37  ;;  %v6750_v4 = vadd.f32 %v15991_v13, %v15990_v48  ;;  %v16010_v13 = vld [vmem:[#allocation108_spill] sm:$0xff] }
 0x483   : > { %v7911_v3 = vadd.f32 %v7792_v57, %v7521_v26  ;;  %7987 = vrot.lane.b32.xlu1 %v7912_v17, %s11353_s30  ;;  %v7422_v47 = vpop.f32.mrf.mxu0  ;;  %v15992_v26 = vld [vmem:[#allocation93_spill] sm:$0xff] }
 0x484   : > { %v11055_v30 = vpop.f32.mrf.mxu1  ;;  %v7525_v58 = vadd.f32 %v7422_v47, %v7135_v18  ;;  %v7142_v17 = vadd.f32 %v15992_v26, %v6751_v12  ;;  %v15997_v18 = vld [vmem:[#allocation91_spill] sm:$0xff] }
 0x485   : > { %v7914_v56 = vadd.f32 %v11055_v30, %v7524_v33  ;;  %7985 = vrot.lane.b32.xlu0 %v7911_v3, %s11353_s30  ;;  %v11005_v2 = vpop.f32.mrf.mxu0  ;;  %v15993_v33 = vld [vmem:[#allocation62_spill] sm:$0xff]  ;;  %v15994_v3 = vld [vmem:[#allocation88_spill] sm:$0xff] }
 0x486   : > { %v7802_v61 = vpop.f32.mrf.mxu1  ;;  %v7528_v63 = vadd.f32 %v11005_v2, %v7138_v41  ;;  %v6753_v47 = vadd.f32 %v15994_v3, %v15993_v33  ;;  %v15995_v30 = vld [vmem:[#allocation98_spill] sm:$0xff]  ;;  %v15128_v41 = vpop.permute.xlu0 %8293 }
 0x487   : > { %v7913_v60 = vadd.f32 %v7802_v61, %v7523_v22  ;;  %7991 = vrot.lane.b32.xlu1 %v7914_v56, %s11353_s30  ;;  %v7432_v31 = vpop.f32.mrf.mxu0  ;;  %v7141_v20 = vadd.f32 %v15995_v30, %v6750_v4  ;;  %v15122_v61 = vpop.permute.xlu1 %8295  ;;  %v16013_v3 = vld [vmem:[#allocation110_spill] sm:$0xff] }
 0x488   : > { %v11058_v6 = vpop.f32.mrf.mxu1  ;;  %v7527_v38 = vadd.f32 %v7432_v31, %v7137_v59 }
 0x489   : > { %v7916_v50 = vadd.f32 %v11058_v6, %v7526_v21  ;;  %7989 = vrot.lane.b32.xlu0 %v7913_v60, %s11353_s30  ;;  %v11008_v51 = vpop.f32.mrf.mxu0  ;;  %v6752_v21 = vadd.f32 %v15997_v18, %v15996_v7  ;;  %v15998_v60 = vld [vmem:[#allocation101_spill] sm:$0xff]  ;;  %v16015_v7 = vld [vmem:[#allocation107_spill] sm:$0xff] }
 0x48a   : > { %v7812_v19 = vpop.f32.mrf.mxu1  ;;  %v7530_v40 = vadd.f32 %v11008_v51, %v7140_v14  ;;  %v7144_v31 = vadd.f32 %v15998_v60, %v6753_v47 }
 0x48b   : > { %v7915_v28 = vadd.f32 %v7812_v19, %v7525_v58  ;;  %7995 = vrot.lane.b32.xlu1 %v7916_v50, %s11353_s30  ;;  %v7442_v25 = vpop.f32.mrf.mxu0  ;;  %v15999_v58 = vld [vmem:[#allocation64_spill] sm:$0xff]  ;;  %v16000_v50 = vld [vmem:[#allocation97_spill] sm:$0xff]  ;;  %v16001_v19 = vld [vmem:[#allocation102_spill] sm:$0xff] }
 0x48c   : > { %v11061_v24 = vpop.f32.mrf.mxu1  ;;  %v7529_v54 = vadd.f32 %v7442_v25, %v7139_v36  ;;  %v6755_v51 = vadd.f32 %v16000_v50, %v15999_v58  ;;  %v7143_v32 = vadd.f32 %v16001_v19, %v6752_v21  ;;  %v16016_v21 = vld [vmem:[#allocation112_spill] sm:$0xff]  ;;  %v16017_v58 = vld [vmem:[#allocation81_spill] sm:$0xff] }
 0x48d   : > { %v7918_v49 = vadd.f32 %v11061_v24, %v7528_v63  ;;  %7993 = vrot.lane.b32.xlu0 %v7915_v28, %s11353_s30  ;;  %v11011_v11 = vpop.f32.mrf.mxu0  ;;  %v16002_v63 = vld [vmem:[#allocation63_spill] sm:$0xff]  ;;  %v16003_v28 = vld [vmem:[#allocation100_spill] sm:$0xff]  ;;  %v16018_v50 = vld [vmem:[#allocation109_spill] sm:$0xff] }
 0x48e   : > { %v7822_v9 = vpop.f32.mrf.mxu1  ;;  %v7532_v37 = vadd.f32 %v11011_v11, %v7142_v17  ;;  %v6754_v25 = vadd.f32 %v16003_v28, %v16002_v63  ;;  %v16004_v24 = vld [vmem:[#allocation104_spill] sm:$0xff]  ;;  %v16006_v11 = vld [vmem:[#allocation99_spill] sm:$0xff]  ;;  %v16019_v19 = vld [vmem:[#allocation113_spill] sm:$0xff] }
 0x48f   : > { %v7917_v5 = vadd.f32 %v7822_v9, %v7527_v38  ;;  %7999 = vrot.lane.b32.xlu1 %v7918_v49, %s11353_s30  ;;  %v7452_v53 = vpop.f32.mrf.mxu0  ;;  %v7146_v62 = vadd.f32 %v16004_v24, %v6755_v51  ;;  %v15138_v38 = vpop.permute.xlu1 %8299  ;;  %v16005_v49 = vld [vmem:[#allocation66_spill] sm:$0xff]  ;;  %v6761_v51 = vadd.f32 %v16018_v50, %v16017_v58  ;;  %v16021_v63 = vld [vmem:[#allocation111_spill] sm:$0xff] }
 0x490   : > { %v11064_v10 = vpop.f32.mrf.mxu1  ;;  %v7531_v6 = vadd.f32 %v7452_v53, %v7141_v20  ;;  %v6757_v9 = vadd.f32 %v16006_v11, %v16005_v49  ;;  %v7145_v45 = vadd.f32 %v16007_v1, %v6754_v25  ;;  %v16008_v53 = vld [vmem:[#allocation80_spill] sm:$0xff]  ;;  %v16022_v25 = vld [vmem:[#allocation114_spill] sm:$0xff]  ;;  %v16023_v49 = vld [vmem:[#allocation115_spill] sm:$0xff] }
 0x491   : > { %v7920_v57 = vadd.f32 %v11064_v10, %v7530_v40  ;;  %7997 = vrot.lane.b32.xlu0 %v7917_v5, %s11353_s30  ;;  %v11014_v42 = vpop.f32.mrf.mxu0  ;;  %v15144_v5 = vpop.permute.xlu0 %8297  ;;  %v16009_v10 = vld [vmem:[#allocation103_spill] sm:$0xff]  ;;  %v7152_v24 = vadd.f32 %v16022_v25, %v6761_v51 }
 0x492   : > { %v7832_v27 = vpop.f32.mrf.mxu1  ;;  %v7534_v39 = vadd.f32 %v11014_v42, %v7144_v31  ;;  %v6756_v48 = vadd.f32 %v16009_v10, %v16008_v53  ;;  %v7148_v4 = vadd.f32 %v16010_v13, %v6757_v9  ;;  %v16011_v42 = vld [vmem:[#allocation67_spill] sm:$0xff]  ;;  %v16024_v13 = vld [vmem:[#allocation94_spill] sm:$0xff] }
 0x493   : > { %v7919_v22 = vadd.f32 %v7832_v27, %v7529_v54  ;;  %8003 = vrot.lane.b32.xlu1 %v7920_v57, %s11353_s30  ;;  %v7462_v56 = vpop.f32.mrf.mxu0  ;;  %v16012_v27 = vld [vmem:[#allocation105_spill] sm:$0xff] }
 0x494   : > { %v11067_v2 = vpop.f32.mrf.mxu1  ;;  %v7533_v16 = vadd.f32 %v7462_v56, %v7143_v32  ;;  %v6759_v33 = vadd.f32 %v16012_v27, %v16011_v42  ;;  %v7147_v47 = vadd.f32 %v16013_v3, %v6756_v48  ;;  %v15154_v56 = vpop.permute.xlu1 %8303 }
 0x495   : > { %v7922_v29 = vadd.f32 %v11067_v2, %v7532_v37  ;;  %8001 = vrot.lane.b32.xlu0 %v7919_v22, %s11353_s30  ;;  %v11017_v44 = vpop.f32.mrf.mxu0  ;;  %v16014_v2 = vld [vmem:[#allocation86_spill] sm:$0xff] }
 0x496   : > { %v7842_v23 = vpop.f32.mrf.mxu1  ;;  %v7536_v12 = vadd.f32 %v11017_v44, %v7146_v62  ;;  %v6758_v18 = vadd.f32 %v16015_v7, %v16014_v2  ;;  %v7150_v60 = vadd.f32 %v16016_v21, %v6759_v33 }
 0x497   : > { %v7921_v52 = vadd.f32 %v7842_v23, %v7531_v6  ;;  %8007 = vrot.lane.b32.xlu1 %v7922_v29, %s11353_s30  ;;  %v7472_v46 = vpop.f32.mrf.mxu0  ;;  %v15160_v23 = vpop.permute.xlu0 %8301 }
 0x498   : > { %v11070_v59 = vpop.f32.mrf.mxu1  ;;  %v7535_v26 = vadd.f32 %v7472_v46, %v7145_v45  ;;  %v7149_v32 = vadd.f32 %v16019_v19, %v6758_v18 }
 0x499   : > { %v7924_v15 = vadd.f32 %v11070_v59, %v7534_v39  ;;  %8005 = vrot.lane.b32.xlu0 %v7921_v52, %s11353_s30  ;;  %v11020_v8 = vpop.f32.mrf.mxu0  ;;  %v16020_v59 = vld [vmem:[#allocation82_spill] sm:$0xff] }
 0x49a   : > { %v7852_v14 = vpop.f32.mrf.mxu1  ;;  %v7538_v30 = vadd.f32 %v11020_v8, %v7148_v4  ;;  %v6760_v28 = vadd.f32 %v16021_v63, %v16020_v59  ;;  %v16025_v4 = vld [vmem:[#allocation96_spill] sm:$0xff] }
 0x49b   : > { %v7923_v35 = vadd.f32 %v7852_v14, %v7533_v16  ;;  %8011 = vrot.lane.b32.xlu1 %v7924_v15, %s11353_s30  ;;  %v7482_v36 = vpop.f32.mrf.mxu0  ;;  %v15170_v14 = vpop.permute.xlu1 %8307 }
 0x49c   : > { %v11073_v40 = vpop.f32.mrf.mxu1  ;;  %v7537_v31 = vadd.f32 %v7482_v36, %v7147_v47  ;;  %v7151_v11 = vadd.f32 %v16023_v49, %v6760_v28  ;;  %v16029_v28 = vld [vmem:[#allocation7_spill] sm:$0xff] }
 0x49d   : > { %v7926_v17 = vadd.f32 %v11073_v40, %v7536_v12  ;;  %8009 = vrot.lane.b32.xlu0 %v7923_v35, %s11353_s30  ;;  %v11023_v54 = vpop.f32.mrf.mxu0  ;;  %v15174_v12 = vpop.permute.xlu0 %8305 }
 0x49e   : > { %v7862_v57 = vpop.f32.mrf.mxu1  ;;  %v7540_v39 = vadd.f32 %v11023_v54, %v7150_v60  ;;  %v16026_v60 = vld [vmem:[#allocation10_spill] sm:$0xff] }
 0x49f   : > { %v7925_v20 = vadd.f32 %v7862_v57, %v7535_v26  ;;  %8015 = vrot.lane.b32.xlu1 %v7926_v17, %s11353_s30  ;;  %v7492_v37 = vpop.f32.mrf.mxu0  ;;  %v15178_v10 = vpop.permute.xlu1 %8311 }
 0x4a0   : > { %v11076_v22 = vpop.f32.mrf.mxu1  ;;  %v7539_v62 = vadd.f32 %v7492_v37, %v7149_v32  ;;  %v16028_v32 = vld [vmem:[#allocation8_spill] sm:$0xff] }
 0x4a1   : > { %v7928_v6 = vadd.f32 %v11076_v22, %v7538_v30  ;;  %8013 = vrot.lane.b32.xlu0 %v7925_v20, %s11353_s30  ;;  %v11026_v29 = vpop.f32.mrf.mxu0  ;;  %v15181_v48 = vpop.permute.xlu0 %8309 }
 0x4a2   : > { %v7872_v44 = vpop.f32.mrf.mxu1  ;;  %v7542_v9 = vadd.f32 %v11026_v29, %v7152_v24 }
 0x4a3   : > { %v7927_v52 = vadd.f32 %v7872_v44, %v7537_v31  ;;  %8019 = vrot.lane.b32.xlu1 %v7928_v6, %s11353_s30  ;;  %v7502_v15 = vpop.f32.mrf.mxu0  ;;  %v15187_v26 = vpop.permute.xlu1 %8315  ;;  %v16027_v44 = vld [vmem:[#allocation9_spill] sm:$0xff] }
 0x4a4   : > { %v11079_v46 = vpop.f32.mrf.mxu1  ;;  %v7541_v35 = vadd.f32 %v7502_v15, %v7151_v11 }
 0x4a5   : > { %v7930_v16 = vadd.f32 %v11079_v46, %v7540_v39  ;;  %8017 = vrot.lane.b32.xlu0 %v7927_v52, %s11353_s30  ;;  %v15189_v17 = vpop.permute.xlu0 %8313 }
 0x4a6   : > { %v7882_v8 = vpop.f32.mrf.mxu1 }
 0x4a7   : > { %v7929_v1 = vadd.f32 %v7882_v8, %v7539_v62  ;;  %8023 = vrot.lane.b32.xlu1 %v7930_v16, %s11353_s30  ;;  %v15191_v54 = vpop.permute.xlu1 %8319  ;;  %v16030_v8 = vld [vmem:[#allocation11_spill] sm:$0xff] }
 0x4a8   : > { %v11082_v45 = vpop.f32.mrf.mxu1 }
 0x4a9   : > { %v7932_v36 = vadd.f32 %v11082_v45, %v7542_v9  ;;  %8021 = vrot.lane.b32.xlu0 %v7929_v1, %s11353_s30  ;;  %v15193_v57 = vpop.permute.xlu0 %8317  ;;  %v16031_v45 = vld [vmem:[#allocation12_spill] sm:$0xff] }
 0x4aa   : > { %v7892_v40 = vpop.f32.mrf.mxu1 }
 0x4ab   : > { %v7931_v53 = vadd.f32 %v7892_v40, %v7541_v35  ;;  %8027 = vrot.lane.b32.xlu1 %v7932_v36, %s11353_s30  ;;  %v15195_v42 = vpop.permute.xlu1 %8323 }
 0x4ad   : > { %8025 = vrot.lane.b32.xlu0 %v7931_v53, %s11353_s30  ;;  %v15197_v27 = vpop.permute.xlu0 %8321 }
 0x4af   : > { %8347 = vrot.lane.b32.xlu1 %v16024_v13, %s11353_s30  ;;  %v15199_v33 = vpop.permute.xlu1 %8327 }
 0x4b1   : > { %8345 = vrot.lane.b32.xlu0 %v16025_v4, %s11353_s30  ;;  %v15201_v3 = vpop.permute.xlu0 %8325 }
 0x4b3   : > { %v15203_v47 = vpop.permute.xlu1 %8331 }
 0x4b5   : > { %v15205_v30 = vpop.permute.xlu0 %8329 }
 0x4b7   : > { %v15207_v20 = vpop.permute.xlu1 %8335 }
 0x4b9   : > { %v15209_v37 = vpop.permute.xlu0 %8333 }
 0x4bb   : > { %v15211_v22 = vpop.permute.xlu1 %8339 }
 0x4bd   : > { %v15213_v2 = vpop.permute.xlu0 %8337 }
 0x4bf   : > { %v15215_v7 = vpop.permute.xlu1 %8343 }
 0x4c1   : > { %v15217_v18 = vpop.permute.xlu0 %8341 }
 0x4e1   : > { %v7968_v21 = vpop.permute.xlu1 %7967 }
 0x4e2   : > { %v8062_v31 = vadd.f32 %v7968_v21, %v16026_v60  ;;  %v16032_v21 = vld [vmem:[#allocation13_spill] sm:$0xff] }
 0x4e3   : > { %v7966_v6 = vpop.permute.xlu0 %7965 }
 0x4e4   : > { %vm8094_vm5 = vcmp.ge.f32.partialorder %v8062_v31, 0.0  ;;  %v8126_v29 = vmul.f32 0.2, %v8062_v31  ;;  %v8061_v58 = vadd.f32 %v7966_v6, %v16027_v44  ;;  %v16033_v44 = vld [vmem:[#allocation14_spill] sm:$0xff] }
 0x4e5   : > { %v7972_v50 = vpop.permute.xlu1 %7971 }
 0x4e6   : > { %v8158_v51 = vsel %vm8094_vm5, %v8062_v31, %v8126_v29  ;;  %vm8093_vm6 = vcmp.ge.f32.partialorder %v8061_v58, 0.0  ;;  %v8125_v19 = vmul.f32 0.2, %v8061_v58  ;;  %v8064_v39 = vadd.f32 %v7972_v50, %v16028_v32  ;;  %v16034_v32 = vld [vmem:[#allocation15_spill] sm:$0xff] }
 0x4e7   : > { %v8382_v52 = vmul.f32 %v15090_v55, %v8158_v51  ;;  %v7970_v46 = vpop.permute.xlu0 %7969 }
 0x4e8   : > { %v8157_v59 = vsel %vm8093_vm6, %v8061_v58, %v8125_v19  ;;  %vm8096_vm7 = vcmp.ge.f32.partialorder %v8064_v39, 0.0  ;;  %v8128_v63 = vmul.f32 0.2, %v8064_v39  ;;  %v8063_v25 = vadd.f32 %v7970_v46, %v16029_v28 }
 0x4e9   : > { %v8381_v24 = vmul.f32 %v15096_v34, %v8157_v59  ;;  %v7976_v62 = vpop.permute.xlu1 %7975  ;;  %8447 = vrot.lane.b32.xlu1 %v8382_v52, %s11353_s30 }
 0x4ea   : > { %v8160_v16 = vsel %vm8096_vm7, %v8064_v39, %v8128_v63  ;;  %vm8095_vm8 = vcmp.ge.f32.partialorder %v8063_v25, 0.0  ;;  %v8127_v15 = vmul.f32 0.2, %v8063_v25  ;;  %v8066_v49 = vadd.f32 %v7976_v62, %v16030_v8  ;;  %v16035_v63 = vld [vmem:[#allocation16_spill] sm:$0xff] }
 0x4eb   : > { %v8384_v11 = vmul.f32 %v15106_v43, %v8160_v16  ;;  %8445 = vrot.lane.b32.xlu0 %v8381_v24, %s11353_s30  ;;  %v7974_v55 = vpop.permute.xlu0 %7973  ;;  %v16036_v16 = vld [vmem:[#allocation17_spill] sm:$0xff] }
 0x4ec   : > { %v8159_v9 = vsel %vm8095_vm8, %v8063_v25, %v8127_v15  ;;  %vm8098_vm9 = vcmp.ge.f32.partialorder %v8066_v49, 0.0  ;;  %v8130_v1 = vmul.f32 0.2, %v8066_v49  ;;  %v8065_v35 = vadd.f32 %v7974_v55, %v16031_v45  ;;  %v16037_v55 = vld [vmem:[#allocation18_spill] sm:$0xff] }
 0x4ed   : > { %v8383_v34 = vmul.f32 %v15112_v0, %v8159_v9  ;;  %v7980_v36 = vpop.permute.xlu1 %7979  ;;  %8451 = vrot.lane.b32.xlu1 %v8384_v11, %s11353_s30 }
 0x4ee   : > { %v8162_v40 = vsel %vm8098_vm9, %v8066_v49, %v8130_v1  ;;  %vm8097_vm10 = vcmp.ge.f32.partialorder %v8065_v35, 0.0  ;;  %v8129_v53 = vmul.f32 0.2, %v8065_v35  ;;  %v8068_v60 = vadd.f32 %v7980_v36, %v16032_v21 }
 0x4ef   : > { %v8386_v43 = vmul.f32 %v15122_v61, %v8162_v40  ;;  %8449 = vrot.lane.b32.xlu0 %v8383_v34, %s11353_s30  ;;  %v7978_v31 = vpop.permute.xlu0 %7977  ;;  %v16038_v34 = vld [vmem:[#allocation20_spill] sm:$0xff] }
 0x4f0   : > { %v8161_v6 = vsel %vm8097_vm10, %v8065_v35, %v8129_v53  ;;  %vm8100_vm11 = vcmp.ge.f32.partialorder %v8068_v60, 0.0  ;;  %v8132_v29 = vmul.f32 0.2, %v8068_v60  ;;  %v8067_v58 = vadd.f32 %v7978_v31, %v16033_v44  ;;  %v16040_v44 = vld [vmem:[#allocation21_spill] sm:$0xff] }
 0x4f1   : > { %v8385_v0 = vmul.f32 %v15128_v41, %v8161_v6  ;;  %v7984_v50 = vpop.permute.xlu1 %7983  ;;  %8455 = vrot.lane.b32.xlu1 %v8386_v43, %s11353_s30 }
 0x4f2   : > { %v8164_v51 = vsel %vm8100_vm11, %v8068_v60, %v8132_v29  ;;  %vm8099_vm12 = vcmp.ge.f32.partialorder %v8067_v58, 0.0  ;;  %v8131_v19 = vmul.f32 0.2, %v8067_v58  ;;  %v8070_v39 = vadd.f32 %v7984_v50, %v16034_v32  ;;  %v16039_v60 = vld [vmem:[#allocation19_spill] sm:$0xff] }
 0x4f3   : > { %v8388_v61 = vmul.f32 %v15138_v38, %v8164_v51  ;;  %8453 = vrot.lane.b32.xlu0 %v8385_v0, %s11353_s30  ;;  %v7982_v52 = vpop.permute.xlu0 %7981 }
 0x4f4   : > { %v8163_v46 = vsel %vm8099_vm12, %v8067_v58, %v8131_v19  ;;  %vm8102_vm13 = vcmp.ge.f32.partialorder %v8070_v39, 0.0  ;;  %v8134_v59 = vmul.f32 0.2, %v8070_v39  ;;  %v8069_v28 = vadd.f32 %v7982_v52, %v16035_v63  ;;  %v16041_v19 = vld [vmem:[#allocation23_spill] sm:$0xff] }
 0x4f5   : > { %v8387_v41 = vmul.f32 %v15144_v5, %v8163_v46  ;;  %v7988_v25 = vpop.permute.xlu1 %7987  ;;  %8459 = vrot.lane.b32.xlu1 %v8388_v61, %s11353_s30  ;;  %v16042_v46 = vld [vmem:[#allocation24_spill] sm:$0xff] }
 0x4f6   : > { %v8166_v24 = vsel %vm8102_vm13, %v8070_v39, %v8134_v59  ;;  %vm8101_vm14 = vcmp.ge.f32.partialorder %v8069_v28, 0.0  ;;  %v8133_v62 = vmul.f32 0.2, %v8069_v28  ;;  %v8072_v15 = vadd.f32 %v7988_v25, %v16036_v16  ;;  %v16043_v25 = vld [vmem:[#allocation26_spill] sm:$0xff] }
 0x4f7   : > { %v8390_v38 = vmul.f32 %v15154_v56, %v8166_v24  ;;  %8457 = vrot.lane.b32.xlu0 %v8387_v41, %s11353_s30  ;;  %v7986_v8 = vpop.permute.xlu0 %7985 }
 0x4f8   : > { %v8165_v49 = vsel %vm8101_vm14, %v8069_v28, %v8133_v62  ;;  %vm8104_vm15 = vcmp.ge.f32.partialorder %v8072_v15, 0.0  ;;  %v8136_v11 = vmul.f32 0.2, %v8072_v15  ;;  %v8071_v9 = vadd.f32 %v7986_v8, %v16037_v55 }
 0x4f9   : > { %v8389_v5 = vmul.f32 %v15160_v23, %v8165_v49  ;;  %v7992_v1 = vpop.permute.xlu1 %7991  ;;  %8463 = vrot.lane.b32.xlu1 %v8390_v38, %s11353_s30  ;;  %v16044_v38 = vld [vmem:[#allocation27_spill] sm:$0xff] }
 0x4fa   : > { %v8168_v45 = vsel %vm8104_vm15, %v8072_v15, %v8136_v11  ;;  %vm8103_vm0 = vcmp.ge.f32.partialorder %v8071_v9, 0.0  ;;  %v8135_v35 = vmul.f32 0.2, %v8071_v9  ;;  %v8074_v36 = vadd.f32 %v7992_v1, %v16038_v34  ;;  %v16046_v34 = vld [vmem:[#allocation31_spill] sm:$0xff] }
 0x4fb   : > { %v8392_v56 = vmul.f32 %v15170_v14, %v8168_v45  ;;  %8461 = vrot.lane.b32.xlu0 %v8389_v5, %s11353_s30  ;;  %v7990_v40 = vpop.permute.xlu0 %7989 }
 0x4fc   : > { %v8167_v53 = vsel %vm8103_vm0, %v8071_v9, %v8135_v35  ;;  %vm8106_vm1 = vcmp.ge.f32.partialorder %v8074_v36, 0.0  ;;  %v8138_v21 = vmul.f32 0.2, %v8074_v36  ;;  %v8073_v43 = vadd.f32 %v7990_v40, %v16039_v60  ;;  %v16045_v9 = vld [vmem:[#allocation28_spill] sm:$0xff] }
 0x4fd   : > { %v8391_v23 = vmul.f32 %v15174_v12, %v8167_v53  ;;  %v7996_v31 = vpop.permute.xlu1 %7995  ;;  %8467 = vrot.lane.b32.xlu1 %v8392_v56, %s11353_s30 }
 0x4fe   : > { %v8170_v6 = vsel %vm8106_vm1, %v8074_v36, %v8138_v21  ;;  %vm8105_vm2 = vcmp.ge.f32.partialorder %v8073_v43, 0.0  ;;  %v8137_v29 = vmul.f32 0.2, %v8073_v43  ;;  %v8076_v58 = vadd.f32 %v7996_v31, %v16040_v44  ;;  %v16047_v21 = vld [vmem:[#allocation33_spill] sm:$0xff] }
 0x4ff   : > { %v8394_v14 = vmul.f32 %v15178_v10, %v8170_v6  ;;  %8465 = vrot.lane.b32.xlu0 %v8391_v23, %s11353_s30  ;;  %v7994_v0 = vpop.permute.xlu0 %7993  ;;  %v16048_v6 = vld [vmem:[#allocation34_spill] sm:$0xff] }
 0x500   : > { %v8169_v50 = vsel %vm8105_vm2, %v8073_v43, %v8137_v29  ;;  %vm8108_vm4 = vcmp.ge.f32.partialorder %v8076_v58, 0.0  ;;  %v8140_v51 = vmul.f32 0.2, %v8076_v58  ;;  %v8075_v32 = vadd.f32 %v7994_v0, %v16041_v19  ;;  %v16049_v0 = vld [vmem:[#allocation37_spill] sm:$0xff] }
 0x501   : > { %v8393_v12 = vmul.f32 %v15181_v48, %v8169_v50  ;;  %v8000_v39 = vpop.permute.xlu1 %7999  ;;  %8471 = vrot.lane.b32.xlu1 %v8394_v14, %s11353_s30 }
 0x502   : > { %v8172_v61 = vsel %vm8108_vm4, %v8076_v58, %v8140_v51  ;;  %vm8107_vm5 = vcmp.ge.f32.partialorder %v8075_v32, 0.0  ;;  %v8139_v52 = vmul.f32 0.2, %v8075_v32  ;;  %v8078_v59 = vadd.f32 %v8000_v39, %v16042_v46 }
 0x503   : > { %v8396_v10 = vmul.f32 %v15187_v26, %v8172_v61  ;;  %8469 = vrot.lane.b32.xlu0 %v8393_v12, %s11353_s30  ;;  %v7998_v63 = vpop.permute.xlu0 %7997  ;;  %v16050_v12 = vld [vmem:[#allocation39_spill] sm:$0xff] }
 0x504   : > { %v8171_v28 = vsel %vm8107_vm5, %v8075_v32, %v8139_v52  ;;  %vm8110_vm6 = vcmp.ge.f32.partialorder %v8078_v59, 0.0  ;;  %v8142_v41 = vmul.f32 0.2, %v8078_v59  ;;  %v8077_v24 = vadd.f32 %v7998_v63, %v16043_v25  ;;  %v16052_v25 = vld [vmem:[#allocation44_spill] sm:$0xff] }
 0x505   : > { %v8395_v48 = vmul.f32 %v15189_v17, %v8171_v28  ;;  %v8004_v62 = vpop.permute.xlu1 %8003  ;;  %8475 = vrot.lane.b32.xlu1 %v8396_v10, %s11353_s30 }
 0x506   : > { %v8174_v16 = vsel %vm8110_vm6, %v8078_v59, %v8142_v41  ;;  %vm8109_vm7 = vcmp.ge.f32.partialorder %v8077_v24, 0.0  ;;  %v8141_v15 = vmul.f32 0.2, %v8077_v24  ;;  %v8080_v8 = vadd.f32 %v8004_v62, %v16044_v38  ;;  %v16051_v59 = vld [vmem:[#allocation40_spill] sm:$0xff] }
 0x507   : > { %v8398_v26 = vmul.f32 %v15191_v54, %v8174_v16  ;;  %8473 = vrot.lane.b32.xlu0 %v8395_v48, %s11353_s30  ;;  %v8002_v49 = vpop.permute.xlu0 %8001 }
 0x508   : > { %v8173_v11 = vsel %vm8109_vm7, %v8077_v24, %v8141_v15  ;;  %vm8112_vm8 = vcmp.ge.f32.partialorder %v8080_v8, 0.0  ;;  %v8144_v55 = vmul.f32 0.2, %v8080_v8  ;;  %v8079_v5 = vadd.f32 %v8002_v49, %v16045_v9  ;;  %v16053_v15 = vld [vmem:[#allocation45_spill] sm:$0xff] }
 0x509   : > { %v8397_v17 = vmul.f32 %v15193_v57, %v8173_v11  ;;  %v8008_v1 = vpop.permute.xlu1 %8007  ;;  %8479 = vrot.lane.b32.xlu1 %v8398_v26, %s11353_s30  ;;  %v16054_v11 = vld [vmem:[#allocation71_spill] sm:$0xff] }
 0x50a   : > { %v8176_v45 = vsel %vm8112_vm8, %v8080_v8, %v8144_v55  ;;  %vm8111_vm9 = vcmp.ge.f32.partialorder %v8079_v5, 0.0  ;;  %v8143_v35 = vmul.f32 0.2, %v8079_v5  ;;  %v8082_v36 = vadd.f32 %v8008_v1, %v16046_v34  ;;  %v16055_v1 = vld [vmem:[#allocation46_spill] sm:$0xff] }
 0x50b   : > { %v8400_v54 = vmul.f32 %v15195_v42, %v8176_v45  ;;  %8477 = vrot.lane.b32.xlu0 %v8397_v17, %s11353_s30  ;;  %v8006_v56 = vpop.permute.xlu0 %8005 }
 0x50c   : > { %v8175_v40 = vsel %vm8111_vm9, %v8079_v5, %v8143_v35  ;;  %vm8114_vm10 = vcmp.ge.f32.partialorder %v8082_v36, 0.0  ;;  %v8146_v53 = vmul.f32 0.2, %v8082_v36  ;;  %v8081_v60 = vadd.f32 %v8006_v56, %v16047_v21 }
 0x50d   : > { %v8399_v57 = vmul.f32 %v15197_v27, %v8175_v40  ;;  %v8012_v43 = vpop.permute.xlu1 %8011  ;;  %8483 = vrot.lane.b32.xlu1 %v8400_v54, %s11353_s30  ;;  %v16056_v54 = vld [vmem:[#allocation50_spill] sm:$0xff] }
 0x50e   : > { %v8178_v23 = vsel %vm8114_vm10, %v8082_v36, %v8146_v53  ;;  %vm8113_vm11 = vcmp.ge.f32.partialorder %v8081_v60, 0.0  ;;  %v8145_v31 = vmul.f32 0.2, %v8081_v60  ;;  %v8084_v29 = vadd.f32 %v8012_v43, %v16048_v6 }
 0x50f   : > { %v8402_v42 = vmul.f32 %v15199_v33, %v8178_v23  ;;  %8481 = vrot.lane.b32.xlu0 %v8399_v57, %s11353_s30  ;;  %v8010_v44 = vpop.permute.xlu0 %8009 }
 0x510   : > { %v8177_v58 = vsel %vm8113_vm11, %v8081_v60, %v8145_v31  ;;  %vm8116_vm12 = vcmp.ge.f32.partialorder %v8084_v29, 0.0  ;;  %v8148_v14 = vmul.f32 0.2, %v8084_v29  ;;  %v8083_v50 = vadd.f32 %v8010_v44, %v16049_v0  ;;  %v16057_v60 = vld [vmem:[#allocation72_spill] sm:$0xff] }
 0x511   : > { %v8401_v27 = vmul.f32 %v15201_v3, %v8177_v58  ;;  %v8016_v51 = vpop.permute.xlu1 %8015  ;;  %8487 = vrot.lane.b32.xlu1 %v8402_v42, %s11353_s30  ;;  %v16059_v58 = vld [vmem:[#allocation25_spill] sm:$0xff]  ;;  %v11256_v0 = vld [vmem:[%s12483_s17 + $0x8] sm:$0xff] }
 0x512   : > { %v8180_v19 = vsel %vm8116_vm12, %v8084_v29, %v8148_v14  ;;  %vm8115_vm13 = vcmp.ge.f32.partialorder %v8083_v50, 0.0  ;;  %v8147_v32 = vmul.f32 0.2, %v8083_v50  ;;  %v8086_v39 = vadd.f32 %v8016_v51, %v16050_v12  ;;  %v11257_v12 = vld [vmem:[%s12483_s17] sm:$0xff] }
 0x513   : > { %v8404_v33 = vmul.f32 %v15203_v47, %v8180_v19  ;;  %8485 = vrot.lane.b32.xlu0 %v8401_v27, %s11353_s30  ;;  %v8014_v61 = vpop.permute.xlu0 %8013  ;;  %v8189_v14 = vsub.f32 1.0, %v16059_v58  ;;  %v16060_v27 = vld [vmem:[#allocation29_spill] sm:$0xff]  ;;  %v11266_v58 = vld [vmem:[%s12483_s17 + $0x58] sm:$0xff] }
 0x514   : > { %v8179_v52 = vsel %vm8115_vm13, %v8083_v50, %v8147_v32  ;;  %vm8118_vm14 = vcmp.ge.f32.partialorder %v8086_v39, 0.0  ;;  %v8150_v46 = vmul.f32 0.2, %v8086_v39  ;;  %v8085_v10 = vadd.f32 %v8014_v61, %v16051_v59  ;;  %v11258_v59 = vld [vmem:[%s12483_s17 + $0x18] sm:$0xff] }
 0x515   : > { %v8403_v3 = vmul.f32 %v15205_v30, %v8179_v52  ;;  %v8020_v63 = vpop.permute.xlu1 %8019  ;;  %8491 = vrot.lane.b32.xlu1 %v8404_v33, %s11353_s30  ;;  %v8192_v51 = vsub.f32 1.0, %v16060_v27  ;;  %v16061_v33 = vld [vmem:[#allocation30_spill] sm:$0xff] }
 0x516   : > { %v8182_v28 = vsel %vm8118_vm14, %v8086_v39, %v8150_v46  ;;  %vm8117_vm15 = vcmp.ge.f32.partialorder %v8085_v10, 0.0  ;;  %v8149_v41 = vmul.f32 0.2, %v8085_v10  ;;  %v8088_v24 = vadd.f32 %v8020_v63, %v16052_v25  ;;  %v11259_v25 = vld [vmem:[%s12483_s17 + $0x10] sm:$0xff] }
 0x517   : > { %v8406_v47 = vmul.f32 %v15207_v20, %v8182_v28  ;;  %8489 = vrot.lane.b32.xlu0 %v8403_v3, %s11353_s30  ;;  %v8018_v48 = vpop.permute.xlu0 %8017  ;;  %v8221_v39 = vmul.f32 %v11257_v12, %v8189_v14  ;;  %v8191_v61 = vsub.f32 1.0, %v16061_v33  ;;  %v16062_v3 = vld [vmem:[#allocation32_spill] sm:$0xff] }
 0x518   : > { %v8181_v62 = vsel %vm8117_vm15, %v8085_v10, %v8149_v41  ;;  %vm8120_vm0 = vcmp.ge.f32.partialorder %v8088_v24, 0.0  ;;  %v8152_v16 = vmul.f32 0.2, %v8088_v24  ;;  %v8087_v38 = vadd.f32 %v8018_v48, %v16053_v15  ;;  %v11260_v15 = vld [vmem:[%s12483_s17 + $0x28] sm:$0xff] }
 0x519   : > { %v8405_v30 = vmul.f32 %v15209_v37, %v8181_v62  ;;  %v8024_v8 = vpop.permute.xlu1 %8023  ;;  %8495 = vrot.lane.b32.xlu1 %v8406_v47, %s11353_s30  ;;  %v8224_v10 = vmul.f32 %v11258_v59, %v8192_v51  ;;  %v8194_v63 = vsub.f32 1.0, %v16062_v3  ;;  %v16063_v47 = vld [vmem:[#allocation35_spill] sm:$0xff]  ;;  %v16071_v12 = vld [vmem:[#allocation48_spill] sm:$0xff]  ;;  %v16072_v59 = vld [vmem:[#allocation49_spill] sm:$0xff] }
 0x51a   : > { %v8184_v26 = vsel %vm8120_vm0, %v8088_v24, %v8152_v16  ;;  %vm8119_vm1 = vcmp.ge.f32.partialorder %v8087_v38, 0.0  ;;  %v8151_v49 = vmul.f32 0.2, %v8087_v38  ;;  %v8090_v55 = vadd.f32 %v8024_v8, %v16054_v11  ;;  %v11261_v11 = vld [vmem:[%s12483_s17 + $0x20] sm:$0xff] }
 0x51b   : > { %v8408_v20 = vmul.f32 %v15211_v22, %v8184_v26  ;;  %8493 = vrot.lane.b32.xlu0 %v8405_v30, %s11353_s30  ;;  %v8022_v9 = vpop.permute.xlu0 %8021  ;;  %v8223_v24 = vmul.f32 %v11259_v25, %v8191_v61  ;;  %v8193_v48 = vsub.f32 1.0, %v16063_v47  ;;  %v16064_v30 = vld [vmem:[#allocation36_spill] sm:$0xff]  ;;  %v16073_v25 = vld [vmem:[#allocation51_spill] sm:$0xff] }
 0x51c   : > { %v8183_v5 = vsel %vm8119_vm1, %v8087_v38, %v8151_v49  ;;  %vm8122_vm2 = vcmp.ge.f32.partialorder %v8090_v55, 0.0  ;;  %v8154_v17 = vmul.f32 0.2, %v8090_v55  ;;  %v8089_v45 = vadd.f32 %v8022_v9, %v16055_v1  ;;  %v11262_v1 = vld [vmem:[%s12483_s17 + $0x38] sm:$0xff] }
 0x51d   : > { %v8407_v37 = vmul.f32 %v15213_v2, %v8183_v5  ;;  %8499 = vrot.lane.b32.xlu1 %v8408_v20, %s11353_s30  ;;  %v8028_v35 = vpop.permute.xlu1 %8027  ;;  %v8226_v38 = vmul.f32 %v11260_v15, %v8194_v63  ;;  %v8196_v8 = vsub.f32 1.0, %v16064_v30  ;;  %v16065_v20 = vld [vmem:[#allocation38_spill] sm:$0xff] }
 0x51e   : > { %v8186_v34 = vsel %vm8122_vm2, %v8090_v55, %v8154_v17  ;;  %vm8121_vm4 = vcmp.ge.f32.partialorder %v8089_v45, 0.0  ;;  %v8153_v36 = vmul.f32 0.2, %v8089_v45  ;;  %v8092_v56 = vadd.f32 %v8028_v35, %v16056_v54  ;;  %v11263_v54 = vld [vmem:[%s12483_s17 + $0x30] sm:$0xff]  ;;  %v16074_v15 = vld [vmem:[#allocation70_spill] sm:$0xff] }
 0x51f   : > { %v8410_v22 = vmul.f32 %v15215_v7, %v8186_v34  ;;  %8497 = vrot.lane.b32.xlu0 %v8407_v37, %s11353_s30  ;;  %v8026_v40 = vpop.permute.xlu0 %8025  ;;  %v8225_v55 = vmul.f32 %v11261_v11, %v8193_v48  ;;  %v8195_v9 = vsub.f32 1.0, %v16065_v20  ;;  %v16066_v37 = vld [vmem:[#allocation41_spill] sm:$0xff] }
 0x520   : > { %v8185_v53 = vsel %vm8121_vm4, %v8089_v45, %v8153_v36  ;;  %v8156_v21 = vmul.f32 0.2, %v8092_v56  ;;  %v8091_v57 = vadd.f32 %v8026_v40, %v16057_v60  ;;  %vm8124_vm5 = vcmp.ge.f32.partialorder %v8092_v56, 0.0  ;;  %v11264_v60 = vld [vmem:[%s12483_s17 + $0x48] sm:$0xff]  ;;  %v16075_v11 = vld [vmem:[#allocation53_spill] sm:$0xff] }
 0x521   : > { %v8409_v2 = vmul.f32 %v15217_v18, %v8185_v53  ;;  %8503 = vrot.lane.b32.xlu1 %v8410_v22, %s11353_s30  ;;  %v8348_v43 = vpop.permute.xlu1 %8347  ;;  %v16058_v18 = vld [vmem:[#allocation22_spill] sm:$0xff]  ;;  %v8228_v45 = vmul.f32 %v11262_v1, %v8196_v8  ;;  %v8198_v35 = vsub.f32 1.0, %v16066_v37  ;;  %v16076_v1 = vld [vmem:[#allocation52_spill] sm:$0xff] }
 0x522   : > { %v8155_v23 = vmul.f32 0.2, %v8091_v57  ;;  %v8188_v31 = vsel %vm8124_vm5, %v8092_v56, %v8156_v21  ;;  %vm8123_vm6 = vcmp.ge.f32.partialorder %v8091_v57, 0.0  ;;  %v8190_v44 = vsub.f32 1.0, %v16058_v18  ;;  %v16067_v22 = vld [vmem:[#allocation42_spill] sm:$0xff] }
 0x523   : > { %v8412_v7 = vmul.f32 %v8348_v43, %v8188_v31  ;;  %8501 = vrot.lane.b32.xlu0 %v8409_v2, %s11353_s30  ;;  %v8346_v6 = vpop.permute.xlu0 %8345  ;;  %v8227_v56 = vmul.f32 %v11263_v54, %v8195_v9  ;;  %v8197_v40 = vsub.f32 1.0, %v16067_v22  ;;  %v16068_v2 = vld [vmem:[#allocation43_spill] sm:$0xff]  ;;  %v16077_v54 = vld [vmem:[#allocation54_spill] sm:$0xff] }
 0x524   : > { %v8187_v29 = vsel %vm8123_vm6, %v8091_v57, %v8155_v23  ;;  %v8222_v50 = vmul.f32 %v11256_v0, %v8190_v44  ;;  %v8230_v57 = vmul.f32 %v11264_v60, %v8198_v35  ;;  %v8200_v43 = vsub.f32 1.0, %v16068_v2  ;;  %v16070_v0 = vld [vmem:[#allocation47_spill] sm:$0xff]  ;;  %v16078_v60 = vld [vmem:[#allocation57_spill] sm:$0xff] }
 0x525   : > { %v8411_v42 = vmul.f32 %v8346_v6, %v8187_v29  ;;  %8507 = vrot.lane.b32.xlu1 %v8412_v7, %s11353_s30  ;;  %v11265_v7 = vld [vmem:[%s12483_s17 + $0x40] sm:$0xff]  ;;  %v16069_v29 = vld [vmem:[#allocation69_spill] sm:$0xff] }
 0x526   : > { %v8229_v6 = vmul.f32 %v11265_v7, %v8197_v40  ;;  %v8232_v14 = vmul.f32 %v11266_v58, %v8200_v43  ;;  %v16079_v7 = vld [vmem:[#allocation74_spill] sm:$0xff]  ;;  %v16080_v58 = vld [vmem:[#allocation73_spill] sm:$0xff] }
 0x527   : > { %8505 = vrot.lane.b32.xlu0 %v8411_v42, %s11353_s30  ;;  %s15322_s30 = scalar_lea.vmem [#allocation4], %s8697_s9  ;;  %v8199_v42 = vsub.f32 1.0, %v16069_v29 }
 0x528   : > { %s8619_s11 = sshll.u32 %s15322_s30, 4  ;;  %s15449_s11 = int_to_ptr.vmem [resolvable:$true] %s8619_s11 }
 0x529   : > { %p11295_p0 = scmp.lt.s32.totalorder %s15449_s11, %s11293_s16 }
 0x55b   : > { %v8448_v19 = vpop.permute.xlu1 %8447 }
 0x55c   : > { %v8542_v32 = vadd.f32 %v8448_v19, %v8222_v50  ;;  %v8202_v50 = vsub.f32 1.0, %v16070_v0  ;;  %v11267_v19 = vld [vmem:[%s12483_s17 + $0x50] sm:$0xff] }
 0x55d   : > { %v8446_v52 = vpop.permute.xlu0 %8445 }
 0x55e   : > { %8574 = vst.msk [vmem:[%s15322_s30 + $0x8] sm:$0xff] %vm4270_vm3, %v8542_v32  ;;  %v8541_v46 = vadd.f32 %v8446_v52, %v8221_v39  ;;  %v8231_v32 = vmul.f32 %v11267_v19, %v8199_v42  ;;  %v8201_v39 = vsub.f32 1.0, %v16071_v12  ;;  %v11268_v52 = vld [vmem:[%s12483_s17 + $0x68] sm:$0xff] }
 0x55f   : > { %v8452_v28 = vpop.permute.xlu1 %8451  ;;  %v16081_v19 = vld [vmem:[#allocation56_spill] sm:$0xff] }
 0x560   : > { %8573 = vst.msk [vmem:[%s15322_s30] sm:$0xff] %vm4270_vm3, %v8541_v46  ;;  %v8544_v41 = vadd.f32 %v8452_v28, %v8224_v10  ;;  %v8234_v46 = vmul.f32 %v11268_v52, %v8202_v50  ;;  %v8204_v10 = vsub.f32 1.0, %v16072_v59  ;;  %v11269_v28 = vld [vmem:[%s12483_s17 + $0x60] sm:$0xff] }
 0x561   : > { %v8450_v62 = vpop.permute.xlu0 %8449  ;;  %v16082_v52 = vld [vmem:[#allocation55_spill] sm:$0xff] }
 0x562   : > { %8576 = vst.msk [vmem:[%s15322_s30 + $0x18] sm:$0xff] %vm4270_vm3, %v8544_v41  ;;  %v8543_v16 = vadd.f32 %v8450_v62, %v8223_v24  ;;  %v8233_v41 = vmul.f32 %v11269_v28, %v8201_v39  ;;  %v8203_v24 = vsub.f32 1.0, %v16073_v25  ;;  %v11270_v62 = vld [vmem:[%s12483_s17 + $0x78] sm:$0xff]  ;;  %v16083_v28 = vld [vmem:[#allocation61_spill] sm:$0xff] }
 0x563   : > { %v8456_v26 = vpop.permute.xlu1 %8455 }
 0x564   : > { %8575 = vst.msk [vmem:[%s15322_s30 + $0x10] sm:$0xff] %vm4270_vm3, %v8543_v16  ;;  %v8546_v49 = vadd.f32 %v8456_v26, %v8226_v38  ;;  %v8236_v16 = vmul.f32 %v11270_v62, %v8204_v10  ;;  %v8206_v38 = vsub.f32 1.0, %v16074_v15  ;;  %v11271_v26 = vld [vmem:[%s12483_s17 + $0x70] sm:$0xff]  ;;  %v16084_v62 = vld [vmem:[#allocation76_spill] sm:$0xff] }
 0x565   : > { %v8454_v5 = vpop.permute.xlu0 %8453 }
 0x566   : > { %8578 = vst.msk [vmem:[%s15322_s30 + $0x28] sm:$0xff] %vm4270_vm3, %v8546_v49  ;;  %v8545_v17 = vadd.f32 %v8454_v5, %v8225_v55  ;;  %v8235_v49 = vmul.f32 %v11271_v26, %v8203_v24  ;;  %v8205_v55 = vsub.f32 1.0, %v16075_v11  ;;  %v11272_v5 = vld [vmem:[%s12483_s17 + $0x88] sm:$0xff]  ;;  %v16085_v26 = vld [vmem:[#allocation75_spill] sm:$0xff] }
 0x567   : > { %v8460_v34 = vpop.permute.xlu1 %8459 }
 0x568   : > { %8577 = vst.msk [vmem:[%s15322_s30 + $0x20] sm:$0xff] %vm4270_vm3, %v8545_v17  ;;  %v8548_v36 = vadd.f32 %v8460_v34, %v8228_v45  ;;  %v8238_v17 = vmul.f32 %v11272_v5, %v8206_v38  ;;  %v8208_v45 = vsub.f32 1.0, %v16076_v1  ;;  %v11273_v34 = vld [vmem:[%s12483_s17 + $0x80] sm:$0xff]  ;;  %v16086_v5 = vld [vmem:[#allocation58_spill] sm:$0xff] }
 0x569   : > { %v8458_v53 = vpop.permute.xlu0 %8457 }
 0x56a   : > { %8580 = vst.msk [vmem:[%s15322_s30 + $0x38] sm:$0xff] %vm4270_vm3, %v8548_v36  ;;  %v8547_v21 = vadd.f32 %v8458_v53, %v8227_v56  ;;  %v8237_v36 = vmul.f32 %v11273_v34, %v8205_v55  ;;  %v8207_v56 = vsub.f32 1.0, %v16077_v54  ;;  %v11274_v53 = vld [vmem:[%s12483_s17 + $0x98] sm:$0xff]  ;;  %v16087_v34 = vld [vmem:[#allocation65_spill] sm:$0xff] }
 0x56b   : > { %v8464_v23 = vpop.permute.xlu1 %8463 }
 0x56c   : > { %8579 = vst.msk [vmem:[%s15322_s30 + $0x30] sm:$0xff] %vm4270_vm3, %v8547_v21  ;;  %v8550_v31 = vadd.f32 %v8464_v23, %v8230_v57  ;;  %v8240_v21 = vmul.f32 %v11274_v53, %v8208_v45  ;;  %v8210_v57 = vsub.f32 1.0, %v16078_v60  ;;  %v11275_v23 = vld [vmem:[%s12483_s17 + $0x90] sm:$0xff]  ;;  %v8220_v53 = vsub.f32 1.0, %v16024_v13 }
 0x56d   : > { %v8462_v18 = vpop.permute.xlu0 %8461 }
 0x56e   : > { %8582 = vst.msk [vmem:[%s15322_s30 + $0x48] sm:$0xff] %vm4270_vm3, %v8550_v31  ;;  %v8549_v44 = vadd.f32 %v8462_v18, %v8229_v6  ;;  %v8239_v31 = vmul.f32 %v11275_v23, %v8207_v56  ;;  %v8209_v6 = vsub.f32 1.0, %v16079_v7  ;;  %v11276_v18 = vld [vmem:[%s12483_s17 + $0xa8] sm:$0xff]  ;;  %v11286_v7 = vld [vmem:[%s12483_s17 + $0xf8] sm:$0xff] }
 0x56f   : > { %v8468_v27 = vpop.permute.xlu1 %8467 }
 0x570   : > { %8581 = vst.msk [vmem:[%s15322_s30 + $0x40] sm:$0xff] %vm4270_vm3, %v8549_v44  ;;  %v8552_v51 = vadd.f32 %v8468_v27, %v8232_v14  ;;  %v8242_v44 = vmul.f32 %v11276_v18, %v8210_v57  ;;  %v8212_v14 = vsub.f32 1.0, %v16080_v58  ;;  %v11277_v27 = vld [vmem:[%s12483_s17 + $0xa0] sm:$0xff] }
 0x571   : > { %v8466_v33 = vpop.permute.xlu0 %8465  ;;  %v11285_v57 = vld [vmem:[%s12483_s17 + $0xe0] sm:$0xff] }
 0x572   : > { %8584 = vst.msk [vmem:[%s15322_s30 + $0x58] sm:$0xff] %vm4270_vm3, %v8552_v51  ;;  %v8551_v61 = vadd.f32 %v8466_v33, %v8231_v32  ;;  %v8241_v51 = vmul.f32 %v11277_v27, %v8209_v6  ;;  %v8211_v32 = vsub.f32 1.0, %v16081_v19  ;;  %v11278_v33 = vld [vmem:[%s12483_s17 + $0xb8] sm:$0xff]  ;;  %v8252_v6 = vmul.f32 %v11286_v7, %v8220_v53 }
 0x573   : > { %v8472_v3 = vpop.permute.xlu1 %8471 }
 0x574   : > { %8583 = vst.msk [vmem:[%s15322_s30 + $0x50] sm:$0xff] %vm4270_vm3, %v8551_v61  ;;  %v8554_v63 = vadd.f32 %v8472_v3, %v8234_v46  ;;  %v8244_v61 = vmul.f32 %v11278_v33, %v8212_v14  ;;  %v8214_v46 = vsub.f32 1.0, %v16082_v52  ;;  %v11279_v3 = vld [vmem:[%s12483_s17 + $0xb0] sm:$0xff] }
 0x575   : > { %v8470_v47 = vpop.permute.xlu0 %8469 }
 0x576   : > { %8586 = vst.msk [vmem:[%s15322_s30 + $0x68] sm:$0xff] %vm4270_vm3, %v8554_v63  ;;  %v8553_v48 = vadd.f32 %v8470_v47, %v8233_v41  ;;  %v8243_v63 = vmul.f32 %v11279_v3, %v8211_v32  ;;  %v8213_v41 = vsub.f32 1.0, %v16083_v28  ;;  %v11280_v47 = vld [vmem:[%s12483_s17 + $0xc8] sm:$0xff] }
 0x577   : > { %v8476_v30 = vpop.permute.xlu1 %8475 }
 0x578   : > { %8585 = vst.msk [vmem:[%s15322_s30 + $0x60] sm:$0xff] %vm4270_vm3, %v8553_v48  ;;  %v8556_v8 = vadd.f32 %v8476_v30, %v8236_v16  ;;  %v8246_v48 = vmul.f32 %v11280_v47, %v8214_v46  ;;  %v8216_v16 = vsub.f32 1.0, %v16084_v62  ;;  %v11281_v30 = vld [vmem:[%s12483_s17 + $0xc0] sm:$0xff] }
 0x579   : > { %v8474_v20 = vpop.permute.xlu0 %8473 }
 0x57a   : > { %8588 = vst.msk [vmem:[%s15322_s30 + $0x78] sm:$0xff] %vm4270_vm3, %v8556_v8  ;;  %v8555_v9 = vadd.f32 %v8474_v20, %v8235_v49  ;;  %v8245_v8 = vmul.f32 %v11281_v30, %v8213_v41  ;;  %v8215_v49 = vsub.f32 1.0, %v16085_v26  ;;  %v11282_v20 = vld [vmem:[%s12483_s17 + $0xd8] sm:$0xff] }
 0x57b   : > { %v8480_v37 = vpop.permute.xlu1 %8479 }
 0x57c   : > { %8587 = vst.msk [vmem:[%s15322_s30 + $0x70] sm:$0xff] %vm4270_vm3, %v8555_v9  ;;  %v8558_v35 = vadd.f32 %v8480_v37, %v8238_v17  ;;  %v8248_v9 = vmul.f32 %v11282_v20, %v8216_v16  ;;  %v8218_v17 = vsub.f32 1.0, %v16086_v5  ;;  %v11283_v37 = vld [vmem:[%s12483_s17 + $0xd0] sm:$0xff] }
 0x57d   : > { %v8478_v22 = vpop.permute.xlu0 %8477 }
 0x57e   : > { %8590 = vst.msk [vmem:[%s15322_s30 + $0x88] sm:$0xff] %vm4270_vm3, %v8558_v35  ;;  %v8557_v40 = vadd.f32 %v8478_v22, %v8237_v36  ;;  %v8247_v35 = vmul.f32 %v11283_v37, %v8215_v49  ;;  %v8217_v36 = vsub.f32 1.0, %v16087_v34  ;;  %v11284_v22 = vld [vmem:[%s12483_s17 + $0xe8] sm:$0xff] }
 0x57f   : > { %v8484_v2 = vpop.permute.xlu1 %8483 }
 0x580   : > { %8589 = vst.msk [vmem:[%s15322_s30 + $0x80] sm:$0xff] %vm4270_vm3, %v8557_v40  ;;  %v8560_v43 = vadd.f32 %v8484_v2, %v8240_v21  ;;  %v8250_v40 = vmul.f32 %v11284_v22, %v8218_v17  ;;  %v8249_v2 = vmul.f32 %v11285_v57, %v8217_v36 }
 0x581   : > { %v8482_v29 = vpop.permute.xlu0 %8481 }
 0x582   : > { %8592 = vst.msk [vmem:[%s15322_s30 + $0x98] sm:$0xff] %vm4270_vm3, %v8560_v43  ;;  %v8559_v42 = vadd.f32 %v8482_v29, %v8239_v31  ;;  %v8219_v43 = vsub.f32 1.0, %v16025_v4 }
 0x583   : > { %v8488_v0 = vpop.permute.xlu1 %8487 }
 0x584   : > { %8591 = vst.msk [vmem:[%s15322_s30 + $0x90] sm:$0xff] %vm4270_vm3, %v8559_v42  ;;  %v8562_v50 = vadd.f32 %v8488_v0, %v8242_v44  ;;  %v11287_v42 = vld [vmem:[%s12483_s17 + $0xf0] sm:$0xff]  ;;  %s11288_s17 = scalar_lea.vmem %s15449_s11, 4096 }
 0x585   : > { %v8486_v12 = vpop.permute.xlu0 %8485  ;;  %v8251_v18 = vmul.f32 %v11287_v42, %v8219_v43  ;;  %p11289_p11 = scmp.ne.s32.totalorder %s15449_s11, %s11288_s17  ;;  %p11296_p1 = scmp.lt.s32.totalorder %s11294_s10, %s11288_s17 }
 0x586   : > { %8594 = vst.msk [vmem:[%s15322_s30 + $0xa8] sm:$0xff] %vm4270_vm3, %v8562_v50  ;;  %v8561_v39 = vadd.f32 %v8486_v12, %v8241_v51 }
 0x587   : > { %v8492_v59 = vpop.permute.xlu1 %8491  ;;  %p11290_p12 = pnand %p11289_p11, %p11425_p5  ;;  %p11297_p2 = por %p11296_p1, %p11295_p0 }
 0x588   : > { %8593 = vst.msk [vmem:[%s15322_s30 + $0xa0] sm:$0xff] %vm4270_vm3, %v8561_v39  ;;  %v8564_v10 = vadd.f32 %v8492_v59, %v8244_v61 }
 0x589   : > { %v8490_v25 = vpop.permute.xlu0 %8489  ;;  %p11291_p13 = pneg %p11290_p12 }
 0x58a   : > { %8596 = vst.msk [vmem:[%s15322_s30 + $0xb8] sm:$0xff] %vm4270_vm3, %v8564_v10  ;;  %v8563_v24 = vadd.f32 %v8490_v25, %v8243_v63 }
 0x58b   : > { %v8496_v15 = vpop.permute.xlu1 %8495  ;;  %p11298_p3 = pnand %p11297_p2, %p11291_p13 }
 0x58c   : > { %8595 = vst.msk [vmem:[%s15322_s30 + $0xb0] sm:$0xff] %vm4270_vm3, %v8563_v24  ;;  %v8566_v38 = vadd.f32 %v8496_v15, %v8246_v48 }
 0x58d   : > { %v8494_v11 = vpop.permute.xlu0 %8493 }
 0x58e   : > { %8598 = vst.msk [vmem:[%s15322_s30 + $0xc8] sm:$0xff] %vm4270_vm3, %v8566_v38  ;;  %v8565_v55 = vadd.f32 %v8494_v11, %v8245_v8 }
 0x58f   : > { %v8500_v1 = vpop.permute.xlu1 %8499 }
 0x590   : > { %8597 = vst.msk [vmem:[%s15322_s30 + $0xc0] sm:$0xff] %vm4270_vm3, %v8565_v55  ;;  %v8568_v45 = vadd.f32 %v8500_v1, %v8248_v9 }
 0x591   : > { %v8498_v54 = vpop.permute.xlu0 %8497 }
 0x592   : > { %8600 = vst.msk [vmem:[%s15322_s30 + $0xd8] sm:$0xff] %vm4270_vm3, %v8568_v45  ;;  %v8567_v56 = vadd.f32 %v8498_v54, %v8247_v35 }
 0x593   : > { %v8504_v21 = vpop.permute.xlu1 %8503 }
 0x594   : > { %8599 = vst.msk [vmem:[%s15322_s30 + $0xd0] sm:$0xff] %vm4270_vm3, %v8567_v56  ;;  %v8570_v60 = vadd.f32 %v8504_v21, %v8250_v40 }
 0x595   : > { %v8502_v23 = vpop.permute.xlu0 %8501 }
 0x596   : > { %8602 = vst.msk [vmem:[%s15322_s30 + $0xe8] sm:$0xff] %vm4270_vm3, %v8570_v60  ;;  %v8569_v31 = vadd.f32 %v8502_v23, %v8249_v2 }
 0x597   : > { %v8508_v13 = vpop.permute.xlu1 %8507 }
 0x598   : > { %8601 = vst.msk [vmem:[%s15322_s30 + $0xe0] sm:$0xff] %vm4270_vm3, %v8569_v31  ;;  %v8572_v29 = vadd.f32 %v8508_v13, %v8252_v6 }
 0x599   : > { %v8506_v44 = vpop.permute.xlu0 %8505 }
 0x59a   : > { %8604 = vst.msk [vmem:[%s15322_s30 + $0xf8] sm:$0xff] %vm4270_vm3, %v8572_v29  ;;  %v8571_v4 = vadd.f32 %v8506_v44, %v8251_v18 }
 0x59c   : > { %8603 = vst.msk [vmem:[%s15322_s30 + $0xf0] sm:$0xff] %vm4270_vm3, %v8571_v4 }
 0x59d   : > { %11301 = shalt.err (!%p11298_p3)
}
 0x59e   : > { %s11302_s23 = scalar_lea.hbm %s15447_s8, 4096  ;;  %s11306_s6 = scalar_lea.hbm %s15502_s5, 8192 }
 0x59f   : > { %p11303_p4 = scmp.ne.s32.totalorder %s15447_s8, %s11302_s23  ;;  %p11307_p9 = scmp.lt.s32.totalorder %s15447_s8, %s15502_s5 }
 0x5a0   : > { %p11308_p10 = scmp.lt.s32.totalorder %s11306_s6, %s11302_s23 }
 0x5a1   : > { %p11304_p7 = pnand %p11303_p4, %p11425_p5 }
 0x5a2   : > { %p11309_p11 = por %p11308_p10, %p11307_p9 }
 0x5a3   : > { %p11305_p8 = pneg %p11304_p7 }
 0x5a5   : > { %p11310_p12 = pnand %p11309_p11, %p11305_p8 }
 0x5a7   : > { %11313 = shalt.err (!%p11310_p12)
}
 0x5a8   : > { %s11355_s30 = smov 128   ;;  %s11356_s13 = smov 8  }
 0x5a9   : > { %11083 = dma.vmem_to_hbm [thread:$0]  (%p11425_p5), %s15449_s11, 4096, %s15447_s8, %s15457_s22, %s11355_s30, %s11355_s30, %s11356_s13  }
 0x5aa PF: > { %p11089_p13 = scmp.ge.s32.totalorder %s11348_s21, 2  ;;  %s8634_s12 = sand.u32 1, %s11336_s18  }
 0x5ab   : > { %s8635_s14 = scalar_lea.sflag [#allocation5], %s8634_s12 }
 0x5ac   : > { %p11086_p0 = pnand %p11089_p13, %p11429_p6 }
 0x5ae   : > { %p11087_p1 = pneg %p11086_p0 }
 0x5b0   : > { %11331 = dma.done.wait (%p11087_p1), %s8635_s14, 4096  }
 0x5b1   : > { %11333 = vsyncadd (%p11087_p1), %s8635_s14, 4294963200  ;;  %p15_p2 = scmp.ge.s32.totalorder %s11412_s24, 4   ;;  %s16088_s18 = smov %s11340_s19 }
 0x5b2   : > { %s16089_s19 = smov %s11344_s20  ;;  %s16090_s20 = smov %s11423_s27 }
 0x5b3   : > { %s16091_s21 = smov %s11412_s24  ;;  %17 = sbr.rel (!%p15_p2) target bundleno = 3 (0x3), region = 98 }
 0x5b8   :  { %8640 = vsyncpa [#allocation5], 1 }
 0x5b9   :  { %8642 = vsyncpa [#allocation5 + $0x1], 1 }

</bundles_post_ra>
